<compile_context>
chip_gen: v7x
topology: tpu7x:2x2x1
jax: 0.10.0
libtpu: 0.0.40
codegen_flags: <defaults>
</compile_context>

<pallas_src>
import math

import jax
import jax.numpy as jnp
from jax import lax
from jax.experimental import pallas as pl
from jax.experimental.pallas import tpu as pltpu

# ------------------------------ configuration ------------------------------
B = 2              # batch
S_LEN = 8          # source sequence length
T_LEN = 8          # dest sequence length
D_MODEL = 128      # d_model == d_vocab (module default behaviour)
D_VOCAB = D_MODEL
N_HEAD = 4
D_HEAD = D_MODEL // N_HEAD
D_FF = 128
N_ENC = 2
N_DEC = 2
N_VOCAB_SRC = 48
N_VOCAB_DST = 48
PAD_IDX = 0
MAX_LEN = 64
LN_EPS = 1e-5
NEG = -1e9         # additive attention mask value (stands in for -inf, numerically safe in f32)
FC_PAD = 128       # lane-dense padded logits width (>= N_VOCAB_DST)

# ------------------------------ packed-slab layout ------------------------------
# Static offsets shared by init_params() and the kernel.
# Encoder matrix slab [N_ENC, D_MODEL, 768]  = qkv_w | out_w | w1 | w2       (all [128,*])
EM_QKV, EM_OUT, EM_W1, EM_W2, ENC_MAT_COLS = 0, 384, 512, 640, 768
# Decoder matrix slab [N_DEC, D_MODEL, 1280] = sa_qkv | sa_out | ca_qkv | ca_out | w1 | w2
(DM_SA_QKV, DM_SA_OUT, DM_CA_QKV, DM_CA_OUT,
 DM_W1, DM_W2, DEC_MAT_COLS) = 0, 384, 512, 896, 1024, 1152, 1280
# Encoder vector slab rows [N_ENC, 10, D_MODEL]
(EV_Q_B, EV_K_B, EV_V_B, EV_OUT_B, EV_LN1_G, EV_LN1_B,
 EV_B1, EV_B2, EV_LN2_G, EV_LN2_B, ENC_VEC_ROWS) = range(11)
# Decoder vector slab rows [N_DEC, 16, D_MODEL]
(DV_SA_Q_B, DV_SA_K_B, DV_SA_V_B, DV_SA_OUT_B, DV_LN1_G, DV_LN1_B,
 DV_CA_Q_B, DV_CA_K_B, DV_CA_V_B, DV_CA_OUT_B, DV_LN2_G, DV_LN2_B,
 DV_B1, DV_B2, DV_LN3_G, DV_LN3_B, DEC_VEC_ROWS) = range(17)
# Final slab rows [5, D_MODEL]
FV_ENC_G, FV_ENC_B, FV_DEC_G, FV_DEC_B, FV_FC_B, FIN_ROWS = range(6)


# ------------------------------ in-kernel helpers ------------------------------
def _row(ref, l, r):
    """[1, D_MODEL] parameter row from a stacked vector slab (static indices)."""
    return ref[l, r:r + 1, :]


def _layer_norm(h, g, b):
    mu = jnp.mean(h, axis=-1, keepdims=True)
    var = jnp.mean(jnp.square(h - mu), axis=-1, keepdims=True)
    return (h - mu) * lax.rsqrt(var + LN_EPS) * g + b


def _attention(q, k, v, bias, w_o, b_o, head_masks):
    """Multi-head attention over flattened [B*L, D] activations.

    q: [Nq, D], k/v: [Nk, D], bias: [Nq, Nk] additive (contains batch block-diag,
    key-padding and causal terms).  Heads are selected with precomputed lane masks so every
    matmul keeps a full 128-wide contraction (no sub-128 lane slicing, no transposes).
    """
    scale = 1.0 / math.sqrt(D_HEAD)
    attn = jnp.zeros((q.shape[0], D_MODEL), jnp.float32)
    for m in head_masks:                                      # static unroll, 4 heads
        # masked contraction == per-head q_h @ k_h^T
        s = lax.dot_general(q, k * m, (((1,), (1,)), ((), ())),
                            preferred_element_type=jnp.float32) * scale + bias
        p = jnp.exp(s - jnp.max(s, axis=-1, keepdims=True))
        p = p * pl.reciprocal(jnp.sum(p, axis=-1, keepdims=True), approx=True)
        # p @ (v * m) fills exactly this head's output columns; sum over heads = concat
        attn = attn + jnp.dot(p, v * m, preferred_element_type=jnp.float32)
    return jnp.dot(attn, w_o, preferred_element_type=jnp.float32) + b_o


def _ffn(x, w1, b1, w2, b2):
    h = jnp.maximum(jnp.dot(x, w1, preferred_element_type=jnp.float32) + b1, 0.0)
    return jnp.dot(h, w2, preferred_element_type=jnp.float32) + b2


# ------------------------------ fused Pallas kernel ------------------------------
def _transformer_kernel(src_ref, tgt_ref, sbias_ref, tbias_ref, cbias_ref,
                        enc_mat_ref, enc_vec_ref, dec_mat_ref, dec_vec_ref,
                        fin_ref, fc_w_ref, logits_ref):
    # head lane masks, built once per invocation
    lane = lax.broadcasted_iota(jnp.int32, (1, D_MODEL), 1)
    head_masks = [((lane >= h * D_HEAD) & (lane < (h + 1) * D_HEAD)).astype(jnp.float32)
                  for h in range(N_HEAD)]

    sbias = sbias_ref[...]
    tbias = tbias_ref[...]
    cbias = cbias_ref[...]

    # -------------------- encoder stack (statically unrolled) --------------------
    x = src_ref[...]
    for l in range(N_ENC):
        qkv_w = enc_mat_ref[l, :, EM_QKV:EM_OUT]
        out_w = enc_mat_ref[l, :, EM_OUT:EM_W1]
        w1 = enc_mat_ref[l, :, EM_W1:EM_W2]
        w2 = enc_mat_ref[l, :, EM_W2:ENC_MAT_COLS]

        qkv = jnp.dot(x, qkv_w, preferred_element_type=jnp.float32)     # [N, 384]
        q = qkv[:, :D_MODEL] + _row(enc_vec_ref, l, EV_Q_B)
        k = qkv[:, D_MODEL:2 * D_MODEL] + _row(enc_vec_ref, l, EV_K_B)
        v = qkv[:, 2 * D_MODEL:] + _row(enc_vec_ref, l, EV_V_B)
        a = _attention(q, k, v, sbias, out_w, _row(enc_vec_ref, l, EV_OUT_B), head_masks)
        x = _layer_norm(x + a, _row(enc_vec_ref, l, EV_LN1_G), _row(enc_vec_ref, l, EV_LN1_B))
        f = _ffn(x, w1, _row(enc_vec_ref, l, EV_B1), w2, _row(enc_vec_ref, l, EV_B2))
        x = _layer_norm(x + f, _row(enc_vec_ref, l, EV_LN2_G), _row(enc_vec_ref, l, EV_LN2_B))
    # encoder final norm; memory never leaves the kernel
    memory = _layer_norm(x, fin_ref[FV_ENC_G:FV_ENC_G + 1, :], fin_ref[FV_ENC_B:FV_ENC_B + 1, :])

    # -------------------- decoder stack (statically unrolled) --------------------
    y = tgt_ref[...]
    for l in range(N_DEC):
        sa_qkv_w = dec_mat_ref[l, :, DM_SA_QKV:DM_SA_OUT]
        sa_out_w = dec_mat_ref[l, :, DM_SA_OUT:DM_CA_QKV]
        ca_q_w = dec_mat_ref[l, :, DM_CA_QKV:DM_CA_QKV + D_MODEL]
        ca_kv_w = dec_mat_ref[l, :, DM_CA_QKV + D_MODEL:DM_CA_OUT]
        ca_out_w = dec_mat_ref[l, :, DM_CA_OUT:DM_W1]
        w1 = dec_mat_ref[l, :, DM_W1:DM_W2]
        w2 = dec_mat_ref[l, :, DM_W2:DEC_MAT_COLS]

        # masked self-attention
        qkv = jnp.dot(y, sa_qkv_w, preferred_element_type=jnp.float32)
        q = qkv[:, :D_MODEL] + _row(dec_vec_ref, l, DV_SA_Q_B)
        k = qkv[:, D_MODEL:2 * D_MODEL] + _row(dec_vec_ref, l, DV_SA_K_B)
        v = qkv[:, 2 * D_MODEL:] + _row(dec_vec_ref, l, DV_SA_V_B)
        a = _attention(q, k, v, tbias, sa_out_w, _row(dec_vec_ref, l, DV_SA_OUT_B), head_masks)
        y = _layer_norm(y + a, _row(dec_vec_ref, l, DV_LN1_G), _row(dec_vec_ref, l, DV_LN1_B))

        # cross-attention over the resident encoder memory
        q = (jnp.dot(y, ca_q_w, preferred_element_type=jnp.float32)
             + _row(dec_vec_ref, l, DV_CA_Q_B))
        kv = jnp.dot(memory, ca_kv_w, preferred_element_type=jnp.float32)   # [N, 256]
        k = kv[:, :D_MODEL] + _row(dec_vec_ref, l, DV_CA_K_B)
        v = kv[:, D_MODEL:] + _row(dec_vec_ref, l, DV_CA_V_B)
        c = _attention(q, k, v, cbias, ca_out_w, _row(dec_vec_ref, l, DV_CA_OUT_B), head_masks)
        y = _layer_norm(y + c, _row(dec_vec_ref, l, DV_LN2_G), _row(dec_vec_ref, l, DV_LN2_B))

        f = _ffn(y, w1, _row(dec_vec_ref, l, DV_B1), w2, _row(dec_vec_ref, l, DV_B2))
        y = _layer_norm(y + f, _row(dec_vec_ref, l, DV_LN3_G), _row(dec_vec_ref, l, DV_LN3_B))

    # decoder final norm + lane-dense (padded-to-128) vocabulary projection, fused here
    yn = _layer_norm(y, fin_ref[FV_DEC_G:FV_DEC_G + 1, :], fin_ref[FV_DEC_B:FV_DEC_B + 1, :])
    logits_ref[...] = (jnp.dot(yn, fc_w_ref[...], preferred_element_type=jnp.float32)
                       + fin_ref[FV_FC_B:FV_FC_B + 1, :])


# ------------------------------ pallas_call wrapper ------------------------------
def _full_spec(a):
    nd = a.ndim
    return pl.BlockSpec(a.shape, lambda i, _nd=nd: (0,) * _nd)


def transformer_forward(src_x, tgt_x, src_bias, tgt_bias, mem_bias,
                        enc_mat, enc_vec, dec_mat, dec_vec, fin, fc_w):
    n_tgt = tgt_x.shape[0]
    args = (src_x, tgt_x, src_bias, tgt_bias, mem_bias,
            enc_mat, enc_vec, dec_mat, dec_vec, fin, fc_w)
    return pl.pallas_call(
        _transformer_kernel,
        out_shape=jax.ShapeDtypeStruct((n_tgt, FC_PAD), jnp.float32),
        grid=(1,),
        in_specs=[_full_spec(a) for a in args],
        out_specs=pl.BlockSpec((n_tgt, FC_PAD), lambda i: (0, 0)),
        compiler_params=pltpu.CompilerParams(dimension_semantics=("arbitrary",)),
    )(*args)


# ------------------------------ masks & positional encoding ------------------------------
def sinusoidal_pe(max_len, d):
    pos = jnp.arange(max_len, dtype=jnp.float32)[:, None]
    i = jnp.arange(0, d, 2, dtype=jnp.float32)
    div = jnp.exp(-i * (math.log(10000.0) / d))
    pe = jnp.zeros((max_len, d), jnp.float32)
    pe = pe.at[:, 0::2].set(jnp.sin(pos * div))
    pe = pe.at[:, 1::2].set(jnp.cos(pos * div))
    return pe


def _padding_bias(tokens, lq):
    # additive bias [B, lq, Lk]: NEG where key token == pad
    bsz, lk = tokens.shape
    key_pad = (tokens == PAD_IDX)[:, None, :]                          # [B, 1, Lk]
    return jnp.broadcast_to(jnp.where(key_pad, NEG, 0.0), (bsz, lq, lk)).astype(jnp.float32)


def _causal_bias(t):
    return jnp.where(jnp.triu(jnp.ones((t, t), dtype=bool), 1), NEG, 0.0).astype(jnp.float32)


def _expand_batch_bias(bias_bqk):
    """[B, Lq, Lk] per-batch bias -> flattened [B*Lq, B*Lk]; NEG on cross-batch blocks."""
    bsz, lq, lk = bias_bqk.shape
    eye = jnp.eye(bsz, dtype=bool)
    big = jnp.where(eye[:, None, :, None], bias_bqk[:, :, None, :], NEG)   # [B,Lq,B,Lk]
    return big.reshape(bsz * lq, bsz * lk).astype(jnp.float32)


# ------------------------------ full forward ------------------------------
def forward(params, source, dest):
    bsz, s = source.shape
    t = dest.shape[1]
    scale = math.sqrt(D_VOCAB)

    # embedding row gather + sqrt(d_vocab) scale + positional encoding (tiny, left to XLA)
    src_x = (jnp.take(params['src_emb'], source, axis=0) * scale
             + params['pe'][:s][None]).reshape(bsz * s, D_MODEL).astype(jnp.float32)
    tgt_x = (jnp.take(params['dst_emb'], dest, axis=0) * scale
             + params['pe'][:t][None]).reshape(bsz * t, D_MODEL).astype(jnp.float32)

    src_bias = _expand_batch_bias(_padding_bias(source, s))                        # enc self-attn
    tgt_bias = _expand_batch_bias(_padding_bias(dest, t) + _causal_bias(t)[None])  # dec self-attn
    mem_bias = _expand_batch_bias(jnp.zeros((bsz, t, s), jnp.float32))             # cross-attn
    # (cross-attention has no key-padding mask, matching the reference forward():
    #  memory_key_padding_mask is not passed in the PyTorch module)

    logits = transformer_forward(src_x, tgt_x, src_bias, tgt_bias, mem_bias,
                                 params['enc_mat'], params['enc_vec'],
                                 params['dec_mat'], params['dec_vec'],
                                 params['fin'], params['fc_w'])
    return {'output': logits[:, :N_VOCAB_DST].reshape(bsz, t, N_VOCAB_DST)}


# ------------------------------ parameter init (deterministic, synthetic) ------------------------------
def init_params(key):
    keys = iter(jax.random.split(key, 64))

    def xavier(shape):
        limit = math.sqrt(6.0 / (shape[0] + shape[1]))
        return jax.random.uniform(next(keys), shape, jnp.float32, -limit, limit)

    def normal(shape, std):
        return jax.random.normal(next(keys), shape, jnp.float32) * std

    def lin(out_dim, in_dim):
        # PyTorch Linear/in_proj weight [out, in], xavier init, pre-transposed ONCE to [in, out]
        return xavier((out_dim, in_dim)).T

    def enc_mat():
        return jnp.concatenate([lin(3 * D_MODEL, D_MODEL),   # qkv_w   [128, 384]
                                lin(D_MODEL, D_MODEL),       # out_w   [128, 128]
                                lin(D_FF, D_MODEL),          # w1      [128, 128]
                                lin(D_MODEL, D_FF)], axis=1)  # w2      [128, 128]

    def dec_mat():
        return jnp.concatenate([lin(3 * D_MODEL, D_MODEL),   # sa_qkv_w
                                lin(D_MODEL, D_MODEL),       # sa_out_w
                                lin(3 * D_MODEL, D_MODEL),   # ca_qkv_w
                                lin(D_MODEL, D_MODEL),       # ca_out_w
                                lin(D_FF, D_MODEL),          # w1
                                lin(D_MODEL, D_FF)], axis=1)  # w2

    # vector slabs: biases zero, LayerNorm gammas one (PyTorch defaults; xavier only hits dim>1)
    enc_vec = jnp.zeros((N_ENC, ENC_VEC_ROWS, D_MODEL), jnp.float32)
    enc_vec = enc_vec.at[:, EV_LN1_G].set(1.0).at[:, EV_LN2_G].set(1.0)
    dec_vec = jnp.zeros((N_DEC, DEC_VEC_ROWS, D_MODEL), jnp.float32)
    dec_vec = dec_vec.at[:, DV_LN1_G].set(1.0).at[:, DV_LN2_G].set(1.0).at[:, DV_LN3_G].set(1.0)

    fin = jnp.zeros((FIN_ROWS, D_MODEL), jnp.float32)
    fin = fin.at[FV_ENC_G].set(1.0).at[FV_DEC_G].set(1.0)     # final enc/dec norms; fc_b = 0

    # final fc: PyTorch [V_dst, D] -> pre-transposed [D, V_dst], zero-padded lane-dense to 128
    fc_w = normal((N_VOCAB_DST, D_MODEL), 1.0 / math.sqrt(D_VOCAB)).T
    fc_w = jnp.pad(fc_w, ((0, 0), (0, FC_PAD - N_VOCAB_DST)))

    return {
        'src_emb': normal((N_VOCAB_SRC, D_VOCAB), 1.0 / math.sqrt(D_VOCAB)),
        'dst_emb': normal((N_VOCAB_DST, D_VOCAB), 1.0 / math.sqrt(D_VOCAB)),
        'pe': sinusoidal_pe(MAX_LEN, D_VOCAB),
        'enc_mat': jnp.stack([enc_mat() for _ in range(N_ENC)]),   # [N_ENC, 128, 768]
        'enc_vec': enc_vec,                                        # [N_ENC, 10, 128]
        'dec_mat': jnp.stack([dec_mat() for _ in range(N_DEC)]),   # [N_DEC, 128, 1280]
        'dec_vec': dec_vec,                                        # [N_DEC, 16, 128]
        'fin': fin,                                                # [5, 128]
        'fc_w': fc_w,                                              # [128, 128]
    }


# TODO(synk): dropout (p=0.3) is identity in eval mode; the beam-search `translate()` /
# incremental `encode()`/`decode()` host-side loops are not part of the forward kernel.

if __name__ == "__main__":
    key = jax.random.PRNGKey(0)
    k_src, k_dst, k_par = jax.random.split(key, 3)

    source = jax.random.randint(k_src, (B, S_LEN), 1, N_VOCAB_SRC, dtype=jnp.int32)
    dest = jax.random.randint(k_dst, (B, T_LEN), 1, N_VOCAB_DST, dtype=jnp.int32)
    # trailing PAD tokens to exercise the key-padding masks
    source = source.at[0, -2:].set(PAD_IDX).at[1, -3:].set(PAD_IDX)
    dest = dest.at[0, -1:].set(PAD_IDX).at[1, -2:].set(PAD_IDX)

    params = init_params(k_par)

    fwd = jax.jit(forward)
    out = fwd(params, source, dest)
    logits = jax.block_until_ready(out['output'])

    assert logits.shape == (B, T_LEN, N_VOCAB_DST), logits.shape
    assert bool(jnp.all(jnp.isfinite(logits)))
    print("KERNEL_OK")
</pallas_src>

<mosaic_0001>
module attributes {stable_mosaic.version = 11 : i64} {
  func.func @_transformer_kernel(%arg0: i32, %arg1: memref<16x128xf32, #tpu.memory_space<vmem>>, %arg2: memref<16x128xf32, #tpu.memory_space<vmem>>, %arg3: memref<16x16xf32, #tpu.memory_space<vmem>>, %arg4: memref<16x16xf32, #tpu.memory_space<vmem>>, %arg5: memref<16x16xf32, #tpu.memory_space<vmem>>, %arg6: memref<2x128x768xf32, #tpu.memory_space<vmem>>, %arg7: memref<2x10x128xf32, #tpu.memory_space<vmem>>, %arg8: memref<2x128x1280xf32, #tpu.memory_space<vmem>>, %arg9: memref<2x16x128xf32, #tpu.memory_space<vmem>>, %arg10: memref<5x128xf32, #tpu.memory_space<vmem>>, %arg11: memref<128x128xf32, #tpu.memory_space<vmem>>, %arg12: memref<16x128xf32, #tpu.memory_space<vmem>>) attributes {dimension_semantics = [#tpu.dimension_semantics<arbitrary>], iteration_bounds = array<i64: 1>, scalar_prefetch = 0 : i64, scratch_operands = 0 : i64, tpu.core_type = #tpu.core_type<tc>, window_params = [{pipeline_mode = #tpu.pipeline_mode<synchronous>, transform_indices = @transform_0, window_bounds = array<i64: 16, 128>}, {pipeline_mode = #tpu.pipeline_mode<synchronous>, transform_indices = @transform_1, window_bounds = array<i64: 16, 128>}, {pipeline_mode = #tpu.pipeline_mode<synchronous>, transform_indices = @transform_2, window_bounds = array<i64: 16, 16>}, {pipeline_mode = #tpu.pipeline_mode<synchronous>, transform_indices = @transform_3, window_bounds = array<i64: 16, 16>}, {pipeline_mode = #tpu.pipeline_mode<synchronous>, transform_indices = @transform_4, window_bounds = array<i64: 16, 16>}, {pipeline_mode = #tpu.pipeline_mode<synchronous>, transform_indices = @transform_5, window_bounds = array<i64: 2, 128, 768>}, {pipeline_mode = #tpu.pipeline_mode<synchronous>, transform_indices = @transform_6, window_bounds = array<i64: 2, 10, 128>}, {pipeline_mode = #tpu.pipeline_mode<synchronous>, transform_indices = @transform_7, window_bounds = array<i64: 2, 128, 1280>}, {pipeline_mode = #tpu.pipeline_mode<synchronous>, transform_indices = @transform_8, window_bounds = array<i64: 2, 16, 128>}, {pipeline_mode = #tpu.pipeline_mode<synchronous>, transform_indices = @transform_9, window_bounds = array<i64: 5, 128>}, {pipeline_mode = #tpu.pipeline_mode<synchronous>, transform_indices = @transform_10, window_bounds = array<i64: 128, 128>}, {pipeline_mode = #tpu.pipeline_mode<synchronous>, transform_indices = @transform_11, window_bounds = array<i64: 16, 128>}]} {
    %0 = tpu.iota {dimensions = array<i32: 1>} : vector<1x128xi32>
    %c0_i32 = arith.constant 0 : i32
    %1 = vector.broadcast %c0_i32 : i32 to vector<1x128xi32>
    %2 = arith.cmpi sge, %0, %1 : vector<1x128xi32>
    %c32_i32 = arith.constant 32 : i32
    %3 = vector.broadcast %c32_i32 : i32 to vector<1x128xi32>
    %4 = arith.cmpi slt, %0, %3 : vector<1x128xi32>
    %5 = arith.andi %2, %4 : vector<1x128xi1>
    %6 = arith.extui %5 : vector<1x128xi1> to vector<1x128xi32>
    %7 = arith.sitofp %6 : vector<1x128xi32> to vector<1x128xf32>
    %c32_i32_0 = arith.constant 32 : i32
    %8 = vector.broadcast %c32_i32_0 : i32 to vector<1x128xi32>
    %9 = arith.cmpi sge, %0, %8 : vector<1x128xi32>
    %c64_i32 = arith.constant 64 : i32
    %10 = vector.broadcast %c64_i32 : i32 to vector<1x128xi32>
    %11 = arith.cmpi slt, %0, %10 : vector<1x128xi32>
    %12 = arith.andi %9, %11 : vector<1x128xi1>
    %13 = arith.extui %12 : vector<1x128xi1> to vector<1x128xi32>
    %14 = arith.sitofp %13 : vector<1x128xi32> to vector<1x128xf32>
    %c64_i32_1 = arith.constant 64 : i32
    %15 = vector.broadcast %c64_i32_1 : i32 to vector<1x128xi32>
    %16 = arith.cmpi sge, %0, %15 : vector<1x128xi32>
    %c96_i32 = arith.constant 96 : i32
    %17 = vector.broadcast %c96_i32 : i32 to vector<1x128xi32>
    %18 = arith.cmpi slt, %0, %17 : vector<1x128xi32>
    %19 = arith.andi %16, %18 : vector<1x128xi1>
    %20 = arith.extui %19 : vector<1x128xi1> to vector<1x128xi32>
    %21 = arith.sitofp %20 : vector<1x128xi32> to vector<1x128xf32>
    %c96_i32_2 = arith.constant 96 : i32
    %22 = vector.broadcast %c96_i32_2 : i32 to vector<1x128xi32>
    %23 = arith.cmpi sge, %0, %22 : vector<1x128xi32>
    %c128_i32 = arith.constant 128 : i32
    %24 = vector.broadcast %c128_i32 : i32 to vector<1x128xi32>
    %25 = arith.cmpi slt, %0, %24 : vector<1x128xi32>
    %26 = arith.andi %23, %25 : vector<1x128xi1>
    %27 = arith.extui %26 : vector<1x128xi1> to vector<1x128xi32>
    %28 = arith.sitofp %27 : vector<1x128xi32> to vector<1x128xf32>
    %c0 = arith.constant 0 : index
    %c0_3 = arith.constant 0 : index
    %29 = vector.load %arg3[%c0, %c0_3] : memref<16x16xf32, #tpu.memory_space<vmem>>, vector<16x16xf32>
    %c0_4 = arith.constant 0 : index
    %c0_5 = arith.constant 0 : index
    %30 = vector.load %arg4[%c0_4, %c0_5] : memref<16x16xf32, #tpu.memory_space<vmem>>, vector<16x16xf32>
    %c0_6 = arith.constant 0 : index
    %c0_7 = arith.constant 0 : index
    %31 = vector.load %arg5[%c0_6, %c0_7] : memref<16x16xf32, #tpu.memory_space<vmem>>, vector<16x16xf32>
    %c0_8 = arith.constant 0 : index
    %c0_9 = arith.constant 0 : index
    %32 = vector.load %arg1[%c0_8, %c0_9] : memref<16x128xf32, #tpu.memory_space<vmem>>, vector<16x128xf32>
    %c0_10 = arith.constant 0 : index
    %c0_11 = arith.constant 0 : index
    %c0_12 = arith.constant 0 : index
    %33 = vector.load %arg6[%c0_10, %c0_11, %c0_12] : memref<2x128x768xf32, #tpu.memory_space<vmem>>, vector<1x128x384xf32>
    %34 = vector.shape_cast %33 : vector<1x128x384xf32> to vector<128x384xf32>
    %c0_13 = arith.constant 0 : index
    %c0_14 = arith.constant 0 : index
    %c384 = arith.constant 384 : index
    %35 = vector.load %arg6[%c0_13, %c0_14, %c384] : memref<2x128x768xf32, #tpu.memory_space<vmem>>, vector<1x128x128xf32>
    %36 = vector.shape_cast %35 : vector<1x128x128xf32> to vector<128x128xf32>
    %c0_15 = arith.constant 0 : index
    %c0_16 = arith.constant 0 : index
    %c512 = arith.constant 512 : index
    %37 = vector.load %arg6[%c0_15, %c0_16, %c512] : memref<2x128x768xf32, #tpu.memory_space<vmem>>, vector<1x128x128xf32>
    %38 = vector.shape_cast %37 : vector<1x128x128xf32> to vector<128x128xf32>
    %c0_17 = arith.constant 0 : index
    %c0_18 = arith.constant 0 : index
    %c640 = arith.constant 640 : index
    %39 = vector.load %arg6[%c0_17, %c0_18, %c640] : memref<2x128x768xf32, #tpu.memory_space<vmem>>, vector<1x128x128xf32>
    %40 = vector.shape_cast %39 : vector<1x128x128xf32> to vector<128x128xf32>
    %cst = arith.constant dense<0.000000e+00> : vector<16x384xf32>
    %41 = tpu.matmul %32, %34, %cst {dimension_numbers = #tpu.dot_dimension_numbers<[1], [0], [0], [1], [0, 0, 1, 1], [], []>} : vector<16x128xf32>, vector<128x384xf32>, vector<16x384xf32> -> vector<16x384xf32>
    %42 = vector.extract_strided_slice %41 {offsets = [0, 0], sizes = [16, 128], strides = [1, 1]} : vector<16x384xf32> to vector<16x128xf32>
    %c0_19 = arith.constant 0 : index
    %c0_20 = arith.constant 0 : index
    %c0_21 = arith.constant 0 : index
    %43 = vector.load %arg7[%c0_19, %c0_20, %c0_21] : memref<2x10x128xf32, #tpu.memory_space<vmem>>, vector<1x1x128xf32>
    %44 = vector.shape_cast %43 : vector<1x1x128xf32> to vector<1x128xf32>
    %45 = vector.broadcast %44 : vector<1x128xf32> to vector<16x128xf32>
    %46 = arith.addf %42, %45 : vector<16x128xf32>
    %47 = vector.extract_strided_slice %41 {offsets = [0, 128], sizes = [16, 128], strides = [1, 1]} : vector<16x384xf32> to vector<16x128xf32>
    %c0_22 = arith.constant 0 : index
    %c1 = arith.constant 1 : index
    %c0_23 = arith.constant 0 : index
    %48 = vector.load %arg7[%c0_22, %c1, %c0_23] : memref<2x10x128xf32, #tpu.memory_space<vmem>>, vector<1x1x128xf32>
    %49 = vector.shape_cast %48 : vector<1x1x128xf32> to vector<1x128xf32>
    %50 = vector.broadcast %49 : vector<1x128xf32> to vector<16x128xf32>
    %51 = arith.addf %47, %50 : vector<16x128xf32>
    %52 = vector.extract_strided_slice %41 {offsets = [0, 256], sizes = [16, 128], strides = [1, 1]} : vector<16x384xf32> to vector<16x128xf32>
    %c0_24 = arith.constant 0 : index
    %c2 = arith.constant 2 : index
    %c0_25 = arith.constant 0 : index
    %53 = vector.load %arg7[%c0_24, %c2, %c0_25] : memref<2x10x128xf32, #tpu.memory_space<vmem>>, vector<1x1x128xf32>
    %54 = vector.shape_cast %53 : vector<1x1x128xf32> to vector<1x128xf32>
    %55 = vector.broadcast %54 : vector<1x128xf32> to vector<16x128xf32>
    %56 = arith.addf %52, %55 : vector<16x128xf32>
    %c0_26 = arith.constant 0 : index
    %c3 = arith.constant 3 : index
    %c0_27 = arith.constant 0 : index
    %57 = vector.load %arg7[%c0_26, %c3, %c0_27] : memref<2x10x128xf32, #tpu.memory_space<vmem>>, vector<1x1x128xf32>
    %58 = vector.shape_cast %57 : vector<1x1x128xf32> to vector<1x128xf32>
    %cst_28 = arith.constant 0.000000e+00 : f32
    %59 = vector.broadcast %cst_28 : f32 to vector<16x128xf32>
    %60 = vector.broadcast %7 : vector<1x128xf32> to vector<16x128xf32>
    %61 = arith.mulf %51, %60 : vector<16x128xf32>
    %cst_29 = arith.constant dense<0.000000e+00> : vector<16x16xf32>
    %62 = tpu.matmul %46, %61, %cst_29 {dimension_numbers = #tpu.dot_dimension_numbers<[1], [1], [0], [0], [0, 0, 1, 0], [], []>} : vector<16x128xf32>, vector<16x128xf32>, vector<16x16xf32> -> vector<16x16xf32>
    %cst_30 = arith.constant 0.176776692 : f32
    %63 = vector.broadcast %cst_30 : f32 to vector<16x16xf32>
    %64 = arith.mulf %62, %63 : vector<16x16xf32>
    %65 = arith.addf %64, %29 : vector<16x16xf32>
    %cst_31 = arith.constant dense<0xFF800000> : vector<16xf32>
    %66 = vector.multi_reduction <maximumf>, %65, %cst_31 [1] : vector<16x16xf32> to vector<16xf32>
    %67 = vector.shape_cast %66 : vector<16xf32> to vector<16x1xf32>
    %68 = vector.broadcast %67 : vector<16x1xf32> to vector<16x16xf32>
    %69 = arith.subf %65, %68 : vector<16x16xf32>
    %70 = math.exp %69 : vector<16x16xf32>
    %cst_32 = arith.constant dense<0.000000e+00> : vector<16xf32>
    %71 = vector.multi_reduction <add>, %70, %cst_32 [1] : vector<16x16xf32> to vector<16xf32>
    %72 = vector.shape_cast %71 : vector<16xf32> to vector<16x1xf32>
    %73 = tpu.reciprocal %72 {approx = true} : vector<16x1xf32> -> vector<16x1xf32>
    %74 = vector.broadcast %73 : vector<16x1xf32> to vector<16x16xf32>
    %75 = arith.mulf %70, %74 : vector<16x16xf32>
    %76 = vector.broadcast %7 : vector<1x128xf32> to vector<16x128xf32>
    %77 = arith.mulf %56, %76 : vector<16x128xf32>
    %cst_33 = arith.constant dense<0.000000e+00> : vector<16x128xf32>
    %78 = tpu.matmul %75, %77, %cst_33 {dimension_numbers = #tpu.dot_dimension_numbers<[1], [0], [0], [1], [0, 0, 1, 1], [], []>} : vector<16x16xf32>, vector<16x128xf32>, vector<16x128xf32> -> vector<16x128xf32>
    %79 = arith.addf %59, %78 : vector<16x128xf32>
    %80 = vector.broadcast %14 : vector<1x128xf32> to vector<16x128xf32>
    %81 = arith.mulf %51, %80 : vector<16x128xf32>
    %cst_34 = arith.constant dense<0.000000e+00> : vector<16x16xf32>
    %82 = tpu.matmul %46, %81, %cst_34 {dimension_numbers = #tpu.dot_dimension_numbers<[1], [1], [0], [0], [0, 0, 1, 0], [], []>} : vector<16x128xf32>, vector<16x128xf32>, vector<16x16xf32> -> vector<16x16xf32>
    %cst_35 = arith.constant 0.176776692 : f32
    %83 = vector.broadcast %cst_35 : f32 to vector<16x16xf32>
    %84 = arith.mulf %82, %83 : vector<16x16xf32>
    %85 = arith.addf %84, %29 : vector<16x16xf32>
    %cst_36 = arith.constant dense<0xFF800000> : vector<16xf32>
    %86 = vector.multi_reduction <maximumf>, %85, %cst_36 [1] : vector<16x16xf32> to vector<16xf32>
    %87 = vector.shape_cast %86 : vector<16xf32> to vector<16x1xf32>
    %88 = vector.broadcast %87 : vector<16x1xf32> to vector<16x16xf32>
    %89 = arith.subf %85, %88 : vector<16x16xf32>
    %90 = math.exp %89 : vector<16x16xf32>
    %cst_37 = arith.constant dense<0.000000e+00> : vector<16xf32>
    %91 = vector.multi_reduction <add>, %90, %cst_37 [1] : vector<16x16xf32> to vector<16xf32>
    %92 = vector.shape_cast %91 : vector<16xf32> to vector<16x1xf32>
    %93 = tpu.reciprocal %92 {approx = true} : vector<16x1xf32> -> vector<16x1xf32>
    %94 = vector.broadcast %93 : vector<16x1xf32> to vector<16x16xf32>
    %95 = arith.mulf %90, %94 : vector<16x16xf32>
    %96 = vector.broadcast %14 : vector<1x128xf32> to vector<16x128xf32>
    %97 = arith.mulf %56, %96 : vector<16x128xf32>
    %cst_38 = arith.constant dense<0.000000e+00> : vector<16x128xf32>
    %98 = tpu.matmul %95, %97, %cst_38 {dimension_numbers = #tpu.dot_dimension_numbers<[1], [0], [0], [1], [0, 0, 1, 1], [], []>} : vector<16x16xf32>, vector<16x128xf32>, vector<16x128xf32> -> vector<16x128xf32>
    %99 = arith.addf %79, %98 : vector<16x128xf32>
    %100 = vector.broadcast %21 : vector<1x128xf32> to vector<16x128xf32>
    %101 = arith.mulf %51, %100 : vector<16x128xf32>
    %cst_39 = arith.constant dense<0.000000e+00> : vector<16x16xf32>
    %102 = tpu.matmul %46, %101, %cst_39 {dimension_numbers = #tpu.dot_dimension_numbers<[1], [1], [0], [0], [0, 0, 1, 0], [], []>} : vector<16x128xf32>, vector<16x128xf32>, vector<16x16xf32> -> vector<16x16xf32>
    %cst_40 = arith.constant 0.176776692 : f32
    %103 = vector.broadcast %cst_40 : f32 to vector<16x16xf32>
    %104 = arith.mulf %102, %103 : vector<16x16xf32>
    %105 = arith.addf %104, %29 : vector<16x16xf32>
    %cst_41 = arith.constant dense<0xFF800000> : vector<16xf32>
    %106 = vector.multi_reduction <maximumf>, %105, %cst_41 [1] : vector<16x16xf32> to vector<16xf32>
    %107 = vector.shape_cast %106 : vector<16xf32> to vector<16x1xf32>
    %108 = vector.broadcast %107 : vector<16x1xf32> to vector<16x16xf32>
    %109 = arith.subf %105, %108 : vector<16x16xf32>
    %110 = math.exp %109 : vector<16x16xf32>
    %cst_42 = arith.constant dense<0.000000e+00> : vector<16xf32>
    %111 = vector.multi_reduction <add>, %110, %cst_42 [1] : vector<16x16xf32> to vector<16xf32>
    %112 = vector.shape_cast %111 : vector<16xf32> to vector<16x1xf32>
    %113 = tpu.reciprocal %112 {approx = true} : vector<16x1xf32> -> vector<16x1xf32>
    %114 = vector.broadcast %113 : vector<16x1xf32> to vector<16x16xf32>
    %115 = arith.mulf %110, %114 : vector<16x16xf32>
    %116 = vector.broadcast %21 : vector<1x128xf32> to vector<16x128xf32>
    %117 = arith.mulf %56, %116 : vector<16x128xf32>
    %cst_43 = arith.constant dense<0.000000e+00> : vector<16x128xf32>
    %118 = tpu.matmul %115, %117, %cst_43 {dimension_numbers = #tpu.dot_dimension_numbers<[1], [0], [0], [1], [0, 0, 1, 1], [], []>} : vector<16x16xf32>, vector<16x128xf32>, vector<16x128xf32> -> vector<16x128xf32>
    %119 = arith.addf %99, %118 : vector<16x128xf32>
    %120 = vector.broadcast %28 : vector<1x128xf32> to vector<16x128xf32>
    %121 = arith.mulf %51, %120 : vector<16x128xf32>
    %cst_44 = arith.constant dense<0.000000e+00> : vector<16x16xf32>
    %122 = tpu.matmul %46, %121, %cst_44 {dimension_numbers = #tpu.dot_dimension_numbers<[1], [1], [0], [0], [0, 0, 1, 0], [], []>} : vector<16x128xf32>, vector<16x128xf32>, vector<16x16xf32> -> vector<16x16xf32>
    %cst_45 = arith.constant 0.176776692 : f32
    %123 = vector.broadcast %cst_45 : f32 to vector<16x16xf32>
    %124 = arith.mulf %122, %123 : vector<16x16xf32>
    %125 = arith.addf %124, %29 : vector<16x16xf32>
    %cst_46 = arith.constant dense<0xFF800000> : vector<16xf32>
    %126 = vector.multi_reduction <maximumf>, %125, %cst_46 [1] : vector<16x16xf32> to vector<16xf32>
    %127 = vector.shape_cast %126 : vector<16xf32> to vector<16x1xf32>
    %128 = vector.broadcast %127 : vector<16x1xf32> to vector<16x16xf32>
    %129 = arith.subf %125, %128 : vector<16x16xf32>
    %130 = math.exp %129 : vector<16x16xf32>
    %cst_47 = arith.constant dense<0.000000e+00> : vector<16xf32>
    %131 = vector.multi_reduction <add>, %130, %cst_47 [1] : vector<16x16xf32> to vector<16xf32>
    %132 = vector.shape_cast %131 : vector<16xf32> to vector<16x1xf32>
    %133 = tpu.reciprocal %132 {approx = true} : vector<16x1xf32> -> vector<16x1xf32>
    %134 = vector.broadcast %133 : vector<16x1xf32> to vector<16x16xf32>
    %135 = arith.mulf %130, %134 : vector<16x16xf32>
    %136 = vector.broadcast %28 : vector<1x128xf32> to vector<16x128xf32>
    %137 = arith.mulf %56, %136 : vector<16x128xf32>
    %cst_48 = arith.constant dense<0.000000e+00> : vector<16x128xf32>
    %138 = tpu.matmul %135, %137, %cst_48 {dimension_numbers = #tpu.dot_dimension_numbers<[1], [0], [0], [1], [0, 0, 1, 1], [], []>} : vector<16x16xf32>, vector<16x128xf32>, vector<16x128xf32> -> vector<16x128xf32>
    %139 = arith.addf %119, %138 : vector<16x128xf32>
    %cst_49 = arith.constant dense<0.000000e+00> : vector<16x128xf32>
    %140 = tpu.matmul %139, %36, %cst_49 {dimension_numbers = #tpu.dot_dimension_numbers<[1], [0], [0], [1], [0, 0, 1, 1], [], []>} : vector<16x128xf32>, vector<128x128xf32>, vector<16x128xf32> -> vector<16x128xf32>
    %141 = vector.broadcast %58 : vector<1x128xf32> to vector<16x128xf32>
    %142 = arith.addf %140, %141 : vector<16x128xf32>
    %143 = arith.addf %32, %142 : vector<16x128xf32>
    %c0_50 = arith.constant 0 : index
    %c4 = arith.constant 4 : index
    %c0_51 = arith.constant 0 : index
    %144 = vector.load %arg7[%c0_50, %c4, %c0_51] : memref<2x10x128xf32, #tpu.memory_space<vmem>>, vector<1x1x128xf32>
    %145 = vector.shape_cast %144 : vector<1x1x128xf32> to vector<1x128xf32>
    %c0_52 = arith.constant 0 : index
    %c5 = arith.constant 5 : index
    %c0_53 = arith.constant 0 : index
    %146 = vector.load %arg7[%c0_52, %c5, %c0_53] : memref<2x10x128xf32, #tpu.memory_space<vmem>>, vector<1x1x128xf32>
    %147 = vector.shape_cast %146 : vector<1x1x128xf32> to vector<1x128xf32>
    %cst_54 = arith.constant dense<0.000000e+00> : vector<16xf32>
    %148 = vector.multi_reduction <add>, %143, %cst_54 [1] : vector<16x128xf32> to vector<16xf32>
    %149 = vector.shape_cast %148 : vector<16xf32> to vector<16x1xf32>
    %cst_55 = arith.constant 1.280000e+02 : f32
    %150 = vector.broadcast %cst_55 : f32 to vector<16x1xf32>
    %151 = arith.divf %149, %150 : vector<16x1xf32>
    %152 = vector.broadcast %151 : vector<16x1xf32> to vector<16x128xf32>
    %153 = arith.subf %143, %152 : vector<16x128xf32>
    %154 = arith.mulf %153, %153 : vector<16x128xf32>
    %cst_56 = arith.constant dense<0.000000e+00> : vector<16xf32>
    %155 = vector.multi_reduction <add>, %154, %cst_56 [1] : vector<16x128xf32> to vector<16xf32>
    %156 = vector.shape_cast %155 : vector<16xf32> to vector<16x1xf32>
    %cst_57 = arith.constant 1.280000e+02 : f32
    %157 = vector.broadcast %cst_57 : f32 to vector<16x1xf32>
    %158 = arith.divf %156, %157 : vector<16x1xf32>
    %159 = vector.broadcast %151 : vector<16x1xf32> to vector<16x128xf32>
    %160 = arith.subf %143, %159 : vector<16x128xf32>
    %cst_58 = arith.constant 9.99999974E-6 : f32
    %161 = vector.broadcast %cst_58 : f32 to vector<16x1xf32>
    %162 = arith.addf %158, %161 : vector<16x1xf32>
    %163 = math.rsqrt %162 : vector<16x1xf32>
    %164 = vector.broadcast %163 : vector<16x1xf32> to vector<16x128xf32>
    %165 = arith.mulf %160, %164 : vector<16x128xf32>
    %166 = vector.broadcast %145 : vector<1x128xf32> to vector<16x128xf32>
    %167 = arith.mulf %165, %166 : vector<16x128xf32>
    %168 = vector.broadcast %147 : vector<1x128xf32> to vector<16x128xf32>
    %169 = arith.addf %167, %168 : vector<16x128xf32>
    %c0_59 = arith.constant 0 : index
    %c6 = arith.constant 6 : index
    %c0_60 = arith.constant 0 : index
    %170 = vector.load %arg7[%c0_59, %c6, %c0_60] : memref<2x10x128xf32, #tpu.memory_space<vmem>>, vector<1x1x128xf32>
    %171 = vector.shape_cast %170 : vector<1x1x128xf32> to vector<1x128xf32>
    %c0_61 = arith.constant 0 : index
    %c7 = arith.constant 7 : index
    %c0_62 = arith.constant 0 : index
    %172 = vector.load %arg7[%c0_61, %c7, %c0_62] : memref<2x10x128xf32, #tpu.memory_space<vmem>>, vector<1x1x128xf32>
    %173 = vector.shape_cast %172 : vector<1x1x128xf32> to vector<1x128xf32>
    %cst_63 = arith.constant dense<0.000000e+00> : vector<16x128xf32>
    %174 = tpu.matmul %169, %38, %cst_63 {dimension_numbers = #tpu.dot_dimension_numbers<[1], [0], [0], [1], [0, 0, 1, 1], [], []>} : vector<16x128xf32>, vector<128x128xf32>, vector<16x128xf32> -> vector<16x128xf32>
    %175 = vector.broadcast %171 : vector<1x128xf32> to vector<16x128xf32>
    %176 = arith.addf %174, %175 : vector<16x128xf32>
    %cst_64 = arith.constant 0.000000e+00 : f32
    %177 = vector.broadcast %cst_64 : f32 to vector<16x128xf32>
    %178 = arith.maximumf %176, %177 : vector<16x128xf32>
    %cst_65 = arith.constant dense<0.000000e+00> : vector<16x128xf32>
    %179 = tpu.matmul %178, %40, %cst_65 {dimension_numbers = #tpu.dot_dimension_numbers<[1], [0], [0], [1], [0, 0, 1, 1], [], []>} : vector<16x128xf32>, vector<128x128xf32>, vector<16x128xf32> -> vector<16x128xf32>
    %180 = vector.broadcast %173 : vector<1x128xf32> to vector<16x128xf32>
    %181 = arith.addf %179, %180 : vector<16x128xf32>
    %182 = arith.addf %169, %181 : vector<16x128xf32>
    %c0_66 = arith.constant 0 : index
    %c8 = arith.constant 8 : index
    %c0_67 = arith.constant 0 : index
    %183 = vector.load %arg7[%c0_66, %c8, %c0_67] : memref<2x10x128xf32, #tpu.memory_space<vmem>>, vector<1x1x128xf32>
    %184 = vector.shape_cast %183 : vector<1x1x128xf32> to vector<1x128xf32>
    %c0_68 = arith.constant 0 : index
    %c9 = arith.constant 9 : index
    %c0_69 = arith.constant 0 : index
    %185 = vector.load %arg7[%c0_68, %c9, %c0_69] : memref<2x10x128xf32, #tpu.memory_space<vmem>>, vector<1x1x128xf32>
    %186 = vector.shape_cast %185 : vector<1x1x128xf32> to vector<1x128xf32>
    %cst_70 = arith.constant dense<0.000000e+00> : vector<16xf32>
    %187 = vector.multi_reduction <add>, %182, %cst_70 [1] : vector<16x128xf32> to vector<16xf32>
    %188 = vector.shape_cast %187 : vector<16xf32> to vector<16x1xf32>
    %cst_71 = arith.constant 1.280000e+02 : f32
    %189 = vector.broadcast %cst_71 : f32 to vector<16x1xf32>
    %190 = arith.divf %188, %189 : vector<16x1xf32>
    %191 = vector.broadcast %190 : vector<16x1xf32> to vector<16x128xf32>
    %192 = arith.subf %182, %191 : vector<16x128xf32>
    %193 = arith.mulf %192, %192 : vector<16x128xf32>
    %cst_72 = arith.constant dense<0.000000e+00> : vector<16xf32>
    %194 = vector.multi_reduction <add>, %193, %cst_72 [1] : vector<16x128xf32> to vector<16xf32>
    %195 = vector.shape_cast %194 : vector<16xf32> to vector<16x1xf32>
    %cst_73 = arith.constant 1.280000e+02 : f32
    %196 = vector.broadcast %cst_73 : f32 to vector<16x1xf32>
    %197 = arith.divf %195, %196 : vector<16x1xf32>
    %198 = vector.broadcast %190 : vector<16x1xf32> to vector<16x128xf32>
    %199 = arith.subf %182, %198 : vector<16x128xf32>
    %cst_74 = arith.constant 9.99999974E-6 : f32
    %200 = vector.broadcast %cst_74 : f32 to vector<16x1xf32>
    %201 = arith.addf %197, %200 : vector<16x1xf32>
    %202 = math.rsqrt %201 : vector<16x1xf32>
    %203 = vector.broadcast %202 : vector<16x1xf32> to vector<16x128xf32>
    %204 = arith.mulf %199, %203 : vector<16x128xf32>
    %205 = vector.broadcast %184 : vector<1x128xf32> to vector<16x128xf32>
    %206 = arith.mulf %204, %205 : vector<16x128xf32>
    %207 = vector.broadcast %186 : vector<1x128xf32> to vector<16x128xf32>
    %208 = arith.addf %206, %207 : vector<16x128xf32>
    %c1_75 = arith.constant 1 : index
    %c0_76 = arith.constant 0 : index
    %c0_77 = arith.constant 0 : index
    %209 = vector.load %arg6[%c1_75, %c0_76, %c0_77] : memref<2x128x768xf32, #tpu.memory_space<vmem>>, vector<1x128x384xf32>
    %210 = vector.shape_cast %209 : vector<1x128x384xf32> to vector<128x384xf32>
    %c1_78 = arith.constant 1 : index
    %c0_79 = arith.constant 0 : index
    %c384_80 = arith.constant 384 : index
    %211 = vector.load %arg6[%c1_78, %c0_79, %c384_80] : memref<2x128x768xf32, #tpu.memory_space<vmem>>, vector<1x128x128xf32>
    %212 = vector.shape_cast %211 : vector<1x128x128xf32> to vector<128x128xf32>
    %c1_81 = arith.constant 1 : index
    %c0_82 = arith.constant 0 : index
    %c512_83 = arith.constant 512 : index
    %213 = vector.load %arg6[%c1_81, %c0_82, %c512_83] : memref<2x128x768xf32, #tpu.memory_space<vmem>>, vector<1x128x128xf32>
    %214 = vector.shape_cast %213 : vector<1x128x128xf32> to vector<128x128xf32>
    %c1_84 = arith.constant 1 : index
    %c0_85 = arith.constant 0 : index
    %c640_86 = arith.constant 640 : index
    %215 = vector.load %arg6[%c1_84, %c0_85, %c640_86] : memref<2x128x768xf32, #tpu.memory_space<vmem>>, vector<1x128x128xf32>
    %216 = vector.shape_cast %215 : vector<1x128x128xf32> to vector<128x128xf32>
    %cst_87 = arith.constant dense<0.000000e+00> : vector<16x384xf32>
    %217 = tpu.matmul %208, %210, %cst_87 {dimension_numbers = #tpu.dot_dimension_numbers<[1], [0], [0], [1], [0, 0, 1, 1], [], []>} : vector<16x128xf32>, vector<128x384xf32>, vector<16x384xf32> -> vector<16x384xf32>
    %218 = vector.extract_strided_slice %217 {offsets = [0, 0], sizes = [16, 128], strides = [1, 1]} : vector<16x384xf32> to vector<16x128xf32>
    %c1_88 = arith.constant 1 : index
    %c0_89 = arith.constant 0 : index
    %c0_90 = arith.constant 0 : index
    %219 = vector.load %arg7[%c1_88, %c0_89, %c0_90] : memref<2x10x128xf32, #tpu.memory_space<vmem>>, vector<1x1x128xf32>
    %220 = vector.shape_cast %219 : vector<1x1x128xf32> to vector<1x128xf32>
    %221 = vector.broadcast %220 : vector<1x128xf32> to vector<16x128xf32>
    %222 = arith.addf %218, %221 : vector<16x128xf32>
    %223 = vector.extract_strided_slice %217 {offsets = [0, 128], sizes = [16, 128], strides = [1, 1]} : vector<16x384xf32> to vector<16x128xf32>
    %c1_91 = arith.constant 1 : index
    %c1_92 = arith.constant 1 : index
    %c0_93 = arith.constant 0 : index
    %224 = vector.load %arg7[%c1_91, %c1_92, %c0_93] : memref<2x10x128xf32, #tpu.memory_space<vmem>>, vector<1x1x128xf32>
    %225 = vector.shape_cast %224 : vector<1x1x128xf32> to vector<1x128xf32>
    %226 = vector.broadcast %225 : vector<1x128xf32> to vector<16x128xf32>
    %227 = arith.addf %223, %226 : vector<16x128xf32>
    %228 = vector.extract_strided_slice %217 {offsets = [0, 256], sizes = [16, 128], strides = [1, 1]} : vector<16x384xf32> to vector<16x128xf32>
    %c1_94 = arith.constant 1 : index
    %c2_95 = arith.constant 2 : index
    %c0_96 = arith.constant 0 : index
    %229 = vector.load %arg7[%c1_94, %c2_95, %c0_96] : memref<2x10x128xf32, #tpu.memory_space<vmem>>, vector<1x1x128xf32>
    %230 = vector.shape_cast %229 : vector<1x1x128xf32> to vector<1x128xf32>
    %231 = vector.broadcast %230 : vector<1x128xf32> to vector<16x128xf32>
    %232 = arith.addf %228, %231 : vector<16x128xf32>
    %c1_97 = arith.constant 1 : index
    %c3_98 = arith.constant 3 : index
    %c0_99 = arith.constant 0 : index
    %233 = vector.load %arg7[%c1_97, %c3_98, %c0_99] : memref<2x10x128xf32, #tpu.memory_space<vmem>>, vector<1x1x128xf32>
    %234 = vector.shape_cast %233 : vector<1x1x128xf32> to vector<1x128xf32>
    %cst_100 = arith.constant 0.000000e+00 : f32
    %235 = vector.broadcast %cst_100 : f32 to vector<16x128xf32>
    %236 = vector.broadcast %7 : vector<1x128xf32> to vector<16x128xf32>
    %237 = arith.mulf %227, %236 : vector<16x128xf32>
    %cst_101 = arith.constant dense<0.000000e+00> : vector<16x16xf32>
    %238 = tpu.matmul %222, %237, %cst_101 {dimension_numbers = #tpu.dot_dimension_numbers<[1], [1], [0], [0], [0, 0, 1, 0], [], []>} : vector<16x128xf32>, vector<16x128xf32>, vector<16x16xf32> -> vector<16x16xf32>
    %cst_102 = arith.constant 0.176776692 : f32
    %239 = vector.broadcast %cst_102 : f32 to vector<16x16xf32>
    %240 = arith.mulf %238, %239 : vector<16x16xf32>
    %241 = arith.addf %240, %29 : vector<16x16xf32>
    %cst_103 = arith.constant dense<0xFF800000> : vector<16xf32>
    %242 = vector.multi_reduction <maximumf>, %241, %cst_103 [1] : vector<16x16xf32> to vector<16xf32>
    %243 = vector.shape_cast %242 : vector<16xf32> to vector<16x1xf32>
    %244 = vector.broadcast %243 : vector<16x1xf32> to vector<16x16xf32>
    %245 = arith.subf %241, %244 : vector<16x16xf32>
    %246 = math.exp %245 : vector<16x16xf32>
    %cst_104 = arith.constant dense<0.000000e+00> : vector<16xf32>
    %247 = vector.multi_reduction <add>, %246, %cst_104 [1] : vector<16x16xf32> to vector<16xf32>
    %248 = vector.shape_cast %247 : vector<16xf32> to vector<16x1xf32>
    %249 = tpu.reciprocal %248 {approx = true} : vector<16x1xf32> -> vector<16x1xf32>
    %250 = vector.broadcast %249 : vector<16x1xf32> to vector<16x16xf32>
    %251 = arith.mulf %246, %250 : vector<16x16xf32>
    %252 = vector.broadcast %7 : vector<1x128xf32> to vector<16x128xf32>
    %253 = arith.mulf %232, %252 : vector<16x128xf32>
    %cst_105 = arith.constant dense<0.000000e+00> : vector<16x128xf32>
    %254 = tpu.matmul %251, %253, %cst_105 {dimension_numbers = #tpu.dot_dimension_numbers<[1], [0], [0], [1], [0, 0, 1, 1], [], []>} : vector<16x16xf32>, vector<16x128xf32>, vector<16x128xf32> -> vector<16x128xf32>
    %255 = arith.addf %235, %254 : vector<16x128xf32>
    %256 = vector.broadcast %14 : vector<1x128xf32> to vector<16x128xf32>
    %257 = arith.mulf %227, %256 : vector<16x128xf32>
    %cst_106 = arith.constant dense<0.000000e+00> : vector<16x16xf32>
    %258 = tpu.matmul %222, %257, %cst_106 {dimension_numbers = #tpu.dot_dimension_numbers<[1], [1], [0], [0], [0, 0, 1, 0], [], []>} : vector<16x128xf32>, vector<16x128xf32>, vector<16x16xf32> -> vector<16x16xf32>
    %cst_107 = arith.constant 0.176776692 : f32
    %259 = vector.broadcast %cst_107 : f32 to vector<16x16xf32>
    %260 = arith.mulf %258, %259 : vector<16x16xf32>
    %261 = arith.addf %260, %29 : vector<16x16xf32>
    %cst_108 = arith.constant dense<0xFF800000> : vector<16xf32>
    %262 = vector.multi_reduction <maximumf>, %261, %cst_108 [1] : vector<16x16xf32> to vector<16xf32>
    %263 = vector.shape_cast %262 : vector<16xf32> to vector<16x1xf32>
    %264 = vector.broadcast %263 : vector<16x1xf32> to vector<16x16xf32>
    %265 = arith.subf %261, %264 : vector<16x16xf32>
    %266 = math.exp %265 : vector<16x16xf32>
    %cst_109 = arith.constant dense<0.000000e+00> : vector<16xf32>
    %267 = vector.multi_reduction <add>, %266, %cst_109 [1] : vector<16x16xf32> to vector<16xf32>
    %268 = vector.shape_cast %267 : vector<16xf32> to vector<16x1xf32>
    %269 = tpu.reciprocal %268 {approx = true} : vector<16x1xf32> -> vector<16x1xf32>
    %270 = vector.broadcast %269 : vector<16x1xf32> to vector<16x16xf32>
    %271 = arith.mulf %266, %270 : vector<16x16xf32>
    %272 = vector.broadcast %14 : vector<1x128xf32> to vector<16x128xf32>
    %273 = arith.mulf %232, %272 : vector<16x128xf32>
    %cst_110 = arith.constant dense<0.000000e+00> : vector<16x128xf32>
    %274 = tpu.matmul %271, %273, %cst_110 {dimension_numbers = #tpu.dot_dimension_numbers<[1], [0], [0], [1], [0, 0, 1, 1], [], []>} : vector<16x16xf32>, vector<16x128xf32>, vector<16x128xf32> -> vector<16x128xf32>
    %275 = arith.addf %255, %274 : vector<16x128xf32>
    %276 = vector.broadcast %21 : vector<1x128xf32> to vector<16x128xf32>
    %277 = arith.mulf %227, %276 : vector<16x128xf32>
    %cst_111 = arith.constant dense<0.000000e+00> : vector<16x16xf32>
    %278 = tpu.matmul %222, %277, %cst_111 {dimension_numbers = #tpu.dot_dimension_numbers<[1], [1], [0], [0], [0, 0, 1, 0], [], []>} : vector<16x128xf32>, vector<16x128xf32>, vector<16x16xf32> -> vector<16x16xf32>
    %cst_112 = arith.constant 0.176776692 : f32
    %279 = vector.broadcast %cst_112 : f32 to vector<16x16xf32>
    %280 = arith.mulf %278, %279 : vector<16x16xf32>
    %281 = arith.addf %280, %29 : vector<16x16xf32>
    %cst_113 = arith.constant dense<0xFF800000> : vector<16xf32>
    %282 = vector.multi_reduction <maximumf>, %281, %cst_113 [1] : vector<16x16xf32> to vector<16xf32>
    %283 = vector.shape_cast %282 : vector<16xf32> to vector<16x1xf32>
    %284 = vector.broadcast %283 : vector<16x1xf32> to vector<16x16xf32>
    %285 = arith.subf %281, %284 : vector<16x16xf32>
    %286 = math.exp %285 : vector<16x16xf32>
    %cst_114 = arith.constant dense<0.000000e+00> : vector<16xf32>
    %287 = vector.multi_reduction <add>, %286, %cst_114 [1] : vector<16x16xf32> to vector<16xf32>
    %288 = vector.shape_cast %287 : vector<16xf32> to vector<16x1xf32>
    %289 = tpu.reciprocal %288 {approx = true} : vector<16x1xf32> -> vector<16x1xf32>
    %290 = vector.broadcast %289 : vector<16x1xf32> to vector<16x16xf32>
    %291 = arith.mulf %286, %290 : vector<16x16xf32>
    %292 = vector.broadcast %21 : vector<1x128xf32> to vector<16x128xf32>
    %293 = arith.mulf %232, %292 : vector<16x128xf32>
    %cst_115 = arith.constant dense<0.000000e+00> : vector<16x128xf32>
    %294 = tpu.matmul %291, %293, %cst_115 {dimension_numbers = #tpu.dot_dimension_numbers<[1], [0], [0], [1], [0, 0, 1, 1], [], []>} : vector<16x16xf32>, vector<16x128xf32>, vector<16x128xf32> -> vector<16x128xf32>
    %295 = arith.addf %275, %294 : vector<16x128xf32>
    %296 = vector.broadcast %28 : vector<1x128xf32> to vector<16x128xf32>
    %297 = arith.mulf %227, %296 : vector<16x128xf32>
    %cst_116 = arith.constant dense<0.000000e+00> : vector<16x16xf32>
    %298 = tpu.matmul %222, %297, %cst_116 {dimension_numbers = #tpu.dot_dimension_numbers<[1], [1], [0], [0], [0, 0, 1, 0], [], []>} : vector<16x128xf32>, vector<16x128xf32>, vector<16x16xf32> -> vector<16x16xf32>
    %cst_117 = arith.constant 0.176776692 : f32
    %299 = vector.broadcast %cst_117 : f32 to vector<16x16xf32>
    %300 = arith.mulf %298, %299 : vector<16x16xf32>
    %301 = arith.addf %300, %29 : vector<16x16xf32>
    %cst_118 = arith.constant dense<0xFF800000> : vector<16xf32>
    %302 = vector.multi_reduction <maximumf>, %301, %cst_118 [1] : vector<16x16xf32> to vector<16xf32>
    %303 = vector.shape_cast %302 : vector<16xf32> to vector<16x1xf32>
    %304 = vector.broadcast %303 : vector<16x1xf32> to vector<16x16xf32>
    %305 = arith.subf %301, %304 : vector<16x16xf32>
    %306 = math.exp %305 : vector<16x16xf32>
    %cst_119 = arith.constant dense<0.000000e+00> : vector<16xf32>
    %307 = vector.multi_reduction <add>, %306, %cst_119 [1] : vector<16x16xf32> to vector<16xf32>
    %308 = vector.shape_cast %307 : vector<16xf32> to vector<16x1xf32>
    %309 = tpu.reciprocal %308 {approx = true} : vector<16x1xf32> -> vector<16x1xf32>
    %310 = vector.broadcast %309 : vector<16x1xf32> to vector<16x16xf32>
    %311 = arith.mulf %306, %310 : vector<16x16xf32>
    %312 = vector.broadcast %28 : vector<1x128xf32> to vector<16x128xf32>
    %313 = arith.mulf %232, %312 : vector<16x128xf32>
    %cst_120 = arith.constant dense<0.000000e+00> : vector<16x128xf32>
    %314 = tpu.matmul %311, %313, %cst_120 {dimension_numbers = #tpu.dot_dimension_numbers<[1], [0], [0], [1], [0, 0, 1, 1], [], []>} : vector<16x16xf32>, vector<16x128xf32>, vector<16x128xf32> -> vector<16x128xf32>
    %315 = arith.addf %295, %314 : vector<16x128xf32>
    %cst_121 = arith.constant dense<0.000000e+00> : vector<16x128xf32>
    %316 = tpu.matmul %315, %212, %cst_121 {dimension_numbers = #tpu.dot_dimension_numbers<[1], [0], [0], [1], [0, 0, 1, 1], [], []>} : vector<16x128xf32>, vector<128x128xf32>, vector<16x128xf32> -> vector<16x128xf32>
    %317 = vector.broadcast %234 : vector<1x128xf32> to vector<16x128xf32>
    %318 = arith.addf %316, %317 : vector<16x128xf32>
    %319 = arith.addf %208, %318 : vector<16x128xf32>
    %c1_122 = arith.constant 1 : index
    %c4_123 = arith.constant 4 : index
    %c0_124 = arith.constant 0 : index
    %320 = vector.load %arg7[%c1_122, %c4_123, %c0_124] : memref<2x10x128xf32, #tpu.memory_space<vmem>>, vector<1x1x128xf32>
    %321 = vector.shape_cast %320 : vector<1x1x128xf32> to vector<1x128xf32>
    %c1_125 = arith.constant 1 : index
    %c5_126 = arith.constant 5 : index
    %c0_127 = arith.constant 0 : index
    %322 = vector.load %arg7[%c1_125, %c5_126, %c0_127] : memref<2x10x128xf32, #tpu.memory_space<vmem>>, vector<1x1x128xf32>
    %323 = vector.shape_cast %322 : vector<1x1x128xf32> to vector<1x128xf32>
    %cst_128 = arith.constant dense<0.000000e+00> : vector<16xf32>
    %324 = vector.multi_reduction <add>, %319, %cst_128 [1] : vector<16x128xf32> to vector<16xf32>
    %325 = vector.shape_cast %324 : vector<16xf32> to vector<16x1xf32>
    %cst_129 = arith.constant 1.280000e+02 : f32
    %326 = vector.broadcast %cst_129 : f32 to vector<16x1xf32>
    %327 = arith.divf %325, %326 : vector<16x1xf32>
    %328 = vector.broadcast %327 : vector<16x1xf32> to vector<16x128xf32>
    %329 = arith.subf %319, %328 : vector<16x128xf32>
    %330 = arith.mulf %329, %329 : vector<16x128xf32>
    %cst_130 = arith.constant dense<0.000000e+00> : vector<16xf32>
    %331 = vector.multi_reduction <add>, %330, %cst_130 [1] : vector<16x128xf32> to vector<16xf32>
    %332 = vector.shape_cast %331 : vector<16xf32> to vector<16x1xf32>
    %cst_131 = arith.constant 1.280000e+02 : f32
    %333 = vector.broadcast %cst_131 : f32 to vector<16x1xf32>
    %334 = arith.divf %332, %333 : vector<16x1xf32>
    %335 = vector.broadcast %327 : vector<16x1xf32> to vector<16x128xf32>
    %336 = arith.subf %319, %335 : vector<16x128xf32>
    %cst_132 = arith.constant 9.99999974E-6 : f32
    %337 = vector.broadcast %cst_132 : f32 to vector<16x1xf32>
    %338 = arith.addf %334, %337 : vector<16x1xf32>
    %339 = math.rsqrt %338 : vector<16x1xf32>
    %340 = vector.broadcast %339 : vector<16x1xf32> to vector<16x128xf32>
    %341 = arith.mulf %336, %340 : vector<16x128xf32>
    %342 = vector.broadcast %321 : vector<1x128xf32> to vector<16x128xf32>
    %343 = arith.mulf %341, %342 : vector<16x128xf32>
    %344 = vector.broadcast %323 : vector<1x128xf32> to vector<16x128xf32>
    %345 = arith.addf %343, %344 : vector<16x128xf32>
    %c1_133 = arith.constant 1 : index
    %c6_134 = arith.constant 6 : index
    %c0_135 = arith.constant 0 : index
    %346 = vector.load %arg7[%c1_133, %c6_134, %c0_135] : memref<2x10x128xf32, #tpu.memory_space<vmem>>, vector<1x1x128xf32>
    %347 = vector.shape_cast %346 : vector<1x1x128xf32> to vector<1x128xf32>
    %c1_136 = arith.constant 1 : index
    %c7_137 = arith.constant 7 : index
    %c0_138 = arith.constant 0 : index
    %348 = vector.load %arg7[%c1_136, %c7_137, %c0_138] : memref<2x10x128xf32, #tpu.memory_space<vmem>>, vector<1x1x128xf32>
    %349 = vector.shape_cast %348 : vector<1x1x128xf32> to vector<1x128xf32>
    %cst_139 = arith.constant dense<0.000000e+00> : vector<16x128xf32>
    %350 = tpu.matmul %345, %214, %cst_139 {dimension_numbers = #tpu.dot_dimension_numbers<[1], [0], [0], [1], [0, 0, 1, 1], [], []>} : vector<16x128xf32>, vector<128x128xf32>, vector<16x128xf32> -> vector<16x128xf32>
    %351 = vector.broadcast %347 : vector<1x128xf32> to vector<16x128xf32>
    %352 = arith.addf %350, %351 : vector<16x128xf32>
    %cst_140 = arith.constant 0.000000e+00 : f32
    %353 = vector.broadcast %cst_140 : f32 to vector<16x128xf32>
    %354 = arith.maximumf %352, %353 : vector<16x128xf32>
    %cst_141 = arith.constant dense<0.000000e+00> : vector<16x128xf32>
    %355 = tpu.matmul %354, %216, %cst_141 {dimension_numbers = #tpu.dot_dimension_numbers<[1], [0], [0], [1], [0, 0, 1, 1], [], []>} : vector<16x128xf32>, vector<128x128xf32>, vector<16x128xf32> -> vector<16x128xf32>
    %356 = vector.broadcast %349 : vector<1x128xf32> to vector<16x128xf32>
    %357 = arith.addf %355, %356 : vector<16x128xf32>
    %358 = arith.addf %345, %357 : vector<16x128xf32>
    %c1_142 = arith.constant 1 : index
    %c8_143 = arith.constant 8 : index
    %c0_144 = arith.constant 0 : index
    %359 = vector.load %arg7[%c1_142, %c8_143, %c0_144] : memref<2x10x128xf32, #tpu.memory_space<vmem>>, vector<1x1x128xf32>
    %360 = vector.shape_cast %359 : vector<1x1x128xf32> to vector<1x128xf32>
    %c1_145 = arith.constant 1 : index
    %c9_146 = arith.constant 9 : index
    %c0_147 = arith.constant 0 : index
    %361 = vector.load %arg7[%c1_145, %c9_146, %c0_147] : memref<2x10x128xf32, #tpu.memory_space<vmem>>, vector<1x1x128xf32>
    %362 = vector.shape_cast %361 : vector<1x1x128xf32> to vector<1x128xf32>
    %cst_148 = arith.constant dense<0.000000e+00> : vector<16xf32>
    %363 = vector.multi_reduction <add>, %358, %cst_148 [1] : vector<16x128xf32> to vector<16xf32>
    %364 = vector.shape_cast %363 : vector<16xf32> to vector<16x1xf32>
    %cst_149 = arith.constant 1.280000e+02 : f32
    %365 = vector.broadcast %cst_149 : f32 to vector<16x1xf32>
    %366 = arith.divf %364, %365 : vector<16x1xf32>
    %367 = vector.broadcast %366 : vector<16x1xf32> to vector<16x128xf32>
    %368 = arith.subf %358, %367 : vector<16x128xf32>
    %369 = arith.mulf %368, %368 : vector<16x128xf32>
    %cst_150 = arith.constant dense<0.000000e+00> : vector<16xf32>
    %370 = vector.multi_reduction <add>, %369, %cst_150 [1] : vector<16x128xf32> to vector<16xf32>
    %371 = vector.shape_cast %370 : vector<16xf32> to vector<16x1xf32>
    %cst_151 = arith.constant 1.280000e+02 : f32
    %372 = vector.broadcast %cst_151 : f32 to vector<16x1xf32>
    %373 = arith.divf %371, %372 : vector<16x1xf32>
    %374 = vector.broadcast %366 : vector<16x1xf32> to vector<16x128xf32>
    %375 = arith.subf %358, %374 : vector<16x128xf32>
    %cst_152 = arith.constant 9.99999974E-6 : f32
    %376 = vector.broadcast %cst_152 : f32 to vector<16x1xf32>
    %377 = arith.addf %373, %376 : vector<16x1xf32>
    %378 = math.rsqrt %377 : vector<16x1xf32>
    %379 = vector.broadcast %378 : vector<16x1xf32> to vector<16x128xf32>
    %380 = arith.mulf %375, %379 : vector<16x128xf32>
    %381 = vector.broadcast %360 : vector<1x128xf32> to vector<16x128xf32>
    %382 = arith.mulf %380, %381 : vector<16x128xf32>
    %383 = vector.broadcast %362 : vector<1x128xf32> to vector<16x128xf32>
    %384 = arith.addf %382, %383 : vector<16x128xf32>
    %c0_153 = arith.constant 0 : index
    %c0_154 = arith.constant 0 : index
    %385 = vector.load %arg10[%c0_153, %c0_154] : memref<5x128xf32, #tpu.memory_space<vmem>>, vector<1x128xf32>
    %c1_155 = arith.constant 1 : index
    %c0_156 = arith.constant 0 : index
    %386 = vector.load %arg10[%c1_155, %c0_156] : memref<5x128xf32, #tpu.memory_space<vmem>>, vector<1x128xf32>
    %cst_157 = arith.constant dense<0.000000e+00> : vector<16xf32>
    %387 = vector.multi_reduction <add>, %384, %cst_157 [1] : vector<16x128xf32> to vector<16xf32>
    %388 = vector.shape_cast %387 : vector<16xf32> to vector<16x1xf32>
    %cst_158 = arith.constant 1.280000e+02 : f32
    %389 = vector.broadcast %cst_158 : f32 to vector<16x1xf32>
    %390 = arith.divf %388, %389 : vector<16x1xf32>
    %391 = vector.broadcast %390 : vector<16x1xf32> to vector<16x128xf32>
    %392 = arith.subf %384, %391 : vector<16x128xf32>
    %393 = arith.mulf %392, %392 : vector<16x128xf32>
    %cst_159 = arith.constant dense<0.000000e+00> : vector<16xf32>
    %394 = vector.multi_reduction <add>, %393, %cst_159 [1] : vector<16x128xf32> to vector<16xf32>
    %395 = vector.shape_cast %394 : vector<16xf32> to vector<16x1xf32>
    %cst_160 = arith.constant 1.280000e+02 : f32
    %396 = vector.broadcast %cst_160 : f32 to vector<16x1xf32>
    %397 = arith.divf %395, %396 : vector<16x1xf32>
    %398 = vector.broadcast %390 : vector<16x1xf32> to vector<16x128xf32>
    %399 = arith.subf %384, %398 : vector<16x128xf32>
    %cst_161 = arith.constant 9.99999974E-6 : f32
    %400 = vector.broadcast %cst_161 : f32 to vector<16x1xf32>
    %401 = arith.addf %397, %400 : vector<16x1xf32>
    %402 = math.rsqrt %401 : vector<16x1xf32>
    %403 = vector.broadcast %402 : vector<16x1xf32> to vector<16x128xf32>
    %404 = arith.mulf %399, %403 : vector<16x128xf32>
    %405 = vector.broadcast %385 : vector<1x128xf32> to vector<16x128xf32>
    %406 = arith.mulf %404, %405 : vector<16x128xf32>
    %407 = vector.broadcast %386 : vector<1x128xf32> to vector<16x128xf32>
    %408 = arith.addf %406, %407 : vector<16x128xf32>
    %c0_162 = arith.constant 0 : index
    %c0_163 = arith.constant 0 : index
    %409 = vector.load %arg2[%c0_162, %c0_163] : memref<16x128xf32, #tpu.memory_space<vmem>>, vector<16x128xf32>
    %c0_164 = arith.constant 0 : index
    %c0_165 = arith.constant 0 : index
    %c0_166 = arith.constant 0 : index
    %410 = vector.load %arg8[%c0_164, %c0_165, %c0_166] : memref<2x128x1280xf32, #tpu.memory_space<vmem>>, vector<1x128x384xf32>
    %411 = vector.shape_cast %410 : vector<1x128x384xf32> to vector<128x384xf32>
    %c0_167 = arith.constant 0 : index
    %c0_168 = arith.constant 0 : index
    %c384_169 = arith.constant 384 : index
    %412 = vector.load %arg8[%c0_167, %c0_168, %c384_169] : memref<2x128x1280xf32, #tpu.memory_space<vmem>>, vector<1x128x128xf32>
    %413 = vector.shape_cast %412 : vector<1x128x128xf32> to vector<128x128xf32>
    %c0_170 = arith.constant 0 : index
    %c0_171 = arith.constant 0 : index
    %c512_172 = arith.constant 512 : index
    %414 = vector.load %arg8[%c0_170, %c0_171, %c512_172] : memref<2x128x1280xf32, #tpu.memory_space<vmem>>, vector<1x128x128xf32>
    %415 = vector.shape_cast %414 : vector<1x128x128xf32> to vector<128x128xf32>
    %c0_173 = arith.constant 0 : index
    %c0_174 = arith.constant 0 : index
    %c640_175 = arith.constant 640 : index
    %416 = vector.load %arg8[%c0_173, %c0_174, %c640_175] : memref<2x128x1280xf32, #tpu.memory_space<vmem>>, vector<1x128x256xf32>
    %417 = vector.shape_cast %416 : vector<1x128x256xf32> to vector<128x256xf32>
    %c0_176 = arith.constant 0 : index
    %c0_177 = arith.constant 0 : index
    %c896 = arith.constant 896 : index
    %418 = vector.load %arg8[%c0_176, %c0_177, %c896] : memref<2x128x1280xf32, #tpu.memory_space<vmem>>, vector<1x128x128xf32>
    %419 = vector.shape_cast %418 : vector<1x128x128xf32> to vector<128x128xf32>
    %c0_178 = arith.constant 0 : index
    %c0_179 = arith.constant 0 : index
    %c1024 = arith.constant 1024 : index
    %420 = vector.load %arg8[%c0_178, %c0_179, %c1024] : memref<2x128x1280xf32, #tpu.memory_space<vmem>>, vector<1x128x128xf32>
    %421 = vector.shape_cast %420 : vector<1x128x128xf32> to vector<128x128xf32>
    %c0_180 = arith.constant 0 : index
    %c0_181 = arith.constant 0 : index
    %c1152 = arith.constant 1152 : index
    %422 = vector.load %arg8[%c0_180, %c0_181, %c1152] : memref<2x128x1280xf32, #tpu.memory_space<vmem>>, vector<1x128x128xf32>
    %423 = vector.shape_cast %422 : vector<1x128x128xf32> to vector<128x128xf32>
    %cst_182 = arith.constant dense<0.000000e+00> : vector<16x384xf32>
    %424 = tpu.matmul %409, %411, %cst_182 {dimension_numbers = #tpu.dot_dimension_numbers<[1], [0], [0], [1], [0, 0, 1, 1], [], []>} : vector<16x128xf32>, vector<128x384xf32>, vector<16x384xf32> -> vector<16x384xf32>
    %425 = vector.extract_strided_slice %424 {offsets = [0, 0], sizes = [16, 128], strides = [1, 1]} : vector<16x384xf32> to vector<16x128xf32>
    %c0_183 = arith.constant 0 : index
    %c0_184 = arith.constant 0 : index
    %c0_185 = arith.constant 0 : index
    %426 = vector.load %arg9[%c0_183, %c0_184, %c0_185] : memref<2x16x128xf32, #tpu.memory_space<vmem>>, vector<1x1x128xf32>
    %427 = vector.shape_cast %426 : vector<1x1x128xf32> to vector<1x128xf32>
    %428 = vector.broadcast %427 : vector<1x128xf32> to vector<16x128xf32>
    %429 = arith.addf %425, %428 : vector<16x128xf32>
    %430 = vector.extract_strided_slice %424 {offsets = [0, 128], sizes = [16, 128], strides = [1, 1]} : vector<16x384xf32> to vector<16x128xf32>
    %c0_186 = arith.constant 0 : index
    %c1_187 = arith.constant 1 : index
    %c0_188 = arith.constant 0 : index
    %431 = vector.load %arg9[%c0_186, %c1_187, %c0_188] : memref<2x16x128xf32, #tpu.memory_space<vmem>>, vector<1x1x128xf32>
    %432 = vector.shape_cast %431 : vector<1x1x128xf32> to vector<1x128xf32>
    %433 = vector.broadcast %432 : vector<1x128xf32> to vector<16x128xf32>
    %434 = arith.addf %430, %433 : vector<16x128xf32>
    %435 = vector.extract_strided_slice %424 {offsets = [0, 256], sizes = [16, 128], strides = [1, 1]} : vector<16x384xf32> to vector<16x128xf32>
    %c0_189 = arith.constant 0 : index
    %c2_190 = arith.constant 2 : index
    %c0_191 = arith.constant 0 : index
    %436 = vector.load %arg9[%c0_189, %c2_190, %c0_191] : memref<2x16x128xf32, #tpu.memory_space<vmem>>, vector<1x1x128xf32>
    %437 = vector.shape_cast %436 : vector<1x1x128xf32> to vector<1x128xf32>
    %438 = vector.broadcast %437 : vector<1x128xf32> to vector<16x128xf32>
    %439 = arith.addf %435, %438 : vector<16x128xf32>
    %c0_192 = arith.constant 0 : index
    %c3_193 = arith.constant 3 : index
    %c0_194 = arith.constant 0 : index
    %440 = vector.load %arg9[%c0_192, %c3_193, %c0_194] : memref<2x16x128xf32, #tpu.memory_space<vmem>>, vector<1x1x128xf32>
    %441 = vector.shape_cast %440 : vector<1x1x128xf32> to vector<1x128xf32>
    %cst_195 = arith.constant 0.000000e+00 : f32
    %442 = vector.broadcast %cst_195 : f32 to vector<16x128xf32>
    %443 = vector.broadcast %7 : vector<1x128xf32> to vector<16x128xf32>
    %444 = arith.mulf %434, %443 : vector<16x128xf32>
    %cst_196 = arith.constant dense<0.000000e+00> : vector<16x16xf32>
    %445 = tpu.matmul %429, %444, %cst_196 {dimension_numbers = #tpu.dot_dimension_numbers<[1], [1], [0], [0], [0, 0, 1, 0], [], []>} : vector<16x128xf32>, vector<16x128xf32>, vector<16x16xf32> -> vector<16x16xf32>
    %cst_197 = arith.constant 0.176776692 : f32
    %446 = vector.broadcast %cst_197 : f32 to vector<16x16xf32>
    %447 = arith.mulf %445, %446 : vector<16x16xf32>
    %448 = arith.addf %447, %30 : vector<16x16xf32>
    %cst_198 = arith.constant dense<0xFF800000> : vector<16xf32>
    %449 = vector.multi_reduction <maximumf>, %448, %cst_198 [1] : vector<16x16xf32> to vector<16xf32>
    %450 = vector.shape_cast %449 : vector<16xf32> to vector<16x1xf32>
    %451 = vector.broadcast %450 : vector<16x1xf32> to vector<16x16xf32>
    %452 = arith.subf %448, %451 : vector<16x16xf32>
    %453 = math.exp %452 : vector<16x16xf32>
    %cst_199 = arith.constant dense<0.000000e+00> : vector<16xf32>
    %454 = vector.multi_reduction <add>, %453, %cst_199 [1] : vector<16x16xf32> to vector<16xf32>
    %455 = vector.shape_cast %454 : vector<16xf32> to vector<16x1xf32>
    %456 = tpu.reciprocal %455 {approx = true} : vector<16x1xf32> -> vector<16x1xf32>
    %457 = vector.broadcast %456 : vector<16x1xf32> to vector<16x16xf32>
    %458 = arith.mulf %453, %457 : vector<16x16xf32>
    %459 = vector.broadcast %7 : vector<1x128xf32> to vector<16x128xf32>
    %460 = arith.mulf %439, %459 : vector<16x128xf32>
    %cst_200 = arith.constant dense<0.000000e+00> : vector<16x128xf32>
    %461 = tpu.matmul %458, %460, %cst_200 {dimension_numbers = #tpu.dot_dimension_numbers<[1], [0], [0], [1], [0, 0, 1, 1], [], []>} : vector<16x16xf32>, vector<16x128xf32>, vector<16x128xf32> -> vector<16x128xf32>
    %462 = arith.addf %442, %461 : vector<16x128xf32>
    %463 = vector.broadcast %14 : vector<1x128xf32> to vector<16x128xf32>
    %464 = arith.mulf %434, %463 : vector<16x128xf32>
    %cst_201 = arith.constant dense<0.000000e+00> : vector<16x16xf32>
    %465 = tpu.matmul %429, %464, %cst_201 {dimension_numbers = #tpu.dot_dimension_numbers<[1], [1], [0], [0], [0, 0, 1, 0], [], []>} : vector<16x128xf32>, vector<16x128xf32>, vector<16x16xf32> -> vector<16x16xf32>
    %cst_202 = arith.constant 0.176776692 : f32
    %466 = vector.broadcast %cst_202 : f32 to vector<16x16xf32>
    %467 = arith.mulf %465, %466 : vector<16x16xf32>
    %468 = arith.addf %467, %30 : vector<16x16xf32>
    %cst_203 = arith.constant dense<0xFF800000> : vector<16xf32>
    %469 = vector.multi_reduction <maximumf>, %468, %cst_203 [1] : vector<16x16xf32> to vector<16xf32>
    %470 = vector.shape_cast %469 : vector<16xf32> to vector<16x1xf32>
    %471 = vector.broadcast %470 : vector<16x1xf32> to vector<16x16xf32>
    %472 = arith.subf %468, %471 : vector<16x16xf32>
    %473 = math.exp %472 : vector<16x16xf32>
    %cst_204 = arith.constant dense<0.000000e+00> : vector<16xf32>
    %474 = vector.multi_reduction <add>, %473, %cst_204 [1] : vector<16x16xf32> to vector<16xf32>
    %475 = vector.shape_cast %474 : vector<16xf32> to vector<16x1xf32>
    %476 = tpu.reciprocal %475 {approx = true} : vector<16x1xf32> -> vector<16x1xf32>
    %477 = vector.broadcast %476 : vector<16x1xf32> to vector<16x16xf32>
    %478 = arith.mulf %473, %477 : vector<16x16xf32>
    %479 = vector.broadcast %14 : vector<1x128xf32> to vector<16x128xf32>
    %480 = arith.mulf %439, %479 : vector<16x128xf32>
    %cst_205 = arith.constant dense<0.000000e+00> : vector<16x128xf32>
    %481 = tpu.matmul %478, %480, %cst_205 {dimension_numbers = #tpu.dot_dimension_numbers<[1], [0], [0], [1], [0, 0, 1, 1], [], []>} : vector<16x16xf32>, vector<16x128xf32>, vector<16x128xf32> -> vector<16x128xf32>
    %482 = arith.addf %462, %481 : vector<16x128xf32>
    %483 = vector.broadcast %21 : vector<1x128xf32> to vector<16x128xf32>
    %484 = arith.mulf %434, %483 : vector<16x128xf32>
    %cst_206 = arith.constant dense<0.000000e+00> : vector<16x16xf32>
    %485 = tpu.matmul %429, %484, %cst_206 {dimension_numbers = #tpu.dot_dimension_numbers<[1], [1], [0], [0], [0, 0, 1, 0], [], []>} : vector<16x128xf32>, vector<16x128xf32>, vector<16x16xf32> -> vector<16x16xf32>
    %cst_207 = arith.constant 0.176776692 : f32
    %486 = vector.broadcast %cst_207 : f32 to vector<16x16xf32>
    %487 = arith.mulf %485, %486 : vector<16x16xf32>
    %488 = arith.addf %487, %30 : vector<16x16xf32>
    %cst_208 = arith.constant dense<0xFF800000> : vector<16xf32>
    %489 = vector.multi_reduction <maximumf>, %488, %cst_208 [1] : vector<16x16xf32> to vector<16xf32>
    %490 = vector.shape_cast %489 : vector<16xf32> to vector<16x1xf32>
    %491 = vector.broadcast %490 : vector<16x1xf32> to vector<16x16xf32>
    %492 = arith.subf %488, %491 : vector<16x16xf32>
    %493 = math.exp %492 : vector<16x16xf32>
    %cst_209 = arith.constant dense<0.000000e+00> : vector<16xf32>
    %494 = vector.multi_reduction <add>, %493, %cst_209 [1] : vector<16x16xf32> to vector<16xf32>
    %495 = vector.shape_cast %494 : vector<16xf32> to vector<16x1xf32>
    %496 = tpu.reciprocal %495 {approx = true} : vector<16x1xf32> -> vector<16x1xf32>
    %497 = vector.broadcast %496 : vector<16x1xf32> to vector<16x16xf32>
    %498 = arith.mulf %493, %497 : vector<16x16xf32>
    %499 = vector.broadcast %21 : vector<1x128xf32> to vector<16x128xf32>
    %500 = arith.mulf %439, %499 : vector<16x128xf32>
    %cst_210 = arith.constant dense<0.000000e+00> : vector<16x128xf32>
    %501 = tpu.matmul %498, %500, %cst_210 {dimension_numbers = #tpu.dot_dimension_numbers<[1], [0], [0], [1], [0, 0, 1, 1], [], []>} : vector<16x16xf32>, vector<16x128xf32>, vector<16x128xf32> -> vector<16x128xf32>
    %502 = arith.addf %482, %501 : vector<16x128xf32>
    %503 = vector.broadcast %28 : vector<1x128xf32> to vector<16x128xf32>
    %504 = arith.mulf %434, %503 : vector<16x128xf32>
    %cst_211 = arith.constant dense<0.000000e+00> : vector<16x16xf32>
    %505 = tpu.matmul %429, %504, %cst_211 {dimension_numbers = #tpu.dot_dimension_numbers<[1], [1], [0], [0], [0, 0, 1, 0], [], []>} : vector<16x128xf32>, vector<16x128xf32>, vector<16x16xf32> -> vector<16x16xf32>
    %cst_212 = arith.constant 0.176776692 : f32
    %506 = vector.broadcast %cst_212 : f32 to vector<16x16xf32>
    %507 = arith.mulf %505, %506 : vector<16x16xf32>
    %508 = arith.addf %507, %30 : vector<16x16xf32>
    %cst_213 = arith.constant dense<0xFF800000> : vector<16xf32>
    %509 = vector.multi_reduction <maximumf>, %508, %cst_213 [1] : vector<16x16xf32> to vector<16xf32>
    %510 = vector.shape_cast %509 : vector<16xf32> to vector<16x1xf32>
    %511 = vector.broadcast %510 : vector<16x1xf32> to vector<16x16xf32>
    %512 = arith.subf %508, %511 : vector<16x16xf32>
    %513 = math.exp %512 : vector<16x16xf32>
    %cst_214 = arith.constant dense<0.000000e+00> : vector<16xf32>
    %514 = vector.multi_reduction <add>, %513, %cst_214 [1] : vector<16x16xf32> to vector<16xf32>
    %515 = vector.shape_cast %514 : vector<16xf32> to vector<16x1xf32>
    %516 = tpu.reciprocal %515 {approx = true} : vector<16x1xf32> -> vector<16x1xf32>
    %517 = vector.broadcast %516 : vector<16x1xf32> to vector<16x16xf32>
    %518 = arith.mulf %513, %517 : vector<16x16xf32>
    %519 = vector.broadcast %28 : vector<1x128xf32> to vector<16x128xf32>
    %520 = arith.mulf %439, %519 : vector<16x128xf32>
    %cst_215 = arith.constant dense<0.000000e+00> : vector<16x128xf32>
    %521 = tpu.matmul %518, %520, %cst_215 {dimension_numbers = #tpu.dot_dimension_numbers<[1], [0], [0], [1], [0, 0, 1, 1], [], []>} : vector<16x16xf32>, vector<16x128xf32>, vector<16x128xf32> -> vector<16x128xf32>
    %522 = arith.addf %502, %521 : vector<16x128xf32>
    %cst_216 = arith.constant dense<0.000000e+00> : vector<16x128xf32>
    %523 = tpu.matmul %522, %413, %cst_216 {dimension_numbers = #tpu.dot_dimension_numbers<[1], [0], [0], [1], [0, 0, 1, 1], [], []>} : vector<16x128xf32>, vector<128x128xf32>, vector<16x128xf32> -> vector<16x128xf32>
    %524 = vector.broadcast %441 : vector<1x128xf32> to vector<16x128xf32>
    %525 = arith.addf %523, %524 : vector<16x128xf32>
    %526 = arith.addf %409, %525 : vector<16x128xf32>
    %c0_217 = arith.constant 0 : index
    %c4_218 = arith.constant 4 : index
    %c0_219 = arith.constant 0 : index
    %527 = vector.load %arg9[%c0_217, %c4_218, %c0_219] : memref<2x16x128xf32, #tpu.memory_space<vmem>>, vector<1x1x128xf32>
    %528 = vector.shape_cast %527 : vector<1x1x128xf32> to vector<1x128xf32>
    %c0_220 = arith.constant 0 : index
    %c5_221 = arith.constant 5 : index
    %c0_222 = arith.constant 0 : index
    %529 = vector.load %arg9[%c0_220, %c5_221, %c0_222] : memref<2x16x128xf32, #tpu.memory_space<vmem>>, vector<1x1x128xf32>
    %530 = vector.shape_cast %529 : vector<1x1x128xf32> to vector<1x128xf32>
    %cst_223 = arith.constant dense<0.000000e+00> : vector<16xf32>
    %531 = vector.multi_reduction <add>, %526, %cst_223 [1] : vector<16x128xf32> to vector<16xf32>
    %532 = vector.shape_cast %531 : vector<16xf32> to vector<16x1xf32>
    %cst_224 = arith.constant 1.280000e+02 : f32
    %533 = vector.broadcast %cst_224 : f32 to vector<16x1xf32>
    %534 = arith.divf %532, %533 : vector<16x1xf32>
    %535 = vector.broadcast %534 : vector<16x1xf32> to vector<16x128xf32>
    %536 = arith.subf %526, %535 : vector<16x128xf32>
    %537 = arith.mulf %536, %536 : vector<16x128xf32>
    %cst_225 = arith.constant dense<0.000000e+00> : vector<16xf32>
    %538 = vector.multi_reduction <add>, %537, %cst_225 [1] : vector<16x128xf32> to vector<16xf32>
    %539 = vector.shape_cast %538 : vector<16xf32> to vector<16x1xf32>
    %cst_226 = arith.constant 1.280000e+02 : f32
    %540 = vector.broadcast %cst_226 : f32 to vector<16x1xf32>
    %541 = arith.divf %539, %540 : vector<16x1xf32>
    %542 = vector.broadcast %534 : vector<16x1xf32> to vector<16x128xf32>
    %543 = arith.subf %526, %542 : vector<16x128xf32>
    %cst_227 = arith.constant 9.99999974E-6 : f32
    %544 = vector.broadcast %cst_227 : f32 to vector<16x1xf32>
    %545 = arith.addf %541, %544 : vector<16x1xf32>
    %546 = math.rsqrt %545 : vector<16x1xf32>
    %547 = vector.broadcast %546 : vector<16x1xf32> to vector<16x128xf32>
    %548 = arith.mulf %543, %547 : vector<16x128xf32>
    %549 = vector.broadcast %528 : vector<1x128xf32> to vector<16x128xf32>
    %550 = arith.mulf %548, %549 : vector<16x128xf32>
    %551 = vector.broadcast %530 : vector<1x128xf32> to vector<16x128xf32>
    %552 = arith.addf %550, %551 : vector<16x128xf32>
    %cst_228 = arith.constant dense<0.000000e+00> : vector<16x128xf32>
    %553 = tpu.matmul %552, %415, %cst_228 {dimension_numbers = #tpu.dot_dimension_numbers<[1], [0], [0], [1], [0, 0, 1, 1], [], []>} : vector<16x128xf32>, vector<128x128xf32>, vector<16x128xf32> -> vector<16x128xf32>
    %c0_229 = arith.constant 0 : index
    %c6_230 = arith.constant 6 : index
    %c0_231 = arith.constant 0 : index
    %554 = vector.load %arg9[%c0_229, %c6_230, %c0_231] : memref<2x16x128xf32, #tpu.memory_space<vmem>>, vector<1x1x128xf32>
    %555 = vector.shape_cast %554 : vector<1x1x128xf32> to vector<1x128xf32>
    %556 = vector.broadcast %555 : vector<1x128xf32> to vector<16x128xf32>
    %557 = arith.addf %553, %556 : vector<16x128xf32>
    %cst_232 = arith.constant dense<0.000000e+00> : vector<16x256xf32>
    %558 = tpu.matmul %408, %417, %cst_232 {dimension_numbers = #tpu.dot_dimension_numbers<[1], [0], [0], [1], [0, 0, 1, 1], [], []>} : vector<16x128xf32>, vector<128x256xf32>, vector<16x256xf32> -> vector<16x256xf32>
    %559 = vector.extract_strided_slice %558 {offsets = [0, 0], sizes = [16, 128], strides = [1, 1]} : vector<16x256xf32> to vector<16x128xf32>
    %c0_233 = arith.constant 0 : index
    %c7_234 = arith.constant 7 : index
    %c0_235 = arith.constant 0 : index
    %560 = vector.load %arg9[%c0_233, %c7_234, %c0_235] : memref<2x16x128xf32, #tpu.memory_space<vmem>>, vector<1x1x128xf32>
    %561 = vector.shape_cast %560 : vector<1x1x128xf32> to vector<1x128xf32>
    %562 = vector.broadcast %561 : vector<1x128xf32> to vector<16x128xf32>
    %563 = arith.addf %559, %562 : vector<16x128xf32>
    %564 = vector.extract_strided_slice %558 {offsets = [0, 128], sizes = [16, 128], strides = [1, 1]} : vector<16x256xf32> to vector<16x128xf32>
    %c0_236 = arith.constant 0 : index
    %c8_237 = arith.constant 8 : index
    %c0_238 = arith.constant 0 : index
    %565 = vector.load %arg9[%c0_236, %c8_237, %c0_238] : memref<2x16x128xf32, #tpu.memory_space<vmem>>, vector<1x1x128xf32>
    %566 = vector.shape_cast %565 : vector<1x1x128xf32> to vector<1x128xf32>
    %567 = vector.broadcast %566 : vector<1x128xf32> to vector<16x128xf32>
    %568 = arith.addf %564, %567 : vector<16x128xf32>
    %c0_239 = arith.constant 0 : index
    %c9_240 = arith.constant 9 : index
    %c0_241 = arith.constant 0 : index
    %569 = vector.load %arg9[%c0_239, %c9_240, %c0_241] : memref<2x16x128xf32, #tpu.memory_space<vmem>>, vector<1x1x128xf32>
    %570 = vector.shape_cast %569 : vector<1x1x128xf32> to vector<1x128xf32>
    %cst_242 = arith.constant 0.000000e+00 : f32
    %571 = vector.broadcast %cst_242 : f32 to vector<16x128xf32>
    %572 = vector.broadcast %7 : vector<1x128xf32> to vector<16x128xf32>
    %573 = arith.mulf %563, %572 : vector<16x128xf32>
    %cst_243 = arith.constant dense<0.000000e+00> : vector<16x16xf32>
    %574 = tpu.matmul %557, %573, %cst_243 {dimension_numbers = #tpu.dot_dimension_numbers<[1], [1], [0], [0], [0, 0, 1, 0], [], []>} : vector<16x128xf32>, vector<16x128xf32>, vector<16x16xf32> -> vector<16x16xf32>
    %cst_244 = arith.constant 0.176776692 : f32
    %575 = vector.broadcast %cst_244 : f32 to vector<16x16xf32>
    %576 = arith.mulf %574, %575 : vector<16x16xf32>
    %577 = arith.addf %576, %31 : vector<16x16xf32>
    %cst_245 = arith.constant dense<0xFF800000> : vector<16xf32>
    %578 = vector.multi_reduction <maximumf>, %577, %cst_245 [1] : vector<16x16xf32> to vector<16xf32>
    %579 = vector.shape_cast %578 : vector<16xf32> to vector<16x1xf32>
    %580 = vector.broadcast %579 : vector<16x1xf32> to vector<16x16xf32>
    %581 = arith.subf %577, %580 : vector<16x16xf32>
    %582 = math.exp %581 : vector<16x16xf32>
    %cst_246 = arith.constant dense<0.000000e+00> : vector<16xf32>
    %583 = vector.multi_reduction <add>, %582, %cst_246 [1] : vector<16x16xf32> to vector<16xf32>
    %584 = vector.shape_cast %583 : vector<16xf32> to vector<16x1xf32>
    %585 = tpu.reciprocal %584 {approx = true} : vector<16x1xf32> -> vector<16x1xf32>
    %586 = vector.broadcast %585 : vector<16x1xf32> to vector<16x16xf32>
    %587 = arith.mulf %582, %586 : vector<16x16xf32>
    %588 = vector.broadcast %7 : vector<1x128xf32> to vector<16x128xf32>
    %589 = arith.mulf %568, %588 : vector<16x128xf32>
    %cst_247 = arith.constant dense<0.000000e+00> : vector<16x128xf32>
    %590 = tpu.matmul %587, %589, %cst_247 {dimension_numbers = #tpu.dot_dimension_numbers<[1], [0], [0], [1], [0, 0, 1, 1], [], []>} : vector<16x16xf32>, vector<16x128xf32>, vector<16x128xf32> -> vector<16x128xf32>
    %591 = arith.addf %571, %590 : vector<16x128xf32>
    %592 = vector.broadcast %14 : vector<1x128xf32> to vector<16x128xf32>
    %593 = arith.mulf %563, %592 : vector<16x128xf32>
    %cst_248 = arith.constant dense<0.000000e+00> : vector<16x16xf32>
    %594 = tpu.matmul %557, %593, %cst_248 {dimension_numbers = #tpu.dot_dimension_numbers<[1], [1], [0], [0], [0, 0, 1, 0], [], []>} : vector<16x128xf32>, vector<16x128xf32>, vector<16x16xf32> -> vector<16x16xf32>
    %cst_249 = arith.constant 0.176776692 : f32
    %595 = vector.broadcast %cst_249 : f32 to vector<16x16xf32>
    %596 = arith.mulf %594, %595 : vector<16x16xf32>
    %597 = arith.addf %596, %31 : vector<16x16xf32>
    %cst_250 = arith.constant dense<0xFF800000> : vector<16xf32>
    %598 = vector.multi_reduction <maximumf>, %597, %cst_250 [1] : vector<16x16xf32> to vector<16xf32>
    %599 = vector.shape_cast %598 : vector<16xf32> to vector<16x1xf32>
    %600 = vector.broadcast %599 : vector<16x1xf32> to vector<16x16xf32>
    %601 = arith.subf %597, %600 : vector<16x16xf32>
    %602 = math.exp %601 : vector<16x16xf32>
    %cst_251 = arith.constant dense<0.000000e+00> : vector<16xf32>
    %603 = vector.multi_reduction <add>, %602, %cst_251 [1] : vector<16x16xf32> to vector<16xf32>
    %604 = vector.shape_cast %603 : vector<16xf32> to vector<16x1xf32>
    %605 = tpu.reciprocal %604 {approx = true} : vector<16x1xf32> -> vector<16x1xf32>
    %606 = vector.broadcast %605 : vector<16x1xf32> to vector<16x16xf32>
    %607 = arith.mulf %602, %606 : vector<16x16xf32>
    %608 = vector.broadcast %14 : vector<1x128xf32> to vector<16x128xf32>
    %609 = arith.mulf %568, %608 : vector<16x128xf32>
    %cst_252 = arith.constant dense<0.000000e+00> : vector<16x128xf32>
    %610 = tpu.matmul %607, %609, %cst_252 {dimension_numbers = #tpu.dot_dimension_numbers<[1], [0], [0], [1], [0, 0, 1, 1], [], []>} : vector<16x16xf32>, vector<16x128xf32>, vector<16x128xf32> -> vector<16x128xf32>
    %611 = arith.addf %591, %610 : vector<16x128xf32>
    %612 = vector.broadcast %21 : vector<1x128xf32> to vector<16x128xf32>
    %613 = arith.mulf %563, %612 : vector<16x128xf32>
    %cst_253 = arith.constant dense<0.000000e+00> : vector<16x16xf32>
    %614 = tpu.matmul %557, %613, %cst_253 {dimension_numbers = #tpu.dot_dimension_numbers<[1], [1], [0], [0], [0, 0, 1, 0], [], []>} : vector<16x128xf32>, vector<16x128xf32>, vector<16x16xf32> -> vector<16x16xf32>
    %cst_254 = arith.constant 0.176776692 : f32
    %615 = vector.broadcast %cst_254 : f32 to vector<16x16xf32>
    %616 = arith.mulf %614, %615 : vector<16x16xf32>
    %617 = arith.addf %616, %31 : vector<16x16xf32>
    %cst_255 = arith.constant dense<0xFF800000> : vector<16xf32>
    %618 = vector.multi_reduction <maximumf>, %617, %cst_255 [1] : vector<16x16xf32> to vector<16xf32>
    %619 = vector.shape_cast %618 : vector<16xf32> to vector<16x1xf32>
    %620 = vector.broadcast %619 : vector<16x1xf32> to vector<16x16xf32>
    %621 = arith.subf %617, %620 : vector<16x16xf32>
    %622 = math.exp %621 : vector<16x16xf32>
    %cst_256 = arith.constant dense<0.000000e+00> : vector<16xf32>
    %623 = vector.multi_reduction <add>, %622, %cst_256 [1] : vector<16x16xf32> to vector<16xf32>
    %624 = vector.shape_cast %623 : vector<16xf32> to vector<16x1xf32>
    %625 = tpu.reciprocal %624 {approx = true} : vector<16x1xf32> -> vector<16x1xf32>
    %626 = vector.broadcast %625 : vector<16x1xf32> to vector<16x16xf32>
    %627 = arith.mulf %622, %626 : vector<16x16xf32>
    %628 = vector.broadcast %21 : vector<1x128xf32> to vector<16x128xf32>
    %629 = arith.mulf %568, %628 : vector<16x128xf32>
    %cst_257 = arith.constant dense<0.000000e+00> : vector<16x128xf32>
    %630 = tpu.matmul %627, %629, %cst_257 {dimension_numbers = #tpu.dot_dimension_numbers<[1], [0], [0], [1], [0, 0, 1, 1], [], []>} : vector<16x16xf32>, vector<16x128xf32>, vector<16x128xf32> -> vector<16x128xf32>
    %631 = arith.addf %611, %630 : vector<16x128xf32>
    %632 = vector.broadcast %28 : vector<1x128xf32> to vector<16x128xf32>
    %633 = arith.mulf %563, %632 : vector<16x128xf32>
    %cst_258 = arith.constant dense<0.000000e+00> : vector<16x16xf32>
    %634 = tpu.matmul %557, %633, %cst_258 {dimension_numbers = #tpu.dot_dimension_numbers<[1], [1], [0], [0], [0, 0, 1, 0], [], []>} : vector<16x128xf32>, vector<16x128xf32>, vector<16x16xf32> -> vector<16x16xf32>
    %cst_259 = arith.constant 0.176776692 : f32
    %635 = vector.broadcast %cst_259 : f32 to vector<16x16xf32>
    %636 = arith.mulf %634, %635 : vector<16x16xf32>
    %637 = arith.addf %636, %31 : vector<16x16xf32>
    %cst_260 = arith.constant dense<0xFF800000> : vector<16xf32>
    %638 = vector.multi_reduction <maximumf>, %637, %cst_260 [1] : vector<16x16xf32> to vector<16xf32>
    %639 = vector.shape_cast %638 : vector<16xf32> to vector<16x1xf32>
    %640 = vector.broadcast %639 : vector<16x1xf32> to vector<16x16xf32>
    %641 = arith.subf %637, %640 : vector<16x16xf32>
    %642 = math.exp %641 : vector<16x16xf32>
    %cst_261 = arith.constant dense<0.000000e+00> : vector<16xf32>
    %643 = vector.multi_reduction <add>, %642, %cst_261 [1] : vector<16x16xf32> to vector<16xf32>
    %644 = vector.shape_cast %643 : vector<16xf32> to vector<16x1xf32>
    %645 = tpu.reciprocal %644 {approx = true} : vector<16x1xf32> -> vector<16x1xf32>
    %646 = vector.broadcast %645 : vector<16x1xf32> to vector<16x16xf32>
    %647 = arith.mulf %642, %646 : vector<16x16xf32>
    %648 = vector.broadcast %28 : vector<1x128xf32> to vector<16x128xf32>
    %649 = arith.mulf %568, %648 : vector<16x128xf32>
    %cst_262 = arith.constant dense<0.000000e+00> : vector<16x128xf32>
    %650 = tpu.matmul %647, %649, %cst_262 {dimension_numbers = #tpu.dot_dimension_numbers<[1], [0], [0], [1], [0, 0, 1, 1], [], []>} : vector<16x16xf32>, vector<16x128xf32>, vector<16x128xf32> -> vector<16x128xf32>
    %651 = arith.addf %631, %650 : vector<16x128xf32>
    %cst_263 = arith.constant dense<0.000000e+00> : vector<16x128xf32>
    %652 = tpu.matmul %651, %419, %cst_263 {dimension_numbers = #tpu.dot_dimension_numbers<[1], [0], [0], [1], [0, 0, 1, 1], [], []>} : vector<16x128xf32>, vector<128x128xf32>, vector<16x128xf32> -> vector<16x128xf32>
    %653 = vector.broadcast %570 : vector<1x128xf32> to vector<16x128xf32>
    %654 = arith.addf %652, %653 : vector<16x128xf32>
    %655 = arith.addf %552, %654 : vector<16x128xf32>
    %c0_264 = arith.constant 0 : index
    %c10 = arith.constant 10 : index
    %c0_265 = arith.constant 0 : index
    %656 = vector.load %arg9[%c0_264, %c10, %c0_265] : memref<2x16x128xf32, #tpu.memory_space<vmem>>, vector<1x1x128xf32>
    %657 = vector.shape_cast %656 : vector<1x1x128xf32> to vector<1x128xf32>
    %c0_266 = arith.constant 0 : index
    %c11 = arith.constant 11 : index
    %c0_267 = arith.constant 0 : index
    %658 = vector.load %arg9[%c0_266, %c11, %c0_267] : memref<2x16x128xf32, #tpu.memory_space<vmem>>, vector<1x1x128xf32>
    %659 = vector.shape_cast %658 : vector<1x1x128xf32> to vector<1x128xf32>
    %cst_268 = arith.constant dense<0.000000e+00> : vector<16xf32>
    %660 = vector.multi_reduction <add>, %655, %cst_268 [1] : vector<16x128xf32> to vector<16xf32>
    %661 = vector.shape_cast %660 : vector<16xf32> to vector<16x1xf32>
    %cst_269 = arith.constant 1.280000e+02 : f32
    %662 = vector.broadcast %cst_269 : f32 to vector<16x1xf32>
    %663 = arith.divf %661, %662 : vector<16x1xf32>
    %664 = vector.broadcast %663 : vector<16x1xf32> to vector<16x128xf32>
    %665 = arith.subf %655, %664 : vector<16x128xf32>
    %666 = arith.mulf %665, %665 : vector<16x128xf32>
    %cst_270 = arith.constant dense<0.000000e+00> : vector<16xf32>
    %667 = vector.multi_reduction <add>, %666, %cst_270 [1] : vector<16x128xf32> to vector<16xf32>
    %668 = vector.shape_cast %667 : vector<16xf32> to vector<16x1xf32>
    %cst_271 = arith.constant 1.280000e+02 : f32
    %669 = vector.broadcast %cst_271 : f32 to vector<16x1xf32>
    %670 = arith.divf %668, %669 : vector<16x1xf32>
    %671 = vector.broadcast %663 : vector<16x1xf32> to vector<16x128xf32>
    %672 = arith.subf %655, %671 : vector<16x128xf32>
    %cst_272 = arith.constant 9.99999974E-6 : f32
    %673 = vector.broadcast %cst_272 : f32 to vector<16x1xf32>
    %674 = arith.addf %670, %673 : vector<16x1xf32>
    %675 = math.rsqrt %674 : vector<16x1xf32>
    %676 = vector.broadcast %675 : vector<16x1xf32> to vector<16x128xf32>
    %677 = arith.mulf %672, %676 : vector<16x128xf32>
    %678 = vector.broadcast %657 : vector<1x128xf32> to vector<16x128xf32>
    %679 = arith.mulf %677, %678 : vector<16x128xf32>
    %680 = vector.broadcast %659 : vector<1x128xf32> to vector<16x128xf32>
    %681 = arith.addf %679, %680 : vector<16x128xf32>
    %c0_273 = arith.constant 0 : index
    %c12 = arith.constant 12 : index
    %c0_274 = arith.constant 0 : index
    %682 = vector.load %arg9[%c0_273, %c12, %c0_274] : memref<2x16x128xf32, #tpu.memory_space<vmem>>, vector<1x1x128xf32>
    %683 = vector.shape_cast %682 : vector<1x1x128xf32> to vector<1x128xf32>
    %c0_275 = arith.constant 0 : index
    %c13 = arith.constant 13 : index
    %c0_276 = arith.constant 0 : index
    %684 = vector.load %arg9[%c0_275, %c13, %c0_276] : memref<2x16x128xf32, #tpu.memory_space<vmem>>, vector<1x1x128xf32>
    %685 = vector.shape_cast %684 : vector<1x1x128xf32> to vector<1x128xf32>
    %cst_277 = arith.constant dense<0.000000e+00> : vector<16x128xf32>
    %686 = tpu.matmul %681, %421, %cst_277 {dimension_numbers = #tpu.dot_dimension_numbers<[1], [0], [0], [1], [0, 0, 1, 1], [], []>} : vector<16x128xf32>, vector<128x128xf32>, vector<16x128xf32> -> vector<16x128xf32>
    %687 = vector.broadcast %683 : vector<1x128xf32> to vector<16x128xf32>
    %688 = arith.addf %686, %687 : vector<16x128xf32>
    %cst_278 = arith.constant 0.000000e+00 : f32
    %689 = vector.broadcast %cst_278 : f32 to vector<16x128xf32>
    %690 = arith.maximumf %688, %689 : vector<16x128xf32>
    %cst_279 = arith.constant dense<0.000000e+00> : vector<16x128xf32>
    %691 = tpu.matmul %690, %423, %cst_279 {dimension_numbers = #tpu.dot_dimension_numbers<[1], [0], [0], [1], [0, 0, 1, 1], [], []>} : vector<16x128xf32>, vector<128x128xf32>, vector<16x128xf32> -> vector<16x128xf32>
    %692 = vector.broadcast %685 : vector<1x128xf32> to vector<16x128xf32>
    %693 = arith.addf %691, %692 : vector<16x128xf32>
    %694 = arith.addf %681, %693 : vector<16x128xf32>
    %c0_280 = arith.constant 0 : index
    %c14 = arith.constant 14 : index
    %c0_281 = arith.constant 0 : index
    %695 = vector.load %arg9[%c0_280, %c14, %c0_281] : memref<2x16x128xf32, #tpu.memory_space<vmem>>, vector<1x1x128xf32>
    %696 = vector.shape_cast %695 : vector<1x1x128xf32> to vector<1x128xf32>
    %c0_282 = arith.constant 0 : index
    %c15 = arith.constant 15 : index
    %c0_283 = arith.constant 0 : index
    %697 = vector.load %arg9[%c0_282, %c15, %c0_283] : memref<2x16x128xf32, #tpu.memory_space<vmem>>, vector<1x1x128xf32>
    %698 = vector.shape_cast %697 : vector<1x1x128xf32> to vector<1x128xf32>
    %cst_284 = arith.constant dense<0.000000e+00> : vector<16xf32>
    %699 = vector.multi_reduction <add>, %694, %cst_284 [1] : vector<16x128xf32> to vector<16xf32>
    %700 = vector.shape_cast %699 : vector<16xf32> to vector<16x1xf32>
    %cst_285 = arith.constant 1.280000e+02 : f32
    %701 = vector.broadcast %cst_285 : f32 to vector<16x1xf32>
    %702 = arith.divf %700, %701 : vector<16x1xf32>
    %703 = vector.broadcast %702 : vector<16x1xf32> to vector<16x128xf32>
    %704 = arith.subf %694, %703 : vector<16x128xf32>
    %705 = arith.mulf %704, %704 : vector<16x128xf32>
    %cst_286 = arith.constant dense<0.000000e+00> : vector<16xf32>
    %706 = vector.multi_reduction <add>, %705, %cst_286 [1] : vector<16x128xf32> to vector<16xf32>
    %707 = vector.shape_cast %706 : vector<16xf32> to vector<16x1xf32>
    %cst_287 = arith.constant 1.280000e+02 : f32
    %708 = vector.broadcast %cst_287 : f32 to vector<16x1xf32>
    %709 = arith.divf %707, %708 : vector<16x1xf32>
    %710 = vector.broadcast %702 : vector<16x1xf32> to vector<16x128xf32>
    %711 = arith.subf %694, %710 : vector<16x128xf32>
    %cst_288 = arith.constant 9.99999974E-6 : f32
    %712 = vector.broadcast %cst_288 : f32 to vector<16x1xf32>
    %713 = arith.addf %709, %712 : vector<16x1xf32>
    %714 = math.rsqrt %713 : vector<16x1xf32>
    %715 = vector.broadcast %714 : vector<16x1xf32> to vector<16x128xf32>
    %716 = arith.mulf %711, %715 : vector<16x128xf32>
    %717 = vector.broadcast %696 : vector<1x128xf32> to vector<16x128xf32>
    %718 = arith.mulf %716, %717 : vector<16x128xf32>
    %719 = vector.broadcast %698 : vector<1x128xf32> to vector<16x128xf32>
    %720 = arith.addf %718, %719 : vector<16x128xf32>
    %c1_289 = arith.constant 1 : index
    %c0_290 = arith.constant 0 : index
    %c0_291 = arith.constant 0 : index
    %721 = vector.load %arg8[%c1_289, %c0_290, %c0_291] : memref<2x128x1280xf32, #tpu.memory_space<vmem>>, vector<1x128x384xf32>
    %722 = vector.shape_cast %721 : vector<1x128x384xf32> to vector<128x384xf32>
    %c1_292 = arith.constant 1 : index
    %c0_293 = arith.constant 0 : index
    %c384_294 = arith.constant 384 : index
    %723 = vector.load %arg8[%c1_292, %c0_293, %c384_294] : memref<2x128x1280xf32, #tpu.memory_space<vmem>>, vector<1x128x128xf32>
    %724 = vector.shape_cast %723 : vector<1x128x128xf32> to vector<128x128xf32>
    %c1_295 = arith.constant 1 : index
    %c0_296 = arith.constant 0 : index
    %c512_297 = arith.constant 512 : index
    %725 = vector.load %arg8[%c1_295, %c0_296, %c512_297] : memref<2x128x1280xf32, #tpu.memory_space<vmem>>, vector<1x128x128xf32>
    %726 = vector.shape_cast %725 : vector<1x128x128xf32> to vector<128x128xf32>
    %c1_298 = arith.constant 1 : index
    %c0_299 = arith.constant 0 : index
    %c640_300 = arith.constant 640 : index
    %727 = vector.load %arg8[%c1_298, %c0_299, %c640_300] : memref<2x128x1280xf32, #tpu.memory_space<vmem>>, vector<1x128x256xf32>
    %728 = vector.shape_cast %727 : vector<1x128x256xf32> to vector<128x256xf32>
    %c1_301 = arith.constant 1 : index
    %c0_302 = arith.constant 0 : index
    %c896_303 = arith.constant 896 : index
    %729 = vector.load %arg8[%c1_301, %c0_302, %c896_303] : memref<2x128x1280xf32, #tpu.memory_space<vmem>>, vector<1x128x128xf32>
    %730 = vector.shape_cast %729 : vector<1x128x128xf32> to vector<128x128xf32>
    %c1_304 = arith.constant 1 : index
    %c0_305 = arith.constant 0 : index
    %c1024_306 = arith.constant 1024 : index
    %731 = vector.load %arg8[%c1_304, %c0_305, %c1024_306] : memref<2x128x1280xf32, #tpu.memory_space<vmem>>, vector<1x128x128xf32>
    %732 = vector.shape_cast %731 : vector<1x128x128xf32> to vector<128x128xf32>
    %c1_307 = arith.constant 1 : index
    %c0_308 = arith.constant 0 : index
    %c1152_309 = arith.constant 1152 : index
    %733 = vector.load %arg8[%c1_307, %c0_308, %c1152_309] : memref<2x128x1280xf32, #tpu.memory_space<vmem>>, vector<1x128x128xf32>
    %734 = vector.shape_cast %733 : vector<1x128x128xf32> to vector<128x128xf32>
    %cst_310 = arith.constant dense<0.000000e+00> : vector<16x384xf32>
    %735 = tpu.matmul %720, %722, %cst_310 {dimension_numbers = #tpu.dot_dimension_numbers<[1], [0], [0], [1], [0, 0, 1, 1], [], []>} : vector<16x128xf32>, vector<128x384xf32>, vector<16x384xf32> -> vector<16x384xf32>
    %736 = vector.extract_strided_slice %735 {offsets = [0, 0], sizes = [16, 128], strides = [1, 1]} : vector<16x384xf32> to vector<16x128xf32>
    %c1_311 = arith.constant 1 : index
    %c0_312 = arith.constant 0 : index
    %c0_313 = arith.constant 0 : index
    %737 = vector.load %arg9[%c1_311, %c0_312, %c0_313] : memref<2x16x128xf32, #tpu.memory_space<vmem>>, vector<1x1x128xf32>
    %738 = vector.shape_cast %737 : vector<1x1x128xf32> to vector<1x128xf32>
    %739 = vector.broadcast %738 : vector<1x128xf32> to vector<16x128xf32>
    %740 = arith.addf %736, %739 : vector<16x128xf32>
    %741 = vector.extract_strided_slice %735 {offsets = [0, 128], sizes = [16, 128], strides = [1, 1]} : vector<16x384xf32> to vector<16x128xf32>
    %c1_314 = arith.constant 1 : index
    %c1_315 = arith.constant 1 : index
    %c0_316 = arith.constant 0 : index
    %742 = vector.load %arg9[%c1_314, %c1_315, %c0_316] : memref<2x16x128xf32, #tpu.memory_space<vmem>>, vector<1x1x128xf32>
    %743 = vector.shape_cast %742 : vector<1x1x128xf32> to vector<1x128xf32>
    %744 = vector.broadcast %743 : vector<1x128xf32> to vector<16x128xf32>
    %745 = arith.addf %741, %744 : vector<16x128xf32>
    %746 = vector.extract_strided_slice %735 {offsets = [0, 256], sizes = [16, 128], strides = [1, 1]} : vector<16x384xf32> to vector<16x128xf32>
    %c1_317 = arith.constant 1 : index
    %c2_318 = arith.constant 2 : index
    %c0_319 = arith.constant 0 : index
    %747 = vector.load %arg9[%c1_317, %c2_318, %c0_319] : memref<2x16x128xf32, #tpu.memory_space<vmem>>, vector<1x1x128xf32>
    %748 = vector.shape_cast %747 : vector<1x1x128xf32> to vector<1x128xf32>
    %749 = vector.broadcast %748 : vector<1x128xf32> to vector<16x128xf32>
    %750 = arith.addf %746, %749 : vector<16x128xf32>
    %c1_320 = arith.constant 1 : index
    %c3_321 = arith.constant 3 : index
    %c0_322 = arith.constant 0 : index
    %751 = vector.load %arg9[%c1_320, %c3_321, %c0_322] : memref<2x16x128xf32, #tpu.memory_space<vmem>>, vector<1x1x128xf32>
    %752 = vector.shape_cast %751 : vector<1x1x128xf32> to vector<1x128xf32>
    %cst_323 = arith.constant 0.000000e+00 : f32
    %753 = vector.broadcast %cst_323 : f32 to vector<16x128xf32>
    %754 = vector.broadcast %7 : vector<1x128xf32> to vector<16x128xf32>
    %755 = arith.mulf %745, %754 : vector<16x128xf32>
    %cst_324 = arith.constant dense<0.000000e+00> : vector<16x16xf32>
    %756 = tpu.matmul %740, %755, %cst_324 {dimension_numbers = #tpu.dot_dimension_numbers<[1], [1], [0], [0], [0, 0, 1, 0], [], []>} : vector<16x128xf32>, vector<16x128xf32>, vector<16x16xf32> -> vector<16x16xf32>
    %cst_325 = arith.constant 0.176776692 : f32
    %757 = vector.broadcast %cst_325 : f32 to vector<16x16xf32>
    %758 = arith.mulf %756, %757 : vector<16x16xf32>
    %759 = arith.addf %758, %30 : vector<16x16xf32>
    %cst_326 = arith.constant dense<0xFF800000> : vector<16xf32>
    %760 = vector.multi_reduction <maximumf>, %759, %cst_326 [1] : vector<16x16xf32> to vector<16xf32>
    %761 = vector.shape_cast %760 : vector<16xf32> to vector<16x1xf32>
    %762 = vector.broadcast %761 : vector<16x1xf32> to vector<16x16xf32>
    %763 = arith.subf %759, %762 : vector<16x16xf32>
    %764 = math.exp %763 : vector<16x16xf32>
    %cst_327 = arith.constant dense<0.000000e+00> : vector<16xf32>
    %765 = vector.multi_reduction <add>, %764, %cst_327 [1] : vector<16x16xf32> to vector<16xf32>
    %766 = vector.shape_cast %765 : vector<16xf32> to vector<16x1xf32>
    %767 = tpu.reciprocal %766 {approx = true} : vector<16x1xf32> -> vector<16x1xf32>
    %768 = vector.broadcast %767 : vector<16x1xf32> to vector<16x16xf32>
    %769 = arith.mulf %764, %768 : vector<16x16xf32>
    %770 = vector.broadcast %7 : vector<1x128xf32> to vector<16x128xf32>
    %771 = arith.mulf %750, %770 : vector<16x128xf32>
    %cst_328 = arith.constant dense<0.000000e+00> : vector<16x128xf32>
    %772 = tpu.matmul %769, %771, %cst_328 {dimension_numbers = #tpu.dot_dimension_numbers<[1], [0], [0], [1], [0, 0, 1, 1], [], []>} : vector<16x16xf32>, vector<16x128xf32>, vector<16x128xf32> -> vector<16x128xf32>
    %773 = arith.addf %753, %772 : vector<16x128xf32>
    %774 = vector.broadcast %14 : vector<1x128xf32> to vector<16x128xf32>
    %775 = arith.mulf %745, %774 : vector<16x128xf32>
    %cst_329 = arith.constant dense<0.000000e+00> : vector<16x16xf32>
    %776 = tpu.matmul %740, %775, %cst_329 {dimension_numbers = #tpu.dot_dimension_numbers<[1], [1], [0], [0], [0, 0, 1, 0], [], []>} : vector<16x128xf32>, vector<16x128xf32>, vector<16x16xf32> -> vector<16x16xf32>
    %cst_330 = arith.constant 0.176776692 : f32
    %777 = vector.broadcast %cst_330 : f32 to vector<16x16xf32>
    %778 = arith.mulf %776, %777 : vector<16x16xf32>
    %779 = arith.addf %778, %30 : vector<16x16xf32>
    %cst_331 = arith.constant dense<0xFF800000> : vector<16xf32>
    %780 = vector.multi_reduction <maximumf>, %779, %cst_331 [1] : vector<16x16xf32> to vector<16xf32>
    %781 = vector.shape_cast %780 : vector<16xf32> to vector<16x1xf32>
    %782 = vector.broadcast %781 : vector<16x1xf32> to vector<16x16xf32>
    %783 = arith.subf %779, %782 : vector<16x16xf32>
    %784 = math.exp %783 : vector<16x16xf32>
    %cst_332 = arith.constant dense<0.000000e+00> : vector<16xf32>
    %785 = vector.multi_reduction <add>, %784, %cst_332 [1] : vector<16x16xf32> to vector<16xf32>
    %786 = vector.shape_cast %785 : vector<16xf32> to vector<16x1xf32>
    %787 = tpu.reciprocal %786 {approx = true} : vector<16x1xf32> -> vector<16x1xf32>
    %788 = vector.broadcast %787 : vector<16x1xf32> to vector<16x16xf32>
    %789 = arith.mulf %784, %788 : vector<16x16xf32>
    %790 = vector.broadcast %14 : vector<1x128xf32> to vector<16x128xf32>
    %791 = arith.mulf %750, %790 : vector<16x128xf32>
    %cst_333 = arith.constant dense<0.000000e+00> : vector<16x128xf32>
    %792 = tpu.matmul %789, %791, %cst_333 {dimension_numbers = #tpu.dot_dimension_numbers<[1], [0], [0], [1], [0, 0, 1, 1], [], []>} : vector<16x16xf32>, vector<16x128xf32>, vector<16x128xf32> -> vector<16x128xf32>
    %793 = arith.addf %773, %792 : vector<16x128xf32>
    %794 = vector.broadcast %21 : vector<1x128xf32> to vector<16x128xf32>
    %795 = arith.mulf %745, %794 : vector<16x128xf32>
    %cst_334 = arith.constant dense<0.000000e+00> : vector<16x16xf32>
    %796 = tpu.matmul %740, %795, %cst_334 {dimension_numbers = #tpu.dot_dimension_numbers<[1], [1], [0], [0], [0, 0, 1, 0], [], []>} : vector<16x128xf32>, vector<16x128xf32>, vector<16x16xf32> -> vector<16x16xf32>
    %cst_335 = arith.constant 0.176776692 : f32
    %797 = vector.broadcast %cst_335 : f32 to vector<16x16xf32>
    %798 = arith.mulf %796, %797 : vector<16x16xf32>
    %799 = arith.addf %798, %30 : vector<16x16xf32>
    %cst_336 = arith.constant dense<0xFF800000> : vector<16xf32>
    %800 = vector.multi_reduction <maximumf>, %799, %cst_336 [1] : vector<16x16xf32> to vector<16xf32>
    %801 = vector.shape_cast %800 : vector<16xf32> to vector<16x1xf32>
    %802 = vector.broadcast %801 : vector<16x1xf32> to vector<16x16xf32>
    %803 = arith.subf %799, %802 : vector<16x16xf32>
    %804 = math.exp %803 : vector<16x16xf32>
    %cst_337 = arith.constant dense<0.000000e+00> : vector<16xf32>
    %805 = vector.multi_reduction <add>, %804, %cst_337 [1] : vector<16x16xf32> to vector<16xf32>
    %806 = vector.shape_cast %805 : vector<16xf32> to vector<16x1xf32>
    %807 = tpu.reciprocal %806 {approx = true} : vector<16x1xf32> -> vector<16x1xf32>
    %808 = vector.broadcast %807 : vector<16x1xf32> to vector<16x16xf32>
    %809 = arith.mulf %804, %808 : vector<16x16xf32>
    %810 = vector.broadcast %21 : vector<1x128xf32> to vector<16x128xf32>
    %811 = arith.mulf %750, %810 : vector<16x128xf32>
    %cst_338 = arith.constant dense<0.000000e+00> : vector<16x128xf32>
    %812 = tpu.matmul %809, %811, %cst_338 {dimension_numbers = #tpu.dot_dimension_numbers<[1], [0], [0], [1], [0, 0, 1, 1], [], []>} : vector<16x16xf32>, vector<16x128xf32>, vector<16x128xf32> -> vector<16x128xf32>
    %813 = arith.addf %793, %812 : vector<16x128xf32>
    %814 = vector.broadcast %28 : vector<1x128xf32> to vector<16x128xf32>
    %815 = arith.mulf %745, %814 : vector<16x128xf32>
    %cst_339 = arith.constant dense<0.000000e+00> : vector<16x16xf32>
    %816 = tpu.matmul %740, %815, %cst_339 {dimension_numbers = #tpu.dot_dimension_numbers<[1], [1], [0], [0], [0, 0, 1, 0], [], []>} : vector<16x128xf32>, vector<16x128xf32>, vector<16x16xf32> -> vector<16x16xf32>
    %cst_340 = arith.constant 0.176776692 : f32
    %817 = vector.broadcast %cst_340 : f32 to vector<16x16xf32>
    %818 = arith.mulf %816, %817 : vector<16x16xf32>
    %819 = arith.addf %818, %30 : vector<16x16xf32>
    %cst_341 = arith.constant dense<0xFF800000> : vector<16xf32>
    %820 = vector.multi_reduction <maximumf>, %819, %cst_341 [1] : vector<16x16xf32> to vector<16xf32>
    %821 = vector.shape_cast %820 : vector<16xf32> to vector<16x1xf32>
    %822 = vector.broadcast %821 : vector<16x1xf32> to vector<16x16xf32>
    %823 = arith.subf %819, %822 : vector<16x16xf32>
    %824 = math.exp %823 : vector<16x16xf32>
    %cst_342 = arith.constant dense<0.000000e+00> : vector<16xf32>
    %825 = vector.multi_reduction <add>, %824, %cst_342 [1] : vector<16x16xf32> to vector<16xf32>
    %826 = vector.shape_cast %825 : vector<16xf32> to vector<16x1xf32>
    %827 = tpu.reciprocal %826 {approx = true} : vector<16x1xf32> -> vector<16x1xf32>
    %828 = vector.broadcast %827 : vector<16x1xf32> to vector<16x16xf32>
    %829 = arith.mulf %824, %828 : vector<16x16xf32>
    %830 = vector.broadcast %28 : vector<1x128xf32> to vector<16x128xf32>
    %831 = arith.mulf %750, %830 : vector<16x128xf32>
    %cst_343 = arith.constant dense<0.000000e+00> : vector<16x128xf32>
    %832 = tpu.matmul %829, %831, %cst_343 {dimension_numbers = #tpu.dot_dimension_numbers<[1], [0], [0], [1], [0, 0, 1, 1], [], []>} : vector<16x16xf32>, vector<16x128xf32>, vector<16x128xf32> -> vector<16x128xf32>
    %833 = arith.addf %813, %832 : vector<16x128xf32>
    %cst_344 = arith.constant dense<0.000000e+00> : vector<16x128xf32>
    %834 = tpu.matmul %833, %724, %cst_344 {dimension_numbers = #tpu.dot_dimension_numbers<[1], [0], [0], [1], [0, 0, 1, 1], [], []>} : vector<16x128xf32>, vector<128x128xf32>, vector<16x128xf32> -> vector<16x128xf32>
    %835 = vector.broadcast %752 : vector<1x128xf32> to vector<16x128xf32>
    %836 = arith.addf %834, %835 : vector<16x128xf32>
    %837 = arith.addf %720, %836 : vector<16x128xf32>
    %c1_345 = arith.constant 1 : index
    %c4_346 = arith.constant 4 : index
    %c0_347 = arith.constant 0 : index
    %838 = vector.load %arg9[%c1_345, %c4_346, %c0_347] : memref<2x16x128xf32, #tpu.memory_space<vmem>>, vector<1x1x128xf32>
    %839 = vector.shape_cast %838 : vector<1x1x128xf32> to vector<1x128xf32>
    %c1_348 = arith.constant 1 : index
    %c5_349 = arith.constant 5 : index
    %c0_350 = arith.constant 0 : index
    %840 = vector.load %arg9[%c1_348, %c5_349, %c0_350] : memref<2x16x128xf32, #tpu.memory_space<vmem>>, vector<1x1x128xf32>
    %841 = vector.shape_cast %840 : vector<1x1x128xf32> to vector<1x128xf32>
    %cst_351 = arith.constant dense<0.000000e+00> : vector<16xf32>
    %842 = vector.multi_reduction <add>, %837, %cst_351 [1] : vector<16x128xf32> to vector<16xf32>
    %843 = vector.shape_cast %842 : vector<16xf32> to vector<16x1xf32>
    %cst_352 = arith.constant 1.280000e+02 : f32
    %844 = vector.broadcast %cst_352 : f32 to vector<16x1xf32>
    %845 = arith.divf %843, %844 : vector<16x1xf32>
    %846 = vector.broadcast %845 : vector<16x1xf32> to vector<16x128xf32>
    %847 = arith.subf %837, %846 : vector<16x128xf32>
    %848 = arith.mulf %847, %847 : vector<16x128xf32>
    %cst_353 = arith.constant dense<0.000000e+00> : vector<16xf32>
    %849 = vector.multi_reduction <add>, %848, %cst_353 [1] : vector<16x128xf32> to vector<16xf32>
    %850 = vector.shape_cast %849 : vector<16xf32> to vector<16x1xf32>
    %cst_354 = arith.constant 1.280000e+02 : f32
    %851 = vector.broadcast %cst_354 : f32 to vector<16x1xf32>
    %852 = arith.divf %850, %851 : vector<16x1xf32>
    %853 = vector.broadcast %845 : vector<16x1xf32> to vector<16x128xf32>
    %854 = arith.subf %837, %853 : vector<16x128xf32>
    %cst_355 = arith.constant 9.99999974E-6 : f32
    %855 = vector.broadcast %cst_355 : f32 to vector<16x1xf32>
    %856 = arith.addf %852, %855 : vector<16x1xf32>
    %857 = math.rsqrt %856 : vector<16x1xf32>
    %858 = vector.broadcast %857 : vector<16x1xf32> to vector<16x128xf32>
    %859 = arith.mulf %854, %858 : vector<16x128xf32>
    %860 = vector.broadcast %839 : vector<1x128xf32> to vector<16x128xf32>
    %861 = arith.mulf %859, %860 : vector<16x128xf32>
    %862 = vector.broadcast %841 : vector<1x128xf32> to vector<16x128xf32>
    %863 = arith.addf %861, %862 : vector<16x128xf32>
    %cst_356 = arith.constant dense<0.000000e+00> : vector<16x128xf32>
    %864 = tpu.matmul %863, %726, %cst_356 {dimension_numbers = #tpu.dot_dimension_numbers<[1], [0], [0], [1], [0, 0, 1, 1], [], []>} : vector<16x128xf32>, vector<128x128xf32>, vector<16x128xf32> -> vector<16x128xf32>
    %c1_357 = arith.constant 1 : index
    %c6_358 = arith.constant 6 : index
    %c0_359 = arith.constant 0 : index
    %865 = vector.load %arg9[%c1_357, %c6_358, %c0_359] : memref<2x16x128xf32, #tpu.memory_space<vmem>>, vector<1x1x128xf32>
    %866 = vector.shape_cast %865 : vector<1x1x128xf32> to vector<1x128xf32>
    %867 = vector.broadcast %866 : vector<1x128xf32> to vector<16x128xf32>
    %868 = arith.addf %864, %867 : vector<16x128xf32>
    %cst_360 = arith.constant dense<0.000000e+00> : vector<16x256xf32>
    %869 = tpu.matmul %408, %728, %cst_360 {dimension_numbers = #tpu.dot_dimension_numbers<[1], [0], [0], [1], [0, 0, 1, 1], [], []>} : vector<16x128xf32>, vector<128x256xf32>, vector<16x256xf32> -> vector<16x256xf32>
    %870 = vector.extract_strided_slice %869 {offsets = [0, 0], sizes = [16, 128], strides = [1, 1]} : vector<16x256xf32> to vector<16x128xf32>
    %c1_361 = arith.constant 1 : index
    %c7_362 = arith.constant 7 : index
    %c0_363 = arith.constant 0 : index
    %871 = vector.load %arg9[%c1_361, %c7_362, %c0_363] : memref<2x16x128xf32, #tpu.memory_space<vmem>>, vector<1x1x128xf32>
    %872 = vector.shape_cast %871 : vector<1x1x128xf32> to vector<1x128xf32>
    %873 = vector.broadcast %872 : vector<1x128xf32> to vector<16x128xf32>
    %874 = arith.addf %870, %873 : vector<16x128xf32>
    %875 = vector.extract_strided_slice %869 {offsets = [0, 128], sizes = [16, 128], strides = [1, 1]} : vector<16x256xf32> to vector<16x128xf32>
    %c1_364 = arith.constant 1 : index
    %c8_365 = arith.constant 8 : index
    %c0_366 = arith.constant 0 : index
    %876 = vector.load %arg9[%c1_364, %c8_365, %c0_366] : memref<2x16x128xf32, #tpu.memory_space<vmem>>, vector<1x1x128xf32>
    %877 = vector.shape_cast %876 : vector<1x1x128xf32> to vector<1x128xf32>
    %878 = vector.broadcast %877 : vector<1x128xf32> to vector<16x128xf32>
    %879 = arith.addf %875, %878 : vector<16x128xf32>
    %c1_367 = arith.constant 1 : index
    %c9_368 = arith.constant 9 : index
    %c0_369 = arith.constant 0 : index
    %880 = vector.load %arg9[%c1_367, %c9_368, %c0_369] : memref<2x16x128xf32, #tpu.memory_space<vmem>>, vector<1x1x128xf32>
    %881 = vector.shape_cast %880 : vector<1x1x128xf32> to vector<1x128xf32>
    %cst_370 = arith.constant 0.000000e+00 : f32
    %882 = vector.broadcast %cst_370 : f32 to vector<16x128xf32>
    %883 = vector.broadcast %7 : vector<1x128xf32> to vector<16x128xf32>
    %884 = arith.mulf %874, %883 : vector<16x128xf32>
    %cst_371 = arith.constant dense<0.000000e+00> : vector<16x16xf32>
    %885 = tpu.matmul %868, %884, %cst_371 {dimension_numbers = #tpu.dot_dimension_numbers<[1], [1], [0], [0], [0, 0, 1, 0], [], []>} : vector<16x128xf32>, vector<16x128xf32>, vector<16x16xf32> -> vector<16x16xf32>
    %cst_372 = arith.constant 0.176776692 : f32
    %886 = vector.broadcast %cst_372 : f32 to vector<16x16xf32>
    %887 = arith.mulf %885, %886 : vector<16x16xf32>
    %888 = arith.addf %887, %31 : vector<16x16xf32>
    %cst_373 = arith.constant dense<0xFF800000> : vector<16xf32>
    %889 = vector.multi_reduction <maximumf>, %888, %cst_373 [1] : vector<16x16xf32> to vector<16xf32>
    %890 = vector.shape_cast %889 : vector<16xf32> to vector<16x1xf32>
    %891 = vector.broadcast %890 : vector<16x1xf32> to vector<16x16xf32>
    %892 = arith.subf %888, %891 : vector<16x16xf32>
    %893 = math.exp %892 : vector<16x16xf32>
    %cst_374 = arith.constant dense<0.000000e+00> : vector<16xf32>
    %894 = vector.multi_reduction <add>, %893, %cst_374 [1] : vector<16x16xf32> to vector<16xf32>
    %895 = vector.shape_cast %894 : vector<16xf32> to vector<16x1xf32>
    %896 = tpu.reciprocal %895 {approx = true} : vector<16x1xf32> -> vector<16x1xf32>
    %897 = vector.broadcast %896 : vector<16x1xf32> to vector<16x16xf32>
    %898 = arith.mulf %893, %897 : vector<16x16xf32>
    %899 = vector.broadcast %7 : vector<1x128xf32> to vector<16x128xf32>
    %900 = arith.mulf %879, %899 : vector<16x128xf32>
    %cst_375 = arith.constant dense<0.000000e+00> : vector<16x128xf32>
    %901 = tpu.matmul %898, %900, %cst_375 {dimension_numbers = #tpu.dot_dimension_numbers<[1], [0], [0], [1], [0, 0, 1, 1], [], []>} : vector<16x16xf32>, vector<16x128xf32>, vector<16x128xf32> -> vector<16x128xf32>
    %902 = arith.addf %882, %901 : vector<16x128xf32>
    %903 = vector.broadcast %14 : vector<1x128xf32> to vector<16x128xf32>
    %904 = arith.mulf %874, %903 : vector<16x128xf32>
    %cst_376 = arith.constant dense<0.000000e+00> : vector<16x16xf32>
    %905 = tpu.matmul %868, %904, %cst_376 {dimension_numbers = #tpu.dot_dimension_numbers<[1], [1], [0], [0], [0, 0, 1, 0], [], []>} : vector<16x128xf32>, vector<16x128xf32>, vector<16x16xf32> -> vector<16x16xf32>
    %cst_377 = arith.constant 0.176776692 : f32
    %906 = vector.broadcast %cst_377 : f32 to vector<16x16xf32>
    %907 = arith.mulf %905, %906 : vector<16x16xf32>
    %908 = arith.addf %907, %31 : vector<16x16xf32>
    %cst_378 = arith.constant dense<0xFF800000> : vector<16xf32>
    %909 = vector.multi_reduction <maximumf>, %908, %cst_378 [1] : vector<16x16xf32> to vector<16xf32>
    %910 = vector.shape_cast %909 : vector<16xf32> to vector<16x1xf32>
    %911 = vector.broadcast %910 : vector<16x1xf32> to vector<16x16xf32>
    %912 = arith.subf %908, %911 : vector<16x16xf32>
    %913 = math.exp %912 : vector<16x16xf32>
    %cst_379 = arith.constant dense<0.000000e+00> : vector<16xf32>
    %914 = vector.multi_reduction <add>, %913, %cst_379 [1] : vector<16x16xf32> to vector<16xf32>
    %915 = vector.shape_cast %914 : vector<16xf32> to vector<16x1xf32>
    %916 = tpu.reciprocal %915 {approx = true} : vector<16x1xf32> -> vector<16x1xf32>
    %917 = vector.broadcast %916 : vector<16x1xf32> to vector<16x16xf32>
    %918 = arith.mulf %913, %917 : vector<16x16xf32>
    %919 = vector.broadcast %14 : vector<1x128xf32> to vector<16x128xf32>
    %920 = arith.mulf %879, %919 : vector<16x128xf32>
    %cst_380 = arith.constant dense<0.000000e+00> : vector<16x128xf32>
    %921 = tpu.matmul %918, %920, %cst_380 {dimension_numbers = #tpu.dot_dimension_numbers<[1], [0], [0], [1], [0, 0, 1, 1], [], []>} : vector<16x16xf32>, vector<16x128xf32>, vector<16x128xf32> -> vector<16x128xf32>
    %922 = arith.addf %902, %921 : vector<16x128xf32>
    %923 = vector.broadcast %21 : vector<1x128xf32> to vector<16x128xf32>
    %924 = arith.mulf %874, %923 : vector<16x128xf32>
    %cst_381 = arith.constant dense<0.000000e+00> : vector<16x16xf32>
    %925 = tpu.matmul %868, %924, %cst_381 {dimension_numbers = #tpu.dot_dimension_numbers<[1], [1], [0], [0], [0, 0, 1, 0], [], []>} : vector<16x128xf32>, vector<16x128xf32>, vector<16x16xf32> -> vector<16x16xf32>
    %cst_382 = arith.constant 0.176776692 : f32
    %926 = vector.broadcast %cst_382 : f32 to vector<16x16xf32>
    %927 = arith.mulf %925, %926 : vector<16x16xf32>
    %928 = arith.addf %927, %31 : vector<16x16xf32>
    %cst_383 = arith.constant dense<0xFF800000> : vector<16xf32>
    %929 = vector.multi_reduction <maximumf>, %928, %cst_383 [1] : vector<16x16xf32> to vector<16xf32>
    %930 = vector.shape_cast %929 : vector<16xf32> to vector<16x1xf32>
    %931 = vector.broadcast %930 : vector<16x1xf32> to vector<16x16xf32>
    %932 = arith.subf %928, %931 : vector<16x16xf32>
    %933 = math.exp %932 : vector<16x16xf32>
    %cst_384 = arith.constant dense<0.000000e+00> : vector<16xf32>
    %934 = vector.multi_reduction <add>, %933, %cst_384 [1] : vector<16x16xf32> to vector<16xf32>
    %935 = vector.shape_cast %934 : vector<16xf32> to vector<16x1xf32>
    %936 = tpu.reciprocal %935 {approx = true} : vector<16x1xf32> -> vector<16x1xf32>
    %937 = vector.broadcast %936 : vector<16x1xf32> to vector<16x16xf32>
    %938 = arith.mulf %933, %937 : vector<16x16xf32>
    %939 = vector.broadcast %21 : vector<1x128xf32> to vector<16x128xf32>
    %940 = arith.mulf %879, %939 : vector<16x128xf32>
    %cst_385 = arith.constant dense<0.000000e+00> : vector<16x128xf32>
    %941 = tpu.matmul %938, %940, %cst_385 {dimension_numbers = #tpu.dot_dimension_numbers<[1], [0], [0], [1], [0, 0, 1, 1], [], []>} : vector<16x16xf32>, vector<16x128xf32>, vector<16x128xf32> -> vector<16x128xf32>
    %942 = arith.addf %922, %941 : vector<16x128xf32>
    %943 = vector.broadcast %28 : vector<1x128xf32> to vector<16x128xf32>
    %944 = arith.mulf %874, %943 : vector<16x128xf32>
    %cst_386 = arith.constant dense<0.000000e+00> : vector<16x16xf32>
    %945 = tpu.matmul %868, %944, %cst_386 {dimension_numbers = #tpu.dot_dimension_numbers<[1], [1], [0], [0], [0, 0, 1, 0], [], []>} : vector<16x128xf32>, vector<16x128xf32>, vector<16x16xf32> -> vector<16x16xf32>
    %cst_387 = arith.constant 0.176776692 : f32
    %946 = vector.broadcast %cst_387 : f32 to vector<16x16xf32>
    %947 = arith.mulf %945, %946 : vector<16x16xf32>
    %948 = arith.addf %947, %31 : vector<16x16xf32>
    %cst_388 = arith.constant dense<0xFF800000> : vector<16xf32>
    %949 = vector.multi_reduction <maximumf>, %948, %cst_388 [1] : vector<16x16xf32> to vector<16xf32>
    %950 = vector.shape_cast %949 : vector<16xf32> to vector<16x1xf32>
    %951 = vector.broadcast %950 : vector<16x1xf32> to vector<16x16xf32>
    %952 = arith.subf %948, %951 : vector<16x16xf32>
    %953 = math.exp %952 : vector<16x16xf32>
    %cst_389 = arith.constant dense<0.000000e+00> : vector<16xf32>
    %954 = vector.multi_reduction <add>, %953, %cst_389 [1] : vector<16x16xf32> to vector<16xf32>
    %955 = vector.shape_cast %954 : vector<16xf32> to vector<16x1xf32>
    %956 = tpu.reciprocal %955 {approx = true} : vector<16x1xf32> -> vector<16x1xf32>
    %957 = vector.broadcast %956 : vector<16x1xf32> to vector<16x16xf32>
    %958 = arith.mulf %953, %957 : vector<16x16xf32>
    %959 = vector.broadcast %28 : vector<1x128xf32> to vector<16x128xf32>
    %960 = arith.mulf %879, %959 : vector<16x128xf32>
    %cst_390 = arith.constant dense<0.000000e+00> : vector<16x128xf32>
    %961 = tpu.matmul %958, %960, %cst_390 {dimension_numbers = #tpu.dot_dimension_numbers<[1], [0], [0], [1], [0, 0, 1, 1], [], []>} : vector<16x16xf32>, vector<16x128xf32>, vector<16x128xf32> -> vector<16x128xf32>
    %962 = arith.addf %942, %961 : vector<16x128xf32>
    %cst_391 = arith.constant dense<0.000000e+00> : vector<16x128xf32>
    %963 = tpu.matmul %962, %730, %cst_391 {dimension_numbers = #tpu.dot_dimension_numbers<[1], [0], [0], [1], [0, 0, 1, 1], [], []>} : vector<16x128xf32>, vector<128x128xf32>, vector<16x128xf32> -> vector<16x128xf32>
    %964 = vector.broadcast %881 : vector<1x128xf32> to vector<16x128xf32>
    %965 = arith.addf %963, %964 : vector<16x128xf32>
    %966 = arith.addf %863, %965 : vector<16x128xf32>
    %c1_392 = arith.constant 1 : index
    %c10_393 = arith.constant 10 : index
    %c0_394 = arith.constant 0 : index
    %967 = vector.load %arg9[%c1_392, %c10_393, %c0_394] : memref<2x16x128xf32, #tpu.memory_space<vmem>>, vector<1x1x128xf32>
    %968 = vector.shape_cast %967 : vector<1x1x128xf32> to vector<1x128xf32>
    %c1_395 = arith.constant 1 : index
    %c11_396 = arith.constant 11 : index
    %c0_397 = arith.constant 0 : index
    %969 = vector.load %arg9[%c1_395, %c11_396, %c0_397] : memref<2x16x128xf32, #tpu.memory_space<vmem>>, vector<1x1x128xf32>
    %970 = vector.shape_cast %969 : vector<1x1x128xf32> to vector<1x128xf32>
    %cst_398 = arith.constant dense<0.000000e+00> : vector<16xf32>
    %971 = vector.multi_reduction <add>, %966, %cst_398 [1] : vector<16x128xf32> to vector<16xf32>
    %972 = vector.shape_cast %971 : vector<16xf32> to vector<16x1xf32>
    %cst_399 = arith.constant 1.280000e+02 : f32
    %973 = vector.broadcast %cst_399 : f32 to vector<16x1xf32>
    %974 = arith.divf %972, %973 : vector<16x1xf32>
    %975 = vector.broadcast %974 : vector<16x1xf32> to vector<16x128xf32>
    %976 = arith.subf %966, %975 : vector<16x128xf32>
    %977 = arith.mulf %976, %976 : vector<16x128xf32>
    %cst_400 = arith.constant dense<0.000000e+00> : vector<16xf32>
    %978 = vector.multi_reduction <add>, %977, %cst_400 [1] : vector<16x128xf32> to vector<16xf32>
    %979 = vector.shape_cast %978 : vector<16xf32> to vector<16x1xf32>
    %cst_401 = arith.constant 1.280000e+02 : f32
    %980 = vector.broadcast %cst_401 : f32 to vector<16x1xf32>
    %981 = arith.divf %979, %980 : vector<16x1xf32>
    %982 = vector.broadcast %974 : vector<16x1xf32> to vector<16x128xf32>
    %983 = arith.subf %966, %982 : vector<16x128xf32>
    %cst_402 = arith.constant 9.99999974E-6 : f32
    %984 = vector.broadcast %cst_402 : f32 to vector<16x1xf32>
    %985 = arith.addf %981, %984 : vector<16x1xf32>
    %986 = math.rsqrt %985 : vector<16x1xf32>
    %987 = vector.broadcast %986 : vector<16x1xf32> to vector<16x128xf32>
    %988 = arith.mulf %983, %987 : vector<16x128xf32>
    %989 = vector.broadcast %968 : vector<1x128xf32> to vector<16x128xf32>
    %990 = arith.mulf %988, %989 : vector<16x128xf32>
    %991 = vector.broadcast %970 : vector<1x128xf32> to vector<16x128xf32>
    %992 = arith.addf %990, %991 : vector<16x128xf32>
    %c1_403 = arith.constant 1 : index
    %c12_404 = arith.constant 12 : index
    %c0_405 = arith.constant 0 : index
    %993 = vector.load %arg9[%c1_403, %c12_404, %c0_405] : memref<2x16x128xf32, #tpu.memory_space<vmem>>, vector<1x1x128xf32>
    %994 = vector.shape_cast %993 : vector<1x1x128xf32> to vector<1x128xf32>
    %c1_406 = arith.constant 1 : index
    %c13_407 = arith.constant 13 : index
    %c0_408 = arith.constant 0 : index
    %995 = vector.load %arg9[%c1_406, %c13_407, %c0_408] : memref<2x16x128xf32, #tpu.memory_space<vmem>>, vector<1x1x128xf32>
    %996 = vector.shape_cast %995 : vector<1x1x128xf32> to vector<1x128xf32>
    %cst_409 = arith.constant dense<0.000000e+00> : vector<16x128xf32>
    %997 = tpu.matmul %992, %732, %cst_409 {dimension_numbers = #tpu.dot_dimension_numbers<[1], [0], [0], [1], [0, 0, 1, 1], [], []>} : vector<16x128xf32>, vector<128x128xf32>, vector<16x128xf32> -> vector<16x128xf32>
    %998 = vector.broadcast %994 : vector<1x128xf32> to vector<16x128xf32>
    %999 = arith.addf %997, %998 : vector<16x128xf32>
    %cst_410 = arith.constant 0.000000e+00 : f32
    %1000 = vector.broadcast %cst_410 : f32 to vector<16x128xf32>
    %1001 = arith.maximumf %999, %1000 : vector<16x128xf32>
    %cst_411 = arith.constant dense<0.000000e+00> : vector<16x128xf32>
    %1002 = tpu.matmul %1001, %734, %cst_411 {dimension_numbers = #tpu.dot_dimension_numbers<[1], [0], [0], [1], [0, 0, 1, 1], [], []>} : vector<16x128xf32>, vector<128x128xf32>, vector<16x128xf32> -> vector<16x128xf32>
    %1003 = vector.broadcast %996 : vector<1x128xf32> to vector<16x128xf32>
    %1004 = arith.addf %1002, %1003 : vector<16x128xf32>
    %1005 = arith.addf %992, %1004 : vector<16x128xf32>
    %c1_412 = arith.constant 1 : index
    %c14_413 = arith.constant 14 : index
    %c0_414 = arith.constant 0 : index
    %1006 = vector.load %arg9[%c1_412, %c14_413, %c0_414] : memref<2x16x128xf32, #tpu.memory_space<vmem>>, vector<1x1x128xf32>
    %1007 = vector.shape_cast %1006 : vector<1x1x128xf32> to vector<1x128xf32>
    %c1_415 = arith.constant 1 : index
    %c15_416 = arith.constant 15 : index
    %c0_417 = arith.constant 0 : index
    %1008 = vector.load %arg9[%c1_415, %c15_416, %c0_417] : memref<2x16x128xf32, #tpu.memory_space<vmem>>, vector<1x1x128xf32>
    %1009 = vector.shape_cast %1008 : vector<1x1x128xf32> to vector<1x128xf32>
    %cst_418 = arith.constant dense<0.000000e+00> : vector<16xf32>
    %1010 = vector.multi_reduction <add>, %1005, %cst_418 [1] : vector<16x128xf32> to vector<16xf32>
    %1011 = vector.shape_cast %1010 : vector<16xf32> to vector<16x1xf32>
    %cst_419 = arith.constant 1.280000e+02 : f32
    %1012 = vector.broadcast %cst_419 : f32 to vector<16x1xf32>
    %1013 = arith.divf %1011, %1012 : vector<16x1xf32>
    %1014 = vector.broadcast %1013 : vector<16x1xf32> to vector<16x128xf32>
    %1015 = arith.subf %1005, %1014 : vector<16x128xf32>
    %1016 = arith.mulf %1015, %1015 : vector<16x128xf32>
    %cst_420 = arith.constant dense<0.000000e+00> : vector<16xf32>
    %1017 = vector.multi_reduction <add>, %1016, %cst_420 [1] : vector<16x128xf32> to vector<16xf32>
    %1018 = vector.shape_cast %1017 : vector<16xf32> to vector<16x1xf32>
    %cst_421 = arith.constant 1.280000e+02 : f32
    %1019 = vector.broadcast %cst_421 : f32 to vector<16x1xf32>
    %1020 = arith.divf %1018, %1019 : vector<16x1xf32>
    %1021 = vector.broadcast %1013 : vector<16x1xf32> to vector<16x128xf32>
    %1022 = arith.subf %1005, %1021 : vector<16x128xf32>
    %cst_422 = arith.constant 9.99999974E-6 : f32
    %1023 = vector.broadcast %cst_422 : f32 to vector<16x1xf32>
    %1024 = arith.addf %1020, %1023 : vector<16x1xf32>
    %1025 = math.rsqrt %1024 : vector<16x1xf32>
    %1026 = vector.broadcast %1025 : vector<16x1xf32> to vector<16x128xf32>
    %1027 = arith.mulf %1022, %1026 : vector<16x128xf32>
    %1028 = vector.broadcast %1007 : vector<1x128xf32> to vector<16x128xf32>
    %1029 = arith.mulf %1027, %1028 : vector<16x128xf32>
    %1030 = vector.broadcast %1009 : vector<1x128xf32> to vector<16x128xf32>
    %1031 = arith.addf %1029, %1030 : vector<16x128xf32>
    %c2_423 = arith.constant 2 : index
    %c0_424 = arith.constant 0 : index
    %1032 = vector.load %arg10[%c2_423, %c0_424] : memref<5x128xf32, #tpu.memory_space<vmem>>, vector<1x128xf32>
    %c3_425 = arith.constant 3 : index
    %c0_426 = arith.constant 0 : index
    %1033 = vector.load %arg10[%c3_425, %c0_426] : memref<5x128xf32, #tpu.memory_space<vmem>>, vector<1x128xf32>
    %cst_427 = arith.constant dense<0.000000e+00> : vector<16xf32>
    %1034 = vector.multi_reduction <add>, %1031, %cst_427 [1] : vector<16x128xf32> to vector<16xf32>
    %1035 = vector.shape_cast %1034 : vector<16xf32> to vector<16x1xf32>
    %cst_428 = arith.constant 1.280000e+02 : f32
    %1036 = vector.broadcast %cst_428 : f32 to vector<16x1xf32>
    %1037 = arith.divf %1035, %1036 : vector<16x1xf32>
    %1038 = vector.broadcast %1037 : vector<16x1xf32> to vector<16x128xf32>
    %1039 = arith.subf %1031, %1038 : vector<16x128xf32>
    %1040 = arith.mulf %1039, %1039 : vector<16x128xf32>
    %cst_429 = arith.constant dense<0.000000e+00> : vector<16xf32>
    %1041 = vector.multi_reduction <add>, %1040, %cst_429 [1] : vector<16x128xf32> to vector<16xf32>
    %1042 = vector.shape_cast %1041 : vector<16xf32> to vector<16x1xf32>
    %cst_430 = arith.constant 1.280000e+02 : f32
    %1043 = vector.broadcast %cst_430 : f32 to vector<16x1xf32>
    %1044 = arith.divf %1042, %1043 : vector<16x1xf32>
    %1045 = vector.broadcast %1037 : vector<16x1xf32> to vector<16x128xf32>
    %1046 = arith.subf %1031, %1045 : vector<16x128xf32>
    %cst_431 = arith.constant 9.99999974E-6 : f32
    %1047 = vector.broadcast %cst_431 : f32 to vector<16x1xf32>
    %1048 = arith.addf %1044, %1047 : vector<16x1xf32>
    %1049 = math.rsqrt %1048 : vector<16x1xf32>
    %1050 = vector.broadcast %1049 : vector<16x1xf32> to vector<16x128xf32>
    %1051 = arith.mulf %1046, %1050 : vector<16x128xf32>
    %1052 = vector.broadcast %1032 : vector<1x128xf32> to vector<16x128xf32>
    %1053 = arith.mulf %1051, %1052 : vector<16x128xf32>
    %1054 = vector.broadcast %1033 : vector<1x128xf32> to vector<16x128xf32>
    %1055 = arith.addf %1053, %1054 : vector<16x128xf32>
    %c0_432 = arith.constant 0 : index
    %c0_433 = arith.constant 0 : index
    %1056 = vector.load %arg11[%c0_432, %c0_433] : memref<128x128xf32, #tpu.memory_space<vmem>>, vector<128x128xf32>
    %cst_434 = arith.constant dense<0.000000e+00> : vector<16x128xf32>
    %1057 = tpu.matmul %1055, %1056, %cst_434 {dimension_numbers = #tpu.dot_dimension_numbers<[1], [0], [0], [1], [0, 0, 1, 1], [], []>} : vector<16x128xf32>, vector<128x128xf32>, vector<16x128xf32> -> vector<16x128xf32>
    %c4_435 = arith.constant 4 : index
    %c0_436 = arith.constant 0 : index
    %1058 = vector.load %arg10[%c4_435, %c0_436] : memref<5x128xf32, #tpu.memory_space<vmem>>, vector<1x128xf32>
    %1059 = vector.broadcast %1058 : vector<1x128xf32> to vector<16x128xf32>
    %1060 = arith.addf %1057, %1059 : vector<16x128xf32>
    %c0_437 = arith.constant 0 : index
    %c0_438 = arith.constant 0 : index
    %1061 = vector.load %arg12[%c0_437, %c0_438] : memref<16x128xf32, #tpu.memory_space<vmem>>, vector<16x128xf32>
    tpu.vector_store %arg12[%c0_437, %c0_438], %1060 {strides = array<i32>} : memref<16x128xf32, #tpu.memory_space<vmem>>, vector<16x128xf32>,
    return
  }
  func.func @transform_0(%arg0: i32) -> (i32, i32) {
    %c0_i32 = arith.constant 0 : i32
    %c0_i32_0 = arith.constant 0 : i32
    %c0_i32_1 = arith.constant 0 : i32
    return %c0_i32, %c0_i32_0 : i32, i32
  }
  func.func @transform_1(%arg0: i32) -> (i32, i32) {
    %c0_i32 = arith.constant 0 : i32
    %c0_i32_0 = arith.constant 0 : i32
    %c0_i32_1 = arith.constant 0 : i32
    return %c0_i32, %c0_i32_0 : i32, i32
  }
  func.func @transform_2(%arg0: i32) -> (i32, i32) {
    %c0_i32 = arith.constant 0 : i32
    %c0_i32_0 = arith.constant 0 : i32
    %c0_i32_1 = arith.constant 0 : i32
    return %c0_i32, %c0_i32_0 : i32, i32
  }
  func.func @transform_3(%arg0: i32) -> (i32, i32) {
    %c0_i32 = arith.constant 0 : i32
    %c0_i32_0 = arith.constant 0 : i32
    %c0_i32_1 = arith.constant 0 : i32
    return %c0_i32, %c0_i32_0 : i32, i32
  }
  func.func @transform_4(%arg0: i32) -> (i32, i32) {
    %c0_i32 = arith.constant 0 : i32
    %c0_i32_0 = arith.constant 0 : i32
    %c0_i32_1 = arith.constant 0 : i32
    return %c0_i32, %c0_i32_0 : i32, i32
  }
  func.func @transform_5(%arg0: i32) -> (i32, i32, i32) {
    %c0_i32 = arith.constant 0 : i32
    %c0_i32_0 = arith.constant 0 : i32
    %c0_i32_1 = arith.constant 0 : i32
    %c0_i32_2 = arith.constant 0 : i32
    return %c0_i32, %c0_i32_0, %c0_i32_1 : i32, i32, i32
  }
  func.func @transform_6(%arg0: i32) -> (i32, i32, i32) {
    %c0_i32 = arith.constant 0 : i32
    %c0_i32_0 = arith.constant 0 : i32
    %c0_i32_1 = arith.constant 0 : i32
    %c0_i32_2 = arith.constant 0 : i32
    return %c0_i32, %c0_i32_0, %c0_i32_1 : i32, i32, i32
  }
  func.func @transform_7(%arg0: i32) -> (i32, i32, i32) {
    %c0_i32 = arith.constant 0 : i32
    %c0_i32_0 = arith.constant 0 : i32
    %c0_i32_1 = arith.constant 0 : i32
    %c0_i32_2 = arith.constant 0 : i32
    return %c0_i32, %c0_i32_0, %c0_i32_1 : i32, i32, i32
  }
  func.func @transform_8(%arg0: i32) -> (i32, i32, i32) {
    %c0_i32 = arith.constant 0 : i32
    %c0_i32_0 = arith.constant 0 : i32
    %c0_i32_1 = arith.constant 0 : i32
    %c0_i32_2 = arith.constant 0 : i32
    return %c0_i32, %c0_i32_0, %c0_i32_1 : i32, i32, i32
  }
  func.func @transform_9(%arg0: i32) -> (i32, i32) {
    %c0_i32 = arith.constant 0 : i32
    %c0_i32_0 = arith.constant 0 : i32
    %c0_i32_1 = arith.constant 0 : i32
    return %c0_i32, %c0_i32_0 : i32, i32
  }
  func.func @transform_10(%arg0: i32) -> (i32, i32) {
    %c0_i32 = arith.constant 0 : i32
    %c0_i32_0 = arith.constant 0 : i32
    %c0_i32_1 = arith.constant 0 : i32
    return %c0_i32, %c0_i32_0 : i32, i32
  }
  func.func @transform_11(%arg0: i32) -> (i32, i32) {
    %c0_i32 = arith.constant 0 : i32
    %c0_i32_0 = arith.constant 0 : i32
    %c0_i32_1 = arith.constant 0 : i32
    return %c0_i32, %c0_i32_0 : i32, i32
  }
}

</mosaic_0001>

<bundles_post_ra>
// kernel: forward.1
= control target key start
LH: loop header
LB: loop body
LE: loop exit
PB: predicated region body
PF: predicated region fallthrough
CT: control target
= control target key end

     0   :  { %16 = vsyncpa [#allocation3], 0  ;;  %s12043_s0 = inlined_call_operand.vmem [shape: f32[16,128], index: 0, kind: input, shape index: {}]   ;;  %s12044_s1 = inlined_call_operand.vmem [shape: f32[16,128], index: 1, kind: input, shape index: {}]   ;;  %s12045_s2 = inlined_call_operand.vmem [shape: f32[16,16], index: 2, kind: input, shape index: {}]   ;;  %s12046_s3 = inlined_call_operand.vmem [shape: f32[16,16], index: 3, kind: input, shape index: {}]   ;;  %s12047_s4 = inlined_call_operand.vmem [shape: f32[16,16], index: 4, kind: input, shape index: {}]   ;;  %s12048_s5 = inlined_call_operand.hbm [shape: f32[2,128,768], index: 5, kind: input, shape index: {}]   ;;  %s12049_s6 = inlined_call_operand.vmem [shape: f32[2,10,128], index: 6, kind: input, shape index: {}]   ;;  %s12050_s7 = inlined_call_operand.hbm [shape: f32[2,128,1280], index: 7, kind: input, shape index: {}]   ;;  %s12051_s8 = inlined_call_operand.hbm [shape: f32[2,16,128], index: 8, kind: input, shape index: {}]   ;;  %s12052_s9 = inlined_call_operand.hbm [shape: f32[5,128], index: 9, kind: input, shape index: {}]   ;;  %s12053_s10 = inlined_call_operand.hbm [shape: f32[128,128], index: 10, kind: input, shape index: {}]   ;;  %s12054_s11 = inlined_call_operand.vmem [shape: f32[16,128], index: 11, kind: output, shape index: {}]  }
   0x1   :  { %17 = vsyncpa [#allocation5], 0 }
   0x2   :  { %18 = vsyncpa [#allocation8], 0  ;;  %s11087_s17 = smov [#allocation4]   ;;  %s10971_s21 = scalar_lea.hbm %s12050_s7, 40960 }
   0x3   :  { %s48_s18 = sshll.u32 %s11087_s17, 4  ;;  %p10972_p0 = scmp.ne.s32.totalorder %s12050_s7, %s10971_s21  ;;  %s49_s18 = int_to_ptr.vmem [resolvable:$true] %s48_s18 }
   0x4   :  { %p10975_p1 = scmp.lt.u32.totalorder %s10971_s21, %s12050_s7 }
   0x6   :  { %p10977_p2 = pnand %p10975_p1, %p10972_p0 }
   0x8   :  { %10980 = shalt.err (!%p10977_p2)
}
   0x9   :  { %s10981_s26 = scalar_lea.vmem %s49_s18, 40960  ;;  %p10986_p4 = scmp.lt.s32.totalorder %s49_s18, %s49_s18 }
   0xa   :  { %p10982_p3 = scmp.ne.s32.totalorder %s49_s18, %s10981_s26  ;;  %p10987_p5 = scmp.lt.s32.totalorder %s10981_s26, %s10981_s26 }
   0xc   :  { %p10988_p6 = por %p10987_p5, %p10986_p4 }
   0xe   :  { %p10989_p7 = pnand %p10988_p6, %p10982_p3 }
  0x10   :  { %10992 = shalt.err (!%p10989_p7)
}
  0x11   :  { %s11088_s27 = smov 1280   ;;  %s11089_s28 = smov 80  }
  0x12   :  { %54 = dma.hbm_to_vmem [thread:$0]  %s12050_s7, 40960, %s49_s18, [#allocation5], %s11088_s27, %s11088_s27, %s11089_s28  }
  0x13   :  { %s11090_s12 = smov [#allocation7]   ;;  %s11091_s14 = smov [#allocation2]  }
  0x14   :  { %s73_s13 = sshll.u32 %s11090_s12, 4  ;;  %s34_s15 = sshll.u32 %s11091_s14, 4  ;;  %s74_s13 = int_to_ptr.vmem [resolvable:$true] %s73_s13  ;;  %s35_s15 = int_to_ptr.vmem [resolvable:$true] %s34_s15 }
  0x15   :  { %s10993_s19 = scalar_lea.hbm %s12052_s9, 128 }
  0x16   :  { %p10994_p8 = scmp.ne.s32.totalorder %s12052_s9, %s10993_s19  ;;  %p10997_p9 = scmp.lt.u32.totalorder %s10993_s19, %s12052_s9 }
  0x18   :  { %p10999_p10 = pnand %p10997_p9, %p10994_p8 }
  0x1a   :  { %11002 = shalt.err (!%p10999_p10)
}
  0x1b   :  { %s11003_s7 = scalar_lea.vmem %s74_s13, 128  ;;  %p11008_p12 = scmp.lt.s32.totalorder %s74_s13, %s74_s13 }
  0x1c   :  { %p11004_p11 = scmp.ne.s32.totalorder %s74_s13, %s11003_s7  ;;  %p11009_p13 = scmp.lt.s32.totalorder %s11003_s7, %s11003_s7 }
  0x1e   :  { %p11010_p0 = por %p11009_p13, %p11008_p12 }
  0x20   :  { %p11011_p1 = pnand %p11010_p0, %p11004_p11 }
  0x22   :  { %11014 = shalt.err (!%p11011_p1)
}
  0x23   :  { %76 = dma.hbm_to_vmem [thread:$0]  %s12052_s9, 128, %s74_s13, [#allocation8]  }
  0x24   :  { %s11015_s27 = scalar_lea.hbm %s12048_s5, 24576 }
  0x25   :  { %p11016_p2 = scmp.ne.s32.totalorder %s12048_s5, %s11015_s27  ;;  %p11019_p3 = scmp.lt.u32.totalorder %s11015_s27, %s12048_s5 }
  0x27   :  { %p11021_p4 = pnand %p11019_p3, %p11016_p2 }
  0x29   :  { %11024 = shalt.err (!%p11021_p4)
}
  0x2a   :  { %s11025_s14 = scalar_lea.vmem %s35_s15, 24576  ;;  %p11030_p6 = scmp.lt.s32.totalorder %s35_s15, %s35_s15 }
  0x2b   :  { %p11026_p5 = scmp.ne.s32.totalorder %s35_s15, %s11025_s14  ;;  %p11031_p7 = scmp.lt.s32.totalorder %s11025_s14, %s11025_s14 }
  0x2d   :  { %p11032_p8 = por %p11031_p7, %p11030_p6 }
  0x2f   :  { %p11033_p9 = pnand %p11032_p8, %p11026_p5 }
  0x31   :  { %11036 = shalt.err (!%p11033_p9)
}
  0x32   :  { %s11092_s9 = smov 768   ;;  %s11093_s13 = smov 48  }
  0x33   :  { %40 = dma.hbm_to_vmem [thread:$0]  %s12048_s5, 24576, %s35_s15, [#allocation3], %s11092_s9, %s11092_s9, %s11093_s13  }
  0x34   :  { %s11094_s19 = smov [#allocation6]   ;;  %s11037_s23 = scalar_lea.hbm %s12051_s8, 512 }
  0x35   :  { %s60_s20 = sshll.u32 %s11094_s19, 4  ;;  %p11038_p10 = scmp.ne.s32.totalorder %s12051_s8, %s11037_s23  ;;  %s61_s20 = int_to_ptr.vmem [resolvable:$true] %s60_s20 }
  0x36   :  { %p11041_p11 = scmp.lt.u32.totalorder %s11037_s23, %s12051_s8 }
  0x38   :  { %p11043_p12 = pnand %p11041_p11, %p11038_p10 }
  0x3a   :  { %11046 = shalt.err (!%p11043_p12)
}
  0x3b   :  { %s11047_s26 = scalar_lea.vmem %s61_s20, 512  ;;  %p11052_p0 = scmp.lt.s32.totalorder %s61_s20, %s61_s20 }
  0x3c   :  { %p11048_p13 = scmp.ne.s32.totalorder %s61_s20, %s11047_s26  ;;  %p11053_p1 = scmp.lt.s32.totalorder %s11047_s26, %s11047_s26 }
  0x3e   :  { %p11054_p2 = por %p11053_p1, %p11052_p0 }
  0x40   :  { %p11055_p3 = pnand %p11054_p2, %p11048_p13 }
  0x42   :  { %11058 = shalt.err (!%p11055_p3)
}
  0x43   :  { %s11095_s5 = smov 128   ;;  %s11096_s15 = smov 8  }
  0x44   :  { %66 = dma.hbm_to_vmem [thread:$0]  %s12051_s8, 512, %s61_s20, [#allocation5], %s11095_s5, %s11095_s5, %s11096_s15  }
  0x45   :  { %s11097_s29 = smov [#allocation9]   ;;  %s11059_s9 = scalar_lea.hbm %s12053_s10, 2048 }
  0x46   :  { %s82_s30 = sshll.u32 %s11097_s29, 4  ;;  %p11060_p4 = scmp.ne.s32.totalorder %s12053_s10, %s11059_s9  ;;  %s83_s30 = int_to_ptr.vmem [resolvable:$true] %s82_s30 }
  0x47   :  { %p11063_p5 = scmp.lt.u32.totalorder %s11059_s9, %s12053_s10 }
  0x49   :  { %p11065_p6 = pnand %p11063_p5, %p11060_p4 }
  0x4b   :  { %11068 = shalt.err (!%p11065_p6)
}
  0x4c   :  { %s11069_s21 = scalar_lea.vmem %s83_s30, 2048  ;;  %p11074_p8 = scmp.lt.s32.totalorder %s83_s30, %s83_s30 }
  0x4d   :  { %p11070_p7 = scmp.ne.s32.totalorder %s83_s30, %s11069_s21  ;;  %p11075_p9 = scmp.lt.s32.totalorder %s11069_s21, %s11069_s21 }
  0x4f   :  { %p11076_p10 = por %p11075_p9, %p11074_p8 }
  0x51   :  { %p11077_p11 = pnand %p11076_p10, %p11070_p7 }
  0x53   :  { %11080 = shalt.err (!%p11077_p11)
}
  0x54   :  { %88 = dma.hbm_to_vmem [thread:$0]  %s12053_s10, 2048, %s83_s30, [#allocation8], %s11095_s5, %s11095_s5, %s11096_s15  }
  0x55   :  { %11081 = dma.done.wait [#allocation3], 24576  }
  0x56   :  { %11082 = vsyncadd [#allocation3], 4294942720 }
  0x57   :  { %11083 = dma.done.wait [#allocation5], 41472  }
  0x58   :  { %11084 = vsyncadd [#allocation5], 4294925824 }
  0x59   :  { %11085 = dma.done.wait [#allocation8], 2176  }
  0x5a   :  { %11086 = vsyncadd [#allocation8], 4294965120  ;;  %v11098_v0 = vmov 0.0   ;;  %v135_v1 = vld [vmem:[#allocation2 + $0x8] sm:$0xff]  ;;  %v138_v2 = vld [vmem:[#allocation2 + $0x38] sm:$0xff]  ;;  %vm485_vm8 = vcmask 130048  }
  0x5b   :  { %294 = vmatprep.mubr.f32.mxu0 %v11098_v0  ;;  %v134_v3 = vld [vmem:[#allocation2] sm:$0xff]  ;;  %v9621_v4 = vpack.c.bf16 %v138_v2, %v135_v1  ;;  %v137_v5 = vld [vmem:[#allocation2 + $0x30] sm:$0xff]  ;;  %v141_v6 = vld [vmem:[#allocation2 + $0x68] sm:$0xff] }
  0x5c   :  { %v144_v7 = vld [vmem:[#allocation2 + $0x98] sm:$0xff]  ;;  %v9623_v8 = vpack.c.bf16 %v137_v5, %v134_v3  ;;  %v140_v10 = vld [vmem:[#allocation2 + $0x60] sm:$0xff]  ;;  %v143_v11 = vld [vmem:[#allocation2 + $0x90] sm:$0xff] }
  0x5d   :  { %v9625_v9 = vpack.c.bf16 %v144_v7, %v141_v6  ;;  %v147_v12 = vld [vmem:[#allocation2 + $0xc8] sm:$0xff]  ;;  %9622 = vmatprep.subr.bf16.mxu0 %v9621_v4  ;;  %v150_v13 = vld [vmem:[#allocation2 + $0xf8] sm:$0xff]  ;;  %v9627_v14 = vpack.c.bf16 %v143_v11, %v140_v10  ;;  %v146_v16 = vld [vmem:[#allocation2 + $0xc0] sm:$0xff] }
  0x5e   :  { %9624 = vmatpush1.bf16.msra.mxu0 %v9623_v8  ;;  %v9629_v15 = vpack.c.bf16 %v150_v13, %v147_v12  ;;  %v149_v17 = vld [vmem:[#allocation2 + $0xf0] sm:$0xff]  ;;  %v153_v18 = vld [vmem:[#allocation2 + $0x128] sm:$0xff]  ;;  %v156_v19 = vld [vmem:[#allocation2 + $0x158] sm:$0xff]  ;;  %v104_v12 = vlaneseq }
  0x5f   :  { %9626 = vmatprep.subr.bf16.mxu0 %v9625_v9  ;;  %v9631_v20 = vpack.c.bf16 %v149_v17, %v146_v16  ;;  %v9633_v21 = vpack.c.bf16 %v156_v19, %v153_v18  ;;  %v152_v22 = vld [vmem:[#allocation2 + $0x120] sm:$0xff]  ;;  %v155_v23 = vld [vmem:[#allocation2 + $0x150] sm:$0xff]  ;;  %v159_v24 = vld [vmem:[#allocation2 + $0x188] sm:$0xff] }
  0x60   :  { %v162_v25 = vld [vmem:[#allocation2 + $0x1b8] sm:$0xff]  ;;  %v11223_v26 = vld [vmem:[%s12043_s0] sm:$0xff]  ;;  %v136_v27 = vld [vmem:[#allocation2 + $0x10] sm:$0xff]  ;;  %v9635_v29 = vpack.c.bf16 %v155_v23, %v152_v22  ;;  %v105_v13 = vand.u32 127, %v104_v12 }
  0x61   :  { %v139_v28 = vld [vmem:[#allocation2 + $0x40] sm:$0xff]  ;;  %8582 = vmatprep.mubr.f32.mxu1 %v11223_v26  ;;  %v142_v32 = vld [vmem:[#allocation2 + $0x70] sm:$0xff]  ;;  %v9637_v34 = vpack.c.bf16 %v162_v25, %v159_v24  ;;  %v165_v39 = vld [vmem:[#allocation2 + $0x1e8] sm:$0xff] }
  0x62   :  { %9628 = vmatpush1.bf16.msra.mxu0 %v9627_v14  ;;  %v158_v30 = vld [vmem:[#allocation2 + $0x180] sm:$0xff]  ;;  %v9653_v31 = vpack.c.bf16 %v139_v28, %v136_v27  ;;  %v161_v35 = vld [vmem:[#allocation2 + $0x1b0] sm:$0xff]  ;;  %v168_v40 = vld [vmem:[#allocation2 + $0x218] sm:$0xff]  ;;  %vm111_vm0 = vcmp.ge.s32.totalorder %v105_v13, 32  ;;  %vm112_vm1 = vcmp.lt.s32.totalorder %v105_v13, 64  ;;  %vm116_vm2 = vcmp.ge.s32.totalorder %v105_v13, 64 }
  0x63   :  { %9630 = vmatprep.subr.bf16.mxu0 %v9629_v15  ;;  %v145_v33 = vld [vmem:[#allocation2 + $0xa0] sm:$0xff]  ;;  %v148_v37 = vld [vmem:[#allocation2 + $0xd0] sm:$0xff]  ;;  %v9639_v41 = vpack.c.bf16 %v161_v35, %v158_v30  ;;  %v9641_v44 = vpack.c.bf16 %v168_v40, %v165_v39  ;;  %v171_v48 = vld [vmem:[#allocation2 + $0x248] sm:$0xff]  ;;  %vm117_vm3 = vcmp.lt.s32.totalorder %v105_v13, 96  ;;  %vm107_vm5 = vcmp.lt.s32.totalorder %v105_v13, 32 }
  0x64   :  { %v9657_v36 = vpack.c.bf16 %v145_v33, %v142_v32  ;;  %v151_v38 = vld [vmem:[#allocation2 + $0x100] sm:$0xff]  ;;  %9654 = vmatprep.subr.bf16.mxu1 %v9653_v31  ;;  %v167_v45 = vld [vmem:[#allocation2 + $0x210] sm:$0xff]  ;;  %v174_v49 = vld [vmem:[#allocation2 + $0x278] sm:$0xff]  ;;  %vm121_vm7 = vcmp.ge.s32.totalorder %v105_v13, 96 }
  0x65   :  { %9656 = vmatpush3.bf16.msra.mxu1 %v9653_v31  ;;  %v164_v42 = vld [vmem:[#allocation2 + $0x1e0] sm:$0xff]  ;;  %v9661_v43 = vpack.c.bf16 %v151_v38, %v148_v37  ;;  %v154_v46 = vld [vmem:[#allocation2 + $0x130] sm:$0xff]  ;;  %v9645_v53 = vpack.c.bf16 %v174_v49, %v171_v48  ;;  %v177_v57 = vld [vmem:[#allocation2 + $0x2a8] sm:$0xff]  ;;  %v11251_v23 = vsel %vm121_vm7, 1.0, %v11098_v0 }
  0x66   :  { %9632 = vmatpush1.bf16.msra.mxu0 %v9631_v20  ;;  %9658 = vmatprep.subr.bf16.mxu1 %v9657_v36  ;;  %v157_v47 = vld [vmem:[#allocation2 + $0x160] sm:$0xff]  ;;  %v9643_v50 = vpack.c.bf16 %v167_v45, %v164_v42  ;;  %v173_v54 = vld [vmem:[#allocation2 + $0x270] sm:$0xff]  ;;  %v180_v58 = vld [vmem:[#allocation2 + $0x2d8] sm:$0xff]  ;;  %v11242_v20 = vsel %vm107_vm5, 1.0, %v11098_v0 }
  0x67   :  { %9634 = vmatprep.subr.bf16.mxu0 %v9633_v21  ;;  %v170_v51 = vld [vmem:[#allocation2 + $0x240] sm:$0xff]  ;;  %v9665_v52 = vpack.c.bf16 %v157_v47, %v154_v46  ;;  %v160_v55 = vld [vmem:[#allocation2 + $0x190] sm:$0xff]  ;;  %v9649_v62 = vpack.c.bf16 %v180_v58, %v177_v57  ;;  %v11231_v10 = vld [vmem:[%s12043_s0 + $0x8] sm:$0xff] }
  0x68   :  { %v163_v56 = vld [vmem:[#allocation2 + $0x1c0] sm:$0xff]  ;;  %v9647_v59 = vpack.c.bf16 %v173_v54, %v170_v51  ;;  %v179_v63 = vld [vmem:[#allocation2 + $0x2d0] sm:$0xff]  ;;  %vm113_vm4 = vmand %vm111_vm0, %vm112_vm1 }
  0x69   :  { %9660 = vmatpush3.bf16.msra.mxu1 %v9657_v36  ;;  %v176_v60 = vld [vmem:[#allocation2 + $0x2a0] sm:$0xff]  ;;  %v9669_v61 = vpack.c.bf16 %v163_v56, %v160_v55  ;;  %v166_v1 = vld [vmem:[#allocation2 + $0x1f0] sm:$0xff]  ;;  %vm118_vm6 = vmand %vm116_vm2, %vm117_vm3  ;;  %v11245_v21 = vsel %vm113_vm4, 1.0, %v11098_v0 }
  0x6a   :  { %9636 = vmatpush1.bf16.msra.mxu0 %v9635_v29  ;;  %9662 = vmatprep.subr.bf16.mxu1 %v9661_v43  ;;  %v169_v2 = vld [vmem:[#allocation2 + $0x220] sm:$0xff]  ;;  %v9651_v3 = vpack.c.bf16 %v179_v63, %v176_v60  ;;  %v172_v5 = vld [vmem:[#allocation2 + $0x250] sm:$0xff]  ;;  %v11248_v22 = vsel %vm118_vm6, 1.0, %v11098_v0 }
  0x6b   :  { %9638 = vmatprep.subr.bf16.mxu0 %v9637_v34  ;;  %v9673_v4 = vpack.c.bf16 %v169_v2, %v166_v1  ;;  %v175_v6 = vld [vmem:[#allocation2 + $0x280] sm:$0xff]  ;;  %v178_v8 = vld [vmem:[#allocation2 + $0x2b0] sm:$0xff] }
  0x6c   :  { %v9677_v7 = vpack.c.bf16 %v175_v6, %v172_v5  ;;  %v181_v9 = vld [vmem:[#allocation2 + $0x2e0] sm:$0xff] }
  0x6d   :  { %9664 = vmatpush3.bf16.msra.mxu1 %v9661_v43  ;;  %v9681_v11 = vpack.c.bf16 %v181_v9, %v178_v8  ;;  %v7865_v14 = vld [vmem:[%s12049_s6] ss:$0 sm:$0xff]  ;;  %v7866_v16 = vld [vmem:[%s12049_s6 + $0x1] ss:$0 sm:$0xff]  ;;  %v7867_v36 = vld [vmem:[%s12049_s6 + $0x2] ss:$0 sm:$0xff] }
  0x6e   :  { %9640 = vmatpush1.bf16.msra.mxu0 %v9639_v41  ;;  %9666 = vmatprep.subr.bf16.mxu1 %v9665_v52  ;;  %v126_v57 = vld [vmem:[%s12045_s2] sm:$0xff] }
  0x6f   :  { %9642 = vmatprep.subr.bf16.mxu0 %v9641_v44 }
  0x71   :  { %9668 = vmatpush3.bf16.msra.mxu1 %v9665_v52 }
  0x72   :  { %9644 = vmatpush1.bf16.msra.mxu0 %v9643_v50  ;;  %9670 = vmatprep.subr.bf16.mxu1 %v9669_v61 }
  0x73   :  { %9646 = vmatprep.subr.bf16.mxu0 %v9645_v53 }
  0x75   :  { %9672 = vmatpush3.bf16.msra.mxu1 %v9669_v61  ;;  %v127_v61 = vld [vmem:[%s12045_s2 + $0x8] sm:$0xff] }
  0x76   :  { %9648 = vmatpush1.bf16.msra.mxu0 %v9647_v59  ;;  %9674 = vmatprep.subr.bf16.mxu1 %v9673_v4 }
  0x77   :  { %9650 = vmatprep.subr.bf16.mxu0 %v9649_v62 }
  0x79   :  { %9676 = vmatpush3.bf16.msra.mxu1 %v9673_v4 }
  0x7a   :  { %9652 = vmatpush1.bf16.msra.mxu0 %v9651_v3  ;;  %9678 = vmatprep.subr.bf16.mxu1 %v9677_v7 }
  0x7d   :  { %295 = vmatmul.mubr.f32.vlgmr.msra.gmra.mrb[0].mxu0 %v11223_v26  ;;  %9680 = vmatpush3.bf16.msra.mxu1 %v9677_v7 }
  0x7e   :  { %300 = vmatprep.mubr.f32.mxu0 %v11098_v0  ;;  %9682 = vmatprep.subr.bf16.mxu1 %v9681_v11 }
  0x81   :  { %301 = vmatmul.mubr.f32.gmra.mrb[2].mxu0 %v11231_v10  ;;  %9684 = vmatpush3.bf16.msra.mxu1 %v9681_v11 }
  0x84   :  { %8583 = vmatmul.mubr.f32.vlgmr.msra.gmra.mrb[0].mxu1 %v11231_v10 }
 0x150   :  { %v296_v15 = vpop.f32.mrb[0].mxu0 }
 0x151   :  { %v387_v17 = vadd.f32 %v7865_v14, %v296_v15  ;;  %v298_v18 = vpop.f32.mrb[1].mxu0 }
 0x152   :  { %v394_v19 = vadd.f32 %v7866_v16, %v298_v18 }
 0x153   :  { %8589 = vmatprep.mubr.f32.mxu0 %v387_v17  ;;  %8596 = vmatprep.mubr.f32.mxu1 %v387_v17 }
 0x154   :  { %v302_v24 = vpop.f32.mrb[2].mxu0  ;;  %v404_v28 = vmul.f32 %v11242_v20, %v394_v19  ;;  %v510_v29 = vmul.f32 %v11245_v21, %v394_v19  ;;  %v777_v30 = vmul.f32 %v11248_v22, %v394_v19  ;;  %v965_v31 = vmul.f32 %v11251_v23, %v394_v19 }
 0x155   :  { %v304_v25 = vpop.f32.mrb[3].mxu0  ;;  %v388_v48 = vadd.f32 %v7865_v14, %v302_v24 }
 0x156   :  { %v395_v27 = vadd.f32 %v7866_v16, %v304_v25 }
 0x157   :  { %v8584_v41 = vpop.f32.mrb[0].mxu1 }
 0x158   :  { %v405_v32 = vmul.f32 %v11242_v20, %v395_v27  ;;  %v511_v33 = vmul.f32 %v11245_v21, %v395_v27  ;;  %v778_v34 = vmul.f32 %v11248_v22, %v395_v27  ;;  %v966_v35 = vmul.f32 %v11251_v23, %v395_v27  ;;  %v373_v43 = vpop.f32.mrb[1].mxu1 }
 0x159   :  { %v11264_v42 = vadd.f32 %v8584_v41, %v7867_v36  ;;  %v11266_v44 = vadd.f32 %v7867_v36, %v373_v43 }
 0x15a   :  { %v9685_v37 = vpack.c.bf16 %v405_v32, %v404_v28  ;;  %v9689_v38 = vpack.c.bf16 %v511_v33, %v510_v29  ;;  %v9701_v39 = vpack.c.bf16 %v778_v34, %v777_v30  ;;  %v9709_v40 = vpack.c.bf16 %v966_v35, %v965_v31 }
 0x15b   :  { %v614_v45 = vmul.f32 %v11245_v21, %v11264_v42  ;;  %v613_v46 = vmul.f32 %v11245_v21, %v11266_v44  ;;  %v508_v49 = vmul.f32 %v11242_v20, %v11266_v44  ;;  %v509_v50 = vmul.f32 %v11242_v20, %v11264_v42 }
 0x15c   :  { %9686 = vmatprep.subr.bf16.mxu0 %v9685_v37  ;;  %9690 = vmatprep.subr.bf16.mxu1 %v9689_v38 }
 0x15d   :  { %9688 = vmatpush3.bf16.xpose.msra.mxu0 %v9685_v37  ;;  %9692 = vmatpush3.bf16.xpose.msra.mxu1 %v9689_v38  ;;  %v9693_v47 = vpack.c.bf16 %v614_v45, %v613_v46  ;;  %v11276_v51 = vpack.c.bf16 %v509_v50, %v508_v49 }
 0x15e   :  { %9702 = vmatprep.subr.bf16.mxu1 %v9701_v39 }
 0x15f   :  { %9694 = vmatprep.subr.bf16.mxu0 %v9693_v47 }
 0x164   :  { %8590 = vmatmul.mubr.f32.vlgmr.msra.gmra.mrb[4].mxu0 %v388_v48  ;;  %8597 = vmatmul.mubr.f32.vlgmr.msra.gmra.mrb[2].mxu1 %v388_v48 }
 0x165   :  { %9704 = vmatpush3.bf16.xpose.msra.mxu1 %v9701_v39  ;;  %8617 = vmatprep.mubr.f32.mxu1 %v387_v17 }
 0x166   :  { %9710 = vmatprep.subr.bf16.mxu1 %v9709_v40  ;;  %9696 = vmatpush3.bf16.msra.mxu0 %v9693_v47 }
 0x167   :  { %9698 = vmatprep.subr.bf16.mxu0 %v11276_v51 }
 0x16c   :  { %8618 = vmatmul.mubr.f32.vlgmr.msra.gmra.mrb[4].mxu1 %v388_v48 }
 0x16d   :  { %9712 = vmatpush3.bf16.xpose.msra.mxu1 %v9709_v40  ;;  %8631 = vmatprep.mubr.f32.mxu1 %v387_v17 }
 0x174   :  { %8632 = vmatmul.mubr.f32.vlgmr.msra.gmra.mrb[6].mxu1 %v388_v48 }
 0x237   :  { %v8591_v52 = vpop.f32.mrb[4].mxu0  ;;  %v8598_v53 = vpop.f32.mrb[2].mxu1 }
 0x238   :  { %v482_v54 = vmul.f32 0.17677669, %v8591_v52  ;;  %v472_v55 = vpop.f32.mrb[5].mxu0  ;;  %v578_v56 = vpop.f32.mrb[3].mxu1  ;;  %v588_v58 = vmul.f32 0.17677669, %v8598_v53 }
 0x239   :  { %v481_v59 = vmul.f32 0.17677669, %v472_v55  ;;  %v587_v60 = vmul.f32 0.17677669, %v578_v56 }
 0x23a   :  { %v590_v3 = vadd.f32 %v588_v58, %v127_v61  ;;  %v484_v4 = vadd.f32 %v482_v54, %v127_v61 }
 0x23b   :  { %v589_v62 = vadd.f32 %v587_v60, %v126_v57  ;;  %v483_v63 = vadd.f32 %v481_v59, %v126_v57 }
 0x23c   :  { %v594_v9 = vsel %vm485_vm8, %v590_v3, -inf  ;;  %v489_v11 = vsel %vm485_vm8, %v484_v4, -inf }
 0x23d   :  { %v591_v1 = vsel %vm485_vm8, %v589_v62, -inf  ;;  %v486_v2 = vsel %vm485_vm8, %v483_v63, -inf }
 0x23e   :  { %592 = vmax.xlane.f32.xlu0 %v591_v1  ;;  %487 = vmax.xlane.f32.xlu1 %v486_v2 }
 0x23f   :  { %v8619_v5 = vpop.f32.mrb[4].mxu1 }
 0x240   :  { %v855_v6 = vmul.f32 0.17677669, %v8619_v5  ;;  %v845_v7 = vpop.f32.mrb[5].mxu1 }
 0x241   :  { %v854_v8 = vmul.f32 0.17677669, %v845_v7 }
 0x242   :  { %595 = vmax.xlane.f32.xlu0 %v594_v9  ;;  %490 = vmax.xlane.f32.xlu1 %v489_v11  ;;  %v857_v12 = vadd.f32 %v855_v6, %v127_v61 }
 0x243   :  { %v856_v13 = vadd.f32 %v854_v8, %v126_v57 }
 0x244   :  { %v861_v14 = vsel %vm485_vm8, %v857_v12, -inf }
 0x245   :  { %v858_v15 = vsel %vm485_vm8, %v856_v13, -inf }
 0x246   :  { %859 = vmax.xlane.f32.xlu0 %v858_v15  ;;  %862 = vmax.xlane.f32.xlu1 %v861_v14 }
 0x247   :  { %v8633_v16 = vpop.f32.mrb[6].mxu1 }
 0x248   :  { %v1043_v17 = vmul.f32 0.17677669, %v8633_v16  ;;  %v1033_v18 = vpop.f32.mrb[7].mxu1 }
 0x249   :  { %v1042_v19 = vmul.f32 0.17677669, %v1033_v18  ;;  %v880_v18 = vmul.f32 %v11248_v22, %v11266_v44 }
 0x24a   :  { %v1045_v24 = vadd.f32 %v1043_v17, %v127_v61 }
 0x24b   :  { %v1044_v25 = vadd.f32 %v1042_v19, %v126_v57  ;;  %v881_v19 = vmul.f32 %v11248_v22, %v11264_v42 }
 0x24c   :  { %v1049_v27 = vsel %vm485_vm8, %v1045_v24, -inf }
 0x24d   :  { %1050 = vmax.xlane.f32.xlu1 %v1049_v27  ;;  %v1046_v28 = vsel %vm485_vm8, %v1044_v25, -inf }
 0x24e   :  { %1047 = vmax.xlane.f32.xlu0 %v1046_v28 }
 0x2cb   :  { %v593_v29 = vpop.xlane.xlu0 %592  ;;  %v488_v30 = vpop.xlane.xlu1 %487 }
 0x2cc   :  { %v597_v31 = vsub.f32 %v589_v62, %v593_v29  ;;  %v492_v32 = vsub.f32 %v483_v63, %v488_v30  ;;  %v9705_v30 = vpack.c.bf16 %v881_v19, %v880_v18  ;;  %v200_v18 = vld [vmem:[#allocation2 + $0x80] sm:$0xff] }
 0x2ce   :  { %v599_v33 = vmul.f32 1.442695, %v597_v31  ;;  %v494_v34 = vmul.f32 1.442695, %v492_v32 }
 0x2cf   :  { %v596_v35 = vpop.xlane.xlu0 %595  ;;  %v491_v36 = vpop.xlane.xlu1 %490 }
 0x2d0   :  { %10725 = vpow2.f32 %v599_v33  ;;  %v598_v37 = vsub.f32 %v590_v3, %v596_v35  ;;  %v493_v38 = vsub.f32 %v484_v4, %v491_v36  ;;  %v1068_v33 = vmul.f32 %v11251_v23, %v11266_v44 }
 0x2d1   :  { %10727 = vpow2.f32 %v494_v34  ;;  %v1069_v34 = vmul.f32 %v11251_v23, %v11264_v42 }
 0x2d2   :  { %v601_v39 = vmul.f32 1.442695, %v598_v37  ;;  %v496_v40 = vmul.f32 1.442695, %v493_v38 }
 0x2d3   :  { %v860_v41 = vpop.xlane.xlu0 %859  ;;  %v863_v43 = vpop.xlane.xlu1 %862  ;;  %v9713_v38 = vpack.c.bf16 %v1069_v34, %v1068_v33 }
 0x2d4   :  { %10729 = vpow2.f32 %v601_v39  ;;  %v864_v45 = vsub.f32 %v856_v13, %v860_v41  ;;  %v865_v46 = vsub.f32 %v857_v12, %v863_v43  ;;  %v182_v39 = vld [vmem:[#allocation2 + $0x18] sm:$0xff] }
 0x2d5   :  { %10731 = vpow2.f32 %v496_v40  ;;  %v183_v40 = vld [vmem:[#allocation2 + $0x48] sm:$0xff] }
 0x2d6   :  { %v866_v47 = vmul.f32 1.442695, %v864_v45  ;;  %v868_v48 = vmul.f32 1.442695, %v865_v46  ;;  %v9717_v44 = vpack.c.bf16 %v183_v40, %v182_v39  ;;  %v184_v46 = vld [vmem:[#allocation2 + $0x78] sm:$0xff]  ;;  %v207_v39 = vld [vmem:[#allocation2 + $0x1d0] sm:$0xff] }
 0x2d7   :  { %v208_v40 = vld [vmem:[#allocation2 + $0x200] sm:$0xff] }
 0x2d8   :  { %10733 = vpow2.f32 %v866_v47  ;;  %v185_v47 = vld [vmem:[#allocation2 + $0xa8] sm:$0xff] }
 0x2d9   :  { %10735 = vpow2.f32 %v868_v48 }
 0x2da   :  { %v10726_v49 = vpop.eup %10725  ;;  %v1051_v50 = vpop.xlane.xlu1 %1050 }
 0x2db   :  { %v1053_v52 = vsub.f32 %v1045_v24, %v1051_v50  ;;  %v1048_v53 = vpop.xlane.xlu0 %1047  ;;  %v603_v54 = vsel %vm485_vm8, %v10726_v49, 0.0  ;;  %v10728_v55 = vpop.eup %10727  ;;  %v186_v50 = vld [vmem:[#allocation2 + $0xd8] sm:$0xff] }
 0x2dc   :  { %v1052_v56 = vsub.f32 %v1044_v25, %v1048_v53  ;;  %604 = vadd.xlane.f32.xlu0 %v603_v54  ;;  %v498_v61 = vsel %vm485_vm8, %v10728_v55, 0.0  ;;  %v188_v54 = vld [vmem:[#allocation2 + $0x138] sm:$0xff] }
 0x2dd   :  { %v1056_v57 = vmul.f32 1.442695, %v1053_v52  ;;  %v187_v52 = vld [vmem:[#allocation2 + $0x108] sm:$0xff] }
 0x2de   :  { %v10730_v58 = vpop.eup %10729  ;;  %v1054_v59 = vmul.f32 1.442695, %v1052_v56  ;;  %v9725_v53 = vpack.c.bf16 %v187_v52, %v186_v50  ;;  %v214_v50 = vld [vmem:[#allocation2 + $0x28] sm:$0xff]  ;;  %v215_v52 = vld [vmem:[#allocation2 + $0x58] sm:$0xff] }
 0x2df   :  { %10737 = vpow2.f32 %v1056_v57  ;;  %v606_v60 = vsel %vm485_vm8, %v10730_v58, 0.0  ;;  %v10732_v62 = vpop.eup %10731  ;;  %v190_v57 = vld [vmem:[#allocation2 + $0x198] sm:$0xff] }
 0x2e0   :  { %10739 = vpow2.f32 %v1054_v59  ;;  %607 = vadd.xlane.f32.xlu1 %v606_v60  ;;  %499 = vadd.xlane.f32.xlu0 %v498_v61  ;;  %v501_v2 = vsel %vm485_vm8, %v10732_v62, 0.0  ;;  %v192_v60 = vld [vmem:[#allocation2 + $0x1f8] sm:$0xff]  ;;  %v193_v61 = vld [vmem:[#allocation2 + $0x228] sm:$0xff] }
 0x2e2   :  { %v10734_v63 = vpop.eup %10733 }
 0x2e3   :  { %v870_v1 = vsel %vm485_vm8, %v10734_v63, 0.0  ;;  %v10736_v3 = vpop.eup %10735 }
 0x2e4   :  { %871 = vadd.xlane.f32.xlu0 %v870_v1  ;;  %502 = vadd.xlane.f32.xlu1 %v501_v2  ;;  %v873_v4 = vsel %vm485_vm8, %v10736_v3, 0.0  ;;  %v195_v1 = vld [vmem:[#allocation2 + $0x288] sm:$0xff] }
 0x2e8   :  { %874 = vadd.xlane.f32.xlu1 %v873_v4  ;;  %v197_v4 = vld [vmem:[#allocation2 + $0x2e8] sm:$0xff] }
 0x2e9   :  { %v10738_v5 = vpop.eup %10737 }
 0x2ea   :  { %v10740_v6 = vpop.eup %10739  ;;  %v1061_v7 = vsel %vm485_vm8, %v10738_v5, 0.0 }
 0x2eb   :  { %v1058_v8 = vsel %vm485_vm8, %v10740_v6, 0.0 }
 0x2ec   :  { %1059 = vadd.xlane.f32.xlu0 %v1058_v8  ;;  %1062 = vadd.xlane.f32.xlu1 %v1061_v7  ;;  %v7876_v8 = vld [vmem:[%s12049_s6 + $0x3] ss:$0 sm:$0xff] }
 0x369   :  { %v605_v9 = vpop.xlane.xlu0 %604 }
 0x36a   :  { %10741 = vrcp.f32 %v605_v9 }
 0x36d   :  { %v500_v11 = vpop.xlane.xlu0 %499  ;;  %v608_v12 = vpop.xlane.xlu1 %607 }
 0x36e   :  { %10743 = vrcp.f32 %v500_v11 }
 0x36f   :  { %10745 = vrcp.f32 %v608_v12 }
 0x371   :  { %v503_v13 = vpop.xlane.xlu1 %502  ;;  %v872_v14 = vpop.xlane.xlu0 %871 }
 0x372   :  { %10747 = vrcp.f32 %v503_v13 }
 0x373   :  { %10749 = vrcp.f32 %v872_v14 }
 0x374   :  { %v10742_v15 = vpop.eup %10741 }
 0x375   :  { %v611_v16 = vmul.f32 %v10742_v15, %v10726_v49  ;;  %v875_v27 = vpop.xlane.xlu1 %874  ;;  %v9721_v49 = vpack.c.bf16 %v185_v47, %v184_v46  ;;  %v212_v47 = vld [vmem:[#allocation2 + $0x2c0] sm:$0xff] }
 0x376   :  { %10751 = vrcp.f32 %v875_v27  ;;  %v202_v27 = vld [vmem:[#allocation2 + $0xe0] sm:$0xff] }
 0x377   :  { %8603 = vmatprep.mubr.msk.f32.mxu0 %vm485_vm8, %v611_v16  ;;  %v198_v16 = vld [vmem:[#allocation2 + $0x20] sm:$0xff] }
 0x378   :  { %v10744_v17 = vpop.eup %10743 }
 0x379   :  { %v10746_v24 = vpop.eup %10745  ;;  %v506_v25 = vmul.f32 %v10744_v17, %v10728_v55  ;;  %v1060_v29 = vpop.xlane.xlu0 %1059  ;;  %v189_v55 = vld [vmem:[#allocation2 + $0x168] sm:$0xff]  ;;  %v199_v17 = vld [vmem:[#allocation2 + $0x50] sm:$0xff] }
 0x37a   :  { %v612_v28 = vmul.f32 %v10746_v24, %v10730_v58  ;;  %10753 = vrcp.f32 %v1060_v29  ;;  %v1063_v35 = vpop.xlane.xlu1 %1062  ;;  %v9729_v56 = vpack.c.bf16 %v189_v55, %v188_v54  ;;  %v191_v58 = vld [vmem:[#allocation2 + $0x1c8] sm:$0xff]  ;;  %v9749_v19 = vpack.c.bf16 %v199_v17, %v198_v16  ;;  %v201_v24 = vld [vmem:[#allocation2 + $0xb0] sm:$0xff]  ;;  %v217_v55 = vld [vmem:[#allocation2 + $0xb8] sm:$0xff] }
 0x37b   :  { %10755 = vrcp.f32 %v1063_v35  ;;  %v9733_v59 = vpack.c.bf16 %v191_v58, %v190_v57  ;;  %v9781_v54 = vpack.c.bf16 %v215_v52, %v214_v50  ;;  %v218_v57 = vld [vmem:[#allocation2 + $0xe8] sm:$0xff]  ;;  %v219_v58 = vld [vmem:[#allocation2 + $0x118] sm:$0xff]  ;;  %v7877_v17 = vld [vmem:[%s12049_s6 + $0x4] ss:$0 sm:$0xff] }
 0x37c   :  { %8604 = vmatmul.mubr.msk.f32.vlgmr.msra.gmra.mrb[6].mxu0 %vm485_vm8, %v612_v28  ;;  %v10748_v31 = vpop.eup %10747  ;;  %v203_v28 = vld [vmem:[#allocation2 + $0x110] sm:$0xff]  ;;  %9750 = vmatprep.subr.bf16.mxu1 %v9749_v19  ;;  %v1477_v52 = vld [vmem:[#allocation2 + $0x340] sm:$0xff] }
 0x37d   :  { %9700 = vmatpush3.bf16.msra.mxu0 %v11276_v51  ;;  %8610 = vmatprep.mubr.msk.f32.mxu0 %vm485_vm8, %v506_v25  ;;  %v10750_v32 = vpop.eup %10749  ;;  %v507_v36 = vmul.f32 %v10748_v31, %v10732_v62  ;;  %v9737_v62 = vpack.c.bf16 %v193_v61, %v192_v60  ;;  %v9753_v25 = vpack.c.bf16 %v201_v24, %v200_v18  ;;  %v220_v60 = vld [vmem:[#allocation2 + $0x148] sm:$0xff]  ;;  %v221_v61 = vld [vmem:[#allocation2 + $0x178] sm:$0xff]  ;;  %v1474_v50 = vld [vmem:[#allocation2 + $0x310] sm:$0xff] }
 0x37e   :  { %9706 = vmatprep.subr.bf16.mxu0 %v9705_v30  ;;  %v878_v37 = vmul.f32 %v10750_v32, %v10734_v63  ;;  %v194_v63 = vld [vmem:[#allocation2 + $0x258] sm:$0xff]  ;;  %9752 = vmatpush3.bf16.msra.mxu1 %v9749_v19  ;;  %v9757_v29 = vpack.c.bf16 %v203_v28, %v202_v27 }
 0x37f   :  { %v9741_v2 = vpack.c.bf16 %v195_v1, %v194_v63  ;;  %9754 = vmatprep.subr.bf16.mxu1 %v9753_v25  ;;  %v222_v63 = vld [vmem:[#allocation2 + $0x1a8] sm:$0xff]  ;;  %v223_v1 = vld [vmem:[#allocation2 + $0x1d8] sm:$0xff] }
 0x380   :  { %v10752_v51 = vpop.eup %10751 }
 0x381   :  { %v879_v43 = vmul.f32 %v10752_v51, %v10736_v3  ;;  %v196_v3 = vld [vmem:[#allocation2 + $0x2b8] sm:$0xff]  ;;  %v206_v51 = vld [vmem:[#allocation2 + $0x1a0] sm:$0xff] }
 0x382   :  { %9756 = vmatpush3.bf16.msra.mxu1 %v9753_v25  ;;  %v7878_v25 = vld [vmem:[%s12049_s6 + $0x5] ss:$0 sm:$0xff] }
 0x383   :  { %9758 = vmatprep.subr.bf16.mxu1 %v9757_v29 }
 0x384   :  { %8611 = vmatmul.mubr.msk.f32.vlgmr.msra.gmra.mrb[6].mxu0 %vm485_vm8, %v507_v36  ;;  %v10754_v41 = vpop.eup %10753  ;;  %v204_v36 = vld [vmem:[#allocation2 + $0x140] sm:$0xff] }
 0x385   :  { %9708 = vmatpush3.bf16.msra.mxu0 %v9705_v30  ;;  %8624 = vmatprep.mubr.msk.f32.mxu0 %vm485_vm8, %v878_v37  ;;  %v1066_v45 = vmul.f32 %v10754_v41, %v10740_v6  ;;  %v10756_v42 = vpop.eup %10755  ;;  %v205_v37 = vld [vmem:[#allocation2 + $0x170] sm:$0xff]  ;;  %v9765_v41 = vpack.c.bf16 %v207_v39, %v206_v51  ;;  %v7880_v51 = vld [vmem:[%s12049_s6 + $0x7] ss:$0 sm:$0xff] }
 0x386   :  { %9714 = vmatprep.subr.bf16.mxu0 %v9713_v38  ;;  %v1067_v48 = vmul.f32 %v10756_v42, %v10738_v5  ;;  %v9745_v5 = vpack.c.bf16 %v197_v4, %v196_v3  ;;  %9760 = vmatpush3.bf16.msra.mxu1 %v9757_v29  ;;  %v211_v42 = vld [vmem:[#allocation2 + $0x290] sm:$0xff]  ;;  %v224_v3 = vld [vmem:[#allocation2 + $0x208] sm:$0xff]  ;;  %v225_v4 = vld [vmem:[#allocation2 + $0x238] sm:$0xff] }
 0x38c   :  { %8625 = vmatmul.mubr.msk.f32.vlgmr.msra.gmra.mrb[6].mxu0 %vm485_vm8, %v879_v43  ;;  %v209_v43 = vld [vmem:[#allocation2 + $0x230] sm:$0xff] }
 0x38d   :  { %9716 = vmatpush3.bf16.msra.mxu0 %v9713_v38  ;;  %8638 = vmatprep.mubr.msk.f32.mxu0 %vm485_vm8, %v1066_v45  ;;  %v9761_v38 = vpack.c.bf16 %v205_v37, %v204_v36  ;;  %v210_v45 = vld [vmem:[#allocation2 + $0x260] sm:$0xff] }
 0x38e   :  { %9718 = vmatprep.subr.bf16.mxu0 %v9717_v44  ;;  %v9773_v46 = vpack.c.bf16 %v211_v42, %v210_v45  ;;  %v1473_v42 = vld [vmem:[#allocation2 + $0x308] sm:$0xff] }
 0x38f   :  { %9762 = vmatprep.subr.bf16.mxu1 %v9761_v38 }
 0x390   :  { %9764 = vmatpush3.bf16.msra.mxu1 %v9761_v38 }
 0x391   :  { %9766 = vmatprep.subr.bf16.mxu1 %v9765_v41 }
 0x394   :  { %8639 = vmatmul.mubr.msk.f32.vlgmr.msra.gmra.mrb[6].mxu0 %vm485_vm8, %v1067_v48  ;;  %9768 = vmatpush3.bf16.msra.mxu1 %v9765_v41  ;;  %v213_v48 = vld [vmem:[#allocation2 + $0x2f0] sm:$0xff] }
 0x395   :  { %9720 = vmatpush3.bf16.msra.mxu0 %v9717_v44  ;;  %v9769_v44 = vpack.c.bf16 %v209_v43, %v208_v40 }
 0x396   :  { %9722 = vmatprep.subr.bf16.mxu0 %v9721_v49 }
 0x397   :  { %9770 = vmatprep.subr.bf16.mxu1 %v9769_v44 }
 0x398   :  { %9772 = vmatpush3.bf16.msra.mxu1 %v9769_v44 }
 0x399   :  { %9724 = vmatpush3.bf16.msra.mxu0 %v9721_v49  ;;  %9774 = vmatprep.subr.bf16.mxu1 %v9773_v46  ;;  %v9777_v49 = vpack.c.bf16 %v213_v48, %v212_v47  ;;  %v1472_v47 = vld [vmem:[#allocation2 + $0x300] sm:$0xff] }
 0x39a   :  { %9726 = vmatprep.subr.bf16.mxu0 %v9725_v53 }
 0x39c   :  { %9776 = vmatpush3.bf16.msra.mxu1 %v9773_v46  ;;  %v1476_v46 = vld [vmem:[#allocation2 + $0x338] sm:$0xff] }
 0x39d   :  { %9728 = vmatpush3.bf16.msra.mxu0 %v9725_v53  ;;  %9778 = vmatprep.subr.bf16.mxu1 %v9777_v49  ;;  %v216_v53 = vld [vmem:[#allocation2 + $0x88] sm:$0xff]  ;;  %v9813_v48 = vpack.c.bf16 %v1476_v46, %v1473_v42  ;;  %v1507_v46 = vld [vmem:[#allocation2 + $0x520] sm:$0xff] }
 0x39e   :  { %9730 = vmatprep.subr.bf16.mxu0 %v9729_v56 }
 0x3a0   :  { %9780 = vmatpush3.bf16.msra.mxu1 %v9777_v49  ;;  %v1475_v49 = vld [vmem:[#allocation2 + $0x330] sm:$0xff] }
 0x3a1   :  { %9732 = vmatpush3.bf16.msra.mxu0 %v9729_v56  ;;  %v9785_v56 = vpack.c.bf16 %v217_v55, %v216_v53  ;;  %v9815_v53 = vpack.c.bf16 %v1475_v49, %v1472_v47  ;;  %v1479_v55 = vld [vmem:[#allocation2 + $0x368] sm:$0xff]  ;;  %9814 = vmatprep.subr.bf16.mxu1 %v9813_v48  ;;  %v1512_v48 = vld [vmem:[#allocation2 + $0x578] sm:$0xff] }
 0x3a2   :  { %9734 = vmatprep.subr.bf16.mxu0 %v9733_v59  ;;  %v1509_v47 = vld [vmem:[#allocation2 + $0x548] sm:$0xff] }
 0x3a5   :  { %9736 = vmatpush3.bf16.msra.mxu0 %v9733_v59  ;;  %v9789_v59 = vpack.c.bf16 %v219_v58, %v218_v57  ;;  %v1478_v57 = vld [vmem:[#allocation2 + $0x360] sm:$0xff] }
 0x3a6   :  { %9738 = vmatprep.subr.bf16.mxu0 %v9737_v62 }
 0x3a9   :  { %9740 = vmatpush3.bf16.msra.mxu0 %v9737_v62  ;;  %v9793_v62 = vpack.c.bf16 %v221_v61, %v220_v60  ;;  %v1480_v60 = vld [vmem:[#allocation2 + $0x370] sm:$0xff]  ;;  %v1483_v61 = vld [vmem:[#allocation2 + $0x3a0] sm:$0xff] }
 0x3aa   :  { %9742 = vmatprep.subr.bf16.mxu0 %v9741_v2 }
 0x3ad   :  { %9744 = vmatpush3.bf16.msra.mxu0 %v9741_v2  ;;  %v9797_v2 = vpack.c.bf16 %v223_v1, %v222_v63  ;;  %v9849_v63 = vpack.c.bf16 %v1483_v61, %v1480_v60  ;;  %v1485_v1 = vld [vmem:[#allocation2 + $0x3c8] sm:$0xff]  ;;  %v1516_v60 = vld [vmem:[#allocation2 + $0x5b0] sm:$0xff]  ;;  %v1519_v61 = vld [vmem:[#allocation2 + $0x5e0] sm:$0xff] }
 0x3ae   :  { %9746 = vmatprep.subr.bf16.mxu0 %v9745_v5 }
 0x3b1   :  { %9748 = vmatpush3.bf16.msra.mxu0 %v9745_v5  ;;  %v9801_v5 = vpack.c.bf16 %v225_v4, %v224_v3  ;;  %v1484_v3 = vld [vmem:[#allocation2 + $0x3c0] sm:$0xff] }
 0x3b2   :  { %9782 = vmatprep.subr.bf16.mxu0 %v9781_v54 }
 0x467   :  { %v8640_v6 = vpop.f32.mrb[6].mxu0 }
 0x468   :  { %v1142_v7 = vpop.f32.mrb[7].mxu0 }
 0x469   :  { %8673 = vmatprep.mubr.f32.mxu0 %v1142_v7  ;;  %v227_v7 = vld [vmem:[#allocation2 + $0x298] sm:$0xff] }
 0x46a   :  { %8674 = vmatmul.mubr.f32.vlgmr.msra.gmra.mrb[8].mxu0 %v8640_v6  ;;  %v226_v6 = vld [vmem:[#allocation2 + $0x268] sm:$0xff] }
 0x46b   :  { %9784 = vmatpush3.bf16.msra.mxu0 %v9781_v54  ;;  %v9845_v54 = vpack.c.bf16 %v1477_v52, %v1474_v50  ;;  %v9837_v50 = vpack.c.bf16 %v1512_v48, %v1509_v47  ;;  %v1508_v52 = vld [vmem:[#allocation2 + $0x540] sm:$0xff] }
 0x46c   :  { %9786 = vmatprep.subr.bf16.mxu0 %v9785_v56 }
 0x46f   :  { %9788 = vmatpush3.bf16.msra.mxu0 %v9785_v56  ;;  %v1482_v56 = vld [vmem:[#allocation2 + $0x398] sm:$0xff] }
 0x470   :  { %9790 = vmatprep.subr.bf16.mxu0 %v9789_v59  ;;  %v9817_v58 = vpack.c.bf16 %v1482_v56, %v1479_v55  ;;  %v1513_v55 = vld [vmem:[#allocation2 + $0x580] sm:$0xff]  ;;  %v1515_v56 = vld [vmem:[#allocation2 + $0x5a8] sm:$0xff] }
 0x473   :  { %9792 = vmatpush3.bf16.msra.mxu0 %v9789_v59  ;;  %v1481_v59 = vld [vmem:[#allocation2 + $0x390] sm:$0xff] }
 0x474   :  { %9794 = vmatprep.subr.bf16.mxu0 %v9793_v62 }
 0x477   :  { %9796 = vmatpush3.bf16.msra.mxu0 %v9793_v62  ;;  %v9819_v62 = vpack.c.bf16 %v1481_v59, %v1478_v57  ;;  %v1518_v57 = vld [vmem:[#allocation2 + $0x5d8] sm:$0xff] }
 0x478   :  { %9798 = vmatprep.subr.bf16.mxu0 %v9797_v2 }
 0x47b   :  { %9800 = vmatpush3.bf16.msra.mxu0 %v9797_v2  ;;  %v1488_v2 = vld [vmem:[#allocation2 + $0x3f8] sm:$0xff] }
 0x47c   :  { %9802 = vmatprep.subr.bf16.mxu0 %v9801_v5  ;;  %v9821_v4 = vpack.c.bf16 %v1488_v2, %v1485_v1  ;;  %v1517_v1 = vld [vmem:[#allocation2 + $0x5d0] sm:$0xff]  ;;  %v9873_v2 = vpack.c.bf16 %v1519_v61, %v1516_v60 }
 0x47f   :  { %9804 = vmatpush3.bf16.msra.mxu0 %v9801_v5  ;;  %v1487_v5 = vld [vmem:[#allocation2 + $0x3f0] sm:$0xff] }
 0x53d   :  { %v8675_v9 = vpop.f32.mrb[8].mxu0 }
 0x53e   :  { %v1229_v11 = vadd.f32 %v8675_v9, %v7876_v8  ;;  %v1223_v12 = vpop.f32.mrb[9].mxu0 }
 0x53f   :  { %v1224_v13 = vadd.f32 %v7876_v8, %v1223_v12  ;;  %v9805_v8 = vpack.c.bf16 %v227_v7, %v226_v6  ;;  %v1486_v6 = vld [vmem:[#allocation2 + $0x3d0] sm:$0xff]  ;;  %v1489_v7 = vld [vmem:[#allocation2 + $0x400] sm:$0xff] }
 0x540   :  { %v1233_v14 = vadd.f32 %v1229_v11, %v11231_v10 }
 0x541   :  { %v1232_v15 = vadd.f32 %v1224_v13, %v11223_v26  ;;  %9806 = vmatprep.subr.bf16.mxu0 %v9805_v8 }
 0x542   :  { %1238 = vadd.xlane.f32.xlu1 %v1233_v14  ;;  %9808 = vmatpush3.bf16.msra.mxu0 %v9805_v8  ;;  %v9853_v8 = vpack.c.bf16 %v1489_v7, %v1486_v6 }
 0x543   :  { %1236 = vadd.xlane.f32.xlu0 %v1232_v15 }
 0x5cf   :  { %v1239_v10 = vpop.xlane.xlu1 %1238 }
 0x5d0   :  { %v1242_v30 = vmul.f32 0.0078125, %v1239_v10  ;;  %v1237_v26 = vpop.xlane.xlu0 %1236 }
 0x5d1   :  { %v1241_v31 = vmul.f32 0.0078125, %v1237_v26  ;;  %v229_v26 = vld [vmem:[#allocation2 + $0x2f8] sm:$0xff] }
 0x5d2   :  { %v11323_v32 = vsub.f32 %v1233_v14, %v1242_v30  ;;  %v228_v30 = vld [vmem:[#allocation2 + $0x2c8] sm:$0xff] }
 0x5d3   :  { %v11325_v33 = vsub.f32 %v1232_v15, %v1241_v31  ;;  %v9809_v31 = vpack.c.bf16 %v229_v26, %v228_v30  ;;  %v1495_v30 = vld [vmem:[#allocation2 + $0x460] sm:$0xff] }
 0x5d4   :  { %v1246_v34 = vmul.f32 %v11323_v32, %v11323_v32 }
 0x5d5   :  { %v1245_v35 = vmul.f32 %v11325_v33, %v11325_v33  ;;  %9810 = vmatprep.subr.bf16.mxu0 %v9809_v31 }
 0x5d6   :  { %1249 = vadd.xlane.f32.xlu1 %v1246_v34  ;;  %9812 = vmatpush3.bf16.msra.mxu0 %v9809_v31  ;;  %v1497_v31 = vld [vmem:[#allocation2 + $0x488] sm:$0xff] }
 0x5d7   :  { %1247 = vadd.xlane.f32.xlu0 %v1245_v35  ;;  %9846 = vmatprep.subr.bf16.mxu0 %v9845_v54 }
 0x663   :  { %v1250_v9 = vpop.xlane.xlu1 %1249 }
 0x664   :  { %v1252_v11 = vmul.f32 0.0078125, %v1250_v9  ;;  %v1248_v12 = vpop.xlane.xlu0 %1247  ;;  %v9823_v9 = vpack.c.bf16 %v1487_v5, %v1484_v3 }
 0x665   :  { %v1251_v13 = vmul.f32 0.0078125, %v1248_v12 }
 0x666   :  { %v1254_v14 = vadd.f32 1e-05, %v1252_v11 }
 0x667   :  { %v1253_v15 = vadd.f32 1e-05, %v1251_v13 }
 0x668   :  { %10757 = vrsqrt.f32 %v1254_v14 }
 0x669   :  { %10759 = vrsqrt.f32 %v1253_v15 }
 0x672   :  { %v10758_v16 = vpop.eup %10757 }
 0x673   :  { %v10760_v18 = vpop.eup %10759  ;;  %v1258_v19 = vmul.f32 %v10758_v16, %v11323_v32  ;;  %v7879_v32 = vld [vmem:[%s12049_s6 + $0x6] ss:$0 sm:$0xff] }
 0x674   :  { %v1257_v24 = vmul.f32 %v10760_v18, %v11325_v33 }
 0x675   :  { %v1264_v27 = vmul.f32 %v7877_v17, %v1258_v19  ;;  %v1491_v19 = vld [vmem:[#allocation2 + $0x428] sm:$0xff] }
 0x676   :  { %v1263_v28 = vmul.f32 %v7877_v17, %v1257_v24  ;;  %v1494_v24 = vld [vmem:[#allocation2 + $0x458] sm:$0xff] }
 0x677   :  { %v1270_v10 = vadd.f32 %v7878_v25, %v1264_v27  ;;  %v1490_v27 = vld [vmem:[#allocation2 + $0x420] sm:$0xff] }
 0x678   :  { %v1269_v29 = vadd.f32 %v7878_v25, %v1263_v28  ;;  %v9825_v25 = vpack.c.bf16 %v1494_v24, %v1491_v19  ;;  %v1493_v28 = vld [vmem:[#allocation2 + $0x450] sm:$0xff] }
 0x67a   :  { %8708 = vmatprep.mubr.f32.mxu1 %v1269_v29 }
 0x67b   :  { %8709 = vmatmul.mubr.f32.vlgmr.msra.gmra.mrb[8].mxu1 %v1270_v10 }
 0x67c   :  { %1632 = vmatprep.mubr.f32.mxu1 %v11098_v0  ;;  %9816 = vmatpush1.bf16.msra.mxu1 %v9815_v53  ;;  %v1511_v53 = vld [vmem:[#allocation2 + $0x570] sm:$0xff] }
 0x67d   :  { %9818 = vmatprep.subr.bf16.mxu1 %v9817_v58  ;;  %v9839_v59 = vpack.c.bf16 %v1511_v53, %v1508_v52 }
 0x680   :  { %9820 = vmatpush1.bf16.msra.mxu1 %v9819_v62  ;;  %v9841_v62 = vpack.c.bf16 %v1518_v57, %v1515_v56 }
 0x681   :  { %9822 = vmatprep.subr.bf16.mxu1 %v9821_v4 }
 0x684   :  { %9824 = vmatpush1.bf16.msra.mxu1 %v9823_v9 }
 0x685   :  { %9826 = vmatprep.subr.bf16.mxu1 %v9825_v25 }
 0x74e   :  { %v8710_v33 = vpop.f32.mrb[8].mxu1 }
 0x74f   :  { %v1349_v34 = vadd.f32 %v8710_v33, %v7879_v32  ;;  %v1343_v35 = vpop.f32.mrb[9].mxu1 }
 0x750   :  { %v1344_v36 = vadd.f32 %v7879_v32, %v1343_v35  ;;  %v1500_v32 = vld [vmem:[#allocation2 + $0x4b8] sm:$0xff]  ;;  %v1499_v35 = vld [vmem:[#allocation2 + $0x4b0] sm:$0xff] }
 0x751   :  { %v1353_v38 = vmax.f32 %v1349_v34, 0.0  ;;  %v9829_v33 = vpack.c.bf16 %v1500_v32, %v1497_v31  ;;  %v1496_v34 = vld [vmem:[#allocation2 + $0x480] sm:$0xff] }
 0x752   :  { %v1352_v37 = vmax.f32 %v1344_v36, 0.0  ;;  %v1498_v36 = vld [vmem:[#allocation2 + $0x490] sm:$0xff] }
 0x754   :  { %8743 = vmatprep.mubr.f32.mxu0 %v1352_v37  ;;  %v9831_v37 = vpack.c.bf16 %v1499_v35, %v1496_v34 }
 0x755   :  { %8744 = vmatmul.mubr.f32.vlgmr.msra.gmra.mrb[10].mxu0 %v1353_v38  ;;  %v1501_v38 = vld [vmem:[#allocation2 + $0x4c0] sm:$0xff] }
 0x756   :  { %9848 = vmatpush3.bf16.msra.mxu0 %v9845_v54  ;;  %v1510_v54 = vld [vmem:[#allocation2 + $0x550] sm:$0xff] }
 0x757   :  { %9850 = vmatprep.subr.bf16.mxu0 %v9849_v63  ;;  %v9869_v58 = vpack.c.bf16 %v1513_v55, %v1510_v54 }
 0x75a   :  { %9852 = vmatpush3.bf16.msra.mxu0 %v9849_v63  ;;  %v1514_v63 = vld [vmem:[#allocation2 + $0x5a0] sm:$0xff] }
 0x75b   :  { %9854 = vmatprep.subr.bf16.mxu0 %v9853_v8  ;;  %v9843_v3 = vpack.c.bf16 %v1517_v1, %v1514_v63 }
 0x75e   :  { %9856 = vmatpush3.bf16.msra.mxu0 %v9853_v8 }
 0x828   :  { %v8745_v39 = vpop.f32.mrb[10].mxu0 }
 0x829   :  { %v1430_v40 = vadd.f32 %v8745_v39, %v7880_v51  ;;  %v1424_v41 = vpop.f32.mrb[11].mxu0  ;;  %v1506_v39 = vld [vmem:[#allocation2 + $0x518] sm:$0xff] }
 0x82a   :  { %v1425_v43 = vadd.f32 %v7880_v51, %v1424_v41  ;;  %v1503_v51 = vld [vmem:[#allocation2 + $0x4e8] sm:$0xff] }
 0x82b   :  { %v1434_v44 = vadd.f32 %v1430_v40, %v1270_v10  ;;  %v9827_v10 = vpack.c.bf16 %v1493_v28, %v1490_v27  ;;  %v9861_v40 = vpack.c.bf16 %v1501_v38, %v1498_v36  ;;  %v9833_v41 = vpack.c.bf16 %v1506_v39, %v1503_v51  ;;  %v7888_v28 = vld [vmem:[%s12049_s6 + $0x12] ss:$0 sm:$0xff] }
 0x82c   :  { %v1433_v45 = vadd.f32 %v1425_v43, %v1269_v29  ;;  %v1492_v29 = vld [vmem:[#allocation2 + $0x430] sm:$0xff]  ;;  %v1502_v43 = vld [vmem:[#allocation2 + $0x4e0] sm:$0xff] }
 0x82d   :  { %1439 = vadd.xlane.f32.xlu1 %v1434_v44  ;;  %v9857_v26 = vpack.c.bf16 %v1495_v30, %v1492_v29  ;;  %9828 = vmatpush1.bf16.msra.mxu1 %v9827_v10 }
 0x82e   :  { %1437 = vadd.xlane.f32.xlu0 %v1433_v45  ;;  %9830 = vmatprep.subr.bf16.mxu1 %v9829_v33 }
 0x82f   :  { %9858 = vmatprep.subr.bf16.mxu0 %v9857_v26 }
 0x830   :  { %9860 = vmatpush3.bf16.msra.mxu0 %v9857_v26 }
 0x831   :  { %9832 = vmatpush1.bf16.msra.mxu1 %v9831_v37  ;;  %9862 = vmatprep.subr.bf16.mxu0 %v9861_v40 }
 0x832   :  { %9834 = vmatprep.subr.bf16.mxu1 %v9833_v41 }
 0x834   :  { %9864 = vmatpush3.bf16.msra.mxu0 %v9861_v40 }
 0x8ba   :  { %v1440_v11 = vpop.xlane.xlu1 %1439 }
 0x8bb   :  { %v1442_v12 = vmul.f32 0.0078125, %v1440_v11  ;;  %v1438_v13 = vpop.xlane.xlu0 %1437 }
 0x8bc   :  { %v1441_v14 = vmul.f32 0.0078125, %v1438_v13 }
 0x8bd   :  { %v11346_v15 = vsub.f32 %v1434_v44, %v1442_v12  ;;  %v1505_v44 = vld [vmem:[#allocation2 + $0x510] sm:$0xff]  ;;  %v7881_v12 = vld [vmem:[%s12049_s6 + $0x8] ss:$0 sm:$0xff] }
 0x8be   :  { %v11348_v16 = vsub.f32 %v1433_v45, %v1441_v14  ;;  %v1504_v45 = vld [vmem:[#allocation2 + $0x4f0] sm:$0xff]  ;;  %v9835_v42 = vpack.c.bf16 %v1505_v44, %v1502_v43 }
 0x8bf   :  { %v1446_v17 = vmul.f32 %v11346_v15, %v11346_v15  ;;  %v9865_v49 = vpack.c.bf16 %v1507_v46, %v1504_v45 }
 0x8c0   :  { %v1445_v18 = vmul.f32 %v11348_v16, %v11348_v16  ;;  %9836 = vmatpush1.bf16.msra.mxu1 %v9835_v42 }
 0x8c1   :  { %1449 = vadd.xlane.f32.xlu1 %v1446_v17  ;;  %9866 = vmatprep.subr.bf16.mxu0 %v9865_v49 }
 0x8c2   :  { %1447 = vadd.xlane.f32.xlu0 %v1445_v18  ;;  %9838 = vmatprep.subr.bf16.mxu1 %v9837_v50  ;;  %v7882_v18 = vld [vmem:[%s12049_s6 + $0x9] ss:$0 sm:$0xff] }
 0x8c3   :  { %9868 = vmatpush3.bf16.msra.mxu0 %v9865_v49 }
 0x8c4   :  { %9870 = vmatprep.subr.bf16.mxu0 %v9869_v58  ;;  %9840 = vmatpush1.bf16.msra.mxu1 %v9839_v59 }
 0x8c5   :  { %9842 = vmatprep.subr.bf16.mxu1 %v9841_v62 }
 0x8c7   :  { %9872 = vmatpush3.bf16.msra.mxu0 %v9869_v58 }
 0x8c8   :  { %9874 = vmatprep.subr.bf16.mxu0 %v9873_v2  ;;  %9844 = vmatpush1.bf16.msra.mxu1 %v9843_v3 }
 0x8cb   :  { %9876 = vmatpush3.bf16.msra.mxu0 %v9873_v2 }
 0x94e   :  { %v1450_v4 = vpop.xlane.xlu1 %1449 }
 0x94f   :  { %v1452_v5 = vmul.f32 0.0078125, %v1450_v4  ;;  %v1448_v6 = vpop.xlane.xlu0 %1447 }
 0x950   :  { %v1451_v7 = vmul.f32 0.0078125, %v1448_v6 }
 0x951   :  { %v1454_v8 = vadd.f32 1e-05, %v1452_v5 }
 0x952   :  { %v1453_v9 = vadd.f32 1e-05, %v1451_v7 }
 0x953   :  { %10761 = vrsqrt.f32 %v1454_v8 }
 0x954   :  { %10763 = vrsqrt.f32 %v1453_v9 }
 0x95d   :  { %v10762_v11 = vpop.eup %10761 }
 0x95e   :  { %v10764_v13 = vpop.eup %10763  ;;  %v1458_v14 = vmul.f32 %v10762_v11, %v11346_v15  ;;  %v7884_v15 = vld [vmem:[%s12049_s6 + $0x10] ss:$0 sm:$0xff]  ;;  %v11422_v11 = vld [vmem:[%s12045_s2 + $0x8] sm:$0xff] }
 0x95f   :  { %v1457_v17 = vmul.f32 %v10764_v13, %v11348_v16  ;;  %v7886_v16 = vld [vmem:[%s12049_s6 + $0x11] ss:$0 sm:$0xff]  ;;  %v11428_v13 = vld [vmem:[%s12045_s2] sm:$0xff] }
 0x960   :  { %v1464_v19 = vmul.f32 %v7881_v12, %v1458_v14 }
 0x961   :  { %v1463_v24 = vmul.f32 %v7881_v12, %v1457_v17 }
 0x962   :  { %v11364_v27 = vadd.f32 %v7882_v18, %v1464_v19 }
 0x963   :  { %v11362_v25 = vadd.f32 %v7882_v18, %v1463_v24 }
 0x965   :  { %1633 = vmatmul.mubr.f32.vlgmr.msra.gmra.mrb[10].mxu1 %v11362_v25  ;;  %8778 = vmatprep.mubr.f32.mxu0 %v11362_v25 }
 0x966   :  { %8779 = vmatmul.mubr.f32.vlgmr.msra.gmra.mrb[12].mxu0 %v11364_v27  ;;  %1638 = vmatprep.mubr.f32.mxu1 %v11098_v0 }
 0x969   :  { %1639 = vmatmul.mubr.f32.gmra.mrb[12].mxu1 %v11364_v27 }
 0xa38   :  { %v1634_v29 = vpop.f32.mrb[10].mxu1 }
 0xa39   :  { %v11380_v10 = vadd.f32 %v7884_v15, %v1634_v29  ;;  %v1636_v30 = vpop.f32.mrb[11].mxu1  ;;  %v8780_v26 = vpop.f32.mrb[12].mxu0 }
 0xa3a   :  { %v1733_v31 = vadd.f32 %v7886_v16, %v1636_v30  ;;  %v1741_v32 = vadd.f32 %v8780_v26, %v7888_v28  ;;  %v1711_v33 = vpop.f32.mrb[13].mxu0 }
 0xa3b   :  { %v1740_v34 = vadd.f32 %v7888_v28, %v1711_v33  ;;  %8785 = vmatprep.mubr.f32.mxu1 %v11380_v10  ;;  %8827 = vmatprep.mubr.f32.mxu0 %v11380_v10 }
 0xa3c   :  { %v1640_v35 = vpop.f32.mrb[12].mxu1  ;;  %v1743_v36 = vmul.f32 %v11242_v20, %v1733_v31  ;;  %v2303_v37 = vmul.f32 %v11251_v23, %v1733_v31  ;;  %v1952_v38 = vmul.f32 %v11245_v21, %v1741_v32  ;;  %v1848_v39 = vmul.f32 %v11245_v21, %v1733_v31 }
 0xa3d   :  { %v1642_v51 = vpop.f32.mrb[13].mxu1  ;;  %v1951_v40 = vmul.f32 %v11245_v21, %v1740_v34  ;;  %v1846_v41 = vmul.f32 %v11242_v20, %v1740_v34  ;;  %v1847_v43 = vmul.f32 %v11242_v20, %v1741_v32  ;;  %v2115_v45 = vmul.f32 %v11248_v22, %v1733_v31 }
 0xa3e   :  { %v1734_v44 = vadd.f32 %v7886_v16, %v1642_v51  ;;  %v2218_v42 = vmul.f32 %v11248_v22, %v1740_v34  ;;  %v2219_v46 = vmul.f32 %v11248_v22, %v1741_v32  ;;  %v2406_v49 = vmul.f32 %v11251_v23, %v1740_v34 }
 0xa3f   :  { %v9885_v47 = vpack.c.bf16 %v1952_v38, %v1951_v40  ;;  %v11394_v48 = vpack.c.bf16 %v1847_v43, %v1846_v41  ;;  %v2407_v50 = vmul.f32 %v11251_v23, %v1741_v32  ;;  %v11408_v62 = vadd.f32 %v7884_v15, %v1640_v35 }
 0xa40   :  { %v1744_v52 = vmul.f32 %v11242_v20, %v1734_v44  ;;  %v2304_v53 = vmul.f32 %v11251_v23, %v1734_v44  ;;  %v1849_v54 = vmul.f32 %v11245_v21, %v1734_v44  ;;  %v2116_v55 = vmul.f32 %v11248_v22, %v1734_v44 }
 0xa41   :  { %v11402_v56 = vpack.c.bf16 %v2219_v46, %v2218_v42  ;;  %v11404_v57 = vpack.c.bf16 %v2407_v50, %v2406_v49 }
 0xa42   :  { %v9877_v58 = vpack.c.bf16 %v1744_v52, %v1743_v36  ;;  %v9901_v59 = vpack.c.bf16 %v2304_v53, %v2303_v37  ;;  %v9881_v60 = vpack.c.bf16 %v1849_v54, %v1848_v39  ;;  %v11406_v61 = vpack.c.bf16 %v2116_v55, %v2115_v45 }
 0xa44   :  { %9878 = vmatprep.subr.bf16.mxu1 %v9877_v58  ;;  %9902 = vmatprep.subr.bf16.mxu0 %v9901_v59 }
 0xa45   :  { %9880 = vmatpush3.bf16.xpose.msra.mxu1 %v9877_v58  ;;  %9904 = vmatpush3.bf16.xpose.msra.mxu0 %v9901_v59 }
 0xa46   :  { %9882 = vmatprep.subr.bf16.mxu1 %v9881_v60 }
 0xa4c   :  { %8786 = vmatmul.mubr.f32.vlgmr.msra.gmra.mrb[14].mxu1 %v11408_v62  ;;  %8828 = vmatmul.mubr.f32.vlgmr.msra.gmra.mrb[14].mxu0 %v11408_v62 }
 0xa4d   :  { %9884 = vmatpush3.bf16.xpose.msra.mxu1 %v9881_v60  ;;  %8792 = vmatprep.mubr.f32.mxu1 %v11380_v10 }
 0xa4e   :  { %9886 = vmatprep.subr.bf16.mxu1 %v9885_v47 }
 0xa54   :  { %8793 = vmatmul.mubr.f32.vlgmr.msra.gmra.mrb[16].mxu1 %v11408_v62 }
 0xa55   :  { %9888 = vmatpush3.bf16.msra.mxu1 %v9885_v47 }
 0xa56   :  { %9890 = vmatprep.subr.bf16.mxu1 %v11394_v48 }
 0xb1f   :  { %v8787_v63 = vpop.f32.mrb[14].mxu1  ;;  %v11415_v1 = vpop.f32.mrb[14].mxu0 }
 0xb20   :  { %v1811_v2 = vpop.f32.mrb[15].mxu1  ;;  %v11417_v3 = vpop.f32.mrb[15].mxu0  ;;  %v1821_v5 = vmul.f32 0.17677669, %v8787_v63 }
 0xb21   :  { %v1820_v8 = vmul.f32 0.17677669, %v1811_v2  ;;  %v2381_v2 = vmul.f32 0.17677669, %v11415_v1 }
 0xb22   :  { %v1823_v18 = vadd.f32 %v11422_v11, %v1821_v5 }
 0xb23   :  { %v1822_v24 = vadd.f32 %v11428_v13, %v1820_v8 }
 0xb24   :  { %v1827_v15 = vsel %vm485_vm8, %v1823_v18, -inf }
 0xb25   :  { %v1824_v16 = vsel %vm485_vm8, %v1822_v24, -inf }
 0xb27   :  { %v8794_v4 = vpop.f32.mrb[16].mxu1 }
 0xb28   :  { %v1926_v6 = vmul.f32 0.17677669, %v8794_v4  ;;  %v1916_v7 = vpop.f32.mrb[17].mxu1 }
 0xb29   :  { %v1925_v9 = vmul.f32 0.17677669, %v1916_v7 }
 0xb2a   :  { %v1928_v12 = vadd.f32 %v11422_v11, %v1926_v6  ;;  %v2380_v6 = vmul.f32 0.17677669, %v11417_v3 }
 0xb2b   :  { %v1927_v14 = vadd.f32 %v11428_v13, %v1925_v9 }
 0xb2c   :  { %v1932_v17 = vsel %vm485_vm8, %v1928_v12, -inf  ;;  %v2382_v9 = vadd.f32 %v11428_v13, %v2380_v6 }
 0xb2d   :  { %1933 = vmax.xlane.f32.xlu1 %v1932_v17  ;;  %v1929_v19 = vsel %vm485_vm8, %v1927_v14, -inf }
 0xb2e   :  { %1930 = vmax.xlane.f32.xlu0 %v1929_v19  ;;  %v2384_v3 = vsel %vm485_vm8, %v2382_v9, -inf }
 0xb31   :  { %1828 = vmax.xlane.f32.xlu1 %v1827_v15 }
 0xb32   :  { %1825 = vmax.xlane.f32.xlu0 %v1824_v16 }
 0xbba   :  { %v1934_v28 = vpop.xlane.xlu1 %1933 }
 0xbbb   :  { %v1936_v29 = vsub.f32 %v1928_v12, %v1934_v28  ;;  %v1931_v30 = vpop.xlane.xlu0 %1930 }
 0xbbc   :  { %v1935_v26 = vsub.f32 %v1927_v14, %v1931_v30 }
 0xbbd   :  { %v1939_v31 = vmul.f32 1.442695, %v1936_v29 }
 0xbbe   :  { %v1937_v32 = vmul.f32 1.442695, %v1935_v26  ;;  %v1829_v33 = vpop.xlane.xlu1 %1828 }
 0xbbf   :  { %10765 = vpow2.f32 %v1939_v31  ;;  %v1831_v34 = vsub.f32 %v1823_v18, %v1829_v33  ;;  %v1826_v35 = vpop.xlane.xlu0 %1825 }
 0xbc0   :  { %10767 = vpow2.f32 %v1937_v32  ;;  %v1830_v36 = vsub.f32 %v1822_v24, %v1826_v35 }
 0xbc1   :  { %v1834_v37 = vmul.f32 1.442695, %v1831_v34 }
 0xbc2   :  { %v1832_v38 = vmul.f32 1.442695, %v1830_v36 }
 0xbc3   :  { %10769 = vpow2.f32 %v1834_v37  ;;  %v1520_v37 = vld [vmem:[#allocation2 + $0x318] sm:$0xff] }
 0xbc4   :  { %10771 = vpow2.f32 %v1832_v38  ;;  %v1521_v38 = vld [vmem:[#allocation2 + $0x348] sm:$0xff] }
 0xbc9   :  { %v10766_v51 = vpop.eup %10765 }
 0xbca   :  { %v10768_v39 = vpop.eup %10767  ;;  %v1944_v40 = vsel %vm485_vm8, %v10766_v51, 0.0 }
 0xbcb   :  { %1945 = vadd.xlane.f32.xlu1 %v1944_v40  ;;  %v1941_v41 = vsel %vm485_vm8, %v10768_v39, 0.0  ;;  %v1523_v40 = vld [vmem:[#allocation2 + $0x3a8] sm:$0xff] }
 0xbcc   :  { %1942 = vadd.xlane.f32.xlu0 %v1941_v41 }
 0xbcd   :  { %v10770_v43 = vpop.eup %10769 }
 0xbce   :  { %v10772_v44 = vpop.eup %10771  ;;  %v1839_v45 = vsel %vm485_vm8, %v10770_v43, 0.0 }
 0xbcf   :  { %1840 = vadd.xlane.f32.xlu1 %v1839_v45  ;;  %v1836_v42 = vsel %vm485_vm8, %v10772_v44, 0.0 }
 0xbd0   :  { %1837 = vadd.xlane.f32.xlu0 %v1836_v42  ;;  %v1526_v42 = vld [vmem:[#allocation2 + $0x438] sm:$0xff] }
 0xc58   :  { %v1946_v46 = vpop.xlane.xlu1 %1945 }
 0xc59   :  { %10773 = vrcp.f32 %v1946_v46  ;;  %v1943_v47 = vpop.xlane.xlu0 %1942  ;;  %v1527_v46 = vld [vmem:[#allocation2 + $0x468] sm:$0xff] }
 0xc5a   :  { %10775 = vrcp.f32 %v1943_v47  ;;  %v9921_v47 = vpack.c.bf16 %v1527_v46, %v1526_v42  ;;  %v1547_v46 = vld [vmem:[#allocation2 + $0x530] sm:$0xff] }
 0xc5c   :  { %v1841_v50 = vpop.xlane.xlu1 %1840 }
 0xc5d   :  { %v1838_v49 = vpop.xlane.xlu0 %1837 }
 0xc5e   :  { %10777 = vrcp.f32 %v1838_v49  ;;  %v1528_v49 = vld [vmem:[#allocation2 + $0x498] sm:$0xff] }
 0xc5f   :  { %10779 = vrcp.f32 %v1841_v50  ;;  %v1529_v50 = vld [vmem:[#allocation2 + $0x4c8] sm:$0xff] }
 0xc63   :  { %v10774_v52 = vpop.eup %10773 }
 0xc64   :  { %v10776_v53 = vpop.eup %10775  ;;  %v1950_v55 = vmul.f32 %v10774_v52, %v10766_v51  ;;  %v1522_v51 = vld [vmem:[#allocation2 + $0x378] sm:$0xff]  ;;  %v9925_v52 = vpack.c.bf16 %v1529_v50, %v1528_v49  ;;  %v1548_v49 = vld [vmem:[#allocation2 + $0x560] sm:$0xff]  ;;  %v1549_v50 = vld [vmem:[#allocation2 + $0x590] sm:$0xff] }
 0xc65   :  { %v1949_v54 = vmul.f32 %v10776_v53, %v10768_v39  ;;  %v9909_v39 = vpack.c.bf16 %v1521_v38, %v1520_v37  ;;  %v9913_v41 = vpack.c.bf16 %v1523_v40, %v1522_v51  ;;  %v1530_v53 = vld [vmem:[#allocation2 + $0x4f8] sm:$0xff]  ;;  %v1543_v40 = vld [vmem:[#allocation2 + $0x470] sm:$0xff] }
 0xc67   :  { %8799 = vmatprep.mubr.msk.f32.mxu1 %vm485_vm8, %v1949_v54  ;;  %9910 = vmatprep.subr.bf16.mxu0 %v9909_v39  ;;  %v1531_v54 = vld [vmem:[#allocation2 + $0x528] sm:$0xff] }
 0xc68   :  { %v10778_v58 = vpop.eup %10777  ;;  %8800 = vmatmul.mubr.msk.f32.vlgmr.msra.gmra.mrb[18].mxu1 %vm485_vm8, %v1950_v55  ;;  %9912 = vmatpush3.bf16.msra.mxu0 %v9909_v39  ;;  %v9929_v55 = vpack.c.bf16 %v1531_v54, %v1530_v53  ;;  %v1542_v39 = vld [vmem:[#allocation2 + $0x440] sm:$0xff]  ;;  %v1551_v54 = vld [vmem:[#allocation2 + $0x5f0] sm:$0xff] }
 0xc69   :  { %9892 = vmatpush3.bf16.msra.mxu1 %v11394_v48  ;;  %v1844_v59 = vmul.f32 %v10778_v58, %v10772_v44  ;;  %v10780_v60 = vpop.eup %10779  ;;  %v1525_v44 = vld [vmem:[#allocation2 + $0x408] sm:$0xff]  ;;  %9914 = vmatprep.subr.bf16.mxu0 %v9913_v41  ;;  %v1532_v58 = vld [vmem:[#allocation2 + $0x558] sm:$0xff]  ;;  %v1550_v53 = vld [vmem:[#allocation2 + $0x5c0] sm:$0xff] }
 0xc6a   :  { %9894 = vmatprep.subr.bf16.mxu1 %v11406_v61  ;;  %v1845_v63 = vmul.f32 %v10780_v60, %v10770_v43  ;;  %v1524_v43 = vld [vmem:[#allocation2 + $0x3d8] sm:$0xff] }
 0xc6b   :  { %8806 = vmatprep.mubr.msk.f32.mxu1 %vm485_vm8, %v1844_v59  ;;  %v9917_v45 = vpack.c.bf16 %v1525_v44, %v1524_v43  ;;  %v1533_v59 = vld [vmem:[#allocation2 + $0x588] sm:$0xff]  ;;  %v1544_v43 = vld [vmem:[#allocation2 + $0x4a0] sm:$0xff]  ;;  %v1545_v44 = vld [vmem:[#allocation2 + $0x4d0] sm:$0xff] }
 0xc6c   :  { %9916 = vmatpush3.bf16.msra.mxu0 %v9913_v41  ;;  %v9933_v60 = vpack.c.bf16 %v1533_v59, %v1532_v58  ;;  %v9953_v41 = vpack.c.bf16 %v1543_v40, %v1542_v39  ;;  %v9957_v42 = vpack.c.bf16 %v1545_v44, %v1544_v43  ;;  %v2847_v58 = vld [vmem:[#allocation4 + $0x8] sm:$0xff]  ;;  %v2850_v59 = vld [vmem:[#allocation4 + $0x58] sm:$0xff]  ;;  %v2852_v44 = vld [vmem:[#allocation4 + $0xa0] sm:$0xff] }
 0xc6d   :  { %9918 = vmatprep.subr.bf16.mxu0 %v9917_v45 }
 0xc70   :  { %8807 = vmatmul.mubr.msk.f32.vlgmr.msra.gmra.mrb[18].mxu1 %vm485_vm8, %v1845_v63  ;;  %9920 = vmatpush3.bf16.msra.mxu0 %v9917_v45  ;;  %v1534_v63 = vld [vmem:[#allocation2 + $0x5b8] sm:$0xff]  ;;  %v1546_v45 = vld [vmem:[#allocation2 + $0x500] sm:$0xff] }
 0xc71   :  { %8813 = vmatprep.mubr.f32.mxu1 %v11380_v10  ;;  %9922 = vmatprep.subr.bf16.mxu0 %v9921_v47 }
 0xc72   :  { %9896 = vmatpush3.bf16.xpose.msra.mxu1 %v11406_v61 }
 0xc73   :  { %9898 = vmatprep.subr.bf16.mxu1 %v11402_v56 }
 0xc74   :  { %9924 = vmatpush3.bf16.msra.mxu0 %v9921_v47  ;;  %v9961_v47 = vpack.c.bf16 %v1547_v46, %v1546_v45  ;;  %v2862_v45 = vld [vmem:[#allocation4 + $0x198] sm:$0xff] }
 0xc75   :  { %9926 = vmatprep.subr.bf16.mxu0 %v9925_v52 }
 0xc78   :  { %9928 = vmatpush3.bf16.msra.mxu0 %v9925_v52  ;;  %v9965_v52 = vpack.c.bf16 %v1549_v50, %v1548_v49  ;;  %v2861_v49 = vld [vmem:[#allocation4 + $0x190] sm:$0xff]  ;;  %v2865_v50 = vld [vmem:[#allocation4 + $0x1e8] sm:$0xff] }
 0xc79   :  { %8814 = vmatmul.mubr.f32.vlgmr.msra.gmra.mrb[20].mxu1 %v11408_v62  ;;  %v2383_v62 = vadd.f32 %v11422_v11, %v2381_v2  ;;  %9930 = vmatprep.subr.bf16.mxu0 %v9929_v55 }
 0xc7a   :  { %9900 = vmatpush3.bf16.msra.mxu1 %v11402_v56 }
 0xc7b   :  { %9906 = vmatprep.subr.bf16.mxu1 %v11404_v57  ;;  %v2387_v1 = vsel %vm485_vm8, %v2383_v62, -inf }
 0xc7c   :  { %9932 = vmatpush3.bf16.msra.mxu0 %v9929_v55  ;;  %v9969_v55 = vpack.c.bf16 %v1551_v54, %v1550_v53 }
 0xc7d   :  { %9934 = vmatprep.subr.bf16.mxu0 %v9933_v60 }
 0xc80   :  { %9936 = vmatpush3.bf16.msra.mxu0 %v9933_v60  ;;  %v10005_v60 = vpack.c.bf16 %v2850_v59, %v2847_v58  ;;  %v2867_v58 = vld [vmem:[#allocation4 + $0x230] sm:$0xff]  ;;  %v2871_v59 = vld [vmem:[#allocation4 + $0x288] sm:$0xff] }
 0xd4c   :  { %v8815_v48 = vpop.f32.mrb[20].mxu1 }
 0xd4d   :  { %v2193_v4 = vmul.f32 0.17677669, %v8815_v48  ;;  %v2183_v5 = vpop.f32.mrb[21].mxu1  ;;  %v1535_v48 = vld [vmem:[#allocation2 + $0x5e8] sm:$0xff] }
 0xd4e   :  { %v2192_v7 = vmul.f32 0.17677669, %v2183_v5  ;;  %v9937_v2 = vpack.c.bf16 %v1535_v48, %v1534_v63  ;;  %v1552_v63 = vld [vmem:[#allocation2 + $0x328] sm:$0xff]  ;;  %v1553_v48 = vld [vmem:[#allocation2 + $0x358] sm:$0xff] }
 0xd4f   :  { %v2195_v10 = vadd.f32 %v11422_v11, %v2193_v4 }
 0xd50   :  { %v2194_v61 = vadd.f32 %v11428_v13, %v2192_v7  ;;  %9938 = vmatprep.subr.bf16.mxu0 %v9937_v2 }
 0xd51   :  { %v2199_v8 = vsel %vm485_vm8, %v2195_v10, -inf  ;;  %9940 = vmatpush3.bf16.msra.mxu0 %v9937_v2  ;;  %v1554_v2 = vld [vmem:[#allocation2 + $0x388] sm:$0xff] }
 0xd52   :  { %2200 = vmax.xlane.f32.xlu1 %v2199_v8  ;;  %v2196_v56 = vsel %vm485_vm8, %v2194_v61, -inf }
 0xd53   :  { %2197 = vmax.xlane.f32.xlu0 %v2196_v56 }
 0xd56   :  { %2388 = vmax.xlane.f32.xlu1 %v2387_v1 }
 0xd57   :  { %2385 = vmax.xlane.f32.xlu0 %v2384_v3 }
 0xddf   :  { %v2201_v12 = vpop.xlane.xlu1 %2200 }
 0xde0   :  { %v2203_v14 = vsub.f32 %v2195_v10, %v2201_v12  ;;  %v2198_v17 = vpop.xlane.xlu0 %2197 }
 0xde1   :  { %v2202_v18 = vsub.f32 %v2194_v61, %v2198_v17  ;;  %v7898_v17 = vld [vmem:[%s12049_s6 + $0x13] ss:$0 sm:$0xff] }
 0xde2   :  { %v2206_v19 = vmul.f32 1.442695, %v2203_v14 }
 0xde3   :  { %v2204_v24 = vmul.f32 1.442695, %v2202_v18  ;;  %v2389_v15 = vpop.xlane.xlu1 %2388 }
 0xde4   :  { %10781 = vpow2.f32 %v2206_v19  ;;  %v2391_v11 = vsub.f32 %v2383_v62, %v2389_v15  ;;  %v2386_v16 = vpop.xlane.xlu0 %2385 }
 0xde5   :  { %10783 = vpow2.f32 %v2204_v24  ;;  %v2390_v28 = vsub.f32 %v2382_v9, %v2386_v16  ;;  %v1536_v16 = vld [vmem:[#allocation2 + $0x320] sm:$0xff] }
 0xde6   :  { %v2394_v13 = vmul.f32 1.442695, %v2391_v11 }
 0xde7   :  { %v2392_v29 = vmul.f32 1.442695, %v2390_v28  ;;  %v1537_v28 = vld [vmem:[#allocation2 + $0x350] sm:$0xff] }
 0xde8   :  { %10785 = vpow2.f32 %v2394_v13  ;;  %v1538_v13 = vld [vmem:[#allocation2 + $0x380] sm:$0xff] }
 0xde9   :  { %10787 = vpow2.f32 %v2392_v29  ;;  %v9941_v29 = vpack.c.bf16 %v1537_v28, %v1536_v16 }
 0xdee   :  { %v11463_v30 = vpop.eup %10781 }
 0xdef   :  { %v10784_v26 = vpop.eup %10783  ;;  %v2211_v31 = vsel %vm485_vm8, %v11463_v30, 0.0 }
 0xdf0   :  { %2212 = vadd.xlane.f32.xlu1 %v2211_v31  ;;  %v2208_v32 = vsel %vm485_vm8, %v10784_v26, 0.0  ;;  %v1540_v31 = vld [vmem:[#allocation2 + $0x3e0] sm:$0xff] }
 0xdf1   :  { %2209 = vadd.xlane.f32.xlu0 %v2208_v32  ;;  %v1541_v32 = vld [vmem:[#allocation2 + $0x410] sm:$0xff] }
 0xdf2   :  { %v11468_v33 = vpop.eup %10785 }
 0xdf3   :  { %v10788_v34 = vpop.eup %10787  ;;  %v2399_v35 = vsel %vm485_vm8, %v11468_v33, 0.0 }
 0xdf4   :  { %2400 = vadd.xlane.f32.xlu1 %v2399_v35  ;;  %v2396_v36 = vsel %vm485_vm8, %v10788_v34, 0.0 }
 0xdf5   :  { %2397 = vadd.xlane.f32.xlu0 %v2396_v36 }
 0xe7d   :  { %v2213_v4 = vpop.xlane.xlu1 %2212 }
 0xe7e   :  { %10789 = vrcp.f32 %v2213_v4  ;;  %v2210_v5 = vpop.xlane.xlu0 %2209  ;;  %v9973_v4 = vpack.c.bf16 %v1553_v48, %v1552_v63 }
 0xe7f   :  { %10791 = vrcp.f32 %v2210_v5  ;;  %v1555_v5 = vld [vmem:[#allocation2 + $0x3b8] sm:$0xff] }
 0xe80   :  { %9974 = vmatprep.subr.bf16.mxu0 %v9973_v4 }
 0xe81   :  { %v2401_v7 = vpop.xlane.xlu1 %2400 }
 0xe82   :  { %v2398_v6 = vpop.xlane.xlu0 %2397 }
 0xe83   :  { %10793 = vrcp.f32 %v2398_v6  ;;  %v9977_v6 = vpack.c.bf16 %v1555_v5, %v1554_v2  ;;  %v2870_v2 = vld [vmem:[#allocation4 + $0x280] sm:$0xff]  ;;  %v2877_v5 = vld [vmem:[#allocation4 + $0x328] sm:$0xff] }
 0xe84   :  { %10795 = vrcp.f32 %v2401_v7  ;;  %v1556_v7 = vld [vmem:[#allocation2 + $0x3e8] sm:$0xff] }
 0xe88   :  { %v10790_v10 = vpop.eup %10789 }
 0xe89   :  { %v10792_v61 = vpop.eup %10791  ;;  %v2217_v62 = vmul.f32 %v10790_v10, %v11463_v30  ;;  %v1539_v30 = vld [vmem:[#allocation2 + $0x3b0] sm:$0xff]  ;;  %v1557_v10 = vld [vmem:[#allocation2 + $0x418] sm:$0xff] }
 0xe8a   :  { %v2216_v8 = vmul.f32 %v10792_v61, %v10784_v26  ;;  %v9945_v26 = vpack.c.bf16 %v1539_v30, %v1538_v13  ;;  %v9981_v61 = vpack.c.bf16 %v1557_v10, %v1556_v7  ;;  %v7901_v30 = vld [vmem:[%s12049_s6 + $0x14] ss:$0 sm:$0xff] }
 0xe8c   :  { %8820 = vmatprep.mubr.msk.f32.mxu1 %vm485_vm8, %v2216_v8  ;;  %v1558_v8 = vld [vmem:[#allocation2 + $0x448] sm:$0xff] }
 0xe8d   :  { %v10794_v56 = vpop.eup %10793  ;;  %8821 = vmatmul.mubr.msk.f32.vlgmr.msra.gmra.mrb[18].mxu1 %vm485_vm8, %v2217_v62  ;;  %v1559_v62 = vld [vmem:[#allocation2 + $0x478] sm:$0xff] }
 0xe8e   :  { %9908 = vmatpush3.bf16.msra.mxu1 %v11404_v57  ;;  %v2404_v9 = vmul.f32 %v10794_v56, %v10788_v34  ;;  %v10796_v1 = vpop.eup %10795  ;;  %v9985_v56 = vpack.c.bf16 %v1559_v62, %v1558_v8  ;;  %v2879_v8 = vld [vmem:[#allocation4 + $0x370] sm:$0xff]  ;;  %v2883_v62 = vld [vmem:[#allocation4 + $0x3c8] sm:$0xff] }
 0xe8f   :  { %v2405_v3 = vmul.f32 %v10796_v1, %v11468_v33  ;;  %9942 = vmatprep.subr.bf16.mxu1 %v9941_v29  ;;  %v9949_v33 = vpack.c.bf16 %v1541_v32, %v1540_v31  ;;  %v1561_v1 = vld [vmem:[#allocation2 + $0x4d8] sm:$0xff] }
 0xe90   :  { %8834 = vmatprep.mubr.msk.f32.mxu1 %vm485_vm8, %v2404_v9  ;;  %v1560_v9 = vld [vmem:[#allocation2 + $0x4a8] sm:$0xff] }
 0xe95   :  { %8835 = vmatmul.mubr.msk.f32.vlgmr.msra.gmra.mrb[18].mxu1 %vm485_vm8, %v2405_v3  ;;  %v9989_v3 = vpack.c.bf16 %v1561_v1, %v1560_v9 }
 0xe96   :  { %9944 = vmatpush3.bf16.msra.mxu1 %v9941_v29 }
 0xe97   :  { %9946 = vmatprep.subr.bf16.mxu1 %v9945_v26 }
 0xe9a   :  { %9948 = vmatpush3.bf16.msra.mxu1 %v9945_v26 }
 0xe9b   :  { %9950 = vmatprep.subr.bf16.mxu1 %v9949_v33 }
 0xe9e   :  { %9952 = vmatpush3.bf16.msra.mxu1 %v9949_v33  ;;  %v7902_v33 = vld [vmem:[%s12049_s6 + $0x15] ss:$0 sm:$0xff] }
 0xe9f   :  { %9954 = vmatprep.subr.bf16.mxu1 %v9953_v41 }
 0xea2   :  { %9956 = vmatpush3.bf16.msra.mxu1 %v9953_v41 }
 0xea3   :  { %9958 = vmatprep.subr.bf16.mxu1 %v9957_v42 }
 0xea6   :  { %9960 = vmatpush3.bf16.msra.mxu1 %v9957_v42 }
 0xea7   :  { %9962 = vmatprep.subr.bf16.mxu1 %v9961_v47 }
 0xeaa   :  { %9964 = vmatpush3.bf16.msra.mxu1 %v9961_v47  ;;  %v2858_v47 = vld [vmem:[#allocation4 + $0x140] sm:$0xff] }
 0xeab   :  { %9966 = vmatprep.subr.bf16.mxu1 %v9965_v52  ;;  %v10015_v53 = vpack.c.bf16 %v2861_v49, %v2858_v47  ;;  %v2872_v47 = vld [vmem:[#allocation4 + $0x290] sm:$0xff]  ;;  %v2875_v49 = vld [vmem:[#allocation4 + $0x2e0] sm:$0xff] }
 0xeae   :  { %9968 = vmatpush3.bf16.msra.mxu1 %v9965_v52  ;;  %v2868_v52 = vld [vmem:[#allocation4 + $0x238] sm:$0xff] }
 0xeaf   :  { %9970 = vmatprep.subr.bf16.mxu1 %v9969_v55  ;;  %v10017_v54 = vpack.c.bf16 %v2868_v52, %v2865_v50  ;;  %v10053_v50 = vpack.c.bf16 %v2875_v49, %v2872_v47  ;;  %v2878_v52 = vld [vmem:[#allocation4 + $0x330] sm:$0xff] }
 0xeb2   :  { %9972 = vmatpush3.bf16.msra.mxu1 %v9969_v55  ;;  %v2864_v55 = vld [vmem:[#allocation4 + $0x1e0] sm:$0xff] }
 0xeb3   :  { %10006 = vmatprep.subr.bf16.mxu1 %v10005_v60  ;;  %v2874_v60 = vld [vmem:[#allocation4 + $0x2d8] sm:$0xff]  ;;  %v10019_v63 = vpack.c.bf16 %v2867_v58, %v2864_v55  ;;  %v2884_v55 = vld [vmem:[#allocation4 + $0x3d0] sm:$0xff]  ;;  %v2887_v58 = vld [vmem:[#allocation4 + $0x420] sm:$0xff] }
 0xeb4   :  { %v10021_v48 = vpack.c.bf16 %v2874_v60, %v2871_v59  ;;  %v10061_v59 = vpack.c.bf16 %v2887_v58, %v2884_v55  ;;  %v2890_v60 = vld [vmem:[#allocation4 + $0x470] sm:$0xff] }
 0xf68   :  { %v8836_v12 = vpop.f32.mrb[18].mxu1 }
 0xf69   :  { %v2480_v14 = vpop.f32.mrb[19].mxu1 }
 0xf6a   :  { %8869 = vmatprep.mubr.f32.mxu0 %v2480_v14  ;;  %v1563_v14 = vld [vmem:[#allocation2 + $0x538] sm:$0xff] }
 0xf6b   :  { %8870 = vmatmul.mubr.f32.vlgmr.msra.gmra.mrb[16].mxu0 %v8836_v12  ;;  %v1562_v12 = vld [vmem:[#allocation2 + $0x508] sm:$0xff] }
 0xf6c   :  { %9976 = vmatpush3.bf16.msra.mxu0 %v9973_v4  ;;  %v2873_v4 = vld [vmem:[#allocation4 + $0x2d0] sm:$0xff] }
 0xf6d   :  { %9978 = vmatprep.subr.bf16.mxu0 %v9977_v6  ;;  %v10023_v7 = vpack.c.bf16 %v2873_v4, %v2870_v2  ;;  %v7913_v2 = vld [vmem:[#allocation6] ss:$0 sm:$0xff] }
 0xf70   :  { %9980 = vmatpush3.bf16.msra.mxu0 %v9977_v6  ;;  %v2880_v6 = vld [vmem:[#allocation4 + $0x378] sm:$0xff] }
 0xf71   :  { %9982 = vmatprep.subr.bf16.mxu0 %v9981_v61  ;;  %v10025_v10 = vpack.c.bf16 %v2880_v6, %v2877_v5  ;;  %v7914_v5 = vld [vmem:[#allocation6 + $0x1] ss:$0 sm:$0xff] }
 0xf74   :  { %9984 = vmatpush3.bf16.msra.mxu0 %v9981_v61  ;;  %v2876_v61 = vld [vmem:[#allocation4 + $0x320] sm:$0xff] }
 0xf75   :  { %9986 = vmatprep.subr.bf16.mxu0 %v9985_v56  ;;  %v10027_v9 = vpack.c.bf16 %v2879_v8, %v2876_v61 }
 0xf78   :  { %9988 = vmatpush3.bf16.msra.mxu0 %v9985_v56  ;;  %v2886_v56 = vld [vmem:[#allocation4 + $0x418] sm:$0xff] }
 0xf79   :  { %9990 = vmatprep.subr.bf16.mxu0 %v9989_v3  ;;  %v10029_v1 = vpack.c.bf16 %v2886_v56, %v2883_v62 }
 0xf7c   :  { %9992 = vmatpush3.bf16.msra.mxu0 %v9989_v3  ;;  %v2882_v3 = vld [vmem:[#allocation4 + $0x3c0] sm:$0xff] }
0x103e   :  { %v8871_v18 = vpop.f32.mrb[16].mxu0 }
0x103f   :  { %v2567_v19 = vadd.f32 %v8871_v18, %v7898_v17  ;;  %v2561_v24 = vpop.f32.mrb[17].mxu0  ;;  %v1564_v18 = vld [vmem:[#allocation2 + $0x568] sm:$0xff] }
0x1040   :  { %v2562_v57 = vadd.f32 %v7898_v17, %v2561_v24  ;;  %v9993_v17 = vpack.c.bf16 %v1563_v14, %v1562_v12  ;;  %v2885_v12 = vld [vmem:[#allocation4 + $0x410] sm:$0xff]  ;;  %v2889_v14 = vld [vmem:[#allocation4 + $0x468] sm:$0xff] }
0x1041   :  { %v2571_v15 = vadd.f32 %v2567_v19, %v11364_v27  ;;  %v1565_v19 = vld [vmem:[#allocation2 + $0x598] sm:$0xff] }
0x1042   :  { %v2570_v11 = vadd.f32 %v2562_v57, %v11362_v25  ;;  %9994 = vmatprep.subr.bf16.mxu0 %v9993_v17  ;;  %v9997_v24 = vpack.c.bf16 %v1565_v19, %v1564_v18  ;;  %v10031_v18 = vpack.c.bf16 %v2885_v12, %v2882_v3 }
0x1043   :  { %2576 = vadd.xlane.f32.xlu1 %v2571_v15  ;;  %9996 = vmatpush3.bf16.msra.mxu0 %v9993_v17  ;;  %v2892_v17 = vld [vmem:[#allocation4 + $0x4b8] sm:$0xff] }
0x1044   :  { %2574 = vadd.xlane.f32.xlu0 %v2570_v11  ;;  %9998 = vmatprep.subr.bf16.mxu0 %v9997_v24  ;;  %v10033_v19 = vpack.c.bf16 %v2892_v17, %v2889_v14 }
0x1047   :  { %10000 = vmatpush3.bf16.msra.mxu0 %v9997_v24  ;;  %v2888_v24 = vld [vmem:[#allocation4 + $0x460] sm:$0xff] }
0x10d0   :  { %v2577_v27 = vpop.xlane.xlu1 %2576 }
0x10d1   :  { %v2579_v34 = vmul.f32 0.0078125, %v2577_v27  ;;  %v2575_v25 = vpop.xlane.xlu0 %2574 }
0x10d2   :  { %v2578_v35 = vmul.f32 0.0078125, %v2575_v25  ;;  %v2849_v25 = vld [vmem:[#allocation4 + $0x50] sm:$0xff] }
0x10d3   :  { %v11485_v36 = vsub.f32 %v2571_v15, %v2579_v34  ;;  %v2846_v34 = vld [vmem:[#allocation4] sm:$0xff] }
0x10d4   :  { %v11487_v37 = vsub.f32 %v2570_v11, %v2578_v35  ;;  %v10007_v40 = vpack.c.bf16 %v2849_v25, %v2846_v34 }
0x10d5   :  { %v2583_v38 = vmul.f32 %v11485_v36, %v11485_v36 }
0x10d6   :  { %v2582_v51 = vmul.f32 %v11487_v37, %v11487_v37 }
0x10d7   :  { %2586 = vadd.xlane.f32.xlu1 %v2583_v38  ;;  %v2853_v38 = vld [vmem:[#allocation4 + $0xa8] sm:$0xff] }
0x10d8   :  { %2584 = vadd.xlane.f32.xlu0 %v2582_v51  ;;  %v2856_v51 = vld [vmem:[#allocation4 + $0xf8] sm:$0xff] }
0x10d9   :  { %v10009_v43 = vpack.c.bf16 %v2856_v51, %v2853_v38  ;;  %v2857_v38 = vld [vmem:[#allocation4 + $0x100] sm:$0xff] }
0x1164   :  { %v2587_v57 = vpop.xlane.xlu1 %2586 }
0x1165   :  { %v2589_v15 = vmul.f32 0.0078125, %v2587_v57  ;;  %v2585_v11 = vpop.xlane.xlu0 %2584  ;;  %v2891_v57 = vld [vmem:[#allocation4 + $0x4b0] sm:$0xff] }
0x1166   :  { %v2588_v16 = vmul.f32 0.0078125, %v2585_v11  ;;  %v11511_v11 = vld [vmem:[%s12044_s1] sm:$0xff] }
0x1167   :  { %v2591_v28 = vadd.f32 1e-05, %v2589_v15  ;;  %v10035_v15 = vpack.c.bf16 %v2891_v57, %v2888_v24 }
0x1168   :  { %v2590_v13 = vadd.f32 1e-05, %v2588_v16  ;;  %v11518_v16 = vld [vmem:[%s12044_s1 + $0x8] sm:$0xff] }
0x1169   :  { %10797 = vrsqrt.f32 %v2591_v28  ;;  %v1566_v28 = vld [vmem:[#allocation2 + $0x5c8] sm:$0xff] }
0x116a   :  { %10799 = vrsqrt.f32 %v2590_v13  ;;  %v1567_v13 = vld [vmem:[#allocation2 + $0x5f8] sm:$0xff] }
0x1173   :  { %v10798_v29 = vpop.eup %10797 }
0x1174   :  { %v10800_v26 = vpop.eup %10799  ;;  %v2595_v31 = vmul.f32 %v10798_v29, %v11485_v36  ;;  %v2855_v36 = vld [vmem:[#allocation4 + $0xf0] sm:$0xff]  ;;  %v10001_v29 = vpack.c.bf16 %v1567_v13, %v1566_v28 }
0x1175   :  { %v2594_v32 = vmul.f32 %v10800_v26, %v11487_v37  ;;  %v2859_v37 = vld [vmem:[#allocation4 + $0x148] sm:$0xff]  ;;  %v10011_v42 = vpack.c.bf16 %v2855_v36, %v2852_v44  ;;  %v2851_v26 = vld [vmem:[#allocation4 + $0x60] sm:$0xff]  ;;  %v2860_v44 = vld [vmem:[#allocation4 + $0x150] sm:$0xff] }
0x1176   :  { %v2601_v27 = vmul.f32 %v7901_v30, %v2595_v31  ;;  %v10013_v46 = vpack.c.bf16 %v2862_v45, %v2859_v37  ;;  %10002 = vmatprep.subr.bf16.mxu0 %v10001_v29  ;;  %v2863_v36 = vld [vmem:[#allocation4 + $0x1a0] sm:$0xff]  ;;  %v2866_v45 = vld [vmem:[#allocation4 + $0x1f0] sm:$0xff] }
0x1177   :  { %v2600_v35 = vmul.f32 %v7901_v30, %v2594_v32  ;;  %10004 = vmatpush3.bf16.msra.mxu0 %v10001_v29  ;;  %v2848_v30 = vld [vmem:[#allocation4 + $0x10] sm:$0xff]  ;;  %v10045_v37 = vpack.c.bf16 %v2863_v36, %v2860_v44  ;;  %v11563_v36 = vld [vmem:[%s12046_s3] sm:$0xff] }
0x1178   :  { %v11503_v41 = vadd.f32 %v7902_v33, %v2601_v27  ;;  %v10037_v31 = vpack.c.bf16 %v2851_v26, %v2848_v30  ;;  %v7905_v32 = vld [vmem:[%s12049_s6 + $0x16] ss:$0 sm:$0xff] }
0x1179   :  { %v11501_v39 = vadd.f32 %v7902_v33, %v2600_v35  ;;  %v2854_v35 = vld [vmem:[#allocation4 + $0xb0] sm:$0xff] }
0x117a   :  { %10038 = vmatprep.subr.bf16.mxu0 %v10037_v31 }
0x117b   :  { %8904 = vmatprep.mubr.f32.mxu1 %v11501_v39 }
0x117c   :  { %8905 = vmatmul.mubr.f32.vlgmr.msra.gmra.mrb[22].mxu1 %v11503_v41 }
0x117d   :  { %10008 = vmatpush1.bf16.msra.mxu1 %v10007_v40  ;;  %3070 = vmatprep.mubr.f32.mxu1 %v11098_v0 }
0x117e   :  { %10010 = vmatprep.subr.bf16.mxu1 %v10009_v43  ;;  %v10041_v43 = vpack.c.bf16 %v2857_v38, %v2854_v35 }
0x1181   :  { %10012 = vmatpush1.bf16.msra.mxu1 %v10011_v42  ;;  %v2869_v42 = vld [vmem:[#allocation4 + $0x240] sm:$0xff] }
0x1182   :  { %10014 = vmatprep.subr.bf16.mxu1 %v10013_v46  ;;  %v10049_v46 = vpack.c.bf16 %v2869_v42, %v2866_v45 }
0x1185   :  { %10016 = vmatpush1.bf16.msra.mxu1 %v10015_v53  ;;  %v2881_v53 = vld [vmem:[#allocation4 + $0x380] sm:$0xff] }
0x1186   :  { %10018 = vmatprep.subr.bf16.mxu1 %v10017_v54  ;;  %v10057_v54 = vpack.c.bf16 %v2881_v53, %v2878_v52 }
0x1189   :  { %10020 = vmatpush1.bf16.msra.mxu1 %v10019_v63  ;;  %v2893_v63 = vld [vmem:[#allocation4 + $0x4c0] sm:$0xff] }
0x118a   :  { %10022 = vmatprep.subr.bf16.mxu1 %v10021_v48  ;;  %v10065_v48 = vpack.c.bf16 %v2893_v63, %v2890_v60 }
0x118d   :  { %10024 = vmatpush1.bf16.msra.mxu1 %v10023_v7 }
0x118e   :  { %10026 = vmatprep.subr.bf16.mxu1 %v10025_v10 }
0x1191   :  { %10028 = vmatpush1.bf16.msra.mxu1 %v10027_v9 }
0x1192   :  { %10030 = vmatprep.subr.bf16.mxu1 %v10029_v1 }
0x1195   :  { %10032 = vmatpush1.bf16.msra.mxu1 %v10031_v18 }
0x1196   :  { %10034 = vmatprep.subr.bf16.mxu1 %v10033_v19 }
0x1199   :  { %10036 = vmatpush1.bf16.msra.mxu1 %v10035_v15 }
0x119c   :  { %3071 = vmatmul.mubr.f32.vlgmr.msra.gmra.mrb[24].mxu1 %v11511_v11 }
0x119d   :  { %3076 = vmatprep.mubr.f32.mxu1 %v11098_v0 }
0x11a0   :  { %3077 = vmatmul.mubr.f32.gmra.mrb[26].mxu1 %v11518_v16 }
0x124f   :  { %v8906_v33 = vpop.f32.mrb[22].mxu1 }
0x1250   :  { %v2686_v27 = vadd.f32 %v8906_v33, %v7905_v32  ;;  %v2680_v34 = vpop.f32.mrb[23].mxu1 }
0x1251   :  { %v2681_v25 = vadd.f32 %v7905_v32, %v2680_v34 }
0x1252   :  { %v2690_v40 = vmax.f32 %v2686_v27, 0.0 }
0x1253   :  { %v2689_v51 = vmax.f32 %v2681_v25, 0.0 }
0x1255   :  { %8939 = vmatprep.mubr.f32.mxu0 %v2689_v51 }
0x1256   :  { %8940 = vmatmul.mubr.f32.vlgmr.msra.gmra.mrb[18].mxu0 %v2690_v40 }
0x1257   :  { %10040 = vmatpush3.bf16.msra.mxu0 %v10037_v31  ;;  %8974 = vmatprep.mubr.f32.mxu0 %v11511_v11 }
0x1258   :  { %10042 = vmatprep.subr.bf16.mxu0 %v10041_v43 }
0x125b   :  { %10044 = vmatpush3.bf16.msra.mxu0 %v10041_v43  ;;  %v11557_v43 = vld [vmem:[%s12046_s3 + $0x8] sm:$0xff] }
0x125c   :  { %10046 = vmatprep.subr.bf16.mxu0 %v10045_v37 }
0x125f   :  { %10048 = vmatpush3.bf16.msra.mxu0 %v10045_v37 }
0x1260   :  { %10050 = vmatprep.subr.bf16.mxu0 %v10049_v46 }
0x1263   :  { %10052 = vmatpush3.bf16.msra.mxu0 %v10049_v46 }
0x1264   :  { %10054 = vmatprep.subr.bf16.mxu0 %v10053_v50 }
0x1267   :  { %10056 = vmatpush3.bf16.msra.mxu0 %v10053_v50 }
0x1268   :  { %10058 = vmatprep.subr.bf16.mxu0 %v10057_v54 }
0x126b   :  { %10060 = vmatpush3.bf16.msra.mxu0 %v10057_v54 }
0x126c   :  { %10062 = vmatprep.subr.bf16.mxu0 %v10061_v59 }
0x126f   :  { %v3072_v4 = vpop.f32.mrb[24].mxu1  ;;  %10064 = vmatpush3.bf16.msra.mxu0 %v10061_v59 }
0x1270   :  { %v11525_v6 = vadd.f32 %v7913_v2, %v3072_v4  ;;  %v3074_v7 = vpop.f32.mrb[25].mxu1  ;;  %10066 = vmatprep.subr.bf16.mxu0 %v10065_v48 }
0x1271   :  { %v3170_v10 = vadd.f32 %v7914_v5, %v3074_v7 }
0x1272   :  { %8981 = vmatprep.mubr.f32.mxu1 %v11525_v6 }
0x1273   :  { %v3078_v61 = vpop.f32.mrb[26].mxu1  ;;  %10068 = vmatpush3.bf16.msra.mxu0 %v10065_v48  ;;  %v3180_v56 = vmul.f32 %v11242_v20, %v3170_v10  ;;  %v3740_v9 = vmul.f32 %v11251_v23, %v3170_v10  ;;  %v3285_v1 = vmul.f32 %v11245_v21, %v3170_v10  ;;  %v3552_v3 = vmul.f32 %v11248_v22, %v3170_v10 }
0x1274   :  { %v3080_v8 = vpop.f32.mrb[27].mxu1  ;;  %v11540_v28 = vadd.f32 %v7913_v2, %v3078_v61 }
0x1275   :  { %v3171_v62 = vadd.f32 %v7914_v5, %v3080_v8 }
0x1276   :  { %8975 = vmatmul.mubr.f32.vlgmr.msra.gmra.mrb[20].mxu0 %v11518_v16 }
0x1277   :  { %9023 = vmatprep.mubr.f32.mxu0 %v11525_v6  ;;  %v3181_v12 = vmul.f32 %v11242_v20, %v3171_v62  ;;  %v3741_v14 = vmul.f32 %v11251_v23, %v3171_v62  ;;  %v3286_v17 = vmul.f32 %v11245_v21, %v3171_v62  ;;  %v3553_v18 = vmul.f32 %v11248_v22, %v3171_v62 }
0x1279   :  { %v10069_v19 = vpack.c.bf16 %v3181_v12, %v3180_v56  ;;  %v10093_v24 = vpack.c.bf16 %v3741_v14, %v3740_v9  ;;  %v10073_v57 = vpack.c.bf16 %v3286_v17, %v3285_v1  ;;  %v11538_v15 = vpack.c.bf16 %v3553_v18, %v3552_v3  ;;  %v7915_v3 = vld [vmem:[#allocation6 + $0x2] ss:$0 sm:$0xff] }
0x127b   :  { %10070 = vmatprep.subr.bf16.mxu1 %v10069_v19  ;;  %10094 = vmatprep.subr.bf16.mxu0 %v10093_v24 }
0x127c   :  { %10072 = vmatpush3.bf16.xpose.msra.mxu1 %v10069_v19  ;;  %10096 = vmatpush3.bf16.xpose.msra.mxu0 %v10093_v24 }
0x127d   :  { %10074 = vmatprep.subr.bf16.mxu1 %v10073_v57 }
0x1283   :  { %8982 = vmatmul.mubr.f32.vlgmr.msra.gmra.mrb[28].mxu1 %v11540_v28  ;;  %9024 = vmatmul.mubr.f32.vlgmr.msra.gmra.mrb[22].mxu0 %v11540_v28 }
0x1284   :  { %10076 = vmatpush3.bf16.xpose.msra.mxu1 %v10073_v57  ;;  %8988 = vmatprep.mubr.f32.mxu1 %v11525_v6 }
0x128b   :  { %8989 = vmatmul.mubr.f32.vlgmr.msra.gmra.mrb[30].mxu1 %v11540_v28 }
0x1329   :  { %v11546_v13 = vpop.f32.mrb[18].mxu0 }
0x132a   :  { %v11548_v29 = vpop.f32.mrb[19].mxu0 }
0x1349   :  { %v8976_v30 = vpop.f32.mrb[20].mxu0 }
0x134a   :  { %v3149_v26 = vpop.f32.mrb[21].mxu0  ;;  %v3178_v12 = vadd.f32 %v8976_v30, %v7915_v3 }
0x134b   :  { %v3177_v14 = vadd.f32 %v7915_v3, %v3149_v26 }
0x134c   :  { %v3389_v18 = vmul.f32 %v11245_v21, %v3178_v12  ;;  %v3284_v57 = vmul.f32 %v11242_v20, %v3178_v12 }
0x134d   :  { %v3388_v17 = vmul.f32 %v11245_v21, %v3177_v14  ;;  %v3283_v24 = vmul.f32 %v11242_v20, %v3177_v14 }
0x134f   :  { %v10077_v19 = vpack.c.bf16 %v3389_v18, %v3388_v17  ;;  %v10081_v30 = vpack.c.bf16 %v3284_v57, %v3283_v24 }
0x1351   :  { %10078 = vmatprep.subr.bf16.mxu1 %v10077_v19 }
0x1352   :  { %10080 = vmatpush3.bf16.msra.mxu1 %v10077_v19 }
0x1353   :  { %10082 = vmatprep.subr.bf16.mxu1 %v10081_v30 }
0x1356   :  { %v8983_v31 = vpop.f32.mrb[28].mxu1  ;;  %v11550_v32 = vpop.f32.mrb[22].mxu0 }
0x1357   :  { %v3248_v33 = vpop.f32.mrb[29].mxu1  ;;  %v11552_v27 = vpop.f32.mrb[23].mxu0  ;;  %v3258_v25 = vmul.f32 0.17677669, %v8983_v31  ;;  %v3655_v31 = vmul.f32 %v11248_v22, %v3177_v14 }
0x1358   :  { %v3257_v51 = vmul.f32 0.17677669, %v3248_v33  ;;  %v3656_v33 = vmul.f32 %v11248_v22, %v3178_v12 }
0x1359   :  { %v3260_v42 = vadd.f32 %v3258_v25, %v11557_v43  ;;  %v3844_v25 = vmul.f32 %v11251_v23, %v3178_v12 }
0x135a   :  { %v3259_v47 = vadd.f32 %v3257_v51, %v11563_v36  ;;  %v10089_v26 = vpack.c.bf16 %v3656_v33, %v3655_v31 }
0x135b   :  { %v3264_v49 = vsel %vm485_vm8, %v3260_v42, -inf }
0x135c   :  { %v3261_v50 = vsel %vm485_vm8, %v3259_v47, -inf }
0x135e   :  { %v8990_v34 = vpop.f32.mrb[30].mxu1 }
0x135f   :  { %v3363_v35 = vmul.f32 0.17677669, %v8990_v34  ;;  %v3353_v38 = vpop.f32.mrb[31].mxu1  ;;  %v3843_v34 = vmul.f32 %v11251_v23, %v3177_v14  ;;  %v7906_v14 = vld [vmem:[%s12049_s6 + $0x17] ss:$0 sm:$0xff] }
0x1360   :  { %v3362_v40 = vmul.f32 0.17677669, %v3353_v38  ;;  %v2767_v24 = vadd.f32 %v11546_v13, %v7906_v14  ;;  %v2762_v31 = vadd.f32 %v7906_v14, %v11548_v29 }
0x1361   :  { %v3365_v44 = vadd.f32 %v3363_v35, %v11557_v43  ;;  %v11584_v35 = vpack.c.bf16 %v3844_v25, %v3843_v34 }
0x1362   :  { %v3364_v37 = vadd.f32 %v3362_v40, %v11563_v36  ;;  %v2771_v25 = vadd.f32 %v2767_v24, %v11503_v41 }
0x1363   :  { %v3369_v45 = vsel %vm485_vm8, %v3365_v44, -inf }
0x1364   :  { %3370 = vmax.xlane.f32.xlu1 %v3369_v45  ;;  %v3366_v46 = vsel %vm485_vm8, %v3364_v37, -inf }
0x1365   :  { %3367 = vmax.xlane.f32.xlu0 %v3366_v46 }
0x1368   :  { %3265 = vmax.xlane.f32.xlu1 %v3264_v49 }
0x1369   :  { %3262 = vmax.xlane.f32.xlu0 %v3261_v50 }
0x13f1   :  { %v3371_v52 = vpop.xlane.xlu1 %3370 }
0x13f2   :  { %v3373_v53 = vsub.f32 %v3365_v44, %v3371_v52  ;;  %v3368_v54 = vpop.xlane.xlu0 %3367 }
0x13f3   :  { %v3372_v55 = vsub.f32 %v3364_v37, %v3368_v54  ;;  %v3818_v54 = vmul.f32 0.17677669, %v11550_v32 }
0x13f4   :  { %v3376_v58 = vmul.f32 1.442695, %v3373_v53 }
0x13f5   :  { %v3374_v59 = vmul.f32 1.442695, %v3372_v55  ;;  %v3266_v60 = vpop.xlane.xlu1 %3265 }
0x13f6   :  { %10801 = vpow2.f32 %v3376_v58  ;;  %v3268_v63 = vsub.f32 %v3260_v42, %v3266_v60  ;;  %v3263_v48 = vpop.xlane.xlu0 %3262 }
0x13f7   :  { %10803 = vpow2.f32 %v3374_v59  ;;  %v3267_v2 = vsub.f32 %v3259_v47, %v3263_v48  ;;  %v3817_v59 = vmul.f32 0.17677669, %v11552_v27  ;;  %v3820_v48 = vadd.f32 %v3818_v54, %v11557_v43 }
0x13f8   :  { %v3271_v4 = vmul.f32 1.442695, %v3268_v63 }
0x13f9   :  { %v3269_v5 = vmul.f32 1.442695, %v3267_v2  ;;  %v3819_v2 = vadd.f32 %v3817_v59, %v11563_v36  ;;  %v3824_v32 = vsel %vm485_vm8, %v3820_v48, -inf  ;;  %v2895_v59 = vld [vmem:[#allocation4 + $0x68] sm:$0xff] }
0x13fa   :  { %10805 = vpow2.f32 %v3271_v4 }
0x13fb   :  { %10807 = vpow2.f32 %v3269_v5  ;;  %v3821_v27 = vsel %vm485_vm8, %v3819_v2, -inf }
0x1400   :  { %v10802_v7 = vpop.eup %10801 }
0x1401   :  { %v10804_v10 = vpop.eup %10803  ;;  %v3381_v61 = vsel %vm485_vm8, %v10802_v7, 0.0 }
0x1402   :  { %3382 = vadd.xlane.f32.xlu1 %v3381_v61  ;;  %v3378_v8 = vsel %vm485_vm8, %v10804_v10, 0.0 }
0x1403   :  { %3379 = vadd.xlane.f32.xlu0 %v3378_v8 }
0x1404   :  { %v10806_v62 = vpop.eup %10805 }
0x1405   :  { %v10808_v56 = vpop.eup %10807  ;;  %v3276_v9 = vsel %vm485_vm8, %v10806_v62, 0.0 }
0x1406   :  { %3277 = vadd.xlane.f32.xlu1 %v3276_v9  ;;  %v3273_v1 = vsel %vm485_vm8, %v10808_v56, 0.0 }
0x1407   :  { %3274 = vadd.xlane.f32.xlu0 %v3273_v1 }
0x148f   :  { %v3383_v38 = vpop.xlane.xlu1 %3382 }
0x1490   :  { %10809 = vrcp.f32 %v3383_v38  ;;  %v3380_v51 = vpop.xlane.xlu0 %3379 }
0x1491   :  { %10811 = vrcp.f32 %v3380_v51 }
0x1493   :  { %v3278_v44 = vpop.xlane.xlu1 %3277 }
0x1494   :  { %v3275_v40 = vpop.xlane.xlu0 %3274 }
0x1495   :  { %10813 = vrcp.f32 %v3275_v40 }
0x1496   :  { %10815 = vrcp.f32 %v3278_v44 }
0x149a   :  { %v10810_v37 = vpop.eup %10809 }
0x149b   :  { %v10812_v45 = vpop.eup %10811  ;;  %v3387_v46 = vmul.f32 %v10810_v37, %v10802_v7 }
0x149c   :  { %v3386_v42 = vmul.f32 %v10812_v45, %v10804_v10 }
0x149e   :  { %8995 = vmatprep.mubr.msk.f32.mxu1 %vm485_vm8, %v3386_v42 }
0x149f   :  { %v10814_v47 = vpop.eup %10813  ;;  %8996 = vmatmul.mubr.msk.f32.vlgmr.msra.gmra.mrb[32].mxu1 %vm485_vm8, %v3387_v46 }
0x14a0   :  { %10084 = vmatpush3.bf16.msra.mxu1 %v10081_v30  ;;  %v3281_v49 = vmul.f32 %v10814_v47, %v10808_v56  ;;  %v10816_v50 = vpop.eup %10815  ;;  %v2770_v30 = vadd.f32 %v2762_v31, %v11501_v39 }
0x14a1   :  { %10086 = vmatprep.subr.bf16.mxu1 %v11538_v15  ;;  %v3282_v52 = vmul.f32 %v10816_v50, %v10806_v62 }
0x14a2   :  { %9002 = vmatprep.mubr.msk.f32.mxu1 %vm485_vm8, %v3281_v49 }
0x14a7   :  { %9003 = vmatmul.mubr.msk.f32.vlgmr.msra.gmra.mrb[32].mxu1 %vm485_vm8, %v3282_v52 }
0x14a8   :  { %9009 = vmatprep.mubr.f32.mxu1 %v11525_v6 }
0x14a9   :  { %10088 = vmatpush3.bf16.xpose.msra.mxu1 %v11538_v15 }
0x14aa   :  { %10090 = vmatprep.subr.bf16.mxu1 %v10089_v26 }
0x14b0   :  { %9010 = vmatmul.mubr.f32.vlgmr.msra.gmra.mrb[34].mxu1 %v11540_v28 }
0x14b1   :  { %10092 = vmatpush3.bf16.msra.mxu1 %v10089_v26 }
0x14b2   :  { %10098 = vmatprep.subr.bf16.mxu1 %v11584_v35 }
0x1583   :  { %v9011_v53 = vpop.f32.mrb[34].mxu1 }
0x1584   :  { %v3630_v55 = vmul.f32 0.17677669, %v9011_v53  ;;  %v3620_v58 = vpop.f32.mrb[35].mxu1 }
0x1585   :  { %v3629_v60 = vmul.f32 0.17677669, %v3620_v58  ;;  %v2894_v58 = vld [vmem:[#allocation4 + $0x18] sm:$0xff] }
0x1586   :  { %v3632_v63 = vadd.f32 %v3630_v55, %v11557_v43 }
0x1587   :  { %v3631_v6 = vadd.f32 %v3629_v60, %v11563_v36  ;;  %v2896_v60 = vld [vmem:[#allocation4 + $0xb8] sm:$0xff] }
0x1588   :  { %v3636_v15 = vsel %vm485_vm8, %v3632_v63, -inf }
0x1589   :  { %3637 = vmax.xlane.f32.xlu1 %v3636_v15  ;;  %v3633_v28 = vsel %vm485_vm8, %v3631_v6, -inf }
0x158a   :  { %3634 = vmax.xlane.f32.xlu0 %v3633_v28  ;;  %v2899_v28 = vld [vmem:[#allocation4 + $0x1a8] sm:$0xff] }
0x158d   :  { %3825 = vmax.xlane.f32.xlu1 %v3824_v32  ;;  %v2901_v32 = vld [vmem:[#allocation4 + $0x248] sm:$0xff] }
0x158e   :  { %3822 = vmax.xlane.f32.xlu0 %v3821_v27 }
0x1616   :  { %v3638_v4 = vpop.xlane.xlu1 %3637 }
0x1617   :  { %v3640_v5 = vsub.f32 %v3632_v63, %v3638_v4  ;;  %v3635_v7 = vpop.xlane.xlu0 %3634  ;;  %v10101_v63 = vpack.c.bf16 %v2895_v59, %v2894_v58  ;;  %v2902_v4 = vld [vmem:[#allocation4 + $0x298] sm:$0xff] }
0x1618   :  { %v3639_v10 = vsub.f32 %v3631_v6, %v3635_v7  ;;  %v2897_v6 = vld [vmem:[#allocation4 + $0x108] sm:$0xff] }
0x1619   :  { %v3643_v61 = vmul.f32 1.442695, %v3640_v5  ;;  %v10105_v15 = vpack.c.bf16 %v2897_v6, %v2896_v60  ;;  %10102 = vmatprep.subr.bf16.mxu0 %v10101_v63  ;;  %v2903_v5 = vld [vmem:[#allocation4 + $0x2e8] sm:$0xff] }
0x161a   :  { %v3641_v8 = vmul.f32 1.442695, %v3639_v10  ;;  %v3826_v62 = vpop.xlane.xlu1 %3825  ;;  %10104 = vmatpush3.bf16.msra.mxu0 %v10101_v63  ;;  %v10117_v7 = vpack.c.bf16 %v2903_v5, %v2902_v4  ;;  %v2904_v10 = vld [vmem:[#allocation4 + $0x338] sm:$0xff]  ;;  %v2935_v4 = vld [vmem:[#allocation4 + $0x170] sm:$0xff] }
0x161b   :  { %10817 = vpow2.f32 %v3643_v61  ;;  %v3828_v43 = vsub.f32 %v3820_v48, %v3826_v62  ;;  %v3823_v56 = vpop.xlane.xlu0 %3822  ;;  %v2898_v48 = vld [vmem:[#allocation4 + $0x158] sm:$0xff]  ;;  %10106 = vmatprep.subr.bf16.mxu0 %v10105_v15  ;;  %v2905_v61 = vld [vmem:[#allocation4 + $0x388] sm:$0xff] }
0x161c   :  { %10819 = vpow2.f32 %v3641_v8  ;;  %v3827_v9 = vsub.f32 %v3819_v2, %v3823_v56  ;;  %v10109_v2 = vpack.c.bf16 %v2899_v28, %v2898_v48  ;;  %v10121_v8 = vpack.c.bf16 %v2905_v61, %v2904_v10  ;;  %v2906_v62 = vld [vmem:[#allocation4 + $0x3d8] sm:$0xff] }
0x161d   :  { %v3831_v36 = vmul.f32 1.442695, %v3828_v43  ;;  %v2907_v43 = vld [vmem:[#allocation4 + $0x428] sm:$0xff]  ;;  %v2936_v10 = vld [vmem:[#allocation4 + $0x1b8] sm:$0xff] }
0x161e   :  { %v3829_v1 = vmul.f32 1.442695, %v3827_v9  ;;  %10108 = vmatpush3.bf16.msra.mxu0 %v10105_v15  ;;  %v10125_v56 = vpack.c.bf16 %v2907_v43, %v2906_v62  ;;  %v2908_v9 = vld [vmem:[#allocation4 + $0x478] sm:$0xff]  ;;  %v2938_v43 = vld [vmem:[#allocation4 + $0x208] sm:$0xff] }
0x161f   :  { %10821 = vpow2.f32 %v3831_v36  ;;  %10110 = vmatprep.subr.bf16.mxu0 %v10109_v2  ;;  %v2909_v36 = vld [vmem:[#allocation4 + $0x4c8] sm:$0xff] }
0x1620   :  { %10823 = vpow2.f32 %v3829_v1  ;;  %v10129_v1 = vpack.c.bf16 %v2909_v36, %v2908_v9  ;;  %v2943_v36 = vld [vmem:[#allocation4 + $0x2b0] sm:$0xff] }
0x1622   :  { %10112 = vmatpush3.bf16.msra.mxu0 %v10109_v2 }
0x1625   :  { %v10818_v3 = vpop.eup %10817 }
0x1626   :  { %v10820_v12 = vpop.eup %10819  ;;  %v3648_v17 = vsel %vm485_vm8, %v10818_v3, 0.0 }
0x1627   :  { %3649 = vadd.xlane.f32.xlu1 %v3648_v17  ;;  %v3645_v18 = vsel %vm485_vm8, %v10820_v12, 0.0 }
0x1628   :  { %3646 = vadd.xlane.f32.xlu0 %v3645_v18 }
0x1629   :  { %v10822_v19 = vpop.eup %10821 }
0x162a   :  { %v10824_v57 = vpop.eup %10823  ;;  %v3836_v33 = vsel %vm485_vm8, %v10822_v19, 0.0 }
0x162b   :  { %3837 = vadd.xlane.f32.xlu1 %v3836_v33  ;;  %v3833_v34 = vsel %vm485_vm8, %v10824_v57, 0.0 }
0x162c   :  { %3834 = vadd.xlane.f32.xlu0 %v3833_v34  ;;  %v7910_v34 = vld [vmem:[%s12049_s6 + $0x19] ss:$0 sm:$0xff] }
0x162f   :  { %2776 = vadd.xlane.f32.xlu1 %v2771_v25 }
0x1630   :  { %2774 = vadd.xlane.f32.xlu0 %v2770_v30 }
0x16b4   :  { %v3650_v26 = vpop.xlane.xlu1 %3649 }
0x16b5   :  { %10825 = vrcp.f32 %v3650_v26  ;;  %v3647_v38 = vpop.xlane.xlu0 %3646 }
0x16b6   :  { %10827 = vrcp.f32 %v3647_v38 }
0x16b8   :  { %v3838_v13 = vpop.xlane.xlu1 %3837 }
0x16b9   :  { %v3835_v51 = vpop.xlane.xlu0 %3834 }
0x16ba   :  { %10829 = vrcp.f32 %v3835_v51 }
0x16bb   :  { %10831 = vrcp.f32 %v3838_v13 }
0x16bc   :  { %v2777_v29 = vpop.xlane.xlu1 %2776 }
0x16bd   :  { %v2779_v40 = vmul.f32 0.0078125, %v2777_v29  ;;  %v2775_v44 = vpop.xlane.xlu0 %2774 }
0x16be   :  { %v2778_v37 = vmul.f32 0.0078125, %v2775_v44  ;;  %v2929_v44 = vld [vmem:[#allocation4 + $0x80] sm:$0xff] }
0x16bf   :  { %v10826_v45 = vpop.eup %10825  ;;  %v11616_v42 = vsub.f32 %v2771_v25, %v2779_v40  ;;  %v2927_v40 = vld [vmem:[#allocation4 + $0x30] sm:$0xff] }
0x16c0   :  { %v10828_v41 = vpop.eup %10827  ;;  %v11618_v46 = vsub.f32 %v2770_v30, %v2778_v37  ;;  %v3654_v49 = vmul.f32 %v10826_v45, %v10818_v3  ;;  %v2926_v37 = vld [vmem:[#allocation4 + $0x28] sm:$0xff]  ;;  %v10165_v45 = vpack.c.bf16 %v2929_v44, %v2927_v40 }
0x16c1   :  { %v2783_v39 = vmul.f32 %v11616_v42, %v11616_v42  ;;  %v3653_v47 = vmul.f32 %v10828_v41, %v10820_v12  ;;  %v2931_v41 = vld [vmem:[#allocation4 + $0xd0] sm:$0xff]  ;;  %v2954_v44 = vld [vmem:[#allocation4 + $0x488] sm:$0xff] }
0x16c2   :  { %v2782_v50 = vmul.f32 %v11618_v46, %v11618_v46 }
0x16c3   :  { %2786 = vadd.xlane.f32.xlu1 %v2783_v39  ;;  %9016 = vmatprep.mubr.msk.f32.mxu1 %vm485_vm8, %v3653_v47  ;;  %v2933_v39 = vld [vmem:[#allocation4 + $0x120] sm:$0xff] }
0x16c4   :  { %v10830_v52 = vpop.eup %10829  ;;  %9017 = vmatmul.mubr.msk.f32.vlgmr.msra.gmra.mrb[32].mxu1 %vm485_vm8, %v3654_v49  ;;  %2784 = vadd.xlane.f32.xlu0 %v2782_v50  ;;  %v10169_v47 = vpack.c.bf16 %v2933_v39, %v2931_v41  ;;  %v2930_v49 = vld [vmem:[#allocation4 + $0xc8] sm:$0xff]  ;;  %v2932_v50 = vld [vmem:[#allocation4 + $0x118] sm:$0xff]  ;;  %v2911_v41 = vld [vmem:[#allocation4 + $0x70] sm:$0xff] }
0x16c5   :  { %10100 = vmatpush3.bf16.msra.mxu1 %v11584_v35  ;;  %v3841_v53 = vmul.f32 %v10830_v52, %v10824_v57  ;;  %v10832_v54 = vpop.eup %10831  ;;  %v2900_v35 = vld [vmem:[#allocation4 + $0x1f8] sm:$0xff]  ;;  %v10171_v52 = vpack.c.bf16 %v2932_v50, %v2930_v49  ;;  %v2912_v39 = vld [vmem:[#allocation4 + $0xc0] sm:$0xff] }
0x16c6   :  { %v3842_v55 = vmul.f32 %v10832_v54, %v10822_v19  ;;  %v10113_v27 = vpack.c.bf16 %v2901_v32, %v2900_v35  ;;  %v7909_v57 = vld [vmem:[%s12049_s6 + $0x18] ss:$0 sm:$0xff]  ;;  %v2914_v50 = vld [vmem:[#allocation4 + $0x160] sm:$0xff] }
0x16c7   :  { %9030 = vmatprep.mubr.msk.f32.mxu1 %vm485_vm8, %v3841_v53 }
0x16c8   :  { %10114 = vmatprep.subr.bf16.mxu0 %v10113_v27 }
0x16c9   :  { %10116 = vmatpush3.bf16.msra.mxu0 %v10113_v27 }
0x16ca   :  { %10118 = vmatprep.subr.bf16.mxu0 %v10117_v7 }
0x16cc   :  { %9031 = vmatmul.mubr.msk.f32.vlgmr.msra.gmra.mrb[32].mxu1 %vm485_vm8, %v3842_v55  ;;  %v7924_v55 = vld [vmem:[#allocation6 + $0x3] ss:$0 sm:$0xff] }
0x16cd   :  { %10120 = vmatpush3.bf16.msra.mxu0 %v10117_v7  ;;  %v2934_v7 = vld [vmem:[#allocation4 + $0x168] sm:$0xff] }
0x16ce   :  { %10122 = vmatprep.subr.bf16.mxu0 %v10121_v8  ;;  %v10175_v61 = vpack.c.bf16 %v2936_v10, %v2934_v7 }
0x16d1   :  { %10124 = vmatpush3.bf16.msra.mxu0 %v10121_v8  ;;  %v2941_v8 = vld [vmem:[#allocation4 + $0x260] sm:$0xff] }
0x16d2   :  { %10126 = vmatprep.subr.bf16.mxu0 %v10125_v56 }
0x16d5   :  { %10128 = vmatpush3.bf16.msra.mxu0 %v10125_v56  ;;  %v2940_v56 = vld [vmem:[#allocation4 + $0x258] sm:$0xff] }
0x16d6   :  { %10130 = vmatprep.subr.bf16.mxu0 %v10129_v1  ;;  %v10179_v9 = vpack.c.bf16 %v2940_v56, %v2938_v43  ;;  %v2917_v43 = vld [vmem:[#allocation4 + $0x250] sm:$0xff] }
0x16d9   :  { %10132 = vmatpush3.bf16.msra.mxu0 %v10129_v1  ;;  %v2945_v1 = vld [vmem:[#allocation4 + $0x300] sm:$0xff] }
0x16da   :  { %10166 = vmatprep.subr.bf16.mxu0 %v10165_v45 }
0x1750   :  { %v2787_v3 = vpop.xlane.xlu1 %2786 }
0x1751   :  { %v2789_v12 = vmul.f32 0.0078125, %v2787_v3  ;;  %v2785_v14 = vpop.xlane.xlu0 %2784  ;;  %v10181_v3 = vpack.c.bf16 %v2945_v1, %v2943_v36 }
0x1752   :  { %v2788_v17 = vmul.f32 0.0078125, %v2785_v14  ;;  %v2944_v14 = vld [vmem:[#allocation4 + $0x2f8] sm:$0xff] }
0x1753   :  { %v2791_v18 = vadd.f32 1e-05, %v2789_v12  ;;  %v2942_v12 = vld [vmem:[#allocation4 + $0x2a8] sm:$0xff] }
0x1754   :  { %v2790_v19 = vadd.f32 1e-05, %v2788_v17  ;;  %v2947_v17 = vld [vmem:[#allocation4 + $0x350] sm:$0xff] }
0x1755   :  { %10833 = vrsqrt.f32 %v2791_v18  ;;  %v10183_v18 = vpack.c.bf16 %v2944_v14, %v2942_v12  ;;  %v2919_v12 = vld [vmem:[#allocation4 + $0x2f0] sm:$0xff]  ;;  %v2920_v14 = vld [vmem:[#allocation4 + $0x340] sm:$0xff] }
0x1756   :  { %10835 = vrsqrt.f32 %v2790_v19  ;;  %v2949_v19 = vld [vmem:[#allocation4 + $0x3a0] sm:$0xff] }
0x175f   :  { %v10834_v24 = vpop.eup %10833 }
0x1760   :  { %v10836_v31 = vpop.eup %10835  ;;  %v2795_v33 = vmul.f32 %v10834_v24, %v11616_v42  ;;  %v2928_v42 = vld [vmem:[#allocation4 + $0x78] sm:$0xff]  ;;  %v2946_v24 = vld [vmem:[#allocation4 + $0x348] sm:$0xff] }
0x1761   :  { %v2794_v25 = vmul.f32 %v10836_v31, %v11618_v46  ;;  %v10167_v46 = vpack.c.bf16 %v2928_v42, %v2926_v37  ;;  %v10185_v31 = vpack.c.bf16 %v2949_v19, %v2947_v17  ;;  %v2956_v37 = vld [vmem:[#allocation4 + $0x4d8] sm:$0xff]  ;;  %v2910_v42 = vld [vmem:[#allocation4 + $0x20] sm:$0xff]  ;;  %v2923_v19 = vld [vmem:[#allocation4 + $0x430] sm:$0xff] }
0x1762   :  { %v2801_v30 = vmul.f32 %v7909_v57, %v2795_v33  ;;  %v2951_v33 = vld [vmem:[#allocation4 + $0x3f0] sm:$0xff]  ;;  %v10195_v45 = vpack.c.bf16 %v2956_v37, %v2954_v44 }
0x1763   :  { %v2800_v26 = vmul.f32 %v7909_v57, %v2794_v25  ;;  %v2948_v57 = vld [vmem:[#allocation4 + $0x398] sm:$0xff] }
0x1764   :  { %v2807_v38 = vadd.f32 %v7910_v34, %v2801_v30  ;;  %v10187_v25 = vpack.c.bf16 %v2948_v57, %v2946_v24 }
0x1765   :  { %v2806_v13 = vadd.f32 %v7910_v34, %v2800_v26  ;;  %v2953_v34 = vld [vmem:[#allocation4 + $0x440] sm:$0xff]  ;;  %v2950_v26 = vld [vmem:[#allocation4 + $0x3e8] sm:$0xff] }
0x1766   :  { %2812 = vadd.xlane.f32.xlu1 %v2807_v38  ;;  %v10189_v30 = vpack.c.bf16 %v2953_v34, %v2951_v33  ;;  %v2925_v33 = vld [vmem:[#allocation4 + $0x4d0] sm:$0xff] }
0x1767   :  { %2810 = vadd.xlane.f32.xlu0 %v2806_v13 }
0x179f   :  { %v9032_v51 = vpop.f32.mrb[32].mxu1 }
0x17a0   :  { %v3917_v29 = vpop.f32.mrb[33].mxu1 }
0x17a1   :  { %9065 = vmatprep.mubr.f32.mxu0 %v3917_v29 }
0x17a2   :  { %9066 = vmatmul.mubr.f32.vlgmr.msra.gmra.mrb[24].mxu0 %v9032_v51  ;;  %v2957_v51 = vld [vmem:[#allocation4 + $0x4e0] sm:$0xff] }
0x17a3   :  { %4189 = vmatprep.mubr.f32.mxu0 %v11098_v0  ;;  %10168 = vmatpush1.bf16.msra.mxu0 %v10167_v46  ;;  %v10133_v46 = vpack.c.bf16 %v2911_v41, %v2910_v42  ;;  %v7926_v42 = vld [vmem:[#allocation6 + $0x5] ss:$0 sm:$0xff] }
0x17a4   :  { %10170 = vmatprep.subr.bf16.mxu0 %v10169_v47  ;;  %v2913_v47 = vld [vmem:[#allocation4 + $0x110] sm:$0xff] }
0x17a5   :  { %v10137_v49 = vpack.c.bf16 %v2913_v47, %v2912_v39  ;;  %10134 = vmatprep.subr.bf16.mxu1 %v10133_v46 }
0x17a6   :  { %10136 = vmatpush3.bf16.msra.mxu1 %v10133_v46 }
0x17a7   :  { %10172 = vmatpush1.bf16.msra.mxu0 %v10171_v52  ;;  %v2915_v52 = vld [vmem:[#allocation4 + $0x1b0] sm:$0xff]  ;;  %10138 = vmatprep.subr.bf16.mxu1 %v10137_v49 }
0x17aa   :  { %10140 = vmatpush3.bf16.msra.mxu1 %v10137_v49  ;;  %v7928_v49 = vld [vmem:[#allocation6 + $0x7] ss:$0 sm:$0xff] }
0x17f3   :  { %v2813_v53 = vpop.xlane.xlu1 %2812 }
0x17f4   :  { %v2811_v54 = vpop.xlane.xlu0 %2810  ;;  %v2815_v58 = vmul.f32 0.0078125, %v2813_v53  ;;  %v10141_v53 = vpack.c.bf16 %v2915_v52, %v2914_v50  ;;  %v7929_v50 = vld [vmem:[#allocation6 + $0x8] ss:$0 sm:$0xff] }
0x17f5   :  { %v2814_v59 = vmul.f32 0.0078125, %v2811_v54 }
0x17f6   :  { %v11638_v48 = vsub.f32 %v2807_v38, %v2815_v58  ;;  %v2952_v38 = vld [vmem:[#allocation4 + $0x438] sm:$0xff]  ;;  %10142 = vmatprep.subr.bf16.mxu1 %v10141_v53 }
0x17f7   :  { %v11643_v2 = vsub.f32 %v2806_v13, %v2814_v59  ;;  %v2955_v13 = vld [vmem:[#allocation4 + $0x490] sm:$0xff]  ;;  %v10191_v29 = vpack.c.bf16 %v2952_v38, %v2950_v26  ;;  %10144 = vmatpush3.bf16.msra.mxu1 %v10141_v53 }
0x17f8   :  { %v2819_v32 = vmul.f32 %v11638_v48, %v11638_v48  ;;  %v10193_v40 = vpack.c.bf16 %v2957_v51, %v2955_v13 }
0x17f9   :  { %v2818_v27 = vmul.f32 %v11643_v2, %v11643_v2 }
0x1875   :  { %v9067_v60 = vpop.f32.mrb[24].mxu0 }
0x1876   :  { %v4004_v63 = vadd.f32 %v9067_v60, %v7924_v55  ;;  %v3998_v6 = vpop.f32.mrb[25].mxu0 }
0x1877   :  { %v3999_v15 = vadd.f32 %v7924_v55, %v3998_v6 }
0x1878   :  { %v11641_v28 = vadd.f32 %v4004_v63, %v11518_v16  ;;  %v2937_v16 = vld [vmem:[#allocation4 + $0x1c0] sm:$0xff] }
0x1879   :  { %v11646_v35 = vadd.f32 %v3999_v15, %v11511_v11  ;;  %v10173_v5 = vpack.c.bf16 %v2937_v16, %v2935_v4  ;;  %v2939_v11 = vld [vmem:[#allocation4 + $0x210] sm:$0xff] }
0x187a   :  { %4013 = vadd.xlane.f32.xlu1 %v11641_v28  ;;  %v10177_v62 = vpack.c.bf16 %v2941_v8, %v2939_v11  ;;  %v7912_v8 = vld [vmem:[#allocation7 + $0x1] ss:$0 sm:$0xff] }
0x187b   :  { %4011 = vadd.xlane.f32.xlu0 %v11646_v35  ;;  %10174 = vmatprep.subr.bf16.mxu0 %v10173_v5 }
0x187c   :  { %10176 = vmatpush1.bf16.msra.mxu0 %v10175_v61 }
0x187d   :  { %10178 = vmatprep.subr.bf16.mxu0 %v10177_v62  ;;  %v2916_v62 = vld [vmem:[#allocation4 + $0x200] sm:$0xff] }
0x187e   :  { %2822 = vadd.xlane.f32.xlu1 %v2819_v32 }
0x187f   :  { %2820 = vadd.xlane.f32.xlu0 %v2818_v27 }
0x1880   :  { %10180 = vmatpush1.bf16.msra.mxu0 %v10179_v9  ;;  %v10145_v9 = vpack.c.bf16 %v2917_v43, %v2916_v62 }
0x1881   :  { %10182 = vmatprep.subr.bf16.mxu0 %v10181_v3  ;;  %v2918_v3 = vld [vmem:[#allocation4 + $0x2a0] sm:$0xff] }
0x1882   :  { %10146 = vmatprep.subr.bf16.mxu1 %v10145_v9  ;;  %v10149_v17 = vpack.c.bf16 %v2919_v12, %v2918_v3 }
0x1883   :  { %10148 = vmatpush3.bf16.msra.mxu1 %v10145_v9 }
0x1884   :  { %10184 = vmatpush1.bf16.msra.mxu0 %v10183_v18  ;;  %v2921_v18 = vld [vmem:[#allocation4 + $0x390] sm:$0xff]  ;;  %10150 = vmatprep.subr.bf16.mxu1 %v10149_v17 }
0x1885   :  { %10186 = vmatprep.subr.bf16.mxu0 %v10185_v31  ;;  %v2924_v31 = vld [vmem:[#allocation4 + $0x480] sm:$0xff] }
0x1886   :  { %v10161_v34 = vpack.c.bf16 %v2925_v33, %v2924_v31 }
0x1887   :  { %10152 = vmatpush3.bf16.msra.mxu1 %v10149_v17 }
0x1888   :  { %10188 = vmatpush1.bf16.msra.mxu0 %v10187_v25 }
0x1889   :  { %10190 = vmatprep.subr.bf16.mxu0 %v10189_v30 }
0x188c   :  { %10192 = vmatpush1.bf16.msra.mxu0 %v10191_v29 }
0x188d   :  { %10194 = vmatprep.subr.bf16.mxu0 %v10193_v40  ;;  %v7925_v40 = vld [vmem:[#allocation6 + $0x4] ss:$0 sm:$0xff] }
0x1890   :  { %10196 = vmatpush1.bf16.msra.mxu0 %v10195_v45 }
0x1907   :  { %v4014_v54 = vpop.xlane.xlu1 %4013 }
0x1908   :  { %v4016_v55 = vmul.f32 0.0078125, %v4014_v54  ;;  %v4012_v58 = vpop.xlane.xlu0 %4011 }
0x1909   :  { %v4015_v59 = vmul.f32 0.0078125, %v4012_v58 }
0x190a   :  { %v11655_v60 = vsub.f32 %v11641_v28, %v4016_v55 }
0x190b   :  { %v11658_v63 = vsub.f32 %v11646_v35, %v4015_v59  ;;  %v2823_v6 = vpop.xlane.xlu1 %2822  ;;  %v7911_v35 = vld [vmem:[#allocation7] ss:$0 sm:$0xff] }
0x190c   :  { %v2825_v15 = vmul.f32 0.0078125, %v2823_v6  ;;  %v2821_v32 = vpop.xlane.xlu0 %2820  ;;  %v4020_v27 = vmul.f32 %v11655_v60, %v11655_v60 }
0x190d   :  { %v2824_v4 = vmul.f32 0.0078125, %v2821_v32  ;;  %v4019_v16 = vmul.f32 %v11658_v63, %v11658_v63 }
0x190e   :  { %v2827_v5 = vadd.f32 1e-05, %v2825_v15  ;;  %4023 = vadd.xlane.f32.xlu1 %v4020_v27 }
0x190f   :  { %v2826_v7 = vadd.f32 1e-05, %v2824_v4  ;;  %4021 = vadd.xlane.f32.xlu0 %v4019_v16 }
0x1910   :  { %10837 = vrsqrt.f32 %v2827_v5 }
0x1911   :  { %10839 = vrsqrt.f32 %v2826_v7 }
0x191a   :  { %v10838_v28 = vpop.eup %10837 }
0x191b   :  { %v10840_v10 = vpop.eup %10839  ;;  %v2831_v11 = vmul.f32 %v10838_v28, %v11638_v48  ;;  %v10153_v48 = vpack.c.bf16 %v2921_v18, %v2920_v14 }
0x191c   :  { %v2830_v61 = vmul.f32 %v10840_v10, %v11643_v2  ;;  %v2922_v2 = vld [vmem:[#allocation4 + $0x3e0] sm:$0xff] }
0x191d   :  { %v2837_v1 = vmul.f32 %v7911_v35, %v2831_v11  ;;  %10154 = vmatprep.subr.bf16.mxu1 %v10153_v48  ;;  %v10157_v57 = vpack.c.bf16 %v2923_v19, %v2922_v2 }
0x191e   :  { %v2836_v56 = vmul.f32 %v7911_v35, %v2830_v61  ;;  %10156 = vmatpush3.bf16.msra.mxu1 %v10153_v48  ;;  %v7927_v48 = vld [vmem:[#allocation6 + $0x6] ss:$0 sm:$0xff] }
0x191f   :  { %v11670_v24 = vadd.f32 %v7912_v8, %v2837_v1  ;;  %10158 = vmatprep.subr.bf16.mxu1 %v10157_v57 }
0x1920   :  { %v11666_v36 = vadd.f32 %v7912_v8, %v2836_v56 }
0x1922   :  { %4190 = vmatmul.mubr.f32.vlgmr.msra.gmra.mrb[26].mxu0 %v11666_v36  ;;  %10160 = vmatpush3.bf16.msra.mxu1 %v10157_v57 }
0x1923   :  { %4195 = vmatprep.mubr.f32.mxu0 %v11098_v0  ;;  %10162 = vmatprep.subr.bf16.mxu1 %v10161_v34 }
0x1926   :  { %4196 = vmatmul.mubr.f32.gmra.mrb[28].mxu0 %v11670_v24  ;;  %10164 = vmatpush3.bf16.msra.mxu1 %v10161_v34 }
0x199b   :  { %v4024_v25 = vpop.xlane.xlu1 %4023 }
0x199c   :  { %v4026_v30 = vmul.f32 0.0078125, %v4024_v25  ;;  %v4022_v26 = vpop.xlane.xlu0 %4021 }
0x199d   :  { %v4025_v38 = vmul.f32 0.0078125, %v4022_v26 }
0x199e   :  { %v4028_v13 = vadd.f32 1e-05, %v4026_v30 }
0x199f   :  { %v4027_v51 = vadd.f32 1e-05, %v4025_v38 }
0x19a0   :  { %10841 = vrsqrt.f32 %v4028_v13 }
0x19a1   :  { %10843 = vrsqrt.f32 %v4027_v51 }
0x19aa   :  { %v10842_v29 = vpop.eup %10841 }
0x19ab   :  { %v10844_v44 = vpop.eup %10843  ;;  %v4032_v37 = vmul.f32 %v10842_v29, %v11655_v60 }
0x19ac   :  { %v4031_v45 = vmul.f32 %v10844_v44, %v11658_v63  ;;  %v11723_v44 = vld [vmem:[%s12047_s4 + $0x8] sm:$0xff] }
0x19ad   :  { %v4038_v41 = vmul.f32 %v7925_v40, %v4032_v37 }
0x19ae   :  { %v4037_v39 = vmul.f32 %v7925_v40, %v4031_v45  ;;  %v11729_v45 = vld [vmem:[%s12047_s4] sm:$0xff] }
0x19af   :  { %v11677_v47 = vadd.f32 %v7926_v42, %v4038_v41 }
0x19b0   :  { %v11675_v46 = vadd.f32 %v7926_v42, %v4037_v39 }
0x19b2   :  { %9100 = vmatprep.mubr.f32.mxu1 %v11675_v46 }
0x19b3   :  { %9101 = vmatmul.mubr.f32.vlgmr.msra.gmra.mrb[36].mxu1 %v11677_v47 }
0x19f5   :  { %v4191_v52 = vpop.f32.mrb[26].mxu0 }
0x19f6   :  { %v4207_v53 = vadd.f32 %v7928_v49, %v4191_v52  ;;  %v4193_v54 = vpop.f32.mrb[27].mxu0 }
0x19f7   :  { %v4214_v55 = vadd.f32 %v7929_v50, %v4193_v54 }
0x19f8   :  { %v4217_v59 = vmul.f32 %v11242_v20, %v4207_v53  ;;  %v4777_v60 = vmul.f32 %v11251_v23, %v4207_v53  ;;  %v4322_v15 = vmul.f32 %v11245_v21, %v4207_v53  ;;  %v4589_v27 = vmul.f32 %v11248_v22, %v4207_v53 }
0x19f9   :  { %v4197_v58 = vpop.f32.mrb[28].mxu0  ;;  %v4425_v32 = vmul.f32 %v11245_v21, %v4214_v55  ;;  %v4320_v16 = vmul.f32 %v11242_v20, %v4214_v55  ;;  %v4692_v5 = vmul.f32 %v11248_v22, %v4214_v55  ;;  %v4880_v7 = vmul.f32 %v11251_v23, %v4214_v55 }
0x19fa   :  { %v4208_v63 = vadd.f32 %v7928_v49, %v4197_v58  ;;  %v4199_v6 = vpop.f32.mrb[29].mxu0 }
0x19fb   :  { %v4215_v4 = vadd.f32 %v7929_v50, %v4199_v6 }
0x19fc   :  { %v4218_v28 = vmul.f32 %v11242_v20, %v4208_v63  ;;  %v4778_v10 = vmul.f32 %v11251_v23, %v4208_v63  ;;  %v4323_v35 = vmul.f32 %v11245_v21, %v4208_v63  ;;  %v4590_v61 = vmul.f32 %v11248_v22, %v4208_v63 }
0x19fd   :  { %v4426_v11 = vmul.f32 %v11245_v21, %v4215_v4  ;;  %v4321_v8 = vmul.f32 %v11242_v20, %v4215_v4  ;;  %v4693_v62 = vmul.f32 %v11248_v22, %v4215_v4  ;;  %v4881_v43 = vmul.f32 %v11251_v23, %v4215_v4 }
0x19fe   :  { %v10197_v56 = vpack.c.bf16 %v4218_v28, %v4217_v59  ;;  %v10221_v9 = vpack.c.bf16 %v4778_v10, %v4777_v60  ;;  %v10201_v1 = vpack.c.bf16 %v4323_v35, %v4322_v15  ;;  %v11697_v3 = vpack.c.bf16 %v4590_v61, %v4589_v27 }
0x19ff   :  { %v10205_v12 = vpack.c.bf16 %v4426_v11, %v4425_v32  ;;  %v11699_v14 = vpack.c.bf16 %v4321_v8, %v4320_v16  ;;  %v11701_v17 = vpack.c.bf16 %v4693_v62, %v4692_v5  ;;  %v11703_v18 = vpack.c.bf16 %v4881_v43, %v4880_v7 }
0x1a00   :  { %10198 = vmatprep.subr.bf16.mxu1 %v10197_v56  ;;  %10222 = vmatprep.subr.bf16.mxu0 %v10221_v9 }
0x1a01   :  { %10200 = vmatpush3.bf16.xpose.msra.mxu1 %v10197_v56  ;;  %10224 = vmatpush3.bf16.xpose.msra.mxu0 %v10221_v9 }
0x1a02   :  { %10202 = vmatprep.subr.bf16.mxu1 %v10201_v1 }
0x1a86   :  { %v9102_v2 = vpop.f32.mrb[36].mxu1 }
0x1a87   :  { %v4116_v19 = vpop.f32.mrb[37].mxu1  ;;  %v11707_v31 = vadd.f32 %v9102_v2, %v7927_v48 }
0x1a88   :  { %v11705_v57 = vadd.f32 %v7927_v48, %v4116_v19 }
0x1a8a   :  { %9107 = vmatprep.mubr.f32.mxu1 %v11705_v57  ;;  %9149 = vmatprep.mubr.f32.mxu0 %v11705_v57 }
0x1a8b   :  { %9108 = vmatmul.mubr.f32.vlgmr.msra.gmra.mrb[38].mxu1 %v11707_v31  ;;  %9150 = vmatmul.mubr.f32.vlgmr.msra.gmra.mrb[30].mxu0 %v11707_v31 }
0x1a8c   :  { %10204 = vmatpush3.bf16.xpose.msra.mxu1 %v10201_v1  ;;  %9114 = vmatprep.mubr.f32.mxu1 %v11705_v57 }
0x1a8d   :  { %10206 = vmatprep.subr.bf16.mxu1 %v10205_v12 }
0x1a93   :  { %9115 = vmatmul.mubr.f32.vlgmr.msra.gmra.mrb[40].mxu1 %v11707_v31 }
0x1a94   :  { %10208 = vmatpush3.bf16.msra.mxu1 %v10205_v12 }
0x1a95   :  { %10210 = vmatprep.subr.bf16.mxu1 %v11699_v14 }
0x1b5e   :  { %v9109_v33 = vpop.f32.mrb[38].mxu1  ;;  %v11716_v34 = vpop.f32.mrb[30].mxu0 }
0x1b5f   :  { %v4285_v25 = vpop.f32.mrb[39].mxu1  ;;  %v11718_v30 = vpop.f32.mrb[31].mxu0  ;;  %v4295_v38 = vmul.f32 0.17677669, %v9109_v33 }
0x1b60   :  { %v4294_v29 = vmul.f32 0.17677669, %v4285_v25 }
0x1b61   :  { %v4297_v39 = vadd.f32 %v4295_v38, %v11723_v44  ;;  %v4855_v38 = vmul.f32 0.17677669, %v11716_v34 }
0x1b62   :  { %v4296_v50 = vadd.f32 %v4294_v29, %v11729_v45  ;;  %v4854_v29 = vmul.f32 0.17677669, %v11718_v30 }
0x1b63   :  { %v4301_v52 = vsel %vm485_vm8, %v4297_v39, -inf }
0x1b64   :  { %v4298_v53 = vsel %vm485_vm8, %v4296_v50, -inf }
0x1b66   :  { %v9116_v26 = vpop.f32.mrb[40].mxu1 }
0x1b67   :  { %v4400_v13 = vmul.f32 0.17677669, %v9116_v26  ;;  %v4390_v51 = vpop.f32.mrb[41].mxu1 }
0x1b68   :  { %v4399_v40 = vmul.f32 0.17677669, %v4390_v51 }
0x1b69   :  { %v4402_v37 = vadd.f32 %v4400_v13, %v11723_v44 }
0x1b6a   :  { %v4401_v42 = vadd.f32 %v4399_v40, %v11729_v45 }
0x1b6b   :  { %v4406_v41 = vsel %vm485_vm8, %v4402_v37, -inf }
0x1b6c   :  { %4407 = vmax.xlane.f32.xlu1 %v4406_v41  ;;  %v4403_v49 = vsel %vm485_vm8, %v4401_v42, -inf }
0x1b6d   :  { %4404 = vmax.xlane.f32.xlu0 %v4403_v49 }
0x1b70   :  { %4302 = vmax.xlane.f32.xlu1 %v4301_v52 }
0x1b71   :  { %4299 = vmax.xlane.f32.xlu0 %v4298_v53 }
0x1bf9   :  { %v4408_v54 = vpop.xlane.xlu1 %4407 }
0x1bfa   :  { %v4410_v55 = vsub.f32 %v4402_v37, %v4408_v54  ;;  %v4405_v58 = vpop.xlane.xlu0 %4404 }
0x1bfb   :  { %v4409_v59 = vsub.f32 %v4401_v42, %v4405_v58  ;;  %v4856_v42 = vadd.f32 %v4854_v29, %v11729_v45 }
0x1bfc   :  { %v4413_v60 = vmul.f32 1.442695, %v4410_v55 }
0x1bfd   :  { %v4411_v63 = vmul.f32 1.442695, %v4409_v59  ;;  %v4303_v6 = vpop.xlane.xlu1 %4302  ;;  %v4858_v30 = vsel %vm485_vm8, %v4856_v42, -inf }
0x1bfe   :  { %10845 = vpow2.f32 %v4413_v60  ;;  %v4305_v15 = vsub.f32 %v4297_v39, %v4303_v6  ;;  %v4300_v32 = vpop.xlane.xlu0 %4299 }
0x1bff   :  { %10847 = vpow2.f32 %v4411_v63  ;;  %v4304_v27 = vsub.f32 %v4296_v50, %v4300_v32 }
0x1c00   :  { %v4308_v4 = vmul.f32 1.442695, %v4305_v15 }
0x1c01   :  { %v4306_v16 = vmul.f32 1.442695, %v4304_v27 }
0x1c02   :  { %10849 = vpow2.f32 %v4308_v4 }
0x1c03   :  { %10851 = vpow2.f32 %v4306_v16 }
0x1c08   :  { %v10846_v5 = vpop.eup %10845 }
0x1c09   :  { %v10848_v7 = vpop.eup %10847  ;;  %v4418_v28 = vsel %vm485_vm8, %v10846_v5, 0.0 }
0x1c0a   :  { %4419 = vadd.xlane.f32.xlu1 %v4418_v28  ;;  %v4415_v10 = vsel %vm485_vm8, %v10848_v7, 0.0  ;;  %v2960_v28 = vld [vmem:[#allocation4 + $0xd8] sm:$0xff] }
0x1c0b   :  { %4416 = vadd.xlane.f32.xlu0 %v4415_v10 }
0x1c0c   :  { %v10850_v35 = vpop.eup %10849 }
0x1c0d   :  { %v10852_v61 = vpop.eup %10851  ;;  %v4313_v11 = vsel %vm485_vm8, %v10850_v35, 0.0 }
0x1c0e   :  { %4314 = vadd.xlane.f32.xlu1 %v4313_v11  ;;  %v4310_v8 = vsel %vm485_vm8, %v10852_v61, 0.0  ;;  %v2962_v11 = vld [vmem:[#allocation4 + $0x178] sm:$0xff] }
0x1c0f   :  { %4311 = vadd.xlane.f32.xlu0 %v4310_v8  ;;  %v2963_v8 = vld [vmem:[#allocation4 + $0x1c8] sm:$0xff] }
0x1c97   :  { %v4420_v62 = vpop.xlane.xlu1 %4419 }
0x1c98   :  { %10853 = vrcp.f32 %v4420_v62  ;;  %v4417_v43 = vpop.xlane.xlu0 %4416  ;;  %v10237_v62 = vpack.c.bf16 %v2963_v8, %v2962_v11  ;;  %v2981_v11 = vld [vmem:[#allocation4 + $0x270] sm:$0xff] }
0x1c99   :  { %10855 = vrcp.f32 %v4417_v43  ;;  %v2964_v43 = vld [vmem:[#allocation4 + $0x218] sm:$0xff] }
0x1c9b   :  { %v4315_v9 = vpop.xlane.xlu1 %4314 }
0x1c9c   :  { %v4312_v56 = vpop.xlane.xlu0 %4311 }
0x1c9d   :  { %10857 = vrcp.f32 %v4312_v56  ;;  %v2965_v56 = vld [vmem:[#allocation4 + $0x268] sm:$0xff] }
0x1c9e   :  { %10859 = vrcp.f32 %v4315_v9  ;;  %v10241_v9 = vpack.c.bf16 %v2965_v56, %v2964_v43  ;;  %v2983_v43 = vld [vmem:[#allocation4 + $0x310] sm:$0xff]  ;;  %v2984_v56 = vld [vmem:[#allocation4 + $0x360] sm:$0xff] }
0x1ca2   :  { %v10854_v1 = vpop.eup %10853 }
0x1ca3   :  { %v10856_v12 = vpop.eup %10855  ;;  %v4424_v2 = vmul.f32 %v10854_v1, %v10846_v5  ;;  %v2958_v5 = vld [vmem:[#allocation4 + $0x38] sm:$0xff] }
0x1ca4   :  { %v4423_v48 = vmul.f32 %v10856_v12, %v10848_v7  ;;  %v2959_v7 = vld [vmem:[#allocation4 + $0x88] sm:$0xff]  ;;  %v2966_v1 = vld [vmem:[#allocation4 + $0x2b8] sm:$0xff] }
0x1ca5   :  { %v10229_v10 = vpack.c.bf16 %v2959_v7, %v2958_v5  ;;  %v2967_v12 = vld [vmem:[#allocation4 + $0x308] sm:$0xff] }
0x1ca6   :  { %9121 = vmatprep.mubr.msk.f32.mxu1 %vm485_vm8, %v4423_v48  ;;  %v10245_v48 = vpack.c.bf16 %v2967_v12, %v2966_v1  ;;  %v2985_v1 = vld [vmem:[#allocation4 + $0x3b0] sm:$0xff] }
0x1ca7   :  { %v10858_v19 = vpop.eup %10857  ;;  %9122 = vmatmul.mubr.msk.f32.vlgmr.msra.gmra.mrb[42].mxu1 %vm485_vm8, %v4424_v2  ;;  %10230 = vmatprep.subr.bf16.mxu0 %v10229_v10  ;;  %v2968_v2 = vld [vmem:[#allocation4 + $0x358] sm:$0xff]  ;;  %v10281_v12 = vpack.c.bf16 %v2985_v1, %v2984_v56  ;;  %v7942_v56 = vld [vmem:[#allocation6 + $0xd] ss:$0 sm:$0xff] }
0x1ca8   :  { %10212 = vmatpush3.bf16.msra.mxu1 %v11699_v14  ;;  %v4318_v33 = vmul.f32 %v10858_v19, %v10852_v61  ;;  %v10860_v25 = vpop.eup %10859  ;;  %10232 = vmatpush3.bf16.msra.mxu0 %v10229_v10  ;;  %v2969_v19 = vld [vmem:[#allocation4 + $0x3a8] sm:$0xff] }
0x1ca9   :  { %10214 = vmatprep.subr.bf16.mxu1 %v11697_v3  ;;  %v4319_v26 = vmul.f32 %v10860_v25, %v10850_v35  ;;  %v2961_v35 = vld [vmem:[#allocation4 + $0x128] sm:$0xff]  ;;  %v2970_v25 = vld [vmem:[#allocation4 + $0x3f8] sm:$0xff] }
0x1caa   :  { %9128 = vmatprep.mubr.msk.f32.mxu1 %vm485_vm8, %v4318_v33  ;;  %v10233_v61 = vpack.c.bf16 %v2961_v35, %v2960_v28  ;;  %v10249_v33 = vpack.c.bf16 %v2969_v19, %v2968_v2  ;;  %v2987_v2 = vld [vmem:[#allocation4 + $0x450] sm:$0xff] }
0x1cac   :  { %10234 = vmatprep.subr.bf16.mxu0 %v10233_v61 }
0x1cad   :  { %10236 = vmatpush3.bf16.msra.mxu0 %v10233_v61  ;;  %v2980_v61 = vld [vmem:[#allocation4 + $0x220] sm:$0xff] }
0x1cae   :  { %10238 = vmatprep.subr.bf16.mxu0 %v10237_v62  ;;  %v10273_v8 = vpack.c.bf16 %v2981_v11, %v2980_v61  ;;  %v7941_v61 = vld [vmem:[#allocation6 + $0xc] ss:$0 sm:$0xff] }
0x1caf   :  { %9129 = vmatmul.mubr.msk.f32.vlgmr.msra.gmra.mrb[42].mxu1 %vm485_vm8, %v4319_v26  ;;  %v2971_v26 = vld [vmem:[#allocation4 + $0x448] sm:$0xff] }
0x1cb0   :  { %9135 = vmatprep.mubr.f32.mxu1 %v11705_v57 }
0x1cb1   :  { %10216 = vmatpush3.bf16.xpose.msra.mxu1 %v11697_v3  ;;  %10240 = vmatpush3.bf16.msra.mxu0 %v10237_v62  ;;  %v2982_v62 = vld [vmem:[#allocation4 + $0x2c0] sm:$0xff] }
0x1cb2   :  { %10218 = vmatprep.subr.bf16.mxu1 %v11701_v17  ;;  %10242 = vmatprep.subr.bf16.mxu0 %v10241_v9 }
0x1cb5   :  { %10244 = vmatpush3.bf16.msra.mxu0 %v10241_v9  ;;  %v10277_v9 = vpack.c.bf16 %v2983_v43, %v2982_v62 }
0x1cb6   :  { %10246 = vmatprep.subr.bf16.mxu0 %v10245_v48 }
0x1cb8   :  { %9136 = vmatmul.mubr.f32.vlgmr.msra.gmra.mrb[44].mxu1 %v11707_v31  ;;  %v4857_v31 = vadd.f32 %v4855_v38, %v11723_v44  ;;  %v2972_v38 = vld [vmem:[#allocation4 + $0x498] sm:$0xff] }
0x1cb9   :  { %10220 = vmatpush3.bf16.msra.mxu1 %v11701_v17  ;;  %10248 = vmatpush3.bf16.msra.mxu0 %v10245_v48  ;;  %v2986_v48 = vld [vmem:[#allocation4 + $0x400] sm:$0xff] }
0x1cba   :  { %10226 = vmatprep.subr.bf16.mxu1 %v11703_v18  ;;  %v4861_v34 = vsel %vm485_vm8, %v4857_v31, -inf  ;;  %10250 = vmatprep.subr.bf16.mxu0 %v10249_v33  ;;  %v10285_v19 = vpack.c.bf16 %v2987_v2, %v2986_v48 }
0x1cbd   :  { %10252 = vmatpush3.bf16.msra.mxu0 %v10249_v33  ;;  %v2988_v33 = vld [vmem:[#allocation4 + $0x4a0] sm:$0xff] }
0x1d8b   :  { %v9137_v14 = vpop.f32.mrb[44].mxu1 }
0x1d8c   :  { %v4667_v13 = vmul.f32 0.17677669, %v9137_v14  ;;  %v4657_v51 = vpop.f32.mrb[45].mxu1  ;;  %v10253_v14 = vpack.c.bf16 %v2971_v26, %v2970_v25  ;;  %v2989_v25 = vld [vmem:[#allocation4 + $0x4f0] sm:$0xff] }
0x1d8d   :  { %v4666_v40 = vmul.f32 0.17677669, %v4657_v51  ;;  %v10289_v26 = vpack.c.bf16 %v2989_v25, %v2988_v33  ;;  %v5284_v33 = vld [vmem:[#allocation4 + $0x508] sm:$0xff]  ;;  %v5287_v25 = vld [vmem:[#allocation4 + $0x558] sm:$0xff] }
0x1d8e   :  { %v4669_v57 = vadd.f32 %v4667_v13, %v11723_v44  ;;  %v2973_v13 = vld [vmem:[#allocation4 + $0x4e8] sm:$0xff]  ;;  %10254 = vmatprep.subr.bf16.mxu0 %v10253_v14 }
0x1d8f   :  { %v4668_v3 = vadd.f32 %v4666_v40, %v11729_v45  ;;  %v10257_v51 = vpack.c.bf16 %v2973_v13, %v2972_v38  ;;  %10256 = vmatpush3.bf16.msra.mxu0 %v10253_v14  ;;  %v2990_v14 = vld [vmem:[#allocation4 + $0x48] sm:$0xff]  ;;  %v2991_v38 = vld [vmem:[#allocation4 + $0x98] sm:$0xff] }
0x1d90   :  { %v4673_v37 = vsel %vm485_vm8, %v4669_v57, -inf  ;;  %v2992_v13 = vld [vmem:[#allocation4 + $0xe8] sm:$0xff] }
0x1d91   :  { %4674 = vmax.xlane.f32.xlu1 %v4673_v37  ;;  %v4670_v17 = vsel %vm485_vm8, %v4668_v3, -inf  ;;  %10258 = vmatprep.subr.bf16.mxu0 %v10257_v51 }
0x1d92   :  { %4671 = vmax.xlane.f32.xlu0 %v4670_v17 }
0x1d93   :  { %10260 = vmatpush3.bf16.msra.mxu0 %v10257_v51  ;;  %v10293_v51 = vpack.c.bf16 %v2991_v38, %v2990_v14  ;;  %v10325_v14 = vpack.c.bf16 %v5287_v25, %v5284_v33  ;;  %v5286_v38 = vld [vmem:[#allocation4 + $0x550] sm:$0xff] }
0x1d94   :  { %v5316_v33 = vld [vmem:[#allocation4 + $0x870] sm:$0xff] }
0x1d95   :  { %4862 = vmax.xlane.f32.xlu1 %v4861_v34  ;;  %10294 = vmatprep.subr.bf16.mxu0 %v10293_v51  ;;  %v5315_v25 = vld [vmem:[#allocation4 + $0x830] sm:$0xff] }
0x1d96   :  { %4859 = vmax.xlane.f32.xlu0 %v4858_v30 }
0x1e1e   :  { %v4675_v41 = vpop.xlane.xlu1 %4674 }
0x1e1f   :  { %v4677_v39 = vsub.f32 %v4669_v57, %v4675_v41  ;;  %v4672_v49 = vpop.xlane.xlu0 %4671 }
0x1e20   :  { %v4676_v50 = vsub.f32 %v4668_v3, %v4672_v49 }
0x1e21   :  { %v4680_v52 = vmul.f32 1.442695, %v4677_v39 }
0x1e22   :  { %v4678_v53 = vmul.f32 1.442695, %v4676_v50  ;;  %v4863_v54 = vpop.xlane.xlu1 %4862 }
0x1e23   :  { %10861 = vpow2.f32 %v4680_v52  ;;  %v4865_v44 = vsub.f32 %v4857_v31, %v4863_v54  ;;  %v4860_v55 = vpop.xlane.xlu0 %4859  ;;  %v7938_v52 = vld [vmem:[#allocation6 + $0x9] ss:$0 sm:$0xff] }
0x1e24   :  { %10863 = vpow2.f32 %v4678_v53  ;;  %v4864_v58 = vsub.f32 %v4856_v42, %v4860_v55 }
0x1e25   :  { %v4868_v45 = vmul.f32 1.442695, %v4865_v44 }
0x1e26   :  { %v4866_v59 = vmul.f32 1.442695, %v4864_v58 }
0x1e27   :  { %10865 = vpow2.f32 %v4868_v45  ;;  %v2974_v45 = vld [vmem:[#allocation4 + $0x40] sm:$0xff] }
0x1e28   :  { %10867 = vpow2.f32 %v4866_v59  ;;  %v2975_v59 = vld [vmem:[#allocation4 + $0x90] sm:$0xff] }
0x1e2d   :  { %v11764_v60 = vpop.eup %10861 }
0x1e2e   :  { %v10864_v63 = vpop.eup %10863  ;;  %v4685_v6 = vsel %vm485_vm8, %v11764_v60, 0.0 }
0x1e2f   :  { %4686 = vadd.xlane.f32.xlu1 %v4685_v6  ;;  %v4682_v15 = vsel %vm485_vm8, %v10864_v63, 0.0  ;;  %v2977_v6 = vld [vmem:[#allocation4 + $0x130] sm:$0xff] }
0x1e30   :  { %4683 = vadd.xlane.f32.xlu0 %v4682_v15 }
0x1e31   :  { %v11769_v32 = vpop.eup %10865 }
0x1e32   :  { %v10868_v27 = vpop.eup %10867  ;;  %v4873_v4 = vsel %vm485_vm8, %v11769_v32, 0.0 }
0x1e33   :  { %4874 = vadd.xlane.f32.xlu1 %v4873_v4  ;;  %v4870_v16 = vsel %vm485_vm8, %v10868_v27, 0.0 }
0x1e34   :  { %4871 = vadd.xlane.f32.xlu0 %v4870_v16 }
0x1ebc   :  { %v4687_v29 = vpop.xlane.xlu1 %4686 }
0x1ebd   :  { %10869 = vrcp.f32 %v4687_v29  ;;  %v4684_v40 = vpop.xlane.xlu0 %4683  ;;  %v2993_v29 = vld [vmem:[#allocation4 + $0x138] sm:$0xff] }
0x1ebe   :  { %10871 = vrcp.f32 %v4684_v40  ;;  %v10297_v40 = vpack.c.bf16 %v2993_v29, %v2992_v13  ;;  %v5285_v13 = vld [vmem:[#allocation4 + $0x510] sm:$0xff] }
0x1ec0   :  { %v4875_v3 = vpop.xlane.xlu1 %4874 }
0x1ec1   :  { %v4872_v57 = vpop.xlane.xlu0 %4871 }
0x1ec2   :  { %10873 = vrcp.f32 %v4872_v57  ;;  %v2994_v57 = vld [vmem:[#allocation4 + $0x188] sm:$0xff] }
0x1ec3   :  { %10875 = vrcp.f32 %v4875_v3  ;;  %v2995_v3 = vld [vmem:[#allocation4 + $0x1d8] sm:$0xff] }
0x1ec7   :  { %v10870_v37 = vpop.eup %10869 }
0x1ec8   :  { %v10872_v31 = vpop.eup %10871  ;;  %v4691_v42 = vmul.f32 %v10870_v37, %v11764_v60  ;;  %v2976_v60 = vld [vmem:[#allocation4 + $0xe0] sm:$0xff]  ;;  %v10301_v37 = vpack.c.bf16 %v2995_v3, %v2994_v57  ;;  %v5290_v57 = vld [vmem:[#allocation4 + $0x5a8] sm:$0xff]  ;;  %v5293_v3 = vld [vmem:[#allocation4 + $0x5f8] sm:$0xff] }
0x1ec9   :  { %v4690_v17 = vmul.f32 %v10872_v31, %v10864_v63  ;;  %v10261_v63 = vpack.c.bf16 %v2975_v59, %v2974_v45  ;;  %v10265_v15 = vpack.c.bf16 %v2977_v6, %v2976_v60  ;;  %v2996_v31 = vld [vmem:[#allocation4 + $0x228] sm:$0xff] }
0x1ecb   :  { %9142 = vmatprep.mubr.msk.f32.mxu1 %vm485_vm8, %v4690_v17  ;;  %v2997_v17 = vld [vmem:[#allocation4 + $0x278] sm:$0xff] }
0x1ecc   :  { %v10874_v34 = vpop.eup %10873  ;;  %9143 = vmatmul.mubr.msk.f32.vlgmr.msra.gmra.mrb[42].mxu1 %vm485_vm8, %v4691_v42  ;;  %v10305_v42 = vpack.c.bf16 %v2997_v17, %v2996_v31  ;;  %v10329_v31 = vpack.c.bf16 %v5293_v3, %v5290_v57  ;;  %v5292_v17 = vld [vmem:[#allocation4 + $0x5f0] sm:$0xff] }
0x1ecd   :  { %10228 = vmatpush3.bf16.msra.mxu1 %v11703_v18  ;;  %v4878_v30 = vmul.f32 %v10874_v34, %v10868_v27  ;;  %v10876_v41 = vpop.eup %10875  ;;  %v2979_v27 = vld [vmem:[#allocation4 + $0x1d0] sm:$0xff]  ;;  %v2998_v34 = vld [vmem:[#allocation4 + $0x2c8] sm:$0xff] }
0x1ece   :  { %v4879_v39 = vmul.f32 %v10876_v41, %v11769_v32  ;;  %v2978_v32 = vld [vmem:[#allocation4 + $0x180] sm:$0xff]  ;;  %10262 = vmatprep.subr.bf16.mxu1 %v10261_v63  ;;  %v5322_v57 = vld [vmem:[#allocation4 + $0x910] sm:$0xff] }
0x1ecf   :  { %9156 = vmatprep.mubr.msk.f32.mxu1 %vm485_vm8, %v4878_v30  ;;  %v10269_v4 = vpack.c.bf16 %v2979_v27, %v2978_v32  ;;  %v2999_v30 = vld [vmem:[#allocation4 + $0x318] sm:$0xff]  ;;  %v7940_v27 = vld [vmem:[#allocation6 + $0xb] ss:$0 sm:$0xff]  ;;  %v5321_v3 = vld [vmem:[#allocation4 + $0x8d0] sm:$0xff] }
0x1ed0   :  { %v10309_v41 = vpack.c.bf16 %v2999_v30, %v2998_v34  ;;  %v5294_v34 = vld [vmem:[#allocation4 + $0x600] sm:$0xff] }
0x1ed4   :  { %9157 = vmatmul.mubr.msk.f32.vlgmr.msra.gmra.mrb[42].mxu1 %vm485_vm8, %v4879_v39  ;;  %v3000_v39 = vld [vmem:[#allocation4 + $0x368] sm:$0xff] }
0x1ed5   :  { %10264 = vmatpush3.bf16.msra.mxu1 %v10261_v63  ;;  %v7939_v63 = vld [vmem:[#allocation6 + $0xa] ss:$0 sm:$0xff] }
0x1ed6   :  { %10266 = vmatprep.subr.bf16.mxu1 %v10265_v15 }
0x1ed9   :  { %10268 = vmatpush3.bf16.msra.mxu1 %v10265_v15 }
0x1eda   :  { %10270 = vmatprep.subr.bf16.mxu1 %v10269_v4 }
0x1edd   :  { %10272 = vmatpush3.bf16.msra.mxu1 %v10269_v4 }
0x1ede   :  { %10274 = vmatprep.subr.bf16.mxu1 %v10273_v8 }
0x1ee1   :  { %10276 = vmatpush3.bf16.msra.mxu1 %v10273_v8 }
0x1ee2   :  { %10278 = vmatprep.subr.bf16.mxu1 %v10277_v9 }
0x1ee5   :  { %10280 = vmatpush3.bf16.msra.mxu1 %v10277_v9 }
0x1ee6   :  { %10282 = vmatprep.subr.bf16.mxu1 %v10281_v12 }
0x1ee9   :  { %10284 = vmatpush3.bf16.msra.mxu1 %v10281_v12 }
0x1eea   :  { %10286 = vmatprep.subr.bf16.mxu1 %v10285_v19 }
0x1eed   :  { %10288 = vmatpush3.bf16.msra.mxu1 %v10285_v19 }
0x1eee   :  { %10290 = vmatprep.subr.bf16.mxu1 %v10289_v26 }
0x1ef1   :  { %10292 = vmatpush3.bf16.msra.mxu1 %v10289_v26  ;;  %v5283_v26 = vld [vmem:[#allocation4 + $0x500] sm:$0xff] }
0x1ef2   :  { %v10327_v29 = vpack.c.bf16 %v5286_v38, %v5283_v26  ;;  %10326 = vmatprep.subr.bf16.mxu1 %v10325_v14  ;;  %v5318_v14 = vld [vmem:[#allocation4 + $0x880] sm:$0xff]  ;;  %v5320_v38 = vld [vmem:[#allocation4 + $0x8c8] sm:$0xff] }
0x1fa7   :  { %v9158_v49 = vpop.f32.mrb[42].mxu1 }
0x1fa8   :  { %v4954_v50 = vpop.f32.mrb[43].mxu1 }
0x1fa9   :  { %9191 = vmatprep.mubr.f32.mxu0 %v4954_v50 }
0x1faa   :  { %9192 = vmatmul.mubr.f32.vlgmr.msra.gmra.mrb[32].mxu0 %v9158_v49  ;;  %v3001_v49 = vld [vmem:[#allocation4 + $0x3b8] sm:$0xff] }
0x1fab   :  { %10296 = vmatpush3.bf16.msra.mxu0 %v10293_v51  ;;  %v10313_v50 = vpack.c.bf16 %v3001_v49, %v3000_v39  ;;  %v5288_v51 = vld [vmem:[#allocation4 + $0x560] sm:$0xff]  ;;  %v5296_v39 = vld [vmem:[#allocation4 + $0x648] sm:$0xff]  ;;  %v5299_v49 = vld [vmem:[#allocation4 + $0x698] sm:$0xff] }
0x1fac   :  { %10298 = vmatprep.subr.bf16.mxu0 %v10297_v40 }
0x1faf   :  { %10300 = vmatpush3.bf16.msra.mxu0 %v10297_v40  ;;  %v10357_v40 = vpack.c.bf16 %v5288_v51, %v5285_v13  ;;  %v5323_v13 = vld [vmem:[#allocation4 + $0x918] sm:$0xff]  ;;  %v10377_v51 = vpack.c.bf16 %v5318_v14, %v5315_v25 }
0x1fb0   :  { %10302 = vmatprep.subr.bf16.mxu0 %v10301_v37 }
0x1fb3   :  { %10304 = vmatpush3.bf16.msra.mxu0 %v10301_v37  ;;  %v5289_v37 = vld [vmem:[#allocation4 + $0x5a0] sm:$0xff] }
0x1fb4   :  { %10306 = vmatprep.subr.bf16.mxu0 %v10305_v42  ;;  %v10331_v30 = vpack.c.bf16 %v5292_v17, %v5289_v37  ;;  %v5324_v37 = vld [vmem:[#allocation4 + $0x920] sm:$0xff]  ;;  %v5329_v17 = vld [vmem:[#allocation4 + $0x9b8] sm:$0xff] }
0x1fb7   :  { %10308 = vmatpush3.bf16.msra.mxu0 %v10305_v42  ;;  %v5291_v42 = vld [vmem:[#allocation4 + $0x5b0] sm:$0xff] }
0x1fb8   :  { %10310 = vmatprep.subr.bf16.mxu0 %v10309_v41 }
0x1fbb   :  { %10312 = vmatpush3.bf16.msra.mxu0 %v10309_v41  ;;  %v10361_v41 = vpack.c.bf16 %v5294_v34, %v5291_v42  ;;  %v10381_v42 = vpack.c.bf16 %v5324_v37, %v5321_v3 }
0x1fbc   :  { %10314 = vmatprep.subr.bf16.mxu0 %v10313_v50 }
0x1fbf   :  { %10316 = vmatpush3.bf16.msra.mxu0 %v10313_v50  ;;  %v5295_v50 = vld [vmem:[#allocation4 + $0x640] sm:$0xff] }
0x207d   :  { %v9193_v53 = vpop.f32.mrb[32].mxu0 }
0x207e   :  { %v5041_v54 = vadd.f32 %v9193_v53, %v7938_v52  ;;  %v5035_v44 = vpop.f32.mrb[33].mxu0  ;;  %v3003_v53 = vld [vmem:[#allocation4 + $0x458] sm:$0xff] }
0x207f   :  { %v5036_v55 = vadd.f32 %v7938_v52, %v5035_v44  ;;  %v3002_v52 = vld [vmem:[#allocation4 + $0x408] sm:$0xff] }
0x2080   :  { %v5045_v58 = vadd.f32 %v5041_v54, %v11677_v47  ;;  %v10317_v54 = vpack.c.bf16 %v3003_v53, %v3002_v52  ;;  %v10333_v52 = vpack.c.bf16 %v5299_v49, %v5296_v39  ;;  %v5298_v53 = vld [vmem:[#allocation4 + $0x690] sm:$0xff]  ;;  %v5325_v49 = vld [vmem:[#allocation4 + $0x960] sm:$0xff] }
0x2081   :  { %v5044_v18 = vadd.f32 %v5036_v55, %v11675_v46 }
0x2082   :  { %5050 = vadd.xlane.f32.xlu1 %v5045_v58  ;;  %10318 = vmatprep.subr.bf16.mxu0 %v10317_v54 }
0x2083   :  { %5048 = vadd.xlane.f32.xlu0 %v5044_v18  ;;  %10320 = vmatpush3.bf16.msra.mxu0 %v10317_v54  ;;  %v5297_v54 = vld [vmem:[#allocation4 + $0x650] sm:$0xff] }
0x210f   :  { %v5051_v47 = vpop.xlane.xlu1 %5050 }
0x2110   :  { %v5053_v16 = vmul.f32 0.0078125, %v5051_v47  ;;  %v5049_v46 = vpop.xlane.xlu0 %5048 }
0x2111   :  { %v5052_v5 = vmul.f32 0.0078125, %v5049_v46 }
0x2112   :  { %v11783_v7 = vsub.f32 %v5045_v58, %v5053_v16 }
0x2113   :  { %v11785_v28 = vsub.f32 %v5044_v18, %v5052_v5  ;;  %v3004_v5 = vld [vmem:[#allocation4 + $0x4a8] sm:$0xff] }
0x2114   :  { %v5057_v10 = vmul.f32 %v11783_v7, %v11783_v7 }
0x2115   :  { %v5056_v35 = vmul.f32 %v11785_v28, %v11785_v28 }
0x2116   :  { %5060 = vadd.xlane.f32.xlu1 %v5057_v10  ;;  %v3005_v10 = vld [vmem:[#allocation4 + $0x4f8] sm:$0xff] }
0x2117   :  { %5058 = vadd.xlane.f32.xlu0 %v5056_v35  ;;  %v10321_v35 = vpack.c.bf16 %v3005_v10, %v3004_v5  ;;  %v5303_v5 = vld [vmem:[#allocation4 + $0x6f0] sm:$0xff] }
0x2119   :  { %10322 = vmatprep.subr.bf16.mxu0 %v10321_v35 }
0x211a   :  { %10324 = vmatpush3.bf16.msra.mxu0 %v10321_v35  ;;  %v5306_v35 = vld [vmem:[#allocation4 + $0x740] sm:$0xff] }
0x211b   :  { %10358 = vmatprep.subr.bf16.mxu0 %v10357_v40 }
0x21a3   :  { %v5061_v44 = vpop.xlane.xlu1 %5060 }
0x21a4   :  { %v5063_v55 = vmul.f32 0.0078125, %v5061_v44  ;;  %v5059_v58 = vpop.xlane.xlu0 %5058  ;;  %v5300_v44 = vld [vmem:[#allocation4 + $0x6a0] sm:$0xff] }
0x21a5   :  { %v5062_v18 = vmul.f32 0.0078125, %v5059_v58  ;;  %v10335_v58 = vpack.c.bf16 %v5298_v53, %v5295_v50  ;;  %v5328_v50 = vld [vmem:[#allocation4 + $0x9b0] sm:$0xff] }
0x21a6   :  { %v5065_v45 = vadd.f32 1e-05, %v5063_v55  ;;  %v10365_v55 = vpack.c.bf16 %v5300_v44, %v5297_v54  ;;  %v10355_v53 = vpack.c.bf16 %v5328_v50, %v5325_v49 }
0x21a7   :  { %v5064_v59 = vadd.f32 1e-05, %v5062_v18 }
0x21a8   :  { %10877 = vrsqrt.f32 %v5065_v45 }
0x21a9   :  { %10879 = vrsqrt.f32 %v5064_v59 }
0x21b2   :  { %v10878_v60 = vpop.eup %10877 }
0x21b3   :  { %v10880_v6 = vpop.eup %10879  ;;  %v5069_v15 = vmul.f32 %v10878_v60, %v11783_v7 }
0x21b4   :  { %v5068_v32 = vmul.f32 %v10880_v6, %v11785_v28 }
0x21b5   :  { %v5075_v4 = vmul.f32 %v7939_v63, %v5069_v15 }
0x21b6   :  { %v5074_v47 = vmul.f32 %v7939_v63, %v5068_v32 }
0x21b7   :  { %v5081_v46 = vadd.f32 %v7940_v27, %v5075_v4  ;;  %v5305_v4 = vld [vmem:[#allocation4 + $0x738] sm:$0xff] }
0x21b8   :  { %v5080_v16 = vadd.f32 %v7940_v27, %v5074_v47  ;;  %v5302_v27 = vld [vmem:[#allocation4 + $0x6e8] sm:$0xff] }
0x21b9   :  { %v10337_v47 = vpack.c.bf16 %v5305_v4, %v5302_v27  ;;  %v7944_v4 = vld [vmem:[#allocation6 + $0xf] ss:$0 sm:$0xff] }
0x21ba   :  { %9226 = vmatprep.mubr.f32.mxu1 %v5080_v16 }
0x21bb   :  { %9227 = vmatmul.mubr.f32.vlgmr.msra.gmra.mrb[46].mxu1 %v5081_v46 }
0x21bc   :  { %5507 = vmatprep.mubr.f32.mxu1 %v11098_v0  ;;  %10328 = vmatpush1.bf16.msra.mxu1 %v10327_v29  ;;  %v10349_v29 = vpack.c.bf16 %v5323_v13, %v5320_v38 }
0x21bd   :  { %10330 = vmatprep.subr.bf16.mxu1 %v10329_v31  ;;  %v5326_v31 = vld [vmem:[#allocation4 + $0x968] sm:$0xff] }
0x21be   :  { %v10353_v39 = vpack.c.bf16 %v5329_v17, %v5326_v31 }
0x21c0   :  { %10332 = vmatpush1.bf16.msra.mxu1 %v10331_v30  ;;  %v5327_v30 = vld [vmem:[#allocation4 + $0x970] sm:$0xff] }
0x21c1   :  { %10334 = vmatprep.subr.bf16.mxu1 %v10333_v52 }
0x21c4   :  { %10336 = vmatpush1.bf16.msra.mxu1 %v10335_v58 }
0x21c5   :  { %10338 = vmatprep.subr.bf16.mxu1 %v10337_v47 }
0x228e   :  { %v9228_v11 = vpop.f32.mrb[46].mxu1 }
0x228f   :  { %v5160_v8 = vadd.f32 %v9228_v11, %v7941_v61  ;;  %v5154_v7 = vpop.f32.mrb[47].mxu1  ;;  %v5308_v11 = vld [vmem:[#allocation4 + $0x788] sm:$0xff] }
0x2290   :  { %v5155_v62 = vadd.f32 %v7941_v61, %v5154_v7  ;;  %v10369_v61 = vpack.c.bf16 %v5306_v35, %v5303_v5 }
0x2291   :  { %v5164_v43 = vmax.f32 %v5160_v8, 0.0  ;;  %v5311_v8 = vld [vmem:[#allocation4 + $0x7d8] sm:$0xff] }
0x2292   :  { %v5163_v28 = vmax.f32 %v5155_v62, 0.0  ;;  %v10341_v7 = vpack.c.bf16 %v5311_v8, %v5308_v11  ;;  %v5307_v62 = vld [vmem:[#allocation4 + $0x780] sm:$0xff] }
0x2294   :  { %9261 = vmatprep.mubr.f32.mxu0 %v5163_v28  ;;  %v5310_v28 = vld [vmem:[#allocation4 + $0x7d0] sm:$0xff] }
0x2295   :  { %9262 = vmatmul.mubr.f32.vlgmr.msra.gmra.mrb[34].mxu0 %v5164_v43  ;;  %v5309_v43 = vld [vmem:[#allocation4 + $0x790] sm:$0xff] }
0x2296   :  { %10360 = vmatpush3.bf16.msra.mxu0 %v10357_v40  ;;  %v5319_v40 = vld [vmem:[#allocation4 + $0x8c0] sm:$0xff] }
0x2297   :  { %10362 = vmatprep.subr.bf16.mxu0 %v10361_v41  ;;  %v10351_v34 = vpack.c.bf16 %v5322_v57, %v5319_v40 }
0x229a   :  { %10364 = vmatpush3.bf16.msra.mxu0 %v10361_v41  ;;  %v5330_v41 = vld [vmem:[#allocation4 + $0x9c0] sm:$0xff] }
0x229b   :  { %10366 = vmatprep.subr.bf16.mxu0 %v10365_v55  ;;  %v10385_v52 = vpack.c.bf16 %v5330_v41, %v5327_v30 }
0x229e   :  { %10368 = vmatpush3.bf16.msra.mxu0 %v10365_v55 }
0x229f   :  { %10370 = vmatprep.subr.bf16.mxu0 %v10369_v61 }
0x22a2   :  { %10372 = vmatpush3.bf16.msra.mxu0 %v10369_v61 }
0x2368   :  { %v9263_v9 = vpop.f32.mrb[34].mxu0 }
0x2369   :  { %v5241_v1 = vadd.f32 %v9263_v9, %v7942_v56  ;;  %v5235_v12 = vpop.f32.mrb[35].mxu0  ;;  %v5312_v9 = vld [vmem:[#allocation4 + $0x7e0] sm:$0xff] }
0x236a   :  { %v5236_v48 = vadd.f32 %v7942_v56, %v5235_v12  ;;  %v10343_v56 = vpack.c.bf16 %v5310_v28, %v5307_v62  ;;  %v5317_v12 = vld [vmem:[#allocation4 + $0x878] sm:$0xff] }
0x236b   :  { %v5245_v2 = vadd.f32 %v5241_v1, %v5081_v46  ;;  %v5304_v46 = vld [vmem:[#allocation4 + $0x730] sm:$0xff]  ;;  %v5314_v1 = vld [vmem:[#allocation4 + $0x828] sm:$0xff] }
0x236c   :  { %v5244_v19 = vadd.f32 %v5236_v48, %v5080_v16  ;;  %v5301_v16 = vld [vmem:[#allocation4 + $0x6e0] sm:$0xff]  ;;  %v10373_v48 = vpack.c.bf16 %v5312_v9, %v5309_v43 }
0x236d   :  { %5250 = vadd.xlane.f32.xlu1 %v5245_v2  ;;  %v10339_v10 = vpack.c.bf16 %v5304_v46, %v5301_v16 }
0x236e   :  { %5248 = vadd.xlane.f32.xlu0 %v5244_v19  ;;  %10374 = vmatprep.subr.bf16.mxu0 %v10373_v48 }
0x236f   :  { %10340 = vmatpush1.bf16.msra.mxu1 %v10339_v10  ;;  %10376 = vmatpush3.bf16.msra.mxu0 %v10373_v48  ;;  %v7946_v10 = vld [vmem:[#allocation6 + $0x11] ss:$0 sm:$0xff] }
0x2370   :  { %10342 = vmatprep.subr.bf16.mxu1 %v10341_v7  ;;  %10378 = vmatprep.subr.bf16.mxu0 %v10377_v51 }
0x2373   :  { %10344 = vmatpush1.bf16.msra.mxu1 %v10343_v56  ;;  %10380 = vmatpush3.bf16.msra.mxu0 %v10377_v51 }
0x2374   :  { %10382 = vmatprep.subr.bf16.mxu0 %v10381_v42 }
0x2377   :  { %10384 = vmatpush3.bf16.msra.mxu0 %v10381_v42 }
0x2378   :  { %10386 = vmatprep.subr.bf16.mxu0 %v10385_v52 }
0x237b   :  { %10388 = vmatpush3.bf16.msra.mxu0 %v10385_v52 }
0x23fa   :  { %v5251_v18 = vpop.xlane.xlu1 %5250 }
0x23fb   :  { %v5253_v45 = vmul.f32 0.0078125, %v5251_v18  ;;  %v5249_v59 = vpop.xlane.xlu0 %5248 }
0x23fc   :  { %v5252_v60 = vmul.f32 0.0078125, %v5249_v59 }
0x23fd   :  { %v11794_v63 = vsub.f32 %v5245_v2, %v5253_v45  ;;  %v10345_v2 = vpack.c.bf16 %v5317_v12, %v5314_v1 }
0x23fe   :  { %v11796_v6 = vsub.f32 %v5244_v19, %v5252_v60  ;;  %v5313_v19 = vld [vmem:[#allocation4 + $0x820] sm:$0xff]  ;;  %v7943_v60 = vld [vmem:[#allocation6 + $0xe] ss:$0 sm:$0xff] }
0x23ff   :  { %v5257_v15 = vmul.f32 %v11794_v63, %v11794_v63  ;;  %v10347_v26 = vpack.c.bf16 %v5316_v33, %v5313_v19  ;;  %10346 = vmatprep.subr.bf16.mxu1 %v10345_v2 }
0x2400   :  { %v5256_v32 = vmul.f32 %v11796_v6, %v11796_v6 }
0x2401   :  { %5260 = vadd.xlane.f32.xlu1 %v5257_v15  ;;  %10348 = vmatpush1.bf16.msra.mxu1 %v10347_v26 }
0x2402   :  { %5258 = vadd.xlane.f32.xlu0 %v5256_v32  ;;  %10350 = vmatprep.subr.bf16.mxu1 %v10349_v29 }
0x2405   :  { %10352 = vmatpush1.bf16.msra.mxu1 %v10351_v34 }
0x2406   :  { %10354 = vmatprep.subr.bf16.mxu1 %v10353_v39 }
0x2409   :  { %10356 = vmatpush1.bf16.msra.mxu1 %v10355_v53 }
0x248e   :  { %v5261_v54 = vpop.xlane.xlu1 %5260 }
0x248f   :  { %v5263_v44 = vmul.f32 0.0078125, %v5261_v54  ;;  %v5259_v55 = vpop.xlane.xlu0 %5258 }
0x2490   :  { %v5262_v58 = vmul.f32 0.0078125, %v5259_v55 }
0x2491   :  { %v5265_v18 = vadd.f32 1e-05, %v5263_v44 }
0x2492   :  { %v5264_v45 = vadd.f32 1e-05, %v5262_v58 }
0x2493   :  { %10881 = vrsqrt.f32 %v5265_v18 }
0x2494   :  { %10883 = vrsqrt.f32 %v5264_v45 }
0x249d   :  { %v10882_v59 = vpop.eup %10881 }
0x249e   :  { %v10884_v15 = vpop.eup %10883  ;;  %v5269_v32 = vmul.f32 %v10882_v59, %v11794_v63  ;;  %v7945_v63 = vld [vmem:[#allocation6 + $0x10] ss:$0 sm:$0xff] }
0x249f   :  { %v5268_v27 = vmul.f32 %v10884_v15, %v11796_v6  ;;  %v7947_v6 = vld [vmem:[#allocation6 + $0x12] ss:$0 sm:$0xff]  ;;  %v11855_v15 = vld [vmem:[%s12046_s3 + $0x8] sm:$0xff] }
0x24a0   :  { %v5275_v47 = vmul.f32 %v7943_v60, %v5269_v32 }
0x24a1   :  { %v5274_v16 = vmul.f32 %v7943_v60, %v5268_v27  ;;  %v11861_v27 = vld [vmem:[%s12046_s3] sm:$0xff] }
0x24a2   :  { %v11806_v5 = vadd.f32 %v7944_v4, %v5275_v47 }
0x24a3   :  { %v11804_v46 = vadd.f32 %v7944_v4, %v5274_v16 }
0x24a5   :  { %5508 = vmatmul.mubr.f32.vlgmr.msra.gmra.mrb[48].mxu1 %v11804_v46  ;;  %9296 = vmatprep.mubr.f32.mxu0 %v11804_v46 }
0x24a6   :  { %9297 = vmatmul.mubr.f32.vlgmr.msra.gmra.mrb[36].mxu0 %v11806_v5  ;;  %5513 = vmatprep.mubr.f32.mxu1 %v11098_v0 }
0x24a9   :  { %5514 = vmatmul.mubr.f32.gmra.mrb[50].mxu1 %v11806_v5 }
0x2578   :  { %v5509_v35 = vpop.f32.mrb[48].mxu1 }
0x2579   :  { %v11813_v61 = vadd.f32 %v7945_v63, %v5509_v35  ;;  %v5511_v11 = vpop.f32.mrb[49].mxu1  ;;  %v9298_v8 = vpop.f32.mrb[36].mxu0 }
0x257a   :  { %v5608_v7 = vadd.f32 %v7946_v10, %v5511_v11  ;;  %v5616_v62 = vadd.f32 %v9298_v8, %v7947_v6  ;;  %v5586_v28 = vpop.f32.mrb[37].mxu0 }
0x257b   :  { %v5615_v43 = vadd.f32 %v7947_v6, %v5586_v28  ;;  %9303 = vmatprep.mubr.f32.mxu1 %v11813_v61  ;;  %9345 = vmatprep.mubr.f32.mxu0 %v11813_v61 }
0x257c   :  { %v5515_v56 = vpop.f32.mrb[50].mxu1  ;;  %v5618_v9 = vmul.f32 %v11242_v20, %v5608_v7  ;;  %v6178_v1 = vmul.f32 %v11251_v23, %v5608_v7  ;;  %v5827_v12 = vmul.f32 %v11245_v21, %v5616_v62  ;;  %v5723_v2 = vmul.f32 %v11245_v21, %v5608_v7 }
0x257d   :  { %v5517_v48 = vpop.f32.mrb[51].mxu1  ;;  %v5826_v19 = vmul.f32 %v11245_v21, %v5615_v43  ;;  %v5721_v33 = vmul.f32 %v11242_v20, %v5615_v43  ;;  %v5722_v25 = vmul.f32 %v11242_v20, %v5616_v62  ;;  %v5990_v14 = vmul.f32 %v11248_v22, %v5608_v7 }
0x257e   :  { %v5609_v26 = vadd.f32 %v7946_v10, %v5517_v48  ;;  %v6093_v38 = vmul.f32 %v11248_v22, %v5615_v43  ;;  %v6094_v13 = vmul.f32 %v11248_v22, %v5616_v62  ;;  %v6281_v40 = vmul.f32 %v11251_v23, %v5615_v43 }
0x257f   :  { %v10397_v51 = vpack.c.bf16 %v5827_v12, %v5826_v19  ;;  %v11827_v29 = vpack.c.bf16 %v5722_v25, %v5721_v33  ;;  %v6282_v57 = vmul.f32 %v11251_v23, %v5616_v62  ;;  %v11841_v50 = vadd.f32 %v7945_v63, %v5515_v56 }
0x2580   :  { %v5619_v3 = vmul.f32 %v11242_v20, %v5609_v26  ;;  %v6179_v37 = vmul.f32 %v11251_v23, %v5609_v26  ;;  %v5724_v31 = vmul.f32 %v11245_v21, %v5609_v26  ;;  %v5991_v17 = vmul.f32 %v11248_v22, %v5609_v26 }
0x2581   :  { %v11835_v42 = vpack.c.bf16 %v6094_v13, %v6093_v38  ;;  %v11837_v34 = vpack.c.bf16 %v6282_v57, %v6281_v40 }
0x2582   :  { %v10389_v30 = vpack.c.bf16 %v5619_v3, %v5618_v9  ;;  %v10413_v41 = vpack.c.bf16 %v6179_v37, %v6178_v1  ;;  %v10393_v39 = vpack.c.bf16 %v5724_v31, %v5723_v2  ;;  %v11839_v49 = vpack.c.bf16 %v5991_v17, %v5990_v14 }
0x2584   :  { %10390 = vmatprep.subr.bf16.mxu1 %v10389_v30  ;;  %10414 = vmatprep.subr.bf16.mxu0 %v10413_v41 }
0x2585   :  { %10392 = vmatpush3.bf16.xpose.msra.mxu1 %v10389_v30  ;;  %10416 = vmatpush3.bf16.xpose.msra.mxu0 %v10413_v41 }
0x2586   :  { %10394 = vmatprep.subr.bf16.mxu1 %v10393_v39 }
0x258c   :  { %9304 = vmatmul.mubr.f32.vlgmr.msra.gmra.mrb[52].mxu1 %v11841_v50  ;;  %9346 = vmatmul.mubr.f32.vlgmr.msra.gmra.mrb[38].mxu0 %v11841_v50 }
0x258d   :  { %10396 = vmatpush3.bf16.xpose.msra.mxu1 %v10393_v39  ;;  %9310 = vmatprep.mubr.f32.mxu1 %v11813_v61 }
0x258e   :  { %10398 = vmatprep.subr.bf16.mxu1 %v10397_v51 }
0x2594   :  { %9311 = vmatmul.mubr.f32.vlgmr.msra.gmra.mrb[54].mxu1 %v11841_v50 }
0x2595   :  { %10400 = vmatpush3.bf16.msra.mxu1 %v10397_v51 }
0x2596   :  { %10402 = vmatprep.subr.bf16.mxu1 %v11827_v29 }
0x265f   :  { %v9305_v52 = vpop.f32.mrb[52].mxu1  ;;  %v11848_v53 = vpop.f32.mrb[38].mxu0 }
0x2660   :  { %v5686_v54 = vpop.f32.mrb[53].mxu1  ;;  %v11850_v44 = vpop.f32.mrb[39].mxu0  ;;  %v5696_v58 = vmul.f32 0.17677669, %v9305_v52 }
0x2661   :  { %v5695_v59 = vmul.f32 0.17677669, %v5686_v54 }
0x2662   :  { %v5698_v47 = vadd.f32 %v11855_v15, %v5696_v58  ;;  %v6256_v58 = vmul.f32 0.17677669, %v11848_v53 }
0x2663   :  { %v5697_v63 = vadd.f32 %v11861_v27, %v5695_v59  ;;  %v6255_v59 = vmul.f32 0.17677669, %v11850_v44 }
0x2664   :  { %v5702_v6 = vsel %vm485_vm8, %v5698_v47, -inf }
0x2665   :  { %v5699_v35 = vsel %vm485_vm8, %v5697_v63, -inf }
0x2667   :  { %v9312_v55 = vpop.f32.mrb[54].mxu1 }
0x2668   :  { %v5801_v18 = vmul.f32 0.17677669, %v9312_v55  ;;  %v5791_v45 = vpop.f32.mrb[55].mxu1 }
0x2669   :  { %v5800_v60 = vmul.f32 0.17677669, %v5791_v45 }
0x266a   :  { %v5803_v32 = vadd.f32 %v11855_v15, %v5801_v18 }
0x266b   :  { %v5802_v4 = vadd.f32 %v11861_v27, %v5800_v60 }
0x266c   :  { %v5807_v16 = vsel %vm485_vm8, %v5803_v32, -inf }
0x266d   :  { %5808 = vmax.xlane.f32.xlu1 %v5807_v16  ;;  %v5804_v10 = vsel %vm485_vm8, %v5802_v4, -inf }
0x266e   :  { %5805 = vmax.xlane.f32.xlu0 %v5804_v10 }
0x2671   :  { %5703 = vmax.xlane.f32.xlu1 %v5702_v6 }
0x2672   :  { %5700 = vmax.xlane.f32.xlu0 %v5699_v35 }
0x26fa   :  { %v5809_v11 = vpop.xlane.xlu1 %5808 }
0x26fb   :  { %v5811_v8 = vsub.f32 %v5803_v32, %v5809_v11  ;;  %v5806_v7 = vpop.xlane.xlu0 %5805  ;;  %v6258_v32 = vadd.f32 %v11855_v15, %v6256_v58  ;;  %v5345_v58 = vld [vmem:[#allocation4 + $0x978] sm:$0xff] }
0x26fc   :  { %v5810_v62 = vsub.f32 %v5802_v4, %v5806_v7 }
0x26fd   :  { %v5814_v28 = vmul.f32 1.442695, %v5811_v8  ;;  %v6262_v53 = vsel %vm485_vm8, %v6258_v32, -inf }
0x26fe   :  { %v5812_v43 = vmul.f32 1.442695, %v5810_v62  ;;  %v5704_v56 = vpop.xlane.xlu1 %5703 }
0x26ff   :  { %10885 = vpow2.f32 %v5814_v28  ;;  %v5706_v9 = vsub.f32 %v5698_v47, %v5704_v56  ;;  %v5701_v1 = vpop.xlane.xlu0 %5700 }
0x2700   :  { %10887 = vpow2.f32 %v5812_v43  ;;  %v5705_v12 = vsub.f32 %v5697_v63, %v5701_v1 }
0x2701   :  { %v5709_v48 = vmul.f32 1.442695, %v5706_v9 }
0x2702   :  { %v5707_v2 = vmul.f32 1.442695, %v5705_v12 }
0x2703   :  { %10889 = vpow2.f32 %v5709_v48 }
0x2704   :  { %10891 = vpow2.f32 %v5707_v2 }
0x2709   :  { %v10886_v19 = vpop.eup %10885 }
0x270a   :  { %v10888_v33 = vpop.eup %10887  ;;  %v5819_v25 = vsel %vm485_vm8, %v10886_v19, 0.0 }
0x270b   :  { %5820 = vadd.xlane.f32.xlu1 %v5819_v25  ;;  %v5816_v26 = vsel %vm485_vm8, %v10888_v33, 0.0  ;;  %v5333_v25 = vld [vmem:[#allocation4 + $0x5b8] sm:$0xff] }
0x270c   :  { %5817 = vadd.xlane.f32.xlu0 %v5816_v26 }
0x270d   :  { %v10890_v14 = vpop.eup %10889 }
0x270e   :  { %v10892_v38 = vpop.eup %10891  ;;  %v5714_v13 = vsel %vm485_vm8, %v10890_v14, 0.0 }
0x270f   :  { %5715 = vadd.xlane.f32.xlu1 %v5714_v13  ;;  %v5711_v51 = vsel %vm485_vm8, %v10892_v38, 0.0  ;;  %v5335_v13 = vld [vmem:[#allocation4 + $0x658] sm:$0xff] }
0x2710   :  { %5712 = vadd.xlane.f32.xlu0 %v5711_v51  ;;  %v5336_v51 = vld [vmem:[#allocation4 + $0x6a8] sm:$0xff] }
0x2798   :  { %v5821_v40 = vpop.xlane.xlu1 %5820 }
0x2799   :  { %10893 = vrcp.f32 %v5821_v40  ;;  %v5818_v57 = vpop.xlane.xlu0 %5817  ;;  %v10429_v40 = vpack.c.bf16 %v5336_v51, %v5335_v13  ;;  %v5380_v13 = vld [vmem:[#allocation4 + $0x7b0] sm:$0xff]  ;;  %v5382_v51 = vld [vmem:[#allocation4 + $0x800] sm:$0xff] }
0x279a   :  { %10895 = vrcp.f32 %v5818_v57  ;;  %v5337_v57 = vld [vmem:[#allocation4 + $0x6f8] sm:$0xff] }
0x279c   :  { %v5716_v37 = vpop.xlane.xlu1 %5715 }
0x279d   :  { %v5713_v3 = vpop.xlane.xlu0 %5712 }
0x279e   :  { %10897 = vrcp.f32 %v5713_v3  ;;  %v5338_v3 = vld [vmem:[#allocation4 + $0x748] sm:$0xff] }
0x279f   :  { %10899 = vrcp.f32 %v5716_v37  ;;  %v10433_v37 = vpack.c.bf16 %v5338_v3, %v5337_v57  ;;  %v10501_v57 = vpack.c.bf16 %v5382_v51, %v5380_v13  ;;  %v5379_v3 = vld [vmem:[#allocation4 + $0x7a8] sm:$0xff] }
0x27a3   :  { %v10894_v31 = vpop.eup %10893 }
0x27a4   :  { %v10896_v17 = vpop.eup %10895  ;;  %v5825_v41 = vmul.f32 %v10894_v31, %v10886_v19  ;;  %v5331_v19 = vld [vmem:[#allocation4 + $0x518] sm:$0xff] }
0x27a5   :  { %v5824_v30 = vmul.f32 %v10896_v17, %v10888_v33  ;;  %v5332_v33 = vld [vmem:[#allocation4 + $0x568] sm:$0xff]  ;;  %v5339_v31 = vld [vmem:[#allocation4 + $0x798] sm:$0xff] }
0x27a6   :  { %v10421_v26 = vpack.c.bf16 %v5332_v33, %v5331_v19  ;;  %v5340_v17 = vld [vmem:[#allocation4 + $0x7e8] sm:$0xff]  ;;  %v5376_v19 = vld [vmem:[#allocation4 + $0x710] sm:$0xff]  ;;  %v5378_v33 = vld [vmem:[#allocation4 + $0x760] sm:$0xff] }
0x27a7   :  { %9317 = vmatprep.mubr.msk.f32.mxu1 %vm485_vm8, %v5824_v30  ;;  %v10437_v30 = vpack.c.bf16 %v5340_v17, %v5339_v31  ;;  %v5384_v31 = vld [vmem:[#allocation4 + $0x850] sm:$0xff]  ;;  %v5386_v17 = vld [vmem:[#allocation4 + $0x8a0] sm:$0xff] }
0x27a8   :  { %v10898_v39 = vpop.eup %10897  ;;  %9318 = vmatmul.mubr.msk.f32.vlgmr.msra.gmra.mrb[56].mxu1 %vm485_vm8, %v5825_v41  ;;  %10422 = vmatprep.subr.bf16.mxu0 %v10421_v26  ;;  %v5341_v41 = vld [vmem:[#allocation4 + $0x838] sm:$0xff] }
0x27a9   :  { %10404 = vmatpush3.bf16.msra.mxu1 %v11827_v29  ;;  %v5719_v52 = vmul.f32 %v10898_v39, %v10892_v38  ;;  %v10900_v54 = vpop.eup %10899  ;;  %10424 = vmatpush3.bf16.msra.mxu0 %v10421_v26  ;;  %v5342_v39 = vld [vmem:[#allocation4 + $0x888] sm:$0xff]  ;;  %v10497_v26 = vpack.c.bf16 %v5378_v33, %v5376_v19 }
0x27aa   :  { %10406 = vmatprep.subr.bf16.mxu1 %v11839_v49  ;;  %v5720_v55 = vmul.f32 %v10900_v54, %v10890_v14  ;;  %v5334_v14 = vld [vmem:[#allocation4 + $0x608] sm:$0xff]  ;;  %v5343_v54 = vld [vmem:[#allocation4 + $0x8d8] sm:$0xff] }
0x27ab   :  { %9324 = vmatprep.mubr.msk.f32.mxu1 %vm485_vm8, %v5719_v52  ;;  %v10425_v38 = vpack.c.bf16 %v5334_v14, %v5333_v25  ;;  %v10441_v52 = vpack.c.bf16 %v5342_v39, %v5341_v41  ;;  %v5375_v14 = vld [vmem:[#allocation4 + $0x708] sm:$0xff]  ;;  %v10505_v41 = vpack.c.bf16 %v5386_v17, %v5384_v31 }
0x27ac   :  { %v5383_v39 = vld [vmem:[#allocation4 + $0x848] sm:$0xff] }
0x27ad   :  { %10426 = vmatprep.subr.bf16.mxu0 %v10425_v38 }
0x27ae   :  { %10428 = vmatpush3.bf16.msra.mxu0 %v10425_v38  ;;  %v5377_v38 = vld [vmem:[#allocation4 + $0x758] sm:$0xff] }
0x27af   :  { %10430 = vmatprep.subr.bf16.mxu0 %v10429_v40 }
0x27b0   :  { %9325 = vmatmul.mubr.msk.f32.vlgmr.msra.gmra.mrb[56].mxu1 %vm485_vm8, %v5720_v55  ;;  %v5344_v55 = vld [vmem:[#allocation4 + $0x928] sm:$0xff] }
0x27b1   :  { %9331 = vmatprep.mubr.f32.mxu1 %v11813_v61 }
0x27b2   :  { %10408 = vmatpush3.bf16.xpose.msra.mxu1 %v11839_v49  ;;  %10432 = vmatpush3.bf16.msra.mxu0 %v10429_v40  ;;  %v10499_v40 = vpack.c.bf16 %v5377_v38, %v5375_v14  ;;  %v7960_v14 = vld [vmem:[#allocation6 + $0x17] ss:$0 sm:$0xff]  ;;  %v7961_v38 = vld [vmem:[#allocation6 + $0x18] ss:$0 sm:$0xff] }
0x27b3   :  { %10410 = vmatprep.subr.bf16.mxu1 %v11835_v42  ;;  %10434 = vmatprep.subr.bf16.mxu0 %v10433_v37 }
0x27b6   :  { %10436 = vmatpush3.bf16.msra.mxu0 %v10433_v37  ;;  %v5381_v37 = vld [vmem:[#allocation4 + $0x7f8] sm:$0xff] }
0x27b7   :  { %10438 = vmatprep.subr.bf16.mxu0 %v10437_v30 }
0x27b9   :  { %9332 = vmatmul.mubr.f32.vlgmr.msra.gmra.mrb[58].mxu1 %v11841_v50 }
0x27ba   :  { %10412 = vmatpush3.bf16.msra.mxu1 %v11835_v42  ;;  %v6257_v42 = vadd.f32 %v11861_v27, %v6255_v59  ;;  %10440 = vmatpush3.bf16.msra.mxu0 %v10437_v30  ;;  %v10503_v30 = vpack.c.bf16 %v5381_v37, %v5379_v3 }
0x27bb   :  { %10418 = vmatprep.subr.bf16.mxu1 %v11837_v34  ;;  %10442 = vmatprep.subr.bf16.mxu0 %v10441_v52 }
0x27bc   :  { %v6259_v44 = vsel %vm485_vm8, %v6257_v42, -inf }
0x27be   :  { %10444 = vmatpush3.bf16.msra.mxu0 %v10441_v52  ;;  %v5385_v52 = vld [vmem:[#allocation4 + $0x898] sm:$0xff] }
0x288c   :  { %v9333_v29 = vpop.f32.mrb[58].mxu1 }
0x288d   :  { %v6068_v18 = vmul.f32 0.17677669, %v9333_v29  ;;  %v6058_v45 = vpop.f32.mrb[59].mxu1  ;;  %v10445_v29 = vpack.c.bf16 %v5344_v55, %v5343_v54  ;;  %v5388_v54 = vld [vmem:[#allocation4 + $0x8f0] sm:$0xff]  ;;  %v5390_v55 = vld [vmem:[#allocation4 + $0x940] sm:$0xff] }
0x288e   :  { %v6067_v60 = vmul.f32 0.17677669, %v6058_v45 }
0x288f   :  { %v6070_v61 = vadd.f32 %v11855_v15, %v6068_v18  ;;  %v5346_v18 = vld [vmem:[#allocation4 + $0x9c8] sm:$0xff]  ;;  %10446 = vmatprep.subr.bf16.mxu0 %v10445_v29 }
0x2890   :  { %v6069_v49 = vadd.f32 %v11861_v27, %v6067_v60  ;;  %v10449_v45 = vpack.c.bf16 %v5346_v18, %v5345_v58  ;;  %10448 = vmatpush3.bf16.msra.mxu0 %v10445_v29  ;;  %v10507_v29 = vpack.c.bf16 %v5385_v52, %v5383_v39  ;;  %v10509_v58 = vpack.c.bf16 %v5390_v55, %v5388_v54  ;;  %v5387_v18 = vld [vmem:[#allocation4 + $0x8e8] sm:$0xff] }
0x2891   :  { %v6074_v50 = vsel %vm485_vm8, %v6070_v61, -inf }
0x2892   :  { %6075 = vmax.xlane.f32.xlu1 %v6074_v50  ;;  %v6071_v4 = vsel %vm485_vm8, %v6069_v49, -inf  ;;  %10450 = vmatprep.subr.bf16.mxu0 %v10449_v45 }
0x2893   :  { %6072 = vmax.xlane.f32.xlu0 %v6071_v4 }
0x2894   :  { %10452 = vmatpush3.bf16.msra.mxu0 %v10449_v45  ;;  %v5389_v45 = vld [vmem:[#allocation4 + $0x938] sm:$0xff] }
0x2896   :  { %6263 = vmax.xlane.f32.xlu1 %v6262_v53 }
0x2897   :  { %6260 = vmax.xlane.f32.xlu0 %v6259_v44 }
0x291f   :  { %v6076_v47 = vpop.xlane.xlu1 %6075 }
0x2920   :  { %v6078_v16 = vsub.f32 %v6070_v61, %v6076_v47  ;;  %v6073_v63 = vpop.xlane.xlu0 %6072 }
0x2921   :  { %v6077_v10 = vsub.f32 %v6069_v49, %v6073_v63  ;;  %v5364_v63 = vld [vmem:[#allocation4 + $0x530] sm:$0xff] }
0x2922   :  { %v6081_v6 = vmul.f32 1.442695, %v6078_v16 }
0x2923   :  { %v6079_v15 = vmul.f32 1.442695, %v6077_v10  ;;  %v6264_v35 = vpop.xlane.xlu1 %6263  ;;  %v5366_v10 = vld [vmem:[#allocation4 + $0x580] sm:$0xff] }
0x2924   :  { %10901 = vpow2.f32 %v6081_v6  ;;  %v6266_v11 = vsub.f32 %v6258_v32, %v6264_v35  ;;  %v6261_v27 = vpop.xlane.xlu0 %6260  ;;  %v10485_v6 = vpack.c.bf16 %v5366_v10, %v5364_v63  ;;  %v5365_v35 = vld [vmem:[#allocation4 + $0x578] sm:$0xff]  ;;  %v5351_v10 = vld [vmem:[#allocation4 + $0x660] sm:$0xff] }
0x2925   :  { %10903 = vpow2.f32 %v6079_v15  ;;  %v6265_v8 = vsub.f32 %v6257_v42, %v6261_v27  ;;  %v5363_v15 = vld [vmem:[#allocation4 + $0x528] sm:$0xff]  ;;  %v5370_v27 = vld [vmem:[#allocation4 + $0x620] sm:$0xff] }
0x2926   :  { %v6269_v7 = vmul.f32 1.442695, %v6266_v11  ;;  %10486 = vmatprep.subr.bf16.mxu0 %v10485_v6  ;;  %v5368_v11 = vld [vmem:[#allocation4 + $0x5d0] sm:$0xff] }
0x2927   :  { %v6267_v62 = vmul.f32 1.442695, %v6265_v8  ;;  %v5352_v6 = vld [vmem:[#allocation4 + $0x6b0] sm:$0xff] }
0x2928   :  { %10905 = vpow2.f32 %v6269_v7  ;;  %v10487_v7 = vpack.c.bf16 %v5365_v35, %v5363_v15  ;;  %v10461_v15 = vpack.c.bf16 %v5352_v6, %v5351_v10  ;;  %v5353_v35 = vld [vmem:[#allocation4 + $0x700] sm:$0xff] }
0x2929   :  { %10907 = vpow2.f32 %v6267_v62 }
0x292e   :  { %v11896_v28 = vpop.eup %10901 }
0x292f   :  { %v10904_v43 = vpop.eup %10903  ;;  %v6086_v56 = vsel %vm485_vm8, %v11896_v28, 0.0 }
0x2930   :  { %6087 = vadd.xlane.f32.xlu1 %v6086_v56  ;;  %v6083_v9 = vsel %vm485_vm8, %v10904_v43, 0.0  ;;  %v5372_v56 = vld [vmem:[#allocation4 + $0x670] sm:$0xff] }
0x2931   :  { %6084 = vadd.xlane.f32.xlu0 %v6083_v9  ;;  %v5374_v9 = vld [vmem:[#allocation4 + $0x6c0] sm:$0xff] }
0x2932   :  { %v11901_v1 = vpop.eup %10905 }
0x2933   :  { %v10908_v12 = vpop.eup %10907  ;;  %v6274_v48 = vsel %vm485_vm8, %v11901_v1, 0.0 }
0x2934   :  { %6275 = vadd.xlane.f32.xlu1 %v6274_v48  ;;  %v6271_v2 = vsel %vm485_vm8, %v10908_v12, 0.0  ;;  %v5371_v48 = vld [vmem:[#allocation4 + $0x668] sm:$0xff] }
0x2935   :  { %6272 = vadd.xlane.f32.xlu0 %v6271_v2  ;;  %v5373_v2 = vld [vmem:[#allocation4 + $0x6b8] sm:$0xff] }
0x2936   :  { %v10495_v25 = vpack.c.bf16 %v5373_v2, %v5371_v48 }
0x29bd   :  { %v6088_v59 = vpop.xlane.xlu1 %6087 }
0x29be   :  { %10909 = vrcp.f32 %v6088_v59  ;;  %v6085_v60 = vpop.xlane.xlu0 %6084  ;;  %v5392_v59 = vld [vmem:[#allocation4 + $0x990] sm:$0xff] }
0x29bf   :  { %10911 = vrcp.f32 %v6085_v60  ;;  %v5394_v60 = vld [vmem:[#allocation4 + $0x9e0] sm:$0xff] }
0x29c1   :  { %v6276_v49 = vpop.xlane.xlu1 %6275 }
0x29c2   :  { %v6273_v61 = vpop.xlane.xlu0 %6272 }
0x29c3   :  { %10913 = vrcp.f32 %v6273_v61  ;;  %v10511_v61 = vpack.c.bf16 %v5389_v45, %v5387_v18 }
0x29c4   :  { %10915 = vrcp.f32 %v6276_v49  ;;  %v10513_v49 = vpack.c.bf16 %v5394_v60, %v5392_v59 }
0x29c8   :  { %v10910_v32 = vpop.eup %10909 }
0x29c9   :  { %v10912_v50 = vpop.eup %10911  ;;  %v6092_v4 = vmul.f32 %v10910_v32, %v11896_v28  ;;  %v5367_v28 = vld [vmem:[#allocation4 + $0x5c8] sm:$0xff] }
0x29ca   :  { %v6091_v42 = vmul.f32 %v10912_v50, %v10904_v43  ;;  %v5369_v43 = vld [vmem:[#allocation4 + $0x618] sm:$0xff]  ;;  %v5391_v32 = vld [vmem:[#allocation4 + $0x988] sm:$0xff] }
0x29cb   :  { %v5393_v50 = vld [vmem:[#allocation4 + $0x9d8] sm:$0xff] }
0x29cc   :  { %9338 = vmatprep.mubr.msk.f32.mxu1 %vm485_vm8, %v6091_v42  ;;  %v10515_v42 = vpack.c.bf16 %v5393_v50, %v5391_v32 }
0x29cd   :  { %v10914_v53 = vpop.eup %10913  ;;  %9339 = vmatmul.mubr.msk.f32.vlgmr.msra.gmra.mrb[56].mxu1 %vm485_vm8, %v6092_v4  ;;  %v5347_v4 = vld [vmem:[#allocation4 + $0x520] sm:$0xff] }
0x29ce   :  { %10420 = vmatpush3.bf16.msra.mxu1 %v11837_v34  ;;  %v6279_v44 = vmul.f32 %v10914_v53, %v10908_v12  ;;  %v10916_v47 = vpop.eup %10915  ;;  %v10489_v34 = vpack.c.bf16 %v5370_v27, %v5368_v11  ;;  %v10493_v12 = vpack.c.bf16 %v5374_v9, %v5372_v56  ;;  %v5348_v53 = vld [vmem:[#allocation4 + $0x570] sm:$0xff]  ;;  %v5361_v56 = vld [vmem:[#allocation4 + $0x980] sm:$0xff] }
0x29cf   :  { %v6280_v16 = vmul.f32 %v10916_v47, %v11901_v1  ;;  %v10491_v1 = vpack.c.bf16 %v5369_v43, %v5367_v28  ;;  %v10453_v47 = vpack.c.bf16 %v5348_v53, %v5347_v4  ;;  %v5354_v11 = vld [vmem:[#allocation4 + $0x750] sm:$0xff] }
0x29d0   :  { %9352 = vmatprep.mubr.msk.f32.mxu1 %vm485_vm8, %v6279_v44  ;;  %v5349_v44 = vld [vmem:[#allocation4 + $0x5c0] sm:$0xff]  ;;  %v5356_v27 = vld [vmem:[#allocation4 + $0x7f0] sm:$0xff] }
0x29d1   :  { %10454 = vmatprep.subr.bf16.mxu1 %v10453_v47  ;;  %v5360_v28 = vld [vmem:[#allocation4 + $0x930] sm:$0xff] }
0x29d2   :  { %v5362_v9 = vld [vmem:[#allocation4 + $0x9d0] sm:$0xff] }
0x29d5   :  { %9353 = vmatmul.mubr.msk.f32.vlgmr.msra.gmra.mrb[56].mxu1 %vm485_vm8, %v6280_v16  ;;  %v5350_v16 = vld [vmem:[#allocation4 + $0x610] sm:$0xff] }
0x29d6   :  { %v10457_v63 = vpack.c.bf16 %v5350_v16, %v5349_v44  ;;  %10456 = vmatpush3.bf16.msra.mxu1 %v10453_v47 }
0x29d8   :  { %10458 = vmatprep.subr.bf16.mxu1 %v10457_v63 }
0x29da   :  { %10460 = vmatpush3.bf16.msra.mxu1 %v10457_v63 }
0x29db   :  { %10462 = vmatprep.subr.bf16.mxu1 %v10461_v15 }
0x29de   :  { %10464 = vmatpush3.bf16.msra.mxu1 %v10461_v15 }
0x2aa8   :  { %v9354_v8 = vpop.f32.mrb[56].mxu1 }
0x2aa9   :  { %v6355_v62 = vpop.f32.mrb[57].mxu1 }
0x2aaa   :  { %9387 = vmatprep.mubr.f32.mxu0 %v6355_v62 }
0x2aab   :  { %9388 = vmatmul.mubr.f32.vlgmr.msra.gmra.mrb[40].mxu0 %v9354_v8  ;;  %v5357_v8 = vld [vmem:[#allocation4 + $0x840] sm:$0xff] }
0x2aac   :  { %10488 = vmatpush1.bf16.msra.mxu0 %v10487_v7  ;;  %6627 = vmatprep.mubr.f32.mxu0 %v11098_v0  ;;  %v5358_v7 = vld [vmem:[#allocation4 + $0x890] sm:$0xff] }
0x2aad   :  { %10490 = vmatprep.subr.bf16.mxu0 %v10489_v34  ;;  %v10473_v62 = vpack.c.bf16 %v5358_v7, %v5357_v8  ;;  %v5359_v34 = vld [vmem:[#allocation4 + $0x8e0] sm:$0xff]  ;;  %v7957_v7 = vld [vmem:[#allocation6 + $0x14] ss:$0 sm:$0xff] }
0x2aae   :  { %v10477_v43 = vpack.c.bf16 %v5360_v28, %v5359_v34 }
0x2ab0   :  { %10492 = vmatpush1.bf16.msra.mxu0 %v10491_v1  ;;  %v10481_v1 = vpack.c.bf16 %v5362_v9, %v5361_v56 }
0x2ab1   :  { %10494 = vmatprep.subr.bf16.mxu0 %v10493_v12  ;;  %v7956_v12 = vld [vmem:[#allocation6 + $0x13] ss:$0 sm:$0xff] }
0x2ab4   :  { %10496 = vmatpush1.bf16.msra.mxu0 %v10495_v25 }
0x2ab5   :  { %10498 = vmatprep.subr.bf16.mxu0 %v10497_v26 }
0x2ab8   :  { %10500 = vmatpush1.bf16.msra.mxu0 %v10499_v40 }
0x2ab9   :  { %10502 = vmatprep.subr.bf16.mxu0 %v10501_v57 }
0x2abc   :  { %10504 = vmatpush1.bf16.msra.mxu0 %v10503_v30 }
0x2abd   :  { %10506 = vmatprep.subr.bf16.mxu0 %v10505_v41 }
0x2ac0   :  { %10508 = vmatpush1.bf16.msra.mxu0 %v10507_v29 }
0x2ac1   :  { %10510 = vmatprep.subr.bf16.mxu0 %v10509_v58 }
0x2ac4   :  { %10512 = vmatpush1.bf16.msra.mxu0 %v10511_v61 }
0x2ac5   :  { %10514 = vmatprep.subr.bf16.mxu0 %v10513_v49 }
0x2ac8   :  { %10516 = vmatpush1.bf16.msra.mxu0 %v10515_v42 }
0x2acb   :  { %6628 = vmatmul.mubr.f32.vlgmr.msra.gmra.mrb[42].mxu0 %v11666_v36  ;;  %v10465_v36 = vpack.c.bf16 %v5354_v11, %v5353_v35 }
0x2acc   :  { %6633 = vmatprep.mubr.f32.mxu0 %v11098_v0  ;;  %v5355_v0 = vld [vmem:[#allocation4 + $0x7a0] sm:$0xff] }
0x2acd   :  { %10466 = vmatprep.subr.bf16.mxu1 %v10465_v36 }
0x2ace   :  { %10468 = vmatpush3.bf16.msra.mxu1 %v10465_v36 }
0x2acf   :  { %6634 = vmatmul.mubr.f32.gmra.mrb[44].mxu0 %v11670_v24  ;;  %v10469_v24 = vpack.c.bf16 %v5356_v27, %v5355_v0 }
0x2ad1   :  { %10470 = vmatprep.subr.bf16.mxu1 %v10469_v24 }
0x2ad2   :  { %10472 = vmatpush3.bf16.msra.mxu1 %v10469_v24 }
0x2ad3   :  { %10474 = vmatprep.subr.bf16.mxu1 %v10473_v62 }
0x2ad6   :  { %10476 = vmatpush3.bf16.msra.mxu1 %v10473_v62 }
0x2ad7   :  { %10478 = vmatprep.subr.bf16.mxu1 %v10477_v43 }
0x2ada   :  { %10480 = vmatpush3.bf16.msra.mxu1 %v10477_v43  ;;  %v7958_v43 = vld [vmem:[#allocation6 + $0x15] ss:$0 sm:$0xff] }
0x2adb   :  { %10482 = vmatprep.subr.bf16.mxu1 %v10481_v1 }
0x2ade   :  { %10484 = vmatpush3.bf16.msra.mxu1 %v10481_v1 }
0x2b7e   :  { %v9389_v48 = vpop.f32.mrb[40].mxu0 }
0x2b7f   :  { %v6442_v2 = vadd.f32 %v9389_v48, %v7956_v12  ;;  %v6436_v19 = vpop.f32.mrb[41].mxu0  ;;  %v7959_v48 = vld [vmem:[#allocation6 + $0x16] ss:$0 sm:$0xff] }
0x2b80   :  { %v6437_v33 = vadd.f32 %v7956_v12, %v6436_v19 }
0x2b81   :  { %v6446_v25 = vadd.f32 %v6442_v2, %v11806_v5 }
0x2b82   :  { %v6445_v26 = vadd.f32 %v6437_v33, %v11804_v46 }
0x2b83   :  { %6451 = vadd.xlane.f32.xlu1 %v6446_v25 }
0x2b84   :  { %6449 = vadd.xlane.f32.xlu0 %v6445_v26 }
0x2b9e   :  { %v6629_v13 = vpop.f32.mrb[42].mxu0 }
0x2b9f   :  { %v6645_v51 = vadd.f32 %v7960_v14, %v6629_v13  ;;  %v6631_v40 = vpop.f32.mrb[43].mxu0 }
0x2ba0   :  { %v6652_v57 = vadd.f32 %v7961_v38, %v6631_v40 }
0x2ba1   :  { %v6655_v37 = vmul.f32 %v11242_v20, %v6645_v51  ;;  %v7215_v31 = vmul.f32 %v11251_v23, %v6645_v51  ;;  %v6760_v41 = vmul.f32 %v11245_v21, %v6645_v51  ;;  %v7027_v46 = vmul.f32 %v11248_v22, %v6645_v51 }
0x2ba2   :  { %v6635_v3 = vpop.f32.mrb[44].mxu0  ;;  %v6863_v5 = vmul.f32 %v11245_v21, %v6652_v57  ;;  %v6758_v52 = vmul.f32 %v11242_v20, %v6652_v57  ;;  %v7130_v54 = vmul.f32 %v11248_v22, %v6652_v57  ;;  %v7318_v55 = vmul.f32 %v11251_v23, %v6652_v57 }
0x2ba3   :  { %v6646_v17 = vadd.f32 %v7960_v14, %v6635_v3  ;;  %v6637_v30 = vpop.f32.mrb[45].mxu0 }
0x2ba4   :  { %v6653_v39 = vadd.f32 %v7961_v38, %v6637_v30 }
0x2ba5   :  { %v6656_v29 = vmul.f32 %v11242_v20, %v6646_v17  ;;  %v7216_v58 = vmul.f32 %v11251_v23, %v6646_v17  ;;  %v6761_v18 = vmul.f32 %v11245_v21, %v6646_v17  ;;  %v7028_v45 = vmul.f32 %v11248_v22, %v6646_v17  ;;  %v11967_v17 = vld [vmem:[%s12047_s4 + $0x8] sm:$0xff] }
0x2ba6   :  { %v6864_v59 = vmul.f32 %v11245_v21, %v6653_v39  ;;  %v6759_v60 = vmul.f32 %v11242_v20, %v6653_v39  ;;  %v7131_v61 = vmul.f32 %v11248_v22, %v6653_v39  ;;  %v7319_v49 = vmul.f32 %v11251_v23, %v6653_v39 }
0x2ba7   :  { %v10517_v32 = vpack.c.bf16 %v6656_v29, %v6655_v37  ;;  %v10541_v50 = vpack.c.bf16 %v7216_v58, %v7215_v31  ;;  %v10521_v42 = vpack.c.bf16 %v6761_v18, %v6760_v41  ;;  %v11935_v4 = vpack.c.bf16 %v7028_v45, %v7027_v46  ;;  %v11973_v41 = vld [vmem:[%s12047_s4] sm:$0xff] }
0x2ba8   :  { %v10525_v53 = vpack.c.bf16 %v6864_v59, %v6863_v5  ;;  %v11937_v44 = vpack.c.bf16 %v6759_v60, %v6758_v52  ;;  %v11939_v47 = vpack.c.bf16 %v7131_v61, %v7130_v54  ;;  %v11941_v16 = vpack.c.bf16 %v7319_v49, %v7318_v55 }
0x2ba9   :  { %10518 = vmatprep.subr.bf16.mxu1 %v10517_v32  ;;  %10542 = vmatprep.subr.bf16.mxu0 %v10541_v50 }
0x2baa   :  { %10544 = vmatpush3.bf16.xpose.msra.mxu0 %v10541_v50 }
0x2c10   :  { %v6452_v20 = vpop.xlane.xlu1 %6451 }
0x2c11   :  { %v6454_v21 = vmul.f32 0.0078125, %v6452_v20  ;;  %v6450_v22 = vpop.xlane.xlu0 %6449 }
0x2c12   :  { %v6453_v63 = vmul.f32 0.0078125, %v6450_v22 }
0x2c13   :  { %v6456_v23 = vsub.f32 %v6446_v25, %v6454_v21 }
0x2c14   :  { %v6455_v10 = vsub.f32 %v6445_v26, %v6453_v63 }
0x2c15   :  { %v6458_v6 = vmul.f32 %v6456_v23, %v6456_v23 }
0x2c16   :  { %v6457_v15 = vmul.f32 %v6455_v10, %v6455_v10 }
0x2c17   :  { %6461 = vadd.xlane.f32.xlu1 %v6458_v6 }
0x2c18   :  { %6459 = vadd.xlane.f32.xlu0 %v6457_v15 }
0x2ca4   :  { %v6462_v35 = vpop.xlane.xlu1 %6461 }
0x2ca5   :  { %v6464_v11 = vmul.f32 0.0078125, %v6462_v35  ;;  %v6460_v36 = vpop.xlane.xlu0 %6459 }
0x2ca6   :  { %v6463_v0 = vmul.f32 0.0078125, %v6460_v36 }
0x2ca7   :  { %v6466_v27 = vadd.f32 1e-05, %v6464_v11 }
0x2ca8   :  { %v6465_v24 = vadd.f32 1e-05, %v6463_v0 }
0x2ca9   :  { %10917 = vrsqrt.f32 %v6466_v27 }
0x2caa   :  { %10919 = vrsqrt.f32 %v6465_v24 }
0x2cb3   :  { %v10918_v8 = vpop.eup %10917 }
0x2cb4   :  { %v10920_v62 = vpop.eup %10919  ;;  %v6470_v34 = vmul.f32 %v10918_v8, %v6456_v23 }
0x2cb5   :  { %v6469_v28 = vmul.f32 %v10920_v62, %v6455_v10 }
0x2cb6   :  { %v6476_v56 = vmul.f32 %v7957_v7, %v6470_v34 }
0x2cb7   :  { %v6475_v9 = vmul.f32 %v7957_v7, %v6469_v28 }
0x2cb8   :  { %v11945_v12 = vadd.f32 %v7958_v43, %v6476_v56 }
0x2cb9   :  { %v11943_v1 = vadd.f32 %v7958_v43, %v6475_v9 }
0x2cbb   :  { %9422 = vmatprep.mubr.f32.mxu1 %v11943_v1 }
0x2cbc   :  { %9423 = vmatmul.mubr.f32.vlgmr.msra.gmra.mrb[60].mxu1 %v11945_v12 }
0x2cbd   :  { %10520 = vmatpush3.bf16.xpose.msra.mxu1 %v10517_v32 }
0x2cbe   :  { %10522 = vmatprep.subr.bf16.mxu1 %v10521_v42 }
0x2d8f   :  { %v9424_v2 = vpop.f32.mrb[60].mxu1 }
0x2d90   :  { %v6554_v19 = vpop.f32.mrb[61].mxu1  ;;  %v11951_v25 = vadd.f32 %v9424_v2, %v7959_v48 }
0x2d91   :  { %v11949_v33 = vadd.f32 %v7959_v48, %v6554_v19 }
0x2d93   :  { %9429 = vmatprep.mubr.f32.mxu1 %v11949_v33  ;;  %9471 = vmatprep.mubr.f32.mxu0 %v11949_v33 }
0x2d94   :  { %9430 = vmatmul.mubr.f32.vlgmr.msra.gmra.mrb[62].mxu1 %v11951_v25  ;;  %9472 = vmatmul.mubr.f32.vlgmr.msra.gmra.mrb[46].mxu0 %v11951_v25 }
0x2d95   :  { %10524 = vmatpush3.bf16.xpose.msra.mxu1 %v10521_v42  ;;  %9436 = vmatprep.mubr.f32.mxu1 %v11949_v33 }
0x2d96   :  { %10526 = vmatprep.subr.bf16.mxu1 %v10525_v53 }
0x2d9c   :  { %9437 = vmatmul.mubr.f32.vlgmr.msra.gmra.mrb[64].mxu1 %v11951_v25 }
0x2d9d   :  { %10528 = vmatpush3.bf16.msra.mxu1 %v10525_v53 }
0x2d9e   :  { %10530 = vmatprep.subr.bf16.mxu1 %v11937_v44 }
0x2e67   :  { %v9431_v26 = vpop.f32.mrb[62].mxu1  ;;  %v11960_v14 = vpop.f32.mrb[46].mxu0 }
0x2e68   :  { %v6723_v38 = vpop.f32.mrb[63].mxu1  ;;  %v11962_v13 = vpop.f32.mrb[47].mxu0  ;;  %v6733_v40 = vmul.f32 0.17677669, %v9431_v26  ;;  %v7293_v9 = vmul.f32 0.17677669, %v11960_v14 }
0x2e69   :  { %v6732_v37 = vmul.f32 0.17677669, %v6723_v38  ;;  %v7292_v19 = vmul.f32 0.17677669, %v11962_v13 }
0x2e6a   :  { %v6735_v46 = vadd.f32 %v11967_v17, %v6733_v40  ;;  %v7295_v38 = vadd.f32 %v11967_v17, %v7293_v9 }
0x2e6b   :  { %v6734_v52 = vadd.f32 %v11973_v41, %v6732_v37 }
0x2e6c   :  { %v6739_v55 = vsel %vm485_vm8, %v6735_v46, -inf  ;;  %v7299_v14 = vsel %vm485_vm8, %v7295_v38, -inf }
0x2e6d   :  { %v6736_v29 = vsel %vm485_vm8, %v6734_v52, -inf }
0x2e6f   :  { %v9438_v51 = vpop.f32.mrb[64].mxu1 }
0x2e70   :  { %v6838_v57 = vmul.f32 0.17677669, %v9438_v51  ;;  %v6828_v3 = vpop.f32.mrb[65].mxu1 }
0x2e71   :  { %v6837_v31 = vmul.f32 0.17677669, %v6828_v3 }
0x2e72   :  { %v6840_v30 = vadd.f32 %v11967_v17, %v6838_v57 }
0x2e73   :  { %v6839_v5 = vadd.f32 %v11973_v41, %v6837_v31 }
0x2e74   :  { %v6844_v39 = vsel %vm485_vm8, %v6840_v30, -inf }
0x2e75   :  { %6845 = vmax.xlane.f32.xlu1 %v6844_v39  ;;  %v6841_v54 = vsel %vm485_vm8, %v6839_v5, -inf }
0x2e76   :  { %6842 = vmax.xlane.f32.xlu0 %v6841_v54 }
0x2e79   :  { %6740 = vmax.xlane.f32.xlu1 %v6739_v55 }
0x2e7a   :  { %6737 = vmax.xlane.f32.xlu0 %v6736_v29 }
0x2f02   :  { %v6846_v58 = vpop.xlane.xlu1 %6845 }
0x2f03   :  { %v6848_v18 = vsub.f32 %v6840_v30, %v6846_v58  ;;  %v6843_v45 = vpop.xlane.xlu0 %6842 }
0x2f04   :  { %v6847_v59 = vsub.f32 %v6839_v5, %v6843_v45 }
0x2f05   :  { %v6851_v60 = vmul.f32 1.442695, %v6848_v18 }
0x2f06   :  { %v6849_v61 = vmul.f32 1.442695, %v6847_v59  ;;  %v6741_v49 = vpop.xlane.xlu1 %6740 }
0x2f07   :  { %10921 = vpow2.f32 %v6851_v60  ;;  %v6743_v32 = vsub.f32 %v6735_v46, %v6741_v49  ;;  %v6738_v50 = vpop.xlane.xlu0 %6737  ;;  %v5396_v49 = vld [vmem:[#allocation4 + $0x588] sm:$0xff] }
0x2f08   :  { %10923 = vpow2.f32 %v6849_v61  ;;  %v6742_v42 = vsub.f32 %v6734_v52, %v6738_v50  ;;  %v5395_v61 = vld [vmem:[#allocation4 + $0x538] sm:$0xff] }
0x2f09   :  { %v6746_v53 = vmul.f32 1.442695, %v6743_v32  ;;  %v5397_v32 = vld [vmem:[#allocation4 + $0x5d8] sm:$0xff]  ;;  %v10549_v50 = vpack.c.bf16 %v5396_v49, %v5395_v61  ;;  %v5419_v49 = vld [vmem:[#allocation4 + $0x7c0] sm:$0xff] }
0x2f0a   :  { %v6744_v20 = vmul.f32 1.442695, %v6742_v42  ;;  %v5398_v42 = vld [vmem:[#allocation4 + $0x628] sm:$0xff] }
0x2f0b   :  { %10925 = vpow2.f32 %v6746_v53  ;;  %v10553_v53 = vpack.c.bf16 %v5398_v42, %v5397_v32  ;;  %10550 = vmatprep.subr.bf16.mxu0 %v10549_v50  ;;  %v5420_v32 = vld [vmem:[#allocation4 + $0x810] sm:$0xff] }
0x2f0c   :  { %10927 = vpow2.f32 %v6744_v20  ;;  %v5399_v20 = vld [vmem:[#allocation4 + $0x678] sm:$0xff]  ;;  %10552 = vmatpush3.bf16.msra.mxu0 %v10549_v50  ;;  %v5421_v50 = vld [vmem:[#allocation4 + $0x860] sm:$0xff]  ;;  %v10597_v42 = vpack.c.bf16 %v5420_v32, %v5419_v49 }
0x2f0d   :  { %10554 = vmatprep.subr.bf16.mxu0 %v10553_v53 }
0x2f10   :  { %10556 = vmatpush3.bf16.msra.mxu0 %v10553_v53  ;;  %v5422_v53 = vld [vmem:[#allocation4 + $0x8b0] sm:$0xff] }
0x2f11   :  { %v10922_v21 = vpop.eup %10921 }
0x2f12   :  { %v10924_v22 = vpop.eup %10923  ;;  %v6856_v63 = vsel %vm485_vm8, %v10922_v21, 0.0 }
0x2f13   :  { %6857 = vadd.xlane.f32.xlu1 %v6856_v63  ;;  %v6853_v23 = vsel %vm485_vm8, %v10924_v22, 0.0  ;;  %v5401_v63 = vld [vmem:[#allocation4 + $0x718] sm:$0xff] }
0x2f14   :  { %6854 = vadd.xlane.f32.xlu0 %v6853_v23  ;;  %v5402_v23 = vld [vmem:[#allocation4 + $0x768] sm:$0xff] }
0x2f15   :  { %v10926_v10 = vpop.eup %10925 }
0x2f16   :  { %v10928_v6 = vpop.eup %10927  ;;  %v6751_v15 = vsel %vm485_vm8, %v10926_v10, 0.0 }
0x2f17   :  { %6752 = vadd.xlane.f32.xlu1 %v6751_v15  ;;  %v6748_v35 = vsel %vm485_vm8, %v10928_v6, 0.0  ;;  %v5404_v15 = vld [vmem:[#allocation4 + $0x808] sm:$0xff] }
0x2f18   :  { %6749 = vadd.xlane.f32.xlu0 %v6748_v35 }
0x2fa0   :  { %v6858_v11 = vpop.xlane.xlu1 %6857 }
0x2fa1   :  { %10929 = vrcp.f32 %v6858_v11  ;;  %v6855_v36 = vpop.xlane.xlu0 %6854  ;;  %v5405_v11 = vld [vmem:[#allocation4 + $0x858] sm:$0xff] }
0x2fa2   :  { %10931 = vrcp.f32 %v6855_v36  ;;  %v5406_v36 = vld [vmem:[#allocation4 + $0x8a8] sm:$0xff] }
0x2fa4   :  { %v6753_v27 = vpop.xlane.xlu1 %6752 }
0x2fa5   :  { %v6750_v0 = vpop.xlane.xlu0 %6749 }
0x2fa6   :  { %10933 = vrcp.f32 %v6750_v0  ;;  %v10569_v0 = vpack.c.bf16 %v5406_v36, %v5405_v11  ;;  %v5429_v11 = vld [vmem:[#allocation4 + $0x5e8] sm:$0xff] }
0x2fa7   :  { %10935 = vrcp.f32 %v6753_v27  ;;  %v5407_v27 = vld [vmem:[#allocation4 + $0x8f8] sm:$0xff] }
0x2fab   :  { %v10930_v24 = vpop.eup %10929 }
0x2fac   :  { %v10932_v8 = vpop.eup %10931  ;;  %v6862_v62 = vmul.f32 %v10930_v24, %v10922_v21  ;;  %v5400_v21 = vld [vmem:[#allocation4 + $0x6c8] sm:$0xff] }
0x2fad   :  { %v6861_v7 = vmul.f32 %v10932_v8, %v10924_v22  ;;  %v10557_v22 = vpack.c.bf16 %v5400_v21, %v5399_v20  ;;  %v5408_v24 = vld [vmem:[#allocation4 + $0x948] sm:$0xff]  ;;  %v10601_v20 = vpack.c.bf16 %v5422_v53, %v5421_v50  ;;  %v5423_v21 = vld [vmem:[#allocation4 + $0x900] sm:$0xff] }
0x2fae   :  { %v10573_v8 = vpack.c.bf16 %v5408_v24, %v5407_v27  ;;  %v5431_v24 = vld [vmem:[#allocation4 + $0x688] sm:$0xff] }
0x2faf   :  { %9443 = vmatprep.mubr.msk.f32.mxu1 %vm485_vm8, %v6861_v7  ;;  %10558 = vmatprep.subr.bf16.mxu0 %v10557_v22  ;;  %v5409_v7 = vld [vmem:[#allocation4 + $0x998] sm:$0xff] }
0x2fb0   :  { %v10934_v34 = vpop.eup %10933  ;;  %9444 = vmatmul.mubr.msk.f32.vlgmr.msra.gmra.mrb[66].mxu1 %vm485_vm8, %v6862_v62  ;;  %10560 = vmatpush3.bf16.msra.mxu0 %v10557_v22  ;;  %v5410_v62 = vld [vmem:[#allocation4 + $0x9e8] sm:$0xff]  ;;  %v5424_v22 = vld [vmem:[#allocation4 + $0x950] sm:$0xff] }
0x2fb1   :  { %10532 = vmatpush3.bf16.msra.mxu1 %v11937_v44  ;;  %v6756_v28 = vmul.f32 %v10934_v34, %v10928_v6  ;;  %v10936_v43 = vpop.eup %10935  ;;  %v5403_v6 = vld [vmem:[#allocation4 + $0x7b8] sm:$0xff]  ;;  %v10577_v34 = vpack.c.bf16 %v5410_v62, %v5409_v7  ;;  %v5433_v62 = vld [vmem:[#allocation4 + $0x728] sm:$0xff] }
0x2fb2   :  { %10534 = vmatprep.subr.bf16.mxu1 %v11935_v4  ;;  %v6757_v56 = vmul.f32 %v10936_v43, %v10926_v10  ;;  %v10561_v10 = vpack.c.bf16 %v5402_v23, %v5401_v63  ;;  %v10565_v35 = vpack.c.bf16 %v5404_v15, %v5403_v6  ;;  %v10605_v63 = vpack.c.bf16 %v5424_v22, %v5423_v21  ;;  %v5425_v23 = vld [vmem:[#allocation4 + $0x9a0] sm:$0xff]  ;;  %v5427_v15 = vld [vmem:[#allocation4 + $0x548] sm:$0xff] }
0x2fb3   :  { %9450 = vmatprep.mubr.msk.f32.mxu1 %vm485_vm8, %v6756_v28 }
0x2fb4   :  { %10562 = vmatprep.subr.bf16.mxu0 %v10561_v10 }
0x2fb5   :  { %10564 = vmatpush3.bf16.msra.mxu0 %v10561_v10  ;;  %v5426_v10 = vld [vmem:[#allocation4 + $0x9f0] sm:$0xff] }
0x2fb6   :  { %10566 = vmatprep.subr.bf16.mxu0 %v10565_v35  ;;  %v10609_v6 = vpack.c.bf16 %v5426_v10, %v5425_v23 }
0x2fb8   :  { %9451 = vmatmul.mubr.msk.f32.vlgmr.msra.gmra.mrb[66].mxu1 %vm485_vm8, %v6757_v56 }
0x2fb9   :  { %9457 = vmatprep.mubr.f32.mxu1 %v11949_v33  ;;  %10568 = vmatpush3.bf16.msra.mxu0 %v10565_v35  ;;  %v5428_v35 = vld [vmem:[#allocation4 + $0x598] sm:$0xff] }
0x2fba   :  { %10536 = vmatpush3.bf16.xpose.msra.mxu1 %v11935_v4  ;;  %10570 = vmatprep.subr.bf16.mxu0 %v10569_v0  ;;  %v10613_v36 = vpack.c.bf16 %v5428_v35, %v5427_v15 }
0x2fbb   :  { %10538 = vmatprep.subr.bf16.mxu1 %v11939_v47 }
0x2fbd   :  { %10572 = vmatpush3.bf16.msra.mxu0 %v10569_v0  ;;  %v5430_v0 = vld [vmem:[#allocation4 + $0x638] sm:$0xff] }
0x2fbe   :  { %10574 = vmatprep.subr.bf16.mxu0 %v10573_v8  ;;  %v10617_v27 = vpack.c.bf16 %v5430_v0, %v5429_v11 }
0x2fc1   :  { %9458 = vmatmul.mubr.f32.vlgmr.msra.gmra.mrb[68].mxu1 %v11951_v25  ;;  %10576 = vmatpush3.bf16.msra.mxu0 %v10573_v8  ;;  %v5432_v8 = vld [vmem:[#allocation4 + $0x6d8] sm:$0xff] }
0x2fc2   :  { %10540 = vmatpush3.bf16.msra.mxu1 %v11939_v47  ;;  %v7294_v47 = vadd.f32 %v11973_v41, %v7292_v19  ;;  %10578 = vmatprep.subr.bf16.mxu0 %v10577_v34  ;;  %v10621_v7 = vpack.c.bf16 %v5432_v8, %v5431_v24 }
0x2fc3   :  { %10546 = vmatprep.subr.bf16.mxu1 %v11941_v16 }
0x2fc4   :  { %v7296_v13 = vsel %vm485_vm8, %v7294_v47, -inf }
0x2fc5   :  { %10580 = vmatpush3.bf16.msra.mxu0 %v10577_v34  ;;  %v5434_v34 = vld [vmem:[#allocation4 + $0x778] sm:$0xff] }
0x2fc6   :  { %10614 = vmatprep.subr.bf16.mxu0 %v10613_v36 }
0x3094   :  { %v9459_v44 = vpop.f32.mrb[68].mxu1 }
0x3095   :  { %v7105_v48 = vmul.f32 0.17677669, %v9459_v44  ;;  %v7095_v2 = vpop.f32.mrb[69].mxu1 }
0x3096   :  { %v7104_v26 = vmul.f32 0.17677669, %v7095_v2 }
0x3097   :  { %v7107_v33 = vadd.f32 %v11967_v17, %v7105_v48 }
0x3098   :  { %v7106_v4 = vadd.f32 %v11973_v41, %v7104_v26 }
0x3099   :  { %v7111_v25 = vsel %vm485_vm8, %v7107_v33, -inf }
0x309a   :  { %7112 = vmax.xlane.f32.xlu1 %v7111_v25  ;;  %v7108_v51 = vsel %vm485_vm8, %v7106_v4, -inf }
0x309b   :  { %7109 = vmax.xlane.f32.xlu0 %v7108_v51  ;;  %v7970_v51 = vld [vmem:[#allocation6 + $0x19] ss:$0 sm:$0xff] }
0x309e   :  { %7300 = vmax.xlane.f32.xlu1 %v7299_v14 }
0x309f   :  { %7297 = vmax.xlane.f32.xlu0 %v7296_v13 }
0x3127   :  { %v7113_v40 = vpop.xlane.xlu1 %7112 }
0x3128   :  { %v7115_v57 = vsub.f32 %v7107_v33, %v7113_v40  ;;  %v7110_v3 = vpop.xlane.xlu0 %7109 }
0x3129   :  { %v7114_v37 = vsub.f32 %v7106_v4, %v7110_v3 }
0x312a   :  { %v7118_v31 = vmul.f32 1.442695, %v7115_v57 }
0x312b   :  { %v7116_v17 = vmul.f32 1.442695, %v7114_v37  ;;  %v7301_v30 = vpop.xlane.xlu1 %7300  ;;  %v5411_v37 = vld [vmem:[#allocation4 + $0x540] sm:$0xff] }
0x312c   :  { %10937 = vpow2.f32 %v7118_v31  ;;  %v7303_v5 = vsub.f32 %v7295_v38, %v7301_v30  ;;  %v7298_v41 = vpop.xlane.xlu0 %7297  ;;  %v5412_v31 = vld [vmem:[#allocation4 + $0x590] sm:$0xff] }
0x312d   :  { %10939 = vpow2.f32 %v7116_v17  ;;  %v7302_v46 = vsub.f32 %v7294_v47, %v7298_v41  ;;  %v5413_v17 = vld [vmem:[#allocation4 + $0x5e0] sm:$0xff]  ;;  %v10581_v30 = vpack.c.bf16 %v5412_v31, %v5411_v37  ;;  %v7972_v37 = vld [vmem:[#allocation6 + $0x1b] ss:$0 sm:$0xff] }
0x312e   :  { %v7306_v39 = vmul.f32 1.442695, %v7303_v5  ;;  %v5414_v5 = vld [vmem:[#allocation4 + $0x630] sm:$0xff] }
0x312f   :  { %v7304_v52 = vmul.f32 1.442695, %v7302_v46  ;;  %v10585_v41 = vpack.c.bf16 %v5414_v5, %v5413_v17  ;;  %v5415_v46 = vld [vmem:[#allocation4 + $0x680] sm:$0xff] }
0x3130   :  { %10941 = vpow2.f32 %v7306_v39  ;;  %v5416_v39 = vld [vmem:[#allocation4 + $0x6d0] sm:$0xff] }
0x3131   :  { %10943 = vpow2.f32 %v7304_v52  ;;  %v10589_v52 = vpack.c.bf16 %v5416_v39, %v5415_v46  ;;  %v5442_v46 = vld [vmem:[#allocation4 + $0x9f8] sm:$0xff] }
0x3136   :  { %v12008_v54 = vpop.eup %10937 }
0x3137   :  { %v10940_v55 = vpop.eup %10939  ;;  %v7123_v29 = vsel %vm485_vm8, %v12008_v54, 0.0 }
0x3138   :  { %7124 = vadd.xlane.f32.xlu1 %v7123_v29  ;;  %v7120_v58 = vsel %vm485_vm8, %v10940_v55, 0.0 }
0x3139   :  { %7121 = vadd.xlane.f32.xlu0 %v7120_v58 }
0x313a   :  { %v12013_v18 = vpop.eup %10941 }
0x313b   :  { %v10944_v45 = vpop.eup %10943  ;;  %v7311_v59 = vsel %vm485_vm8, %v12013_v18, 0.0 }
0x313c   :  { %7312 = vadd.xlane.f32.xlu1 %v7311_v59  ;;  %v7308_v60 = vsel %vm485_vm8, %v10944_v45, 0.0  ;;  %v5417_v59 = vld [vmem:[#allocation4 + $0x720] sm:$0xff] }
0x313d   :  { %7309 = vadd.xlane.f32.xlu0 %v7308_v60  ;;  %v5418_v60 = vld [vmem:[#allocation4 + $0x770] sm:$0xff] }
0x313e   :  { %v10593_v61 = vpack.c.bf16 %v5418_v60, %v5417_v59 }
0x31c5   :  { %v7125_v28 = vpop.xlane.xlu1 %7124 }
0x31c6   :  { %10945 = vrcp.f32 %v7125_v28  ;;  %v7122_v43 = vpop.xlane.xlu0 %7121  ;;  %v10625_v28 = vpack.c.bf16 %v5434_v34, %v5433_v62 }
0x31c7   :  { %10947 = vrcp.f32 %v7122_v43  ;;  %v5435_v43 = vld [vmem:[#allocation4 + $0x7c8] sm:$0xff] }
0x31c9   :  { %v7313_v44 = vpop.xlane.xlu1 %7312 }
0x31ca   :  { %v7310_v56 = vpop.xlane.xlu0 %7309 }
0x31cb   :  { %10949 = vrcp.f32 %v7310_v56  ;;  %v5436_v56 = vld [vmem:[#allocation4 + $0x818] sm:$0xff] }
0x31cc   :  { %10951 = vrcp.f32 %v7313_v44  ;;  %v10629_v44 = vpack.c.bf16 %v5436_v56, %v5435_v43 }
0x31d0   :  { %v10946_v9 = vpop.eup %10945 }
0x31d1   :  { %v10948_v48 = vpop.eup %10947  ;;  %v7129_v19 = vmul.f32 %v10946_v9, %v12008_v54  ;;  %v5437_v9 = vld [vmem:[#allocation4 + $0x868] sm:$0xff] }
0x31d2   :  { %v7128_v2 = vmul.f32 %v10948_v48, %v10940_v55  ;;  %v5438_v48 = vld [vmem:[#allocation4 + $0x8b8] sm:$0xff] }
0x31d4   :  { %9464 = vmatprep.mubr.msk.f32.mxu1 %vm485_vm8, %v7128_v2  ;;  %v10633_v2 = vpack.c.bf16 %v5438_v48, %v5437_v9  ;;  %v7757_v9 = vld [vmem:[#allocation9 + $0x8] sm:$0xff]  ;;  %v7758_v48 = vld [vmem:[#allocation9 + $0x10] sm:$0xff] }
0x31d5   :  { %v10950_v26 = vpop.eup %10949  ;;  %9465 = vmatmul.mubr.msk.f32.vlgmr.msra.gmra.mrb[66].mxu1 %vm485_vm8, %v7129_v19  ;;  %v5439_v19 = vld [vmem:[#allocation4 + $0x908] sm:$0xff] }
0x31d6   :  { %10548 = vmatpush3.bf16.msra.mxu1 %v11941_v16  ;;  %v7316_v33 = vmul.f32 %v10950_v26, %v10944_v45  ;;  %v10952_v4 = vpop.eup %10951  ;;  %v5440_v26 = vld [vmem:[#allocation4 + $0x958] sm:$0xff] }
0x31d7   :  { %v7317_v38 = vmul.f32 %v10952_v4, %v12013_v18  ;;  %10582 = vmatprep.subr.bf16.mxu1 %v10581_v30 }
0x31d8   :  { %9478 = vmatprep.mubr.msk.f32.mxu1 %vm485_vm8, %v7316_v33  ;;  %v10637_v33 = vpack.c.bf16 %v5440_v26, %v5439_v19  ;;  %v7759_v19 = vld [vmem:[#allocation9 + $0x18] sm:$0xff] }
0x31d9   :  { %v10649_v26 = vpack.c.bf16 %v7759_v19, %v7758_v48 }
0x31dd   :  { %9479 = vmatmul.mubr.msk.f32.vlgmr.msra.gmra.mrb[66].mxu1 %vm485_vm8, %v7317_v38 }
0x31de   :  { %10584 = vmatpush3.bf16.msra.mxu1 %v10581_v30 }
0x31df   :  { %10586 = vmatprep.subr.bf16.mxu1 %v10585_v41 }
0x31e2   :  { %10588 = vmatpush3.bf16.msra.mxu1 %v10585_v41  ;;  %v5441_v41 = vld [vmem:[#allocation4 + $0x9a8] sm:$0xff] }
0x31e3   :  { %10590 = vmatprep.subr.bf16.mxu1 %v10589_v52  ;;  %v10641_v39 = vpack.c.bf16 %v5442_v46, %v5441_v41  ;;  %v7767_v46 = vld [vmem:[#allocation9 + $0x58] sm:$0xff] }
0x31e6   :  { %10592 = vmatpush3.bf16.msra.mxu1 %v10589_v52  ;;  %v7973_v52 = vld [vmem:[#allocation6 + $0x1c] ss:$0 sm:$0xff] }
0x31e7   :  { %10594 = vmatprep.subr.bf16.mxu1 %v10593_v61 }
0x31ea   :  { %10596 = vmatpush3.bf16.msra.mxu1 %v10593_v61 }
0x31eb   :  { %10598 = vmatprep.subr.bf16.mxu1 %v10597_v42 }
0x31ee   :  { %10600 = vmatpush3.bf16.msra.mxu1 %v10597_v42 }
0x31ef   :  { %10602 = vmatprep.subr.bf16.mxu1 %v10601_v20 }
0x31f2   :  { %10604 = vmatpush3.bf16.msra.mxu1 %v10601_v20 }
0x31f3   :  { %10606 = vmatprep.subr.bf16.mxu1 %v10605_v63 }
0x31f6   :  { %10608 = vmatpush3.bf16.msra.mxu1 %v10605_v63 }
0x31f7   :  { %10610 = vmatprep.subr.bf16.mxu1 %v10609_v6 }
0x31fa   :  { %10612 = vmatpush3.bf16.msra.mxu1 %v10609_v6 }
0x32b0   :  { %v9480_v25 = vpop.f32.mrb[66].mxu1 }
0x32b1   :  { %v7392_v47 = vpop.f32.mrb[67].mxu1 }
0x32b2   :  { %9513 = vmatprep.mubr.f32.mxu0 %v7392_v47 }
0x32b3   :  { %9514 = vmatmul.mubr.f32.vlgmr.msra.gmra.mrb[48].mxu0 %v9480_v25 }
0x32b4   :  { %10616 = vmatpush3.bf16.msra.mxu0 %v10613_v36 }
0x32b5   :  { %10618 = vmatprep.subr.bf16.mxu0 %v10617_v27 }
0x32b8   :  { %10620 = vmatpush3.bf16.msra.mxu0 %v10617_v27  ;;  %v7975_v27 = vld [vmem:[#allocation6 + $0x1e] ss:$0 sm:$0xff] }
0x32b9   :  { %10622 = vmatprep.subr.bf16.mxu0 %v10621_v7 }
0x32bc   :  { %10624 = vmatpush3.bf16.msra.mxu0 %v10621_v7  ;;  %v7976_v7 = vld [vmem:[#allocation6 + $0x1f] ss:$0 sm:$0xff] }
0x32bd   :  { %10626 = vmatprep.subr.bf16.mxu0 %v10625_v28 }
0x32c0   :  { %10628 = vmatpush3.bf16.msra.mxu0 %v10625_v28 }
0x32c1   :  { %10630 = vmatprep.subr.bf16.mxu0 %v10629_v44 }
0x32c4   :  { %10632 = vmatpush3.bf16.msra.mxu0 %v10629_v44  ;;  %v7756_v44 = vld [vmem:[#allocation9] sm:$0xff] }
0x32c5   :  { %10634 = vmatprep.subr.bf16.mxu0 %v10633_v2 }
0x32c8   :  { %10636 = vmatpush3.bf16.msra.mxu0 %v10633_v2  ;;  %v10645_v2 = vpack.c.bf16 %v7757_v9, %v7756_v44 }
0x32c9   :  { %10638 = vmatprep.subr.bf16.mxu0 %v10637_v33 }
0x32ca   :  { %10646 = vmatprep.subr.bf16.mxu1 %v10645_v2 }
0x32cc   :  { %10640 = vmatpush3.bf16.msra.mxu0 %v10637_v33  ;;  %v7760_v33 = vld [vmem:[#allocation9 + $0x20] sm:$0xff] }
0x32cd   :  { %10642 = vmatprep.subr.bf16.mxu0 %v10641_v39 }
0x32d0   :  { %10644 = vmatpush3.bf16.msra.mxu0 %v10641_v39 }
0x3386   :  { %v9515_v14 = vpop.f32.mrb[48].mxu0 }
0x3387   :  { %v7479_v13 = vadd.f32 %v9515_v14, %v7970_v51  ;;  %v7473_v40 = vpop.f32.mrb[49].mxu0 }
0x3388   :  { %v7474_v57 = vadd.f32 %v7970_v51, %v7473_v40  ;;  %v7971_v40 = vld [vmem:[#allocation6 + $0x1a] ss:$0 sm:$0xff] }
0x3389   :  { %v7483_v3 = vadd.f32 %v7479_v13, %v11945_v12 }
0x338a   :  { %v7482_v16 = vadd.f32 %v7474_v57, %v11943_v1 }
0x338b   :  { %7488 = vadd.xlane.f32.xlu1 %v7483_v3 }
0x338c   :  { %7486 = vadd.xlane.f32.xlu0 %v7482_v16 }
0x3418   :  { %v7489_v12 = vpop.xlane.xlu1 %7488 }
0x3419   :  { %v7491_v54 = vmul.f32 0.0078125, %v7489_v12  ;;  %v7487_v1 = vpop.xlane.xlu0 %7486 }
0x341a   :  { %v7490_v55 = vmul.f32 0.0078125, %v7487_v1 }
0x341b   :  { %v12027_v29 = vsub.f32 %v7483_v3, %v7491_v54 }
0x341c   :  { %v12029_v58 = vsub.f32 %v7482_v16, %v7490_v55 }
0x341d   :  { %v7495_v18 = vmul.f32 %v12027_v29, %v12027_v29 }
0x341e   :  { %v7494_v45 = vmul.f32 %v12029_v58, %v12029_v58 }
0x341f   :  { %7498 = vadd.xlane.f32.xlu1 %v7495_v18 }
0x3420   :  { %7496 = vadd.xlane.f32.xlu0 %v7494_v45 }
0x34ac   :  { %v7499_v4 = vpop.xlane.xlu1 %7498 }
0x34ad   :  { %v7501_v38 = vmul.f32 0.0078125, %v7499_v4  ;;  %v7497_v25 = vpop.xlane.xlu0 %7496  ;;  %v7761_v4 = vld [vmem:[#allocation9 + $0x28] sm:$0xff] }
0x34ae   :  { %v7500_v47 = vmul.f32 0.0078125, %v7497_v25 }
0x34af   :  { %v7503_v51 = vadd.f32 1e-05, %v7501_v38  ;;  %v10653_v38 = vpack.c.bf16 %v7761_v4, %v7760_v33 }
0x34b0   :  { %v7502_v14 = vadd.f32 1e-05, %v7500_v47 }
0x34b1   :  { %10953 = vrsqrt.f32 %v7503_v51 }
0x34b2   :  { %10955 = vrsqrt.f32 %v7502_v14 }
0x34bb   :  { %v10954_v13 = vpop.eup %10953 }
0x34bc   :  { %v10956_v57 = vpop.eup %10955  ;;  %v7507_v3 = vmul.f32 %v10954_v13, %v12027_v29 }
0x34bd   :  { %v7506_v16 = vmul.f32 %v10956_v57, %v12029_v58  ;;  %v7974_v58 = vld [vmem:[#allocation6 + $0x1d] ss:$0 sm:$0xff] }
0x34be   :  { %v7513_v31 = vmul.f32 %v7971_v40, %v7507_v3 }
0x34bf   :  { %v7512_v17 = vmul.f32 %v7971_v40, %v7506_v16  ;;  %v7762_v16 = vld [vmem:[#allocation9 + $0x30] sm:$0xff] }
0x34c0   :  { %v7519_v5 = vadd.f32 %v7972_v37, %v7513_v31 }
0x34c1   :  { %v7518_v30 = vadd.f32 %v7972_v37, %v7512_v17  ;;  %v7763_v37 = vld [vmem:[#allocation9 + $0x38] sm:$0xff]  ;;  %v7764_v17 = vld [vmem:[#allocation9 + $0x40] sm:$0xff] }
0x34c2   :  { %v10657_v31 = vpack.c.bf16 %v7763_v37, %v7762_v16 }
0x34c3   :  { %9548 = vmatprep.mubr.f32.mxu1 %v7518_v30 }
0x34c4   :  { %9549 = vmatmul.mubr.f32.vlgmr.msra.gmra.mrb[70].mxu1 %v7519_v5 }
0x34c5   :  { %10648 = vmatpush3.bf16.msra.mxu1 %v10645_v2 }
0x34c6   :  { %10650 = vmatprep.subr.bf16.mxu1 %v10649_v26 }
0x34c9   :  { %10652 = vmatpush3.bf16.msra.mxu1 %v10649_v26 }
0x34ca   :  { %10654 = vmatprep.subr.bf16.mxu1 %v10653_v38 }
0x34cd   :  { %10656 = vmatpush3.bf16.msra.mxu1 %v10653_v38 }
0x34ce   :  { %10658 = vmatprep.subr.bf16.mxu1 %v10657_v31 }
0x34d1   :  { %10660 = vmatpush3.bf16.msra.mxu1 %v10657_v31 }
0x3597   :  { %v9550_v12 = vpop.f32.mrb[70].mxu1 }
0x3598   :  { %v7598_v54 = vadd.f32 %v9550_v12, %v7973_v52  ;;  %v7592_v1 = vpop.f32.mrb[71].mxu1  ;;  %v7769_v12 = vld [vmem:[#allocation9 + $0x68] sm:$0xff] }
0x3599   :  { %v7593_v55 = vadd.f32 %v7973_v52, %v7592_v1  ;;  %v7768_v52 = vld [vmem:[#allocation9 + $0x60] sm:$0xff]  ;;  %v7770_v1 = vld [vmem:[#allocation9 + $0x70] sm:$0xff] }
0x359a   :  { %v7602_v18 = vmax.f32 %v7598_v54, 0.0  ;;  %v10669_v54 = vpack.c.bf16 %v7769_v12, %v7768_v52 }
0x359b   :  { %v7601_v29 = vmax.f32 %v7593_v55, 0.0  ;;  %v7771_v55 = vld [vmem:[#allocation9 + $0x78] sm:$0xff] }
0x359d   :  { %9583 = vmatprep.mubr.f32.mxu0 %v7601_v29  ;;  %v10673_v29 = vpack.c.bf16 %v7771_v55, %v7770_v1 }
0x359e   :  { %9584 = vmatmul.mubr.f32.vlgmr.msra.gmra.mrb[50].mxu0 %v7602_v18 }
0x3671   :  { %v9585_v45 = vpop.f32.mrb[50].mxu0 }
0x3672   :  { %v7679_v59 = vadd.f32 %v9585_v45, %v7974_v58  ;;  %v7673_v60 = vpop.f32.mrb[51].mxu0 }
0x3673   :  { %v7674_v61 = vadd.f32 %v7974_v58, %v7673_v60 }
0x3674   :  { %v7683_v49 = vadd.f32 %v7679_v59, %v7519_v5  ;;  %v7766_v5 = vld [vmem:[#allocation9 + $0x50] sm:$0xff] }
0x3675   :  { %v7682_v32 = vadd.f32 %v7674_v61, %v7518_v30  ;;  %v7765_v30 = vld [vmem:[#allocation9 + $0x48] sm:$0xff]  ;;  %v10665_v39 = vpack.c.bf16 %v7767_v46, %v7766_v5 }
0x3676   :  { %7688 = vadd.xlane.f32.xlu1 %v7683_v49  ;;  %v10661_v41 = vpack.c.bf16 %v7765_v30, %v7764_v17 }
0x3677   :  { %7686 = vadd.xlane.f32.xlu0 %v7682_v32 }
0x3678   :  { %10662 = vmatprep.subr.bf16.mxu1 %v10661_v41 }
0x3679   :  { %10664 = vmatpush3.bf16.msra.mxu1 %v10661_v41 }
0x367a   :  { %10666 = vmatprep.subr.bf16.mxu1 %v10665_v39 }
0x367d   :  { %10668 = vmatpush3.bf16.msra.mxu1 %v10665_v39 }
0x367e   :  { %10670 = vmatprep.subr.bf16.mxu1 %v10669_v54 }
0x3681   :  { %10672 = vmatpush3.bf16.msra.mxu1 %v10669_v54 }
0x3682   :  { %10674 = vmatprep.subr.bf16.mxu1 %v10673_v29 }
0x3685   :  { %10676 = vmatpush3.bf16.msra.mxu1 %v10673_v29 }
0x3703   :  { %v7689_v50 = vpop.xlane.xlu1 %7688 }
0x3704   :  { %v7691_v42 = vmul.f32 0.0078125, %v7689_v50  ;;  %v7687_v53 = vpop.xlane.xlu0 %7686 }
0x3705   :  { %v7690_v20 = vmul.f32 0.0078125, %v7687_v53 }
0x3706   :  { %v7693_v21 = vsub.f32 %v7683_v49, %v7691_v42 }
0x3707   :  { %v7692_v22 = vsub.f32 %v7682_v32, %v7690_v20  ;;  %v7977_v32 = vld [vmem:[#allocation7 + $0x2] ss:$0 sm:$0xff]  ;;  %v7978_v20 = vld [vmem:[#allocation7 + $0x3] ss:$0 sm:$0xff] }
0x3708   :  { %v7695_v63 = vmul.f32 %v7693_v21, %v7693_v21 }
0x3709   :  { %v7694_v23 = vmul.f32 %v7692_v22, %v7692_v22 }
0x370a   :  { %7698 = vadd.xlane.f32.xlu1 %v7695_v63 }
0x370b   :  { %7696 = vadd.xlane.f32.xlu0 %v7694_v23 }
0x3797   :  { %v7699_v10 = vpop.xlane.xlu1 %7698 }
0x3798   :  { %v7701_v6 = vmul.f32 0.0078125, %v7699_v10  ;;  %v7697_v15 = vpop.xlane.xlu0 %7696  ;;  %v7979_v10 = vld [vmem:[#allocation7 + $0x4] ss:$0 sm:$0xff] }
0x3799   :  { %v7700_v35 = vmul.f32 0.0078125, %v7697_v15 }
0x379a   :  { %v7703_v11 = vadd.f32 1e-05, %v7701_v6 }
0x379b   :  { %v7702_v36 = vadd.f32 1e-05, %v7700_v35 }
0x379c   :  { %10957 = vrsqrt.f32 %v7703_v11 }
0x379d   :  { %10959 = vrsqrt.f32 %v7702_v36 }
0x37a6   :  { %v10958_v0 = vpop.eup %10957 }
0x37a7   :  { %v10960_v24 = vpop.eup %10959  ;;  %v7707_v8 = vmul.f32 %v10958_v0, %v7693_v21 }
0x37a8   :  { %v7706_v62 = vmul.f32 %v10960_v24, %v7692_v22 }
0x37a9   :  { %v7713_v34 = vmul.f32 %v7975_v27, %v7707_v8 }
0x37aa   :  { %v7712_v28 = vmul.f32 %v7975_v27, %v7706_v62 }
0x37ab   :  { %v7719_v43 = vadd.f32 %v7976_v7, %v7713_v34 }
0x37ac   :  { %v7718_v56 = vadd.f32 %v7976_v7, %v7712_v28 }
0x37ad   :  { %7724 = vadd.xlane.f32.xlu1 %v7719_v43 }
0x37ae   :  { %7722 = vadd.xlane.f32.xlu0 %v7718_v56 }
0x383a   :  { %v7725_v25 = vpop.xlane.xlu1 %7724 }
0x383b   :  { %v7727_v47 = vmul.f32 0.0078125, %v7725_v25  ;;  %v7723_v51 = vpop.xlane.xlu0 %7722 }
0x383c   :  { %v7726_v14 = vmul.f32 0.0078125, %v7723_v51 }
0x383d   :  { %v7729_v13 = vsub.f32 %v7719_v43, %v7727_v47 }
0x383e   :  { %v7728_v40 = vsub.f32 %v7718_v56, %v7726_v14 }
0x383f   :  { %v7731_v57 = vmul.f32 %v7729_v13, %v7729_v13 }
0x3840   :  { %v7730_v3 = vmul.f32 %v7728_v40, %v7728_v40 }
0x3841   :  { %7734 = vadd.xlane.f32.xlu1 %v7731_v57 }
0x3842   :  { %7732 = vadd.xlane.f32.xlu0 %v7730_v3 }
0x38ce   :  { %v7735_v18 = vpop.xlane.xlu1 %7734 }
0x38cf   :  { %v7737_v58 = vmul.f32 0.0078125, %v7735_v18  ;;  %v7733_v45 = vpop.xlane.xlu0 %7732 }
0x38d0   :  { %v7736_v59 = vmul.f32 0.0078125, %v7733_v45 }
0x38d1   :  { %v7739_v60 = vadd.f32 1e-05, %v7737_v58 }
0x38d2   :  { %v7738_v61 = vadd.f32 1e-05, %v7736_v59 }
0x38d3   :  { %10961 = vrsqrt.f32 %v7739_v60 }
0x38d4   :  { %10963 = vrsqrt.f32 %v7738_v61 }
0x38dd   :  { %v10962_v49 = vpop.eup %10961 }
0x38de   :  { %v10964_v50 = vpop.eup %10963  ;;  %v7743_v42 = vmul.f32 %v10962_v49, %v7729_v13 }
0x38df   :  { %v7742_v53 = vmul.f32 %v10964_v50, %v7728_v40 }
0x38e0   :  { %v7749_v21 = vmul.f32 %v7977_v32, %v7743_v42 }
0x38e1   :  { %v7748_v22 = vmul.f32 %v7977_v32, %v7742_v53 }
0x38e2   :  { %v7755_v23 = vadd.f32 %v7978_v20, %v7749_v21 }
0x38e3   :  { %v7754_v63 = vadd.f32 %v7978_v20, %v7748_v22 }
0x38e5   :  { %9618 = vmatprep.mubr.f32.mxu1 %v7754_v63 }
0x38e6   :  { %9619 = vmatmul.mubr.f32.vlgmr.msra.gmra.mrb[72].mxu1 %v7755_v23 }
0x39b9   :  { %v9620_v6 = vpop.f32.mrb[72].mxu1 }
0x39ba   :  { %v7849_v15 = vadd.f32 %v9620_v6, %v7979_v10  ;;  %v7843_v35 = vpop.f32.mrb[73].mxu1 }
0x39bb   :  { %v7844_v11 = vadd.f32 %v7979_v10, %v7843_v35 }
0x39bc   :  { %7853 = vst [vmem:[%s12054_s11 + $0x8] sm:$0xff] %v7849_v15 }
0x39bd   :  { %7852 = vst [vmem:[%s12054_s11] sm:$0xff] %v7844_v11 }
0x39be   :  { %7858 = vsyncpa [#allocation3], 1 }
0x39bf   :  { %7859 = vsyncpa [#allocation5], 1 }
0x39c0   :  { %7860 = vsyncpa [#allocation8], 1 }

</bundles_post_ra>
